<compile_context>
chip_gen: v7x
topology: tpu7x:2x2x1
jax: 0.10.0
libtpu: 0.0.40
codegen_flags: <defaults>
</compile_context>

<pallas_src>
import functools

import jax
import jax.numpy as jnp
from jax.experimental import pallas as pl
from jax.experimental.pallas import tpu as pltpu

NEG_SLOPE = 0.2                 # DGL GATConv default negative_slope
NEG_INF = -1e30                 # finite "-inf" (avoids inf-inf NaN paths)
VMEM_LIMIT = 48 * 1024 * 1024   # raised scoped-VMEM limit, still safe on v7x


# --------------------------- stage 1: fused projection -----------------------
def _proj_kernel(x_ref, w_ref, comb_ref):
    """comb = x @ [W | W_res? | W@a_l | W@a_r] — single bf16 MXU push and one
    lane-dense f32 store.  feat / res / el|er are split off by cheap XLA
    slices in the wrapper (no sub-128-lane masked output stores)."""
    comb_ref[...] = jnp.dot(x_ref[...], w_ref[...],
                            preferred_element_type=jnp.float32)


# ------------------ stage 2: online-softmax masked attention -----------------
def _attn_kernel(el_ref, er_ref, feat_ref, adjt_ref, res_ref, *refs,
                 num_heads, out_feats, emit_aux):
    if emit_aux:
        out_ref, bef_ref, attn_ref, m_sc, l_sc, acc_sc = refs
    else:
        out_ref, m_sc, l_sc, acc_sc = refs
        bef_ref = attn_ref = None

    k = pl.program_id(1)
    is_last = k == pl.num_programs(1) - 1

    @pl.when(k == 0)
    def _init():
        m_sc[...] = jnp.full_like(m_sc, NEG_INF)
        l_sc[...] = jnp.zeros_like(l_sc)
        acc_sc[...] = jnp.zeros_like(acc_sc)

    # Mask work hoisted out of the head loop: one convert + one additive bias
    # per (dst, src) tile, shared by all heads.  Adjacency is binary {0,1}.
    maskf = adjt_ref[...].astype(jnp.float32)            # [t_dst, t_src]
    bias = (1.0 - maskf) * NEG_INF                       # 0 on edges, -1e30 off
    er = er_ref[...]                                     # [t_dst, H] f32

    for h in range(num_heads):                           # static unroll (H small)
        lo = h * out_feats
        el_row = el_ref[h:h + 1, :]                      # [1, t_src]
        z = el_row + er[:, h:h + 1]                      # u_add_v -> [t_dst, t_src]
        e = jnp.maximum(z, NEG_SLOPE * z) + bias         # leaky_relu + mask bias

        # online softmax over the src axis (lane-axis reductions, EUP exp)
        m_old = m_sc[h]                                  # [t_dst, 1]
        m_new = jnp.maximum(m_old, jnp.max(e, axis=-1, keepdims=True))
        a = jnp.exp(m_old - m_new)                       # rescale of running sums
        # "* maskf" keeps fully-masked (dst-row, src-chunk) pairs exact: there
        # both the logits and the running max are ~-1e30, so exp(e-m) == 1.
        pexp = jnp.exp(e - m_new) * maskf
        l_new = a * l_sc[h] + jnp.sum(pexp, axis=-1, keepdims=True)
        acc_new = a * acc_sc[h] + jnp.dot(
            pexp.astype(jnp.bfloat16), feat_ref[:, lo:lo + out_feats],
            preferred_element_type=jnp.float32)
        m_sc[h] = m_new
        l_sc[h] = l_new
        acc_sc[h] = acc_new

        if emit_aux:
            # alpha written inside the head loop; valid because emit_aux forces
            # a single src chunk (t_src == N), so pexp/l_new are the full row.
            @pl.when(is_last)
            def _write_alpha():
                inv_l = pl.reciprocal(jnp.maximum(l_new, 1e-30), approx=False)
                attn_ref[h] = pexp * inv_l               # dst-major [t_dst, N_src]

    @pl.when(is_last)
    def _finalize():
        parts = []
        for h in range(num_heads):
            inv_l = pl.reciprocal(jnp.maximum(l_sc[h], 1e-30), approx=False)
            parts.append(acc_sc[h] * inv_l)
        rst = parts[0] if num_heads == 1 else jnp.concatenate(parts, axis=-1)
        # single lane-dense store; residual + the module's outer ReLU fused
        out_ref[...] = jnp.maximum(rst + res_ref[...], 0.0)
        if emit_aux:
            bef_ref[...] = rst                           # rstbef: no residual, no relu


# ------------------------------ layer wrapper ---------------------------------
def apply_layer(x, adj_t_i8, p, *, t_row=512, t_dst=256, t_src=128, emit_aux=False):
    """One GATConv layer (forward2 semantics, outer ReLU fused).

    adj_t_i8: transposed binary adjacency as int8, adj_t_i8[v, u] = adj[u, v].
    """
    n, din = x.shape
    num_heads, out_feats = p["num_heads"], p["out_feats"]
    hd = num_heads * out_feats
    res_w = p["res_w"]
    has_res = res_w is not None
    if not has_res:
        assert din == hd, "identity residual requires in_feats == num_heads*out_feats"

    t_row = min(t_row, n)
    t_dst = min(t_dst, n)
    if t_dst >= n and n >= 16 and n % 16 == 0:
        t_dst = n // 2          # keep >=2 dst grid steps so v7x megacore uses both TCs
    # emit_aux (alpha output) needs the whole src axis in one chunk so alpha can
    # be normalized in-kernel; otherwise stream src in t_src chunks (online
    # softmax) so VMEM residency is independent of N.
    t_src = n if emit_aux else min(t_src, n)
    assert n % t_row == 0 and n % t_dst == 0 and n % t_src == 0, \
        "N must be divisible by the tile sizes"
    # TODO(synk): arbitrary N would need padding + masking of the node axis.

    # Pack fc + residual fc + attention-score projections into ONE matmul:
    #   el_h = (x @ W_h) . a_l_h  ==  x @ (W_h @ a_l_h)
    w_r = p["w"].reshape(din, num_heads, out_feats)
    w_el = jnp.einsum("dhk,hk->dh", w_r, p["attn_l"])      # [Din, H]
    w_er = jnp.einsum("dhk,hk->dh", w_r, p["attn_r"])      # [Din, H]
    cols = [p["w"]] + ([res_w] if has_res else []) + [w_el, w_er]
    w_comb = jnp.concatenate(cols, axis=1).astype(jnp.bfloat16)   # [Din, Dcomb] bf16
    dcomb = w_comb.shape[1]
    x_bf16 = x.astype(jnp.bfloat16)

    # ---- stage 1: row-tiled fused projection (one lane-dense output) ----
    comb = pl.pallas_call(
        _proj_kernel,
        out_shape=jax.ShapeDtypeStruct((n, dcomb), jnp.float32),
        grid=(n // t_row,),
        in_specs=[pl.BlockSpec((t_row, din), lambda i: (i, 0)),
                  pl.BlockSpec((din, dcomb), lambda i: (0, 0))],
        out_specs=pl.BlockSpec((t_row, dcomb), lambda i: (i, 0)),
        compiler_params=pltpu.CompilerParams(
            dimension_semantics=("parallel",),
            vmem_limit_bytes=VMEM_LIMIT),
        cost_estimate=pl.CostEstimate(
            flops=2 * n * din * dcomb,
            transcendentals=0,
            bytes_accessed=2 * (n * din + din * dcomb) + 4 * n * dcomb),
    )(x_bf16, w_comb)

    feat = comb[:, :hd].astype(jnp.bfloat16)       # src features: bf16 MXU operand
    if has_res:
        resid = comb[:, hd:2 * hd]                 # f32 residual
        aux = comb[:, 2 * hd:]
    else:
        resid = x                                  # nn.Identity residual
        aux = comb[:, hd:]
    el_t = jnp.transpose(aux[:, :num_heads])       # [H, N] f32 (logits stay f32)
    er = aux[:, num_heads:]                        # [N, H] f32

    # ---- stage 2: (dst "parallel") x (src "arbitrary") online-softmax attention ----
    n_dst, n_src = n // t_dst, n // t_src
    in_specs = [
        pl.BlockSpec((num_heads, t_src), lambda i, k: (0, k)),     # el  (src chunk)
        pl.BlockSpec((t_dst, num_heads), lambda i, k: (i, 0)),     # er  (dst tile)
        pl.BlockSpec((t_src, hd), lambda i, k: (k, 0)),            # feat_src chunk, bf16
        pl.BlockSpec((t_dst, t_src), lambda i, k: (i, k)),         # adj^T tile, int8
        pl.BlockSpec((t_dst, hd), lambda i, k: (i, 0)),            # residual dst tile
    ]
    out_main = pl.BlockSpec((t_dst, hd), lambda i, k: (i, 0))
    scratch = [pltpu.VMEM((num_heads, t_dst, 1), jnp.float32),          # running max m
               pltpu.VMEM((num_heads, t_dst, 1), jnp.float32),          # running sum l
               pltpu.VMEM((num_heads, t_dst, out_feats), jnp.float32)]  # running acc

    if emit_aux:
        out_shape = (jax.ShapeDtypeStruct((n, hd), jnp.float32),
                     jax.ShapeDtypeStruct((n, hd), jnp.float32),
                     jax.ShapeDtypeStruct((num_heads, n, n), jnp.float32))
        out_specs = (out_main, out_main,
                     pl.BlockSpec((num_heads, t_dst, n), lambda i, k: (0, i, 0)))
        aux_bytes = 4 * (num_heads * n * n + n * hd)
    else:
        out_shape = jax.ShapeDtypeStruct((n, hd), jnp.float32)
        out_specs = out_main
        aux_bytes = 0

    result = pl.pallas_call(
        functools.partial(_attn_kernel, num_heads=num_heads,
                          out_feats=out_feats, emit_aux=emit_aux),
        out_shape=out_shape,
        grid=(n_dst, n_src),
        in_specs=in_specs,
        out_specs=out_specs,
        scratch_shapes=scratch,
        compiler_params=pltpu.CompilerParams(
            dimension_semantics=("parallel", "arbitrary"),
            vmem_limit_bytes=VMEM_LIMIT),
        cost_estimate=pl.CostEstimate(
            flops=2 * num_heads * n * n * out_feats + 12 * num_heads * n * n,
            transcendentals=num_heads * n * (n + 2 * n_src),
            bytes_accessed=(n * n                     # int8 adjacency
                            + 2 * n * hd * n_dst      # feat re-streamed per dst tile (bf16)
                            + 4 * (2 * n * hd + 3 * n * num_heads)
                            + aux_bytes)),
    )(el_t, er, feat, adj_t_i8, resid)

    if emit_aux:
        out, bef, attn_dst = result
        # Final layer only: one transpose to the src-major [H, N_src, N_dst]
        # layout the caller expects (kernel stores dst-major, lane-dense).
        attn = jnp.transpose(attn_dst, (0, 2, 1))
        return out, bef, attn
    return result


# ------------------------------ params ----------------------------------------
def init_gat_params(key, in_feats, out_feats, num_heads, residual_identity):
    k1, k2, k3, k4 = jax.random.split(key, 4)
    w_scale = 1.0 / jnp.sqrt(jnp.float32(in_feats))
    a_scale = 1.0 / jnp.sqrt(jnp.float32(out_feats))
    w = jax.random.normal(k1, (in_feats, num_heads * out_feats), jnp.float32) * w_scale
    attn_l = jax.random.normal(k2, (num_heads, out_feats), jnp.float32) * a_scale
    attn_r = jax.random.normal(k3, (num_heads, out_feats), jnp.float32) * a_scale
    if residual_identity:
        assert in_feats == num_heads * out_feats
        res_w = None                        # nn.Identity: no matmul, no eye() load
    else:
        res_w = jax.random.normal(k4, (in_feats, num_heads * out_feats),
                                  jnp.float32) * w_scale
    return dict(w=w, attn_l=attn_l, attn_r=attn_r, res_w=res_w,
                num_heads=num_heads, out_feats=out_feats)


# ------------------------- pure-JAX reference ----------------------------------
def gat_layer_ref(x, p, adj):
    n = x.shape[0]
    h, d = p["num_heads"], p["out_feats"]
    feat = (x @ p["w"]).reshape(n, h, d)
    el = jnp.sum(feat * p["attn_l"][None], axis=-1)          # [N, H]
    er = jnp.sum(feat * p["attn_r"][None], axis=-1)          # [N, H]
    e = el[:, None, :] + er[None, :, :]                      # [Nsrc, Ndst, H]
    e = jnp.where(e > 0, e, NEG_SLOPE * e)
    mask = (adj > 0)[:, :, None]
    e = jnp.where(mask, e, NEG_INF)
    m = jnp.max(e, axis=0, keepdims=True)
    pexp = jnp.exp(e - m) * adj[:, :, None]
    alpha = pexp / jnp.sum(pexp, axis=0, keepdims=True)
    rst = jnp.einsum("uvh,uhd->vhd", alpha, feat)
    if p["res_w"] is not None:
        res = (x @ p["res_w"]).reshape(n, h, d)
    else:
        res = x.reshape(n, h, d)
    out = jnp.maximum(rst + res, 0.0).reshape(n, -1)
    bef = rst.reshape(n, -1)
    attn = jnp.transpose(alpha, (2, 0, 1))
    return out, bef, attn


if __name__ == "__main__":
    # Small shapes mirroring the module structure (scaled down):
    #   l1: Din=64  -> H=4, Dout=32 (residual = Linear)
    #   l2: Din=128 -> H=4, Dout=32 (residual = Identity, Din == H*Dout)
    #   l3: same as l2
    #   l4: Din=128 -> H=1, Dout=32 (residual = Linear)
    N, IN_FEAT, OUT_FEAT, N_HEAD = 256, 64, 32, 4

    key = jax.random.PRNGKey(0)
    k_feat, k_adj, k1, k2, k3, k4 = jax.random.split(key, 6)

    feat = jax.random.normal(k_feat, (N, IN_FEAT), jnp.float32)
    adj = (jax.random.uniform(k_adj, (N, N)) < 0.4).astype(jnp.float32)
    adj = jnp.maximum(adj, jnp.eye(N, dtype=jnp.float32))  # self loops: every dst has >=1 edge

    p1 = init_gat_params(k1, IN_FEAT, OUT_FEAT, N_HEAD, residual_identity=False)
    p2 = init_gat_params(k2, N_HEAD * OUT_FEAT, OUT_FEAT, N_HEAD, residual_identity=True)
    p3 = init_gat_params(k3, N_HEAD * OUT_FEAT, OUT_FEAT, N_HEAD, residual_identity=True)
    p4 = init_gat_params(k4, N_HEAD * OUT_FEAT, OUT_FEAT, 1, residual_identity=False)

    def run(feat, adj):
        # binary dst-major mask, stored as int8 and computed once for all 4 layers
        adj_t = jnp.transpose(adj).astype(jnp.int8)
        x = apply_layer(feat, adj_t, p1)                 # layers 1-3: no attn/bef writeback
        x = apply_layer(x, adj_t, p2)
        x = apply_layer(x, adj_t, p3)
        x, bef, attn = apply_layer(x, adj_t, p4, emit_aux=True)
        # TODO(synk): matplotlib hist/plt.show() of (x1 - x) in the torch module is a
        # host-side visualization side effect with no kernel equivalent; omitted.
        return x, attn, bef

    out, attn, bef = jax.jit(run)(feat, adj)
    jax.block_until_ready((out, attn, bef))

    # reference check (pure JAX, same math, f32)
    def run_ref(feat, adj):
        x, _, _ = gat_layer_ref(feat, p1, adj)
        x, _, _ = gat_layer_ref(x, p2, adj)
        x, _, _ = gat_layer_ref(x, p3, adj)
        x, bef, attn = gat_layer_ref(x, p4, adj)
        return x, attn, bef

    out_r, attn_r, bef_r = run_ref(feat, adj)
    assert out.shape == (N, OUT_FEAT) and bef.shape == (N, OUT_FEAT)
    assert attn.shape == (1, N, N)
    assert jnp.allclose(out, out_r, rtol=2e-2, atol=2e-2)
    assert jnp.allclose(bef, bef_r, rtol=2e-2, atol=2e-2)
    assert jnp.allclose(attn, attn_r, rtol=2e-2, atol=2e-2)

    print("KERNEL_OK")
</pallas_src>

<mosaic_0001>
module attributes {stable_mosaic.version = 11 : i64} {
  func.func @_proj_kernel(%arg0: i32, %arg1: memref<256x64xbf16, #tpu.memory_space<vmem>>, %arg2: memref<64x264xbf16, #tpu.memory_space<vmem>>, %arg3: memref<256x264xf32, #tpu.memory_space<vmem>>) attributes {dimension_semantics = [#tpu.dimension_semantics<parallel>], iteration_bounds = array<i64: 1>, scalar_prefetch = 0 : i64, scratch_operands = 0 : i64, tpu.core_type = #tpu.core_type<tc>, window_params = [{transform_indices = @transform_0, window_bounds = array<i64: 256, 64>}, {pipeline_mode = #tpu.pipeline_mode<synchronous>, transform_indices = @transform_1, window_bounds = array<i64: 64, 264>}, {transform_indices = @transform_2, window_bounds = array<i64: 256, 264>}]} {
    %c0 = arith.constant 0 : index
    %c0_0 = arith.constant 0 : index
    %0 = vector.load %arg1[%c0, %c0_0] : memref<256x64xbf16, #tpu.memory_space<vmem>>, vector<256x64xbf16>
    %c0_1 = arith.constant 0 : index
    %c0_2 = arith.constant 0 : index
    %1 = vector.load %arg2[%c0_1, %c0_2] : memref<64x264xbf16, #tpu.memory_space<vmem>>, vector<64x264xbf16>
    %cst = arith.constant dense<0.000000e+00> : vector<256x264xf32>
    %2 = tpu.matmul %0, %1, %cst {dimension_numbers = #tpu.dot_dimension_numbers<[1], [0], [0], [1], [0, 0, 1, 1], [], []>} : vector<256x64xbf16>, vector<64x264xbf16>, vector<256x264xf32> -> vector<256x264xf32>
    %c0_3 = arith.constant 0 : index
    %c0_4 = arith.constant 0 : index
    %3 = vector.load %arg3[%c0_3, %c0_4] : memref<256x264xf32, #tpu.memory_space<vmem>>, vector<256x264xf32>
    tpu.vector_store %arg3[%c0_3, %c0_4], %2 {strides = array<i32>} : memref<256x264xf32, #tpu.memory_space<vmem>>, vector<256x264xf32>,
    return
  }
  func.func @transform_0(%arg0: i32) -> (i32, i32) {
    %c0_i32 = arith.constant 0 : i32
    %c0_i32_0 = arith.constant 0 : i32
    return %arg0, %c0_i32 : i32, i32
  }
  func.func @transform_1(%arg0: i32) -> (i32, i32) {
    %c0_i32 = arith.constant 0 : i32
    %c0_i32_0 = arith.constant 0 : i32
    %c0_i32_1 = arith.constant 0 : i32
    return %c0_i32, %c0_i32_0 : i32, i32
  }
  func.func @transform_2(%arg0: i32) -> (i32, i32) {
    %c0_i32 = arith.constant 0 : i32
    %c0_i32_0 = arith.constant 0 : i32
    return %arg0, %c0_i32 : i32, i32
  }
}

module attributes {stable_mosaic.version = 11 : i64} {
  func.func @_attn_kernel(%arg0: i32, %arg1: i32, %arg2: memref<4x128xf32, #tpu.memory_space<vmem>>, %arg3: memref<128x4xf32, #tpu.memory_space<vmem>>, %arg4: memref<128x128xbf16, #tpu.memory_space<vmem>>, %arg5: memref<128x128xi8, #tpu.memory_space<vmem>>, %arg6: memref<128x128xf32, #tpu.memory_space<vmem>>, %arg7: memref<128x128xf32, #tpu.memory_space<vmem>>, %arg8: memref<4x128x1xf32, #tpu.memory_space<vmem>>, %arg9: memref<4x128x1xf32, #tpu.memory_space<vmem>>, %arg10: memref<4x128x32xf32, #tpu.memory_space<vmem>>) attributes {dimension_semantics = [#tpu.dimension_semantics<parallel>, #tpu.dimension_semantics<arbitrary>], iteration_bounds = array<i64: 2, 2>, scalar_prefetch = 0 : i64, scratch_operands = 3 : i64, tpu.core_type = #tpu.core_type<tc>, window_params = [{transform_indices = @transform_0, window_bounds = array<i64: 4, 128>}, {transform_indices = @transform_1, window_bounds = array<i64: 128, 4>}, {transform_indices = @transform_2, window_bounds = array<i64: 128, 128>}, {transform_indices = @transform_3, window_bounds = array<i64: 128, 128>}, {transform_indices = @transform_4, window_bounds = array<i64: 128, 128>}, {transform_indices = @transform_5, window_bounds = array<i64: 128, 128>}]} {
    %c1_i32 = arith.constant 1 : i32
    %0 = arith.cmpi eq, %arg1, %c1_i32 : i32
    %c0_i32 = arith.constant 0 : i32
    %1 = arith.cmpi eq, %arg1, %c0_i32 : i32
    %2 = arith.extui %1 : i1 to i32
    %c0_i32_0 = arith.constant 0 : i32
    %3 = arith.cmpi ne, %2, %c0_i32_0 : i32
    scf.if %3 {
      %cst_104 = arith.constant -1.000000e+30 : f32
      %185 = vector.broadcast %cst_104 : f32 to vector<4x128x1xf32>
      %c0_105 = arith.constant 0 : index
      %c0_106 = arith.constant 0 : index
      %c0_107 = arith.constant 0 : index
      %186 = vector.load %arg8[%c0_105, %c0_106, %c0_107] : memref<4x128x1xf32, #tpu.memory_space<vmem>>, vector<4x128x1xf32>
      tpu.vector_store %arg8[%c0_105, %c0_106, %c0_107], %185 {strides = array<i32>} : memref<4x128x1xf32, #tpu.memory_space<vmem>>, vector<4x128x1xf32>,
      %cst_108 = arith.constant 0.000000e+00 : f32
      %187 = vector.broadcast %cst_108 : f32 to vector<4x128x1xf32>
      %c0_109 = arith.constant 0 : index
      %c0_110 = arith.constant 0 : index
      %c0_111 = arith.constant 0 : index
      %188 = vector.load %arg9[%c0_109, %c0_110, %c0_111] : memref<4x128x1xf32, #tpu.memory_space<vmem>>, vector<4x128x1xf32>
      tpu.vector_store %arg9[%c0_109, %c0_110, %c0_111], %187 {strides = array<i32>} : memref<4x128x1xf32, #tpu.memory_space<vmem>>, vector<4x128x1xf32>,
      %cst_112 = arith.constant 0.000000e+00 : f32
      %189 = vector.broadcast %cst_112 : f32 to vector<4x128x32xf32>
      %c0_113 = arith.constant 0 : index
      %c0_114 = arith.constant 0 : index
      %c0_115 = arith.constant 0 : index
      %190 = vector.load %arg10[%c0_113, %c0_114, %c0_115] : memref<4x128x32xf32, #tpu.memory_space<vmem>>, vector<4x128x32xf32>
      tpu.vector_store %arg10[%c0_113, %c0_114, %c0_115], %189 {strides = array<i32>} : memref<4x128x32xf32, #tpu.memory_space<vmem>>, vector<4x128x32xf32>,
    } else {
    }
    %c0 = arith.constant 0 : index
    %c0_1 = arith.constant 0 : index
    %4 = vector.load %arg5[%c0, %c0_1] : memref<128x128xi8, #tpu.memory_space<vmem>>, vector<128x128xi8>
    %5 = arith.sitofp %4 : vector<128x128xi8> to vector<128x128xf32>
    %cst = arith.constant 1.000000e+00 : f32
    %6 = vector.broadcast %cst : f32 to vector<128x128xf32>
    %7 = arith.subf %6, %5 : vector<128x128xf32>
    %cst_2 = arith.constant -1.000000e+30 : f32
    %8 = vector.broadcast %cst_2 : f32 to vector<128x128xf32>
    %9 = arith.mulf %7, %8 : vector<128x128xf32>
    %c0_3 = arith.constant 0 : index
    %c0_4 = arith.constant 0 : index
    %10 = vector.load %arg3[%c0_3, %c0_4] : memref<128x4xf32, #tpu.memory_space<vmem>>, vector<128x4xf32>
    %c0_5 = arith.constant 0 : index
    %c0_6 = arith.constant 0 : index
    %11 = vector.load %arg2[%c0_5, %c0_6] : memref<4x128xf32, #tpu.memory_space<vmem>>, vector<1x128xf32>
    %12 = vector.extract_strided_slice %10 {offsets = [0, 0], sizes = [128, 1], strides = [1, 1]} : vector<128x4xf32> to vector<128x1xf32>
    %13 = vector.broadcast %11 : vector<1x128xf32> to vector<128x128xf32>
    %14 = vector.broadcast %12 : vector<128x1xf32> to vector<128x128xf32>
    %15 = arith.addf %13, %14 : vector<128x128xf32>
    %cst_7 = arith.constant 2.000000e-01 : f32
    %16 = vector.broadcast %cst_7 : f32 to vector<128x128xf32>
    %17 = arith.mulf %16, %15 : vector<128x128xf32>
    %18 = arith.maximumf %15, %17 : vector<128x128xf32>
    %19 = arith.addf %18, %9 : vector<128x128xf32>
    %c0_8 = arith.constant 0 : index
    %c0_9 = arith.constant 0 : index
    %c0_10 = arith.constant 0 : index
    %20 = vector.load %arg8[%c0_8, %c0_9, %c0_10] : memref<4x128x1xf32, #tpu.memory_space<vmem>>, vector<1x128x1xf32>
    %21 = vector.shape_cast %20 : vector<1x128x1xf32> to vector<128x1xf32>
    %cst_11 = arith.constant dense<0xFF800000> : vector<128xf32>
    %22 = vector.multi_reduction <maximumf>, %19, %cst_11 [1] : vector<128x128xf32> to vector<128xf32>
    %23 = vector.shape_cast %22 : vector<128xf32> to vector<128x1xf32>
    %24 = arith.maximumf %21, %23 : vector<128x1xf32>
    %25 = arith.subf %21, %24 : vector<128x1xf32>
    %26 = math.exp %25 : vector<128x1xf32>
    %27 = vector.broadcast %24 : vector<128x1xf32> to vector<128x128xf32>
    %28 = arith.subf %19, %27 : vector<128x128xf32>
    %29 = math.exp %28 : vector<128x128xf32>
    %30 = arith.mulf %29, %5 : vector<128x128xf32>
    %c0_12 = arith.constant 0 : index
    %c0_13 = arith.constant 0 : index
    %c0_14 = arith.constant 0 : index
    %31 = vector.load %arg9[%c0_12, %c0_13, %c0_14] : memref<4x128x1xf32, #tpu.memory_space<vmem>>, vector<1x128x1xf32>
    %32 = vector.shape_cast %31 : vector<1x128x1xf32> to vector<128x1xf32>
    %33 = arith.mulf %26, %32 : vector<128x1xf32>
    %cst_15 = arith.constant dense<0.000000e+00> : vector<128xf32>
    %34 = vector.multi_reduction <add>, %30, %cst_15 [1] : vector<128x128xf32> to vector<128xf32>
    %35 = vector.shape_cast %34 : vector<128xf32> to vector<128x1xf32>
    %36 = arith.addf %33, %35 : vector<128x1xf32>
    %c0_16 = arith.constant 0 : index
    %c0_17 = arith.constant 0 : index
    %c0_18 = arith.constant 0 : index
    %37 = vector.load %arg10[%c0_16, %c0_17, %c0_18] : memref<4x128x32xf32, #tpu.memory_space<vmem>>, vector<1x128x32xf32>
    %38 = vector.shape_cast %37 : vector<1x128x32xf32> to vector<128x32xf32>
    %39 = vector.broadcast %26 : vector<128x1xf32> to vector<128x32xf32>
    %40 = arith.mulf %39, %38 : vector<128x32xf32>
    %41 = arith.truncf %30 : vector<128x128xf32> to vector<128x128xbf16>
    %c0_19 = arith.constant 0 : index
    %c0_20 = arith.constant 0 : index
    %42 = vector.load %arg4[%c0_19, %c0_20] : memref<128x128xbf16, #tpu.memory_space<vmem>>, vector<128x32xbf16>
    %cst_21 = arith.constant dense<0.000000e+00> : vector<128x32xf32>
    %43 = tpu.matmul %41, %42, %cst_21 {dimension_numbers = #tpu.dot_dimension_numbers<[1], [0], [0], [1], [0, 0, 1, 1], [], []>} : vector<128x128xbf16>, vector<128x32xbf16>, vector<128x32xf32> -> vector<128x32xf32>
    %44 = arith.addf %40, %43 : vector<128x32xf32>
    %c0_22 = arith.constant 0 : index
    %c0_23 = arith.constant 0 : index
    %c0_24 = arith.constant 0 : index
    %45 = vector.load %arg8[%c0_22, %c0_23, %c0_24] : memref<4x128x1xf32, #tpu.memory_space<vmem>>, vector<1x128x1xf32>
    %46 = vector.shape_cast %45 : vector<1x128x1xf32> to vector<128x1xf32>
    %47 = vector.shape_cast %24 : vector<128x1xf32> to vector<1x128x1xf32>
    tpu.vector_store %arg8[%c0_22, %c0_23, %c0_24], %47 {strides = array<i32>} : memref<4x128x1xf32, #tpu.memory_space<vmem>>, vector<1x128x1xf32>,
    %c0_25 = arith.constant 0 : index
    %c0_26 = arith.constant 0 : index
    %c0_27 = arith.constant 0 : index
    %48 = vector.load %arg9[%c0_25, %c0_26, %c0_27] : memref<4x128x1xf32, #tpu.memory_space<vmem>>, vector<1x128x1xf32>
    %49 = vector.shape_cast %48 : vector<1x128x1xf32> to vector<128x1xf32>
    %50 = vector.shape_cast %36 : vector<128x1xf32> to vector<1x128x1xf32>
    tpu.vector_store %arg9[%c0_25, %c0_26, %c0_27], %50 {strides = array<i32>} : memref<4x128x1xf32, #tpu.memory_space<vmem>>, vector<1x128x1xf32>,
    %c0_28 = arith.constant 0 : index
    %c0_29 = arith.constant 0 : index
    %c0_30 = arith.constant 0 : index
    %51 = vector.load %arg10[%c0_28, %c0_29, %c0_30] : memref<4x128x32xf32, #tpu.memory_space<vmem>>, vector<1x128x32xf32>
    %52 = vector.shape_cast %51 : vector<1x128x32xf32> to vector<128x32xf32>
    %53 = vector.shape_cast %44 : vector<128x32xf32> to vector<1x128x32xf32>
    tpu.vector_store %arg10[%c0_28, %c0_29, %c0_30], %53 {strides = array<i32>} : memref<4x128x32xf32, #tpu.memory_space<vmem>>, vector<1x128x32xf32>,
    %c1 = arith.constant 1 : index
    %c0_31 = arith.constant 0 : index
    %54 = vector.load %arg2[%c1, %c0_31] : memref<4x128xf32, #tpu.memory_space<vmem>>, vector<1x128xf32>
    %55 = vector.extract_strided_slice %10 {offsets = [0, 1], sizes = [128, 1], strides = [1, 1]} : vector<128x4xf32> to vector<128x1xf32>
    %56 = vector.broadcast %54 : vector<1x128xf32> to vector<128x128xf32>
    %57 = vector.broadcast %55 : vector<128x1xf32> to vector<128x128xf32>
    %58 = arith.addf %56, %57 : vector<128x128xf32>
    %cst_32 = arith.constant 2.000000e-01 : f32
    %59 = vector.broadcast %cst_32 : f32 to vector<128x128xf32>
    %60 = arith.mulf %59, %58 : vector<128x128xf32>
    %61 = arith.maximumf %58, %60 : vector<128x128xf32>
    %62 = arith.addf %61, %9 : vector<128x128xf32>
    %c1_33 = arith.constant 1 : index
    %c0_34 = arith.constant 0 : index
    %c0_35 = arith.constant 0 : index
    %63 = vector.load %arg8[%c1_33, %c0_34, %c0_35] : memref<4x128x1xf32, #tpu.memory_space<vmem>>, vector<1x128x1xf32>
    %64 = vector.shape_cast %63 : vector<1x128x1xf32> to vector<128x1xf32>
    %cst_36 = arith.constant dense<0xFF800000> : vector<128xf32>
    %65 = vector.multi_reduction <maximumf>, %62, %cst_36 [1] : vector<128x128xf32> to vector<128xf32>
    %66 = vector.shape_cast %65 : vector<128xf32> to vector<128x1xf32>
    %67 = arith.maximumf %64, %66 : vector<128x1xf32>
    %68 = arith.subf %64, %67 : vector<128x1xf32>
    %69 = math.exp %68 : vector<128x1xf32>
    %70 = vector.broadcast %67 : vector<128x1xf32> to vector<128x128xf32>
    %71 = arith.subf %62, %70 : vector<128x128xf32>
    %72 = math.exp %71 : vector<128x128xf32>
    %73 = arith.mulf %72, %5 : vector<128x128xf32>
    %c1_37 = arith.constant 1 : index
    %c0_38 = arith.constant 0 : index
    %c0_39 = arith.constant 0 : index
    %74 = vector.load %arg9[%c1_37, %c0_38, %c0_39] : memref<4x128x1xf32, #tpu.memory_space<vmem>>, vector<1x128x1xf32>
    %75 = vector.shape_cast %74 : vector<1x128x1xf32> to vector<128x1xf32>
    %76 = arith.mulf %69, %75 : vector<128x1xf32>
    %cst_40 = arith.constant dense<0.000000e+00> : vector<128xf32>
    %77 = vector.multi_reduction <add>, %73, %cst_40 [1] : vector<128x128xf32> to vector<128xf32>
    %78 = vector.shape_cast %77 : vector<128xf32> to vector<128x1xf32>
    %79 = arith.addf %76, %78 : vector<128x1xf32>
    %c1_41 = arith.constant 1 : index
    %c0_42 = arith.constant 0 : index
    %c0_43 = arith.constant 0 : index
    %80 = vector.load %arg10[%c1_41, %c0_42, %c0_43] : memref<4x128x32xf32, #tpu.memory_space<vmem>>, vector<1x128x32xf32>
    %81 = vector.shape_cast %80 : vector<1x128x32xf32> to vector<128x32xf32>
    %82 = vector.broadcast %69 : vector<128x1xf32> to vector<128x32xf32>
    %83 = arith.mulf %82, %81 : vector<128x32xf32>
    %84 = arith.truncf %73 : vector<128x128xf32> to vector<128x128xbf16>
    %c0_44 = arith.constant 0 : index
    %c32 = arith.constant 32 : index
    %85 = vector.load %arg4[%c0_44, %c32] : memref<128x128xbf16, #tpu.memory_space<vmem>>, vector<128x32xbf16>
    %cst_45 = arith.constant dense<0.000000e+00> : vector<128x32xf32>
    %86 = tpu.matmul %84, %85, %cst_45 {dimension_numbers = #tpu.dot_dimension_numbers<[1], [0], [0], [1], [0, 0, 1, 1], [], []>} : vector<128x128xbf16>, vector<128x32xbf16>, vector<128x32xf32> -> vector<128x32xf32>
    %87 = arith.addf %83, %86 : vector<128x32xf32>
    %c1_46 = arith.constant 1 : index
    %c0_47 = arith.constant 0 : index
    %c0_48 = arith.constant 0 : index
    %88 = vector.load %arg8[%c1_46, %c0_47, %c0_48] : memref<4x128x1xf32, #tpu.memory_space<vmem>>, vector<1x128x1xf32>
    %89 = vector.shape_cast %88 : vector<1x128x1xf32> to vector<128x1xf32>
    %90 = vector.shape_cast %67 : vector<128x1xf32> to vector<1x128x1xf32>
    tpu.vector_store %arg8[%c1_46, %c0_47, %c0_48], %90 {strides = array<i32>} : memref<4x128x1xf32, #tpu.memory_space<vmem>>, vector<1x128x1xf32>,
    %c1_49 = arith.constant 1 : index
    %c0_50 = arith.constant 0 : index
    %c0_51 = arith.constant 0 : index
    %91 = vector.load %arg9[%c1_49, %c0_50, %c0_51] : memref<4x128x1xf32, #tpu.memory_space<vmem>>, vector<1x128x1xf32>
    %92 = vector.shape_cast %91 : vector<1x128x1xf32> to vector<128x1xf32>
    %93 = vector.shape_cast %79 : vector<128x1xf32> to vector<1x128x1xf32>
    tpu.vector_store %arg9[%c1_49, %c0_50, %c0_51], %93 {strides = array<i32>} : memref<4x128x1xf32, #tpu.memory_space<vmem>>, vector<1x128x1xf32>,
    %c1_52 = arith.constant 1 : index
    %c0_53 = arith.constant 0 : index
    %c0_54 = arith.constant 0 : index
    %94 = vector.load %arg10[%c1_52, %c0_53, %c0_54] : memref<4x128x32xf32, #tpu.memory_space<vmem>>, vector<1x128x32xf32>
    %95 = vector.shape_cast %94 : vector<1x128x32xf32> to vector<128x32xf32>
    %96 = vector.shape_cast %87 : vector<128x32xf32> to vector<1x128x32xf32>
    tpu.vector_store %arg10[%c1_52, %c0_53, %c0_54], %96 {strides = array<i32>} : memref<4x128x32xf32, #tpu.memory_space<vmem>>, vector<1x128x32xf32>,
    %c2 = arith.constant 2 : index
    %c0_55 = arith.constant 0 : index
    %97 = vector.load %arg2[%c2, %c0_55] : memref<4x128xf32, #tpu.memory_space<vmem>>, vector<1x128xf32>
    %98 = vector.extract_strided_slice %10 {offsets = [0, 2], sizes = [128, 1], strides = [1, 1]} : vector<128x4xf32> to vector<128x1xf32>
    %99 = vector.broadcast %97 : vector<1x128xf32> to vector<128x128xf32>
    %100 = vector.broadcast %98 : vector<128x1xf32> to vector<128x128xf32>
    %101 = arith.addf %99, %100 : vector<128x128xf32>
    %cst_56 = arith.constant 2.000000e-01 : f32
    %102 = vector.broadcast %cst_56 : f32 to vector<128x128xf32>
    %103 = arith.mulf %102, %101 : vector<128x128xf32>
    %104 = arith.maximumf %101, %103 : vector<128x128xf32>
    %105 = arith.addf %104, %9 : vector<128x128xf32>
    %c2_57 = arith.constant 2 : index
    %c0_58 = arith.constant 0 : index
    %c0_59 = arith.constant 0 : index
    %106 = vector.load %arg8[%c2_57, %c0_58, %c0_59] : memref<4x128x1xf32, #tpu.memory_space<vmem>>, vector<1x128x1xf32>
    %107 = vector.shape_cast %106 : vector<1x128x1xf32> to vector<128x1xf32>
    %cst_60 = arith.constant dense<0xFF800000> : vector<128xf32>
    %108 = vector.multi_reduction <maximumf>, %105, %cst_60 [1] : vector<128x128xf32> to vector<128xf32>
    %109 = vector.shape_cast %108 : vector<128xf32> to vector<128x1xf32>
    %110 = arith.maximumf %107, %109 : vector<128x1xf32>
    %111 = arith.subf %107, %110 : vector<128x1xf32>
    %112 = math.exp %111 : vector<128x1xf32>
    %113 = vector.broadcast %110 : vector<128x1xf32> to vector<128x128xf32>
    %114 = arith.subf %105, %113 : vector<128x128xf32>
    %115 = math.exp %114 : vector<128x128xf32>
    %116 = arith.mulf %115, %5 : vector<128x128xf32>
    %c2_61 = arith.constant 2 : index
    %c0_62 = arith.constant 0 : index
    %c0_63 = arith.constant 0 : index
    %117 = vector.load %arg9[%c2_61, %c0_62, %c0_63] : memref<4x128x1xf32, #tpu.memory_space<vmem>>, vector<1x128x1xf32>
    %118 = vector.shape_cast %117 : vector<1x128x1xf32> to vector<128x1xf32>
    %119 = arith.mulf %112, %118 : vector<128x1xf32>
    %cst_64 = arith.constant dense<0.000000e+00> : vector<128xf32>
    %120 = vector.multi_reduction <add>, %116, %cst_64 [1] : vector<128x128xf32> to vector<128xf32>
    %121 = vector.shape_cast %120 : vector<128xf32> to vector<128x1xf32>
    %122 = arith.addf %119, %121 : vector<128x1xf32>
    %c2_65 = arith.constant 2 : index
    %c0_66 = arith.constant 0 : index
    %c0_67 = arith.constant 0 : index
    %123 = vector.load %arg10[%c2_65, %c0_66, %c0_67] : memref<4x128x32xf32, #tpu.memory_space<vmem>>, vector<1x128x32xf32>
    %124 = vector.shape_cast %123 : vector<1x128x32xf32> to vector<128x32xf32>
    %125 = vector.broadcast %112 : vector<128x1xf32> to vector<128x32xf32>
    %126 = arith.mulf %125, %124 : vector<128x32xf32>
    %127 = arith.truncf %116 : vector<128x128xf32> to vector<128x128xbf16>
    %c0_68 = arith.constant 0 : index
    %c64 = arith.constant 64 : index
    %128 = vector.load %arg4[%c0_68, %c64] : memref<128x128xbf16, #tpu.memory_space<vmem>>, vector<128x32xbf16>
    %cst_69 = arith.constant dense<0.000000e+00> : vector<128x32xf32>
    %129 = tpu.matmul %127, %128, %cst_69 {dimension_numbers = #tpu.dot_dimension_numbers<[1], [0], [0], [1], [0, 0, 1, 1], [], []>} : vector<128x128xbf16>, vector<128x32xbf16>, vector<128x32xf32> -> vector<128x32xf32>
    %130 = arith.addf %126, %129 : vector<128x32xf32>
    %c2_70 = arith.constant 2 : index
    %c0_71 = arith.constant 0 : index
    %c0_72 = arith.constant 0 : index
    %131 = vector.load %arg8[%c2_70, %c0_71, %c0_72] : memref<4x128x1xf32, #tpu.memory_space<vmem>>, vector<1x128x1xf32>
    %132 = vector.shape_cast %131 : vector<1x128x1xf32> to vector<128x1xf32>
    %133 = vector.shape_cast %110 : vector<128x1xf32> to vector<1x128x1xf32>
    tpu.vector_store %arg8[%c2_70, %c0_71, %c0_72], %133 {strides = array<i32>} : memref<4x128x1xf32, #tpu.memory_space<vmem>>, vector<1x128x1xf32>,
    %c2_73 = arith.constant 2 : index
    %c0_74 = arith.constant 0 : index
    %c0_75 = arith.constant 0 : index
    %134 = vector.load %arg9[%c2_73, %c0_74, %c0_75] : memref<4x128x1xf32, #tpu.memory_space<vmem>>, vector<1x128x1xf32>
    %135 = vector.shape_cast %134 : vector<1x128x1xf32> to vector<128x1xf32>
    %136 = vector.shape_cast %122 : vector<128x1xf32> to vector<1x128x1xf32>
    tpu.vector_store %arg9[%c2_73, %c0_74, %c0_75], %136 {strides = array<i32>} : memref<4x128x1xf32, #tpu.memory_space<vmem>>, vector<1x128x1xf32>,
    %c2_76 = arith.constant 2 : index
    %c0_77 = arith.constant 0 : index
    %c0_78 = arith.constant 0 : index
    %137 = vector.load %arg10[%c2_76, %c0_77, %c0_78] : memref<4x128x32xf32, #tpu.memory_space<vmem>>, vector<1x128x32xf32>
    %138 = vector.shape_cast %137 : vector<1x128x32xf32> to vector<128x32xf32>
    %139 = vector.shape_cast %130 : vector<128x32xf32> to vector<1x128x32xf32>
    tpu.vector_store %arg10[%c2_76, %c0_77, %c0_78], %139 {strides = array<i32>} : memref<4x128x32xf32, #tpu.memory_space<vmem>>, vector<1x128x32xf32>,
    %c3 = arith.constant 3 : index
    %c0_79 = arith.constant 0 : index
    %140 = vector.load %arg2[%c3, %c0_79] : memref<4x128xf32, #tpu.memory_space<vmem>>, vector<1x128xf32>
    %141 = vector.extract_strided_slice %10 {offsets = [0, 3], sizes = [128, 1], strides = [1, 1]} : vector<128x4xf32> to vector<128x1xf32>
    %142 = vector.broadcast %140 : vector<1x128xf32> to vector<128x128xf32>
    %143 = vector.broadcast %141 : vector<128x1xf32> to vector<128x128xf32>
    %144 = arith.addf %142, %143 : vector<128x128xf32>
    %cst_80 = arith.constant 2.000000e-01 : f32
    %145 = vector.broadcast %cst_80 : f32 to vector<128x128xf32>
    %146 = arith.mulf %145, %144 : vector<128x128xf32>
    %147 = arith.maximumf %144, %146 : vector<128x128xf32>
    %148 = arith.addf %147, %9 : vector<128x128xf32>
    %c3_81 = arith.constant 3 : index
    %c0_82 = arith.constant 0 : index
    %c0_83 = arith.constant 0 : index
    %149 = vector.load %arg8[%c3_81, %c0_82, %c0_83] : memref<4x128x1xf32, #tpu.memory_space<vmem>>, vector<1x128x1xf32>
    %150 = vector.shape_cast %149 : vector<1x128x1xf32> to vector<128x1xf32>
    %cst_84 = arith.constant dense<0xFF800000> : vector<128xf32>
    %151 = vector.multi_reduction <maximumf>, %148, %cst_84 [1] : vector<128x128xf32> to vector<128xf32>
    %152 = vector.shape_cast %151 : vector<128xf32> to vector<128x1xf32>
    %153 = arith.maximumf %150, %152 : vector<128x1xf32>
    %154 = arith.subf %150, %153 : vector<128x1xf32>
    %155 = math.exp %154 : vector<128x1xf32>
    %156 = vector.broadcast %153 : vector<128x1xf32> to vector<128x128xf32>
    %157 = arith.subf %148, %156 : vector<128x128xf32>
    %158 = math.exp %157 : vector<128x128xf32>
    %159 = arith.mulf %158, %5 : vector<128x128xf32>
    %c3_85 = arith.constant 3 : index
    %c0_86 = arith.constant 0 : index
    %c0_87 = arith.constant 0 : index
    %160 = vector.load %arg9[%c3_85, %c0_86, %c0_87] : memref<4x128x1xf32, #tpu.memory_space<vmem>>, vector<1x128x1xf32>
    %161 = vector.shape_cast %160 : vector<1x128x1xf32> to vector<128x1xf32>
    %162 = arith.mulf %155, %161 : vector<128x1xf32>
    %cst_88 = arith.constant dense<0.000000e+00> : vector<128xf32>
    %163 = vector.multi_reduction <add>, %159, %cst_88 [1] : vector<128x128xf32> to vector<128xf32>
    %164 = vector.shape_cast %163 : vector<128xf32> to vector<128x1xf32>
    %165 = arith.addf %162, %164 : vector<128x1xf32>
    %c3_89 = arith.constant 3 : index
    %c0_90 = arith.constant 0 : index
    %c0_91 = arith.constant 0 : index
    %166 = vector.load %arg10[%c3_89, %c0_90, %c0_91] : memref<4x128x32xf32, #tpu.memory_space<vmem>>, vector<1x128x32xf32>
    %167 = vector.shape_cast %166 : vector<1x128x32xf32> to vector<128x32xf32>
    %168 = vector.broadcast %155 : vector<128x1xf32> to vector<128x32xf32>
    %169 = arith.mulf %168, %167 : vector<128x32xf32>
    %170 = arith.truncf %159 : vector<128x128xf32> to vector<128x128xbf16>
    %c0_92 = arith.constant 0 : index
    %c96 = arith.constant 96 : index
    %171 = vector.load %arg4[%c0_92, %c96] : memref<128x128xbf16, #tpu.memory_space<vmem>>, vector<128x32xbf16>
    %cst_93 = arith.constant dense<0.000000e+00> : vector<128x32xf32>
    %172 = tpu.matmul %170, %171, %cst_93 {dimension_numbers = #tpu.dot_dimension_numbers<[1], [0], [0], [1], [0, 0, 1, 1], [], []>} : vector<128x128xbf16>, vector<128x32xbf16>, vector<128x32xf32> -> vector<128x32xf32>
    %173 = arith.addf %169, %172 : vector<128x32xf32>
    %c3_94 = arith.constant 3 : index
    %c0_95 = arith.constant 0 : index
    %c0_96 = arith.constant 0 : index
    %174 = vector.load %arg8[%c3_94, %c0_95, %c0_96] : memref<4x128x1xf32, #tpu.memory_space<vmem>>, vector<1x128x1xf32>
    %175 = vector.shape_cast %174 : vector<1x128x1xf32> to vector<128x1xf32>
    %176 = vector.shape_cast %153 : vector<128x1xf32> to vector<1x128x1xf32>
    tpu.vector_store %arg8[%c3_94, %c0_95, %c0_96], %176 {strides = array<i32>} : memref<4x128x1xf32, #tpu.memory_space<vmem>>, vector<1x128x1xf32>,
    %c3_97 = arith.constant 3 : index
    %c0_98 = arith.constant 0 : index
    %c0_99 = arith.constant 0 : index
    %177 = vector.load %arg9[%c3_97, %c0_98, %c0_99] : memref<4x128x1xf32, #tpu.memory_space<vmem>>, vector<1x128x1xf32>
    %178 = vector.shape_cast %177 : vector<1x128x1xf32> to vector<128x1xf32>
    %179 = vector.shape_cast %165 : vector<128x1xf32> to vector<1x128x1xf32>
    tpu.vector_store %arg9[%c3_97, %c0_98, %c0_99], %179 {strides = array<i32>} : memref<4x128x1xf32, #tpu.memory_space<vmem>>, vector<1x128x1xf32>,
    %c3_100 = arith.constant 3 : index
    %c0_101 = arith.constant 0 : index
    %c0_102 = arith.constant 0 : index
    %180 = vector.load %arg10[%c3_100, %c0_101, %c0_102] : memref<4x128x32xf32, #tpu.memory_space<vmem>>, vector<1x128x32xf32>
    %181 = vector.shape_cast %180 : vector<1x128x32xf32> to vector<128x32xf32>
    %182 = vector.shape_cast %173 : vector<128x32xf32> to vector<1x128x32xf32>
    tpu.vector_store %arg10[%c3_100, %c0_101, %c0_102], %182 {strides = array<i32>} : memref<4x128x32xf32, #tpu.memory_space<vmem>>, vector<1x128x32xf32>,
    %183 = arith.extui %0 : i1 to i32
    %c0_i32_103 = arith.constant 0 : i32
    %184 = arith.cmpi ne, %183, %c0_i32_103 : i32
    scf.if %184 {
      %c0_104 = arith.constant 0 : index
      %c0_105 = arith.constant 0 : index
      %c0_106 = arith.constant 0 : index
      %185 = vector.load %arg9[%c0_104, %c0_105, %c0_106] : memref<4x128x1xf32, #tpu.memory_space<vmem>>, vector<1x128x1xf32>
      %186 = vector.shape_cast %185 : vector<1x128x1xf32> to vector<128x1xf32>
      %cst_107 = arith.constant 1.000000e-30 : f32
      %187 = vector.broadcast %cst_107 : f32 to vector<128x1xf32>
      %188 = arith.maximumf %186, %187 : vector<128x1xf32>
      %189 = tpu.reciprocal %188 : vector<128x1xf32> -> vector<128x1xf32>
      %c0_108 = arith.constant 0 : index
      %c0_109 = arith.constant 0 : index
      %c0_110 = arith.constant 0 : index
      %190 = vector.load %arg10[%c0_108, %c0_109, %c0_110] : memref<4x128x32xf32, #tpu.memory_space<vmem>>, vector<1x128x32xf32>
      %191 = vector.shape_cast %190 : vector<1x128x32xf32> to vector<128x32xf32>
      %192 = vector.broadcast %189 : vector<128x1xf32> to vector<128x32xf32>
      %193 = arith.mulf %191, %192 : vector<128x32xf32>
      %c1_111 = arith.constant 1 : index
      %c0_112 = arith.constant 0 : index
      %c0_113 = arith.constant 0 : index
      %194 = vector.load %arg9[%c1_111, %c0_112, %c0_113] : memref<4x128x1xf32, #tpu.memory_space<vmem>>, vector<1x128x1xf32>
      %195 = vector.shape_cast %194 : vector<1x128x1xf32> to vector<128x1xf32>
      %cst_114 = arith.constant 1.000000e-30 : f32
      %196 = vector.broadcast %cst_114 : f32 to vector<128x1xf32>
      %197 = arith.maximumf %195, %196 : vector<128x1xf32>
      %198 = tpu.reciprocal %197 : vector<128x1xf32> -> vector<128x1xf32>
      %c1_115 = arith.constant 1 : index
      %c0_116 = arith.constant 0 : index
      %c0_117 = arith.constant 0 : index
      %199 = vector.load %arg10[%c1_115, %c0_116, %c0_117] : memref<4x128x32xf32, #tpu.memory_space<vmem>>, vector<1x128x32xf32>
      %200 = vector.shape_cast %199 : vector<1x128x32xf32> to vector<128x32xf32>
      %201 = vector.broadcast %198 : vector<128x1xf32> to vector<128x32xf32>
      %202 = arith.mulf %200, %201 : vector<128x32xf32>
      %c2_118 = arith.constant 2 : index
      %c0_119 = arith.constant 0 : index
      %c0_120 = arith.constant 0 : index
      %203 = vector.load %arg9[%c2_118, %c0_119, %c0_120] : memref<4x128x1xf32, #tpu.memory_space<vmem>>, vector<1x128x1xf32>
      %204 = vector.shape_cast %203 : vector<1x128x1xf32> to vector<128x1xf32>
      %cst_121 = arith.constant 1.000000e-30 : f32
      %205 = vector.broadcast %cst_121 : f32 to vector<128x1xf32>
      %206 = arith.maximumf %204, %205 : vector<128x1xf32>
      %207 = tpu.reciprocal %206 : vector<128x1xf32> -> vector<128x1xf32>
      %c2_122 = arith.constant 2 : index
      %c0_123 = arith.constant 0 : index
      %c0_124 = arith.constant 0 : index
      %208 = vector.load %arg10[%c2_122, %c0_123, %c0_124] : memref<4x128x32xf32, #tpu.memory_space<vmem>>, vector<1x128x32xf32>
      %209 = vector.shape_cast %208 : vector<1x128x32xf32> to vector<128x32xf32>
      %210 = vector.broadcast %207 : vector<128x1xf32> to vector<128x32xf32>
      %211 = arith.mulf %209, %210 : vector<128x32xf32>
      %c3_125 = arith.constant 3 : index
      %c0_126 = arith.constant 0 : index
      %c0_127 = arith.constant 0 : index
      %212 = vector.load %arg9[%c3_125, %c0_126, %c0_127] : memref<4x128x1xf32, #tpu.memory_space<vmem>>, vector<1x128x1xf32>
      %213 = vector.shape_cast %212 : vector<1x128x1xf32> to vector<128x1xf32>
      %cst_128 = arith.constant 1.000000e-30 : f32
      %214 = vector.broadcast %cst_128 : f32 to vector<128x1xf32>
      %215 = arith.maximumf %213, %214 : vector<128x1xf32>
      %216 = tpu.reciprocal %215 : vector<128x1xf32> -> vector<128x1xf32>
      %c3_129 = arith.constant 3 : index
      %c0_130 = arith.constant 0 : index
      %c0_131 = arith.constant 0 : index
      %217 = vector.load %arg10[%c3_129, %c0_130, %c0_131] : memref<4x128x32xf32, #tpu.memory_space<vmem>>, vector<1x128x32xf32>
      %218 = vector.shape_cast %217 : vector<1x128x32xf32> to vector<128x32xf32>
      %219 = vector.broadcast %216 : vector<128x1xf32> to vector<128x32xf32>
      %220 = arith.mulf %218, %219 : vector<128x32xf32>
      %221 = tpu.concatenate %193, %202, %211, %220 in 1 : vector<128x32xf32>, vector<128x32xf32>, vector<128x32xf32>, vector<128x32xf32> -> vector<128x128xf32>
      %c0_132 = arith.constant 0 : index
      %c0_133 = arith.constant 0 : index
      %222 = vector.load %arg6[%c0_132, %c0_133] : memref<128x128xf32, #tpu.memory_space<vmem>>, vector<128x128xf32>
      %223 = arith.addf %221, %222 : vector<128x128xf32>
      %cst_134 = arith.constant 0.000000e+00 : f32
      %224 = vector.broadcast %cst_134 : f32 to vector<128x128xf32>
      %225 = arith.maximumf %223, %224 : vector<128x128xf32>
      %c0_135 = arith.constant 0 : index
      %c0_136 = arith.constant 0 : index
      %226 = vector.load %arg7[%c0_135, %c0_136] : memref<128x128xf32, #tpu.memory_space<vmem>>, vector<128x128xf32>
      tpu.vector_store %arg7[%c0_135, %c0_136], %225 {strides = array<i32>} : memref<128x128xf32, #tpu.memory_space<vmem>>, vector<128x128xf32>,
    } else {
    }
    return
  }
  func.func @transform_0(%arg0: i32, %arg1: i32) -> (i32, i32) {
    %c0_i32 = arith.constant 0 : i32
    %c0_i32_0 = arith.constant 0 : i32
    return %c0_i32, %arg1 : i32, i32
  }
  func.func @transform_1(%arg0: i32, %arg1: i32) -> (i32, i32) {
    %c0_i32 = arith.constant 0 : i32
    %c0_i32_0 = arith.constant 0 : i32
    return %arg0, %c0_i32 : i32, i32
  }
  func.func @transform_2(%arg0: i32, %arg1: i32) -> (i32, i32) {
    %c0_i32 = arith.constant 0 : i32
    %c0_i32_0 = arith.constant 0 : i32
    return %arg1, %c0_i32 : i32, i32
  }
  func.func @transform_3(%arg0: i32, %arg1: i32) -> (i32, i32) {
    %c0_i32 = arith.constant 0 : i32
    return %arg0, %arg1 : i32, i32
  }
  func.func @transform_4(%arg0: i32, %arg1: i32) -> (i32, i32) {
    %c0_i32 = arith.constant 0 : i32
    %c0_i32_0 = arith.constant 0 : i32
    return %arg0, %c0_i32 : i32, i32
  }
  func.func @transform_5(%arg0: i32, %arg1: i32) -> (i32, i32) {
    %c0_i32 = arith.constant 0 : i32
    %c0_i32_0 = arith.constant 0 : i32
    return %arg0, %c0_i32 : i32, i32
  }
}

module attributes {stable_mosaic.version = 11 : i64} {
  func.func @_proj_kernel(%arg0: i32, %arg1: memref<256x128xbf16, #tpu.memory_space<vmem>>, %arg2: memref<128x136xbf16, #tpu.memory_space<vmem>>, %arg3: memref<256x136xf32, #tpu.memory_space<vmem>>) attributes {dimension_semantics = [#tpu.dimension_semantics<parallel>], iteration_bounds = array<i64: 1>, scalar_prefetch = 0 : i64, scratch_operands = 0 : i64, tpu.core_type = #tpu.core_type<tc>, window_params = [{transform_indices = @transform_0, window_bounds = array<i64: 256, 128>}, {pipeline_mode = #tpu.pipeline_mode<synchronous>, transform_indices = @transform_1, window_bounds = array<i64: 128, 136>}, {transform_indices = @transform_2, window_bounds = array<i64: 256, 136>}]} {
    %c0 = arith.constant 0 : index
    %c0_0 = arith.constant 0 : index
    %0 = vector.load %arg1[%c0, %c0_0] : memref<256x128xbf16, #tpu.memory_space<vmem>>, vector<256x128xbf16>
    %c0_1 = arith.constant 0 : index
    %c0_2 = arith.constant 0 : index
    %1 = vector.load %arg2[%c0_1, %c0_2] : memref<128x136xbf16, #tpu.memory_space<vmem>>, vector<128x136xbf16>
    %cst = arith.constant dense<0.000000e+00> : vector<256x136xf32>
    %2 = tpu.matmul %0, %1, %cst {dimension_numbers = #tpu.dot_dimension_numbers<[1], [0], [0], [1], [0, 0, 1, 1], [], []>} : vector<256x128xbf16>, vector<128x136xbf16>, vector<256x136xf32> -> vector<256x136xf32>
    %c0_3 = arith.constant 0 : index
    %c0_4 = arith.constant 0 : index
    %3 = vector.load %arg3[%c0_3, %c0_4] : memref<256x136xf32, #tpu.memory_space<vmem>>, vector<256x136xf32>
    tpu.vector_store %arg3[%c0_3, %c0_4], %2 {strides = array<i32>} : memref<256x136xf32, #tpu.memory_space<vmem>>, vector<256x136xf32>,
    return
  }
  func.func @transform_0(%arg0: i32) -> (i32, i32) {
    %c0_i32 = arith.constant 0 : i32
    %c0_i32_0 = arith.constant 0 : i32
    return %arg0, %c0_i32 : i32, i32
  }
  func.func @transform_1(%arg0: i32) -> (i32, i32) {
    %c0_i32 = arith.constant 0 : i32
    %c0_i32_0 = arith.constant 0 : i32
    %c0_i32_1 = arith.constant 0 : i32
    return %c0_i32, %c0_i32_0 : i32, i32
  }
  func.func @transform_2(%arg0: i32) -> (i32, i32) {
    %c0_i32 = arith.constant 0 : i32
    %c0_i32_0 = arith.constant 0 : i32
    return %arg0, %c0_i32 : i32, i32
  }
}

module attributes {stable_mosaic.version = 11 : i64} {
  func.func @_proj_kernel(%arg0: i32, %arg1: memref<256x128xbf16, #tpu.memory_space<vmem>>, %arg2: memref<128x66xbf16, #tpu.memory_space<vmem>>, %arg3: memref<256x66xf32, #tpu.memory_space<vmem>>) attributes {dimension_semantics = [#tpu.dimension_semantics<parallel>], iteration_bounds = array<i64: 1>, scalar_prefetch = 0 : i64, scratch_operands = 0 : i64, tpu.core_type = #tpu.core_type<tc>, window_params = [{transform_indices = @transform_0, window_bounds = array<i64: 256, 128>}, {pipeline_mode = #tpu.pipeline_mode<synchronous>, transform_indices = @transform_1, window_bounds = array<i64: 128, 66>}, {transform_indices = @transform_2, window_bounds = array<i64: 256, 66>}]} {
    %c0 = arith.constant 0 : index
    %c0_0 = arith.constant 0 : index
    %0 = vector.load %arg1[%c0, %c0_0] : memref<256x128xbf16, #tpu.memory_space<vmem>>, vector<256x128xbf16>
    %c0_1 = arith.constant 0 : index
    %c0_2 = arith.constant 0 : index
    %1 = vector.load %arg2[%c0_1, %c0_2] : memref<128x66xbf16, #tpu.memory_space<vmem>>, vector<128x66xbf16>
    %cst = arith.constant dense<0.000000e+00> : vector<256x66xf32>
    %2 = tpu.matmul %0, %1, %cst {dimension_numbers = #tpu.dot_dimension_numbers<[1], [0], [0], [1], [0, 0, 1, 1], [], []>} : vector<256x128xbf16>, vector<128x66xbf16>, vector<256x66xf32> -> vector<256x66xf32>
    %c0_3 = arith.constant 0 : index
    %c0_4 = arith.constant 0 : index
    %3 = vector.load %arg3[%c0_3, %c0_4] : memref<256x66xf32, #tpu.memory_space<vmem>>, vector<256x66xf32>
    tpu.vector_store %arg3[%c0_3, %c0_4], %2 {strides = array<i32>} : memref<256x66xf32, #tpu.memory_space<vmem>>, vector<256x66xf32>,
    return
  }
  func.func @transform_0(%arg0: i32) -> (i32, i32) {
    %c0_i32 = arith.constant 0 : i32
    %c0_i32_0 = arith.constant 0 : i32
    return %arg0, %c0_i32 : i32, i32
  }
  func.func @transform_1(%arg0: i32) -> (i32, i32) {
    %c0_i32 = arith.constant 0 : i32
    %c0_i32_0 = arith.constant 0 : i32
    %c0_i32_1 = arith.constant 0 : i32
    return %c0_i32, %c0_i32_0 : i32, i32
  }
  func.func @transform_2(%arg0: i32) -> (i32, i32) {
    %c0_i32 = arith.constant 0 : i32
    %c0_i32_0 = arith.constant 0 : i32
    return %arg0, %c0_i32 : i32, i32
  }
}

module attributes {stable_mosaic.version = 11 : i64} {
  func.func @_attn_kernel(%arg0: i32, %arg1: i32, %arg2: memref<1x256xf32, #tpu.memory_space<vmem>>, %arg3: memref<128x1xf32, #tpu.memory_space<vmem>>, %arg4: memref<256x32xbf16, #tpu.memory_space<vmem>>, %arg5: memref<128x256xi8, #tpu.memory_space<vmem>>, %arg6: memref<128x32xf32, #tpu.memory_space<vmem>>, %arg7: memref<128x32xf32, #tpu.memory_space<vmem>>, %arg8: memref<128x32xf32, #tpu.memory_space<vmem>>, %arg9: memref<1x128x256xf32, #tpu.memory_space<vmem>>, %arg10: memref<1x128x1xf32, #tpu.memory_space<vmem>>, %arg11: memref<1x128x1xf32, #tpu.memory_space<vmem>>, %arg12: memref<1x128x32xf32, #tpu.memory_space<vmem>>) attributes {dimension_semantics = [#tpu.dimension_semantics<parallel>, #tpu.dimension_semantics<arbitrary>], iteration_bounds = array<i64: 2, 1>, scalar_prefetch = 0 : i64, scratch_operands = 3 : i64, tpu.core_type = #tpu.core_type<tc>, window_params = [{transform_indices = @transform_0, window_bounds = array<i64: 1, 256>}, {transform_indices = @transform_1, window_bounds = array<i64: 128, 1>}, {transform_indices = @transform_2, window_bounds = array<i64: 256, 32>}, {transform_indices = @transform_3, window_bounds = array<i64: 128, 256>}, {transform_indices = @transform_4, window_bounds = array<i64: 128, 32>}, {transform_indices = @transform_5, window_bounds = array<i64: 128, 32>}, {transform_indices = @transform_6, window_bounds = array<i64: 128, 32>}, {transform_indices = @transform_7, window_bounds = array<i64: 1, 128, 256>}]} {
    %c0_i32 = arith.constant 0 : i32
    %0 = arith.cmpi eq, %arg1, %c0_i32 : i32
    %c0_i32_0 = arith.constant 0 : i32
    %1 = arith.cmpi eq, %arg1, %c0_i32_0 : i32
    %2 = arith.extui %1 : i1 to i32
    %c0_i32_1 = arith.constant 0 : i32
    %3 = arith.cmpi ne, %2, %c0_i32_1 : i32
    scf.if %3 {
      %cst_34 = arith.constant -1.000000e+30 : f32
      %57 = vector.broadcast %cst_34 : f32 to vector<1x128x1xf32>
      %c0_35 = arith.constant 0 : index
      %c0_36 = arith.constant 0 : index
      %c0_37 = arith.constant 0 : index
      %58 = vector.load %arg10[%c0_35, %c0_36, %c0_37] : memref<1x128x1xf32, #tpu.memory_space<vmem>>, vector<1x128x1xf32>
      tpu.vector_store %arg10[%c0_35, %c0_36, %c0_37], %57 {strides = array<i32>} : memref<1x128x1xf32, #tpu.memory_space<vmem>>, vector<1x128x1xf32>,
      %cst_38 = arith.constant 0.000000e+00 : f32
      %59 = vector.broadcast %cst_38 : f32 to vector<1x128x1xf32>
      %c0_39 = arith.constant 0 : index
      %c0_40 = arith.constant 0 : index
      %c0_41 = arith.constant 0 : index
      %60 = vector.load %arg11[%c0_39, %c0_40, %c0_41] : memref<1x128x1xf32, #tpu.memory_space<vmem>>, vector<1x128x1xf32>
      tpu.vector_store %arg11[%c0_39, %c0_40, %c0_41], %59 {strides = array<i32>} : memref<1x128x1xf32, #tpu.memory_space<vmem>>, vector<1x128x1xf32>,
      %cst_42 = arith.constant 0.000000e+00 : f32
      %61 = vector.broadcast %cst_42 : f32 to vector<1x128x32xf32>
      %c0_43 = arith.constant 0 : index
      %c0_44 = arith.constant 0 : index
      %c0_45 = arith.constant 0 : index
      %62 = vector.load %arg12[%c0_43, %c0_44, %c0_45] : memref<1x128x32xf32, #tpu.memory_space<vmem>>, vector<1x128x32xf32>
      tpu.vector_store %arg12[%c0_43, %c0_44, %c0_45], %61 {strides = array<i32>} : memref<1x128x32xf32, #tpu.memory_space<vmem>>, vector<1x128x32xf32>,
    } else {
    }
    %c0 = arith.constant 0 : index
    %c0_2 = arith.constant 0 : index
    %4 = vector.load %arg5[%c0, %c0_2] : memref<128x256xi8, #tpu.memory_space<vmem>>, vector<128x256xi8>
    %5 = arith.sitofp %4 : vector<128x256xi8> to vector<128x256xf32>
    %cst = arith.constant 1.000000e+00 : f32
    %6 = vector.broadcast %cst : f32 to vector<128x256xf32>
    %7 = arith.subf %6, %5 : vector<128x256xf32>
    %cst_3 = arith.constant -1.000000e+30 : f32
    %8 = vector.broadcast %cst_3 : f32 to vector<128x256xf32>
    %9 = arith.mulf %7, %8 : vector<128x256xf32>
    %c0_4 = arith.constant 0 : index
    %c0_5 = arith.constant 0 : index
    %10 = vector.load %arg3[%c0_4, %c0_5] : memref<128x1xf32, #tpu.memory_space<vmem>>, vector<128x1xf32>
    %c0_6 = arith.constant 0 : index
    %c0_7 = arith.constant 0 : index
    %11 = vector.load %arg2[%c0_6, %c0_7] : memref<1x256xf32, #tpu.memory_space<vmem>>, vector<1x256xf32>
    %12 = vector.broadcast %11 : vector<1x256xf32> to vector<128x256xf32>
    %13 = vector.broadcast %10 : vector<128x1xf32> to vector<128x256xf32>
    %14 = arith.addf %12, %13 : vector<128x256xf32>
    %cst_8 = arith.constant 2.000000e-01 : f32
    %15 = vector.broadcast %cst_8 : f32 to vector<128x256xf32>
    %16 = arith.mulf %15, %14 : vector<128x256xf32>
    %17 = arith.maximumf %14, %16 : vector<128x256xf32>
    %18 = arith.addf %17, %9 : vector<128x256xf32>
    %c0_9 = arith.constant 0 : index
    %c0_10 = arith.constant 0 : index
    %c0_11 = arith.constant 0 : index
    %19 = vector.load %arg10[%c0_9, %c0_10, %c0_11] : memref<1x128x1xf32, #tpu.memory_space<vmem>>, vector<1x128x1xf32>
    %20 = vector.shape_cast %19 : vector<1x128x1xf32> to vector<128x1xf32>
    %cst_12 = arith.constant dense<0xFF800000> : vector<128xf32>
    %21 = vector.multi_reduction <maximumf>, %18, %cst_12 [1] : vector<128x256xf32> to vector<128xf32>
    %22 = vector.shape_cast %21 : vector<128xf32> to vector<128x1xf32>
    %23 = arith.maximumf %20, %22 : vector<128x1xf32>
    %24 = arith.subf %20, %23 : vector<128x1xf32>
    %25 = math.exp %24 : vector<128x1xf32>
    %26 = vector.broadcast %23 : vector<128x1xf32> to vector<128x256xf32>
    %27 = arith.subf %18, %26 : vector<128x256xf32>
    %28 = math.exp %27 : vector<128x256xf32>
    %29 = arith.mulf %28, %5 : vector<128x256xf32>
    %c0_13 = arith.constant 0 : index
    %c0_14 = arith.constant 0 : index
    %c0_15 = arith.constant 0 : index
    %30 = vector.load %arg11[%c0_13, %c0_14, %c0_15] : memref<1x128x1xf32, #tpu.memory_space<vmem>>, vector<1x128x1xf32>
    %31 = vector.shape_cast %30 : vector<1x128x1xf32> to vector<128x1xf32>
    %32 = arith.mulf %25, %31 : vector<128x1xf32>
    %cst_16 = arith.constant dense<0.000000e+00> : vector<128xf32>
    %33 = vector.multi_reduction <add>, %29, %cst_16 [1] : vector<128x256xf32> to vector<128xf32>
    %34 = vector.shape_cast %33 : vector<128xf32> to vector<128x1xf32>
    %35 = arith.addf %32, %34 : vector<128x1xf32>
    %c0_17 = arith.constant 0 : index
    %c0_18 = arith.constant 0 : index
    %c0_19 = arith.constant 0 : index
    %36 = vector.load %arg12[%c0_17, %c0_18, %c0_19] : memref<1x128x32xf32, #tpu.memory_space<vmem>>, vector<1x128x32xf32>
    %37 = vector.shape_cast %36 : vector<1x128x32xf32> to vector<128x32xf32>
    %38 = vector.broadcast %25 : vector<128x1xf32> to vector<128x32xf32>
    %39 = arith.mulf %38, %37 : vector<128x32xf32>
    %40 = arith.truncf %29 : vector<128x256xf32> to vector<128x256xbf16>
    %c0_20 = arith.constant 0 : index
    %c0_21 = arith.constant 0 : index
    %41 = vector.load %arg4[%c0_20, %c0_21] : memref<256x32xbf16, #tpu.memory_space<vmem>>, vector<256x32xbf16>
    %cst_22 = arith.constant dense<0.000000e+00> : vector<128x32xf32>
    %42 = tpu.matmul %40, %41, %cst_22 {dimension_numbers = #tpu.dot_dimension_numbers<[1], [0], [0], [1], [0, 0, 1, 1], [], []>} : vector<128x256xbf16>, vector<256x32xbf16>, vector<128x32xf32> -> vector<128x32xf32>
    %43 = arith.addf %39, %42 : vector<128x32xf32>
    %c0_23 = arith.constant 0 : index
    %c0_24 = arith.constant 0 : index
    %c0_25 = arith.constant 0 : index
    %44 = vector.load %arg10[%c0_23, %c0_24, %c0_25] : memref<1x128x1xf32, #tpu.memory_space<vmem>>, vector<1x128x1xf32>
    %45 = vector.shape_cast %44 : vector<1x128x1xf32> to vector<128x1xf32>
    %46 = vector.shape_cast %23 : vector<128x1xf32> to vector<1x128x1xf32>
    tpu.vector_store %arg10[%c0_23, %c0_24, %c0_25], %46 {strides = array<i32>} : memref<1x128x1xf32, #tpu.memory_space<vmem>>, vector<1x128x1xf32>,
    %c0_26 = arith.constant 0 : index
    %c0_27 = arith.constant 0 : index
    %c0_28 = arith.constant 0 : index
    %47 = vector.load %arg11[%c0_26, %c0_27, %c0_28] : memref<1x128x1xf32, #tpu.memory_space<vmem>>, vector<1x128x1xf32>
    %48 = vector.shape_cast %47 : vector<1x128x1xf32> to vector<128x1xf32>
    %49 = vector.shape_cast %35 : vector<128x1xf32> to vector<1x128x1xf32>
    tpu.vector_store %arg11[%c0_26, %c0_27, %c0_28], %49 {strides = array<i32>} : memref<1x128x1xf32, #tpu.memory_space<vmem>>, vector<1x128x1xf32>,
    %c0_29 = arith.constant 0 : index
    %c0_30 = arith.constant 0 : index
    %c0_31 = arith.constant 0 : index
    %50 = vector.load %arg12[%c0_29, %c0_30, %c0_31] : memref<1x128x32xf32, #tpu.memory_space<vmem>>, vector<1x128x32xf32>
    %51 = vector.shape_cast %50 : vector<1x128x32xf32> to vector<128x32xf32>
    %52 = vector.shape_cast %43 : vector<128x32xf32> to vector<1x128x32xf32>
    tpu.vector_store %arg12[%c0_29, %c0_30, %c0_31], %52 {strides = array<i32>} : memref<1x128x32xf32, #tpu.memory_space<vmem>>, vector<1x128x32xf32>,
    %53 = arith.extui %0 : i1 to i32
    %c0_i32_32 = arith.constant 0 : i32
    %54 = arith.cmpi ne, %53, %c0_i32_32 : i32
    scf.if %54 {
      %cst_34 = arith.constant 1.000000e-30 : f32
      %57 = vector.broadcast %cst_34 : f32 to vector<128x1xf32>
      %58 = arith.maximumf %35, %57 : vector<128x1xf32>
      %59 = tpu.reciprocal %58 : vector<128x1xf32> -> vector<128x1xf32>
      %60 = vector.broadcast %59 : vector<128x1xf32> to vector<128x256xf32>
      %61 = arith.mulf %29, %60 : vector<128x256xf32>
      %c0_35 = arith.constant 0 : index
      %c0_36 = arith.constant 0 : index
      %c0_37 = arith.constant 0 : index
      %62 = vector.load %arg9[%c0_35, %c0_36, %c0_37] : memref<1x128x256xf32, #tpu.memory_space<vmem>>, vector<1x128x256xf32>
      %63 = vector.shape_cast %62 : vector<1x128x256xf32> to vector<128x256xf32>
      %64 = vector.shape_cast %61 : vector<128x256xf32> to vector<1x128x256xf32>
      tpu.vector_store %arg9[%c0_35, %c0_36, %c0_37], %64 {strides = array<i32>} : memref<1x128x256xf32, #tpu.memory_space<vmem>>, vector<1x128x256xf32>,
    } else {
    }
    %55 = arith.extui %0 : i1 to i32
    %c0_i32_33 = arith.constant 0 : i32
    %56 = arith.cmpi ne, %55, %c0_i32_33 : i32
    scf.if %56 {
      %c0_34 = arith.constant 0 : index
      %c0_35 = arith.constant 0 : index
      %c0_36 = arith.constant 0 : index
      %57 = vector.load %arg11[%c0_34, %c0_35, %c0_36] : memref<1x128x1xf32, #tpu.memory_space<vmem>>, vector<1x128x1xf32>
      %58 = vector.shape_cast %57 : vector<1x128x1xf32> to vector<128x1xf32>
      %cst_37 = arith.constant 1.000000e-30 : f32
      %59 = vector.broadcast %cst_37 : f32 to vector<128x1xf32>
      %60 = arith.maximumf %58, %59 : vector<128x1xf32>
      %61 = tpu.reciprocal %60 : vector<128x1xf32> -> vector<128x1xf32>
      %c0_38 = arith.constant 0 : index
      %c0_39 = arith.constant 0 : index
      %c0_40 = arith.constant 0 : index
      %62 = vector.load %arg12[%c0_38, %c0_39, %c0_40] : memref<1x128x32xf32, #tpu.memory_space<vmem>>, vector<1x128x32xf32>
      %63 = vector.shape_cast %62 : vector<1x128x32xf32> to vector<128x32xf32>
      %64 = vector.broadcast %61 : vector<128x1xf32> to vector<128x32xf32>
      %65 = arith.mulf %63, %64 : vector<128x32xf32>
      %c0_41 = arith.constant 0 : index
      %c0_42 = arith.constant 0 : index
      %66 = vector.load %arg6[%c0_41, %c0_42] : memref<128x32xf32, #tpu.memory_space<vmem>>, vector<128x32xf32>
      %67 = arith.addf %65, %66 : vector<128x32xf32>
      %cst_43 = arith.constant 0.000000e+00 : f32
      %68 = vector.broadcast %cst_43 : f32 to vector<128x32xf32>
      %69 = arith.maximumf %67, %68 : vector<128x32xf32>
      %c0_44 = arith.constant 0 : index
      %c0_45 = arith.constant 0 : index
      %70 = vector.load %arg7[%c0_44, %c0_45] : memref<128x32xf32, #tpu.memory_space<vmem>>, vector<128x32xf32>
      tpu.vector_store %arg7[%c0_44, %c0_45], %69 {strides = array<i32>} : memref<128x32xf32, #tpu.memory_space<vmem>>, vector<128x32xf32>,
      %c0_46 = arith.constant 0 : index
      %c0_47 = arith.constant 0 : index
      %71 = vector.load %arg8[%c0_46, %c0_47] : memref<128x32xf32, #tpu.memory_space<vmem>>, vector<128x32xf32>
      tpu.vector_store %arg8[%c0_46, %c0_47], %65 {strides = array<i32>} : memref<128x32xf32, #tpu.memory_space<vmem>>, vector<128x32xf32>,
    } else {
    }
    return
  }
  func.func @transform_0(%arg0: i32, %arg1: i32) -> (i32, i32) {
    %c0_i32 = arith.constant 0 : i32
    %c0_i32_0 = arith.constant 0 : i32
    return %c0_i32, %arg1 : i32, i32
  }
  func.func @transform_1(%arg0: i32, %arg1: i32) -> (i32, i32) {
    %c0_i32 = arith.constant 0 : i32
    %c0_i32_0 = arith.constant 0 : i32
    return %arg0, %c0_i32 : i32, i32
  }
  func.func @transform_2(%arg0: i32, %arg1: i32) -> (i32, i32) {
    %c0_i32 = arith.constant 0 : i32
    %c0_i32_0 = arith.constant 0 : i32
    return %arg1, %c0_i32 : i32, i32
  }
  func.func @transform_3(%arg0: i32, %arg1: i32) -> (i32, i32) {
    %c0_i32 = arith.constant 0 : i32
    return %arg0, %arg1 : i32, i32
  }
  func.func @transform_4(%arg0: i32, %arg1: i32) -> (i32, i32) {
    %c0_i32 = arith.constant 0 : i32
    %c0_i32_0 = arith.constant 0 : i32
    return %arg0, %c0_i32 : i32, i32
  }
  func.func @transform_5(%arg0: i32, %arg1: i32) -> (i32, i32) {
    %c0_i32 = arith.constant 0 : i32
    %c0_i32_0 = arith.constant 0 : i32
    return %arg0, %c0_i32 : i32, i32
  }
  func.func @transform_6(%arg0: i32, %arg1: i32) -> (i32, i32) {
    %c0_i32 = arith.constant 0 : i32
    %c0_i32_0 = arith.constant 0 : i32
    return %arg0, %c0_i32 : i32, i32
  }
  func.func @transform_7(%arg0: i32, %arg1: i32) -> (i32, i32, i32) {
    %c0_i32 = arith.constant 0 : i32
    %c0_i32_0 = arith.constant 0 : i32
    %c0_i32_1 = arith.constant 0 : i32
    return %c0_i32, %arg0, %c0_i32_0 : i32, i32, i32
  }
}

</mosaic_0001>

<bundles_post_ra>
// kernel: run.8
= control target key start
LH: loop header
LB: loop body
LE: loop exit
PB: predicated region body
PF: predicated region fallthrough
CT: control target
= control target key end

     0   :  { %v869_v1 = vmov 0   ;;  %vm204_vm0 = vcmask 523264   ;;  %vm609_vm1 = vcmask 64512   ;;  %s1341_s1 = inlined_call_operand.vmem [shape: bf16[64,264], index: 1, kind: input, shape index: {}]   ;;  %s1342_s0 = inlined_call_operand.vmem [shape: bf16[256,64], index: 0, kind: input, shape index: {}]   ;;  %s1343_s2 = inlined_call_operand.vmem [shape: f32[256,264], index: 2, kind: output, shape index: {}]  }
   0x1   :  { %v837_v0 = vld [vmem:[%s1341_s1 + $0x4] ss:$12 sps:$4 sm:$0xff]   ;;  %285 = vmatprep.mubr.bf16.mxu0 %v869_v1  ;;  %405 = vmatprep.mubr.bf16.mxu1 %v869_v1  ;;  %v839_v2 = vld [vmem:[%s1341_s1] ss:$12 sps:$4 sm:$0xff]   ;;  %v840_v3 = vld [vmem:[%s1341_s1 + $0x1c] ss:$12 sps:$4 sm:$0xff]  }
   0x2   :  { %253 = vmatprep.subr.bf16.mxu0 %v837_v0  ;;  %828 = vmatprep.subr.bf16.mxu1 %v837_v0  ;;  %v842_v4 = vld [vmem:[%s1341_s1 + $0x18] ss:$12 sps:$4 sm:$0xff]   ;;  %v843_v5 = vld [vmem:[%s1341_s1 + $0x34] ss:$12 sps:$4 sm:$0xff]   ;;  %v845_v6 = vld [vmem:[%s1341_s1 + $0x30] ss:$12 sps:$4 sm:$0xff]  }
   0x3   :  { %254 = vmatpush1.bf16.msra.mxu0 %v839_v2  ;;  %832 = vmatpush1.bf16.msra.mxu1 %v839_v2  ;;  %v846_v7 = vld [vmem:[%s1341_s1 + $0x4c] ss:$12 sps:$4 sm:$0xff]   ;;  %v848_v8 = vld [vmem:[%s1341_s1 + $0x48] ss:$12 sps:$4 sm:$0xff]   ;;  %v849_v10 = vld [vmem:[%s1342_s0] sm:$0xff]  }
   0x4   :  { %255 = vmatprep.subr.bf16.mxu0 %v840_v3  ;;  %829 = vmatprep.subr.bf16.mxu1 %v840_v3  ;;  %v851_v9 = vld [vmem:[%s1341_s1 + $0x8] ss:$12 sps:$4 sm:$0xff]   ;;  %v920_v11 = vld [vmem:[%s1342_s0 + $0x60] sm:$0xff]   ;;  %v860_v16 = vld [vmem:[%s1341_s1 + $0x50] ss:$12 sps:$4 sm:$0xff]  }
   0x5   :  { %v854_v12 = vld [vmem:[%s1341_s1 + $0x20] ss:$12 sps:$4 sm:$0xff]   ;;  %v857_v13 = vld [vmem:[%s1341_s1 + $0x38] ss:$12 sps:$4 sm:$0xff]   ;;  %v855_v17 = vld [vmem:[%s1342_s0 + $0x10] sm:$0xff]  }
   0x6   :  { %v852_v14 = vld [vmem:[%s1342_s0 + $0x8] sm:$0xff]   ;;  %v856_v18 = vld [vmem:[%s1342_s0 + $0x70] sm:$0xff]   ;;  %v858_v19 = vld [vmem:[%s1342_s0 + $0x18] sm:$0xff]  }
   0x7   :  { %256 = vmatpush1.bf16.msra.mxu0 %v842_v4  ;;  %833 = vmatpush1.bf16.msra.mxu1 %v842_v4  ;;  %v853_v15 = vld [vmem:[%s1342_s0 + $0x68] sm:$0xff]   ;;  %v859_v20 = vld [vmem:[%s1342_s0 + $0x78] sm:$0xff]   ;;  %v861_v21 = vld [vmem:[%s1342_s0 + $0x20] sm:$0xff]  }
   0x8   :  { %257 = vmatprep.subr.bf16.mxu0 %v843_v5  ;;  %830 = vmatprep.subr.bf16.mxu1 %v843_v5  ;;  %v862_v22 = vld [vmem:[%s1342_s0 + $0x28] sm:$0xff]   ;;  %v863_v23 = vld [vmem:[%s1342_s0 + $0x30] sm:$0xff]   ;;  %v864_v24 = vld [vmem:[%s1342_s0 + $0x38] sm:$0xff]  }
   0x9   :  { %v865_v25 = vld [vmem:[%s1342_s0 + $0x40] sm:$0xff]   ;;  %v866_v26 = vld [vmem:[%s1342_s0 + $0x48] sm:$0xff]   ;;  %v867_v27 = vld [vmem:[%s1342_s0 + $0x50] sm:$0xff]  }
   0xa   :  { %v868_v28 = vld [vmem:[%s1342_s0 + $0x58] sm:$0xff]  }
   0xb   :  { %258 = vmatpush1.bf16.msra.mxu0 %v845_v6  ;;  %834 = vmatpush1.bf16.msra.mxu1 %v845_v6 }
   0xc   :  { %259 = vmatprep.subr.bf16.mxu0 %v846_v7  ;;  %831 = vmatprep.subr.bf16.mxu1 %v846_v7 }
   0xf   :  { %260 = vmatpush1.bf16.msra.mxu0 %v848_v8  ;;  %835 = vmatpush1.bf16.msra.mxu1 %v848_v8 }
  0x10   :  { %788 = vmatprep.subr.bf16.mxu1 %v851_v9 }
  0x12   :  { %736 = vmatmul.mubr.msk.bf16.vlgmr.msra.gmra.mrb[0].mxu0 %vm204_vm0, %v849_v10  ;;  %748 = vmatmul.mubr.msk.bf16.vlgmr.msra.gmra.mrb[0].mxu1 %vm204_vm0, %v920_v11 }
  0x13   :  { %789 = vmatpush3.bf16.msra.mxu1 %v851_v9  ;;  %295 = vmatprep.mubr.bf16.mxu0 %v869_v1 }
  0x14   :  { %415 = vmatprep.mubr.bf16.mxu1 %v869_v1  ;;  %790 = vmatprep.subr.bf16.mxu1 %v854_v12 }
  0x17   :  { %791 = vmatpush3.bf16.msra.mxu1 %v854_v12 }
  0x18   :  { %792 = vmatprep.subr.bf16.mxu1 %v857_v13 }
  0x1a   :  { %737 = vmatmul.mubr.msk.bf16.gmra.mrb[4].mxu0 %vm204_vm0, %v852_v14  ;;  %749 = vmatmul.mubr.msk.bf16.gmra.mrb[4].mxu1 %vm204_vm0, %v853_v15 }
  0x1b   :  { %305 = vmatprep.mubr.bf16.mxu0 %v869_v1  ;;  %425 = vmatprep.mubr.bf16.mxu1 %v869_v1 }
  0x1c   :  { %793 = vmatpush3.bf16.msra.mxu1 %v857_v13 }
  0x1d   :  { %794 = vmatprep.subr.bf16.mxu1 %v860_v16 }
  0x20   :  { %795 = vmatpush3.bf16.msra.mxu1 %v860_v16 }
  0x22   :  { %738 = vmatmul.mubr.msk.bf16.gmra.mrb[8].mxu0 %vm204_vm0, %v855_v17  ;;  %750 = vmatmul.mubr.msk.bf16.gmra.mrb[8].mxu1 %vm204_vm0, %v856_v18 }
  0x23   :  { %315 = vmatprep.mubr.bf16.mxu0 %v869_v1  ;;  %435 = vmatprep.mubr.bf16.mxu1 %v869_v1 }
  0x2a   :  { %739 = vmatmul.mubr.msk.bf16.gmra.mrb[12].mxu0 %vm204_vm0, %v858_v19  ;;  %751 = vmatmul.mubr.msk.bf16.gmra.mrb[12].mxu1 %vm204_vm0, %v859_v20 }
  0x2b   :  { %325 = vmatprep.mubr.bf16.mxu0 %v869_v1  ;;  %796 = vmatprep.mubr.msk.bf16.mxu1 %vm204_vm0, %v849_v10 }
  0x32   :  { %740 = vmatmul.mubr.msk.bf16.gmra.mrb[16].mxu0 %vm204_vm0, %v861_v21  ;;  %797 = vmatmul.mubr.msk.bf16.vlgmr.msra.gmra.mrb[16].mxu1 %vm204_vm0, %v852_v14 }
  0x33   :  { %335 = vmatprep.mubr.bf16.mxu0 %v869_v1  ;;  %800 = vmatprep.mubr.msk.bf16.mxu1 %vm204_vm0, %v855_v17 }
  0x3a   :  { %741 = vmatmul.mubr.msk.bf16.gmra.mrb[20].mxu0 %vm204_vm0, %v862_v22  ;;  %801 = vmatmul.mubr.msk.bf16.gmra.mrb[20].mxu1 %vm204_vm0, %v858_v19 }
  0x3b   :  { %345 = vmatprep.mubr.bf16.mxu0 %v869_v1  ;;  %804 = vmatprep.mubr.msk.bf16.mxu1 %vm204_vm0, %v861_v21 }
  0x42   :  { %742 = vmatmul.mubr.msk.bf16.gmra.mrb[24].mxu0 %vm204_vm0, %v863_v23  ;;  %805 = vmatmul.mubr.msk.bf16.gmra.mrb[24].mxu1 %vm204_vm0, %v862_v22 }
  0x43   :  { %355 = vmatprep.mubr.bf16.mxu0 %v869_v1  ;;  %808 = vmatprep.mubr.msk.bf16.mxu1 %vm204_vm0, %v863_v23 }
  0x4a   :  { %743 = vmatmul.mubr.msk.bf16.gmra.mrb[28].mxu0 %vm204_vm0, %v864_v24  ;;  %809 = vmatmul.mubr.msk.bf16.gmra.mrb[28].mxu1 %vm204_vm0, %v864_v24 }
  0x4b   :  { %365 = vmatprep.mubr.bf16.mxu0 %v869_v1  ;;  %812 = vmatprep.mubr.msk.bf16.mxu1 %vm204_vm0, %v865_v25 }
  0x52   :  { %744 = vmatmul.mubr.msk.bf16.gmra.mrb[32].mxu0 %vm204_vm0, %v865_v25  ;;  %813 = vmatmul.mubr.msk.bf16.gmra.mrb[32].mxu1 %vm204_vm0, %v866_v26 }
  0x53   :  { %375 = vmatprep.mubr.bf16.mxu0 %v869_v1  ;;  %816 = vmatprep.mubr.msk.bf16.mxu1 %vm204_vm0, %v867_v27 }
  0x5a   :  { %745 = vmatmul.mubr.msk.bf16.gmra.mrb[36].mxu0 %vm204_vm0, %v866_v26  ;;  %817 = vmatmul.mubr.msk.bf16.gmra.mrb[36].mxu1 %vm204_vm0, %v868_v28 }
  0x5b   :  { %385 = vmatprep.mubr.bf16.mxu0 %v869_v1  ;;  %820 = vmatprep.mubr.msk.bf16.mxu1 %vm204_vm0, %v920_v11 }
  0x62   :  { %746 = vmatmul.mubr.msk.bf16.gmra.mrb[40].mxu0 %vm204_vm0, %v867_v27  ;;  %821 = vmatmul.mubr.msk.bf16.gmra.mrb[40].mxu1 %vm204_vm0, %v853_v15 }
  0x63   :  { %395 = vmatprep.mubr.bf16.mxu0 %v869_v1  ;;  %824 = vmatprep.mubr.msk.bf16.mxu1 %vm204_vm0, %v856_v18 }
  0x6a   :  { %747 = vmatmul.mubr.msk.bf16.gmra.mrb[44].mxu0 %vm204_vm0, %v868_v28  ;;  %825 = vmatmul.mubr.msk.bf16.gmra.mrb[44].mxu1 %vm204_vm0, %v859_v20 }
  0xe5   :  { %v287_v29 = vpop.f32.mrb[0].mxu0  ;;  %v407_v30 = vpop.f32.mrb[0].mxu1 }
  0xe6   :  { %607 = vst [vmem:[%s1343_s2] sm:$0xff] %v287_v29  ;;  %680 = vst [vmem:[%s1343_s2 + $0x240] sm:$0xff] %v407_v30  ;;  %v289_v31 = vpop.f32.mrb[1].mxu0  ;;  %v409_v32 = vpop.f32.mrb[1].mxu1 }
  0xe7   :  { %608 = vst [vmem:[%s1343_s2 + $0x8] sm:$0xff] %v289_v31  ;;  %681 = vst [vmem:[%s1343_s2 + $0x248] sm:$0xff] %v409_v32  ;;  %v291_v33 = vpop.f32.mrb[2].mxu0  ;;  %v411_v34 = vpop.f32.mrb[2].mxu1 }
  0xe8   :  { %611 = vst [vmem:[%s1343_s2 + $0x18] sm:$0xff] %v291_v33  ;;  %683 = vst [vmem:[%s1343_s2 + $0x258] sm:$0xff] %v411_v34  ;;  %v293_v35 = vpop.f32.mrb[3].mxu0  ;;  %v413_v36 = vpop.f32.mrb[3].mxu1 }
  0xe9   :  { %612 = vst [vmem:[%s1343_s2 + $0x20] sm:$0xff] %v293_v35  ;;  %684 = vst [vmem:[%s1343_s2 + $0x260] sm:$0xff] %v413_v36 }
  0xed   :  { %v297_v37 = vpop.f32.mrb[4].mxu0  ;;  %v417_v38 = vpop.f32.mrb[4].mxu1 }
  0xee   :  { %614 = vst [vmem:[%s1343_s2 + $0x30] sm:$0xff] %v297_v37  ;;  %686 = vst [vmem:[%s1343_s2 + $0x270] sm:$0xff] %v417_v38  ;;  %v299_v39 = vpop.f32.mrb[5].mxu0  ;;  %v419_v40 = vpop.f32.mrb[5].mxu1 }
  0xef   :  { %615 = vst [vmem:[%s1343_s2 + $0x38] sm:$0xff] %v299_v39  ;;  %687 = vst [vmem:[%s1343_s2 + $0x278] sm:$0xff] %v419_v40  ;;  %v301_v41 = vpop.f32.mrb[6].mxu0  ;;  %v421_v42 = vpop.f32.mrb[6].mxu1 }
  0xf0   :  { %617 = vst [vmem:[%s1343_s2 + $0x48] sm:$0xff] %v301_v41  ;;  %689 = vst [vmem:[%s1343_s2 + $0x288] sm:$0xff] %v421_v42  ;;  %v303_v43 = vpop.f32.mrb[7].mxu0  ;;  %v423_v44 = vpop.f32.mrb[7].mxu1 }
  0xf1   :  { %618 = vst [vmem:[%s1343_s2 + $0x50] sm:$0xff] %v303_v43  ;;  %690 = vst [vmem:[%s1343_s2 + $0x290] sm:$0xff] %v423_v44 }
  0xf5   :  { %v307_v45 = vpop.f32.mrb[8].mxu0  ;;  %v427_v46 = vpop.f32.mrb[8].mxu1 }
  0xf6   :  { %620 = vst [vmem:[%s1343_s2 + $0x60] sm:$0xff] %v307_v45  ;;  %692 = vst [vmem:[%s1343_s2 + $0x2a0] sm:$0xff] %v427_v46  ;;  %v309_v47 = vpop.f32.mrb[9].mxu0  ;;  %v429_v48 = vpop.f32.mrb[9].mxu1 }
  0xf7   :  { %621 = vst [vmem:[%s1343_s2 + $0x68] sm:$0xff] %v309_v47  ;;  %693 = vst [vmem:[%s1343_s2 + $0x2a8] sm:$0xff] %v429_v48  ;;  %v311_v49 = vpop.f32.mrb[10].mxu0  ;;  %v431_v50 = vpop.f32.mrb[10].mxu1 }
  0xf8   :  { %623 = vst [vmem:[%s1343_s2 + $0x78] sm:$0xff] %v311_v49  ;;  %695 = vst [vmem:[%s1343_s2 + $0x2b8] sm:$0xff] %v431_v50  ;;  %v313_v51 = vpop.f32.mrb[11].mxu0  ;;  %v433_v52 = vpop.f32.mrb[11].mxu1 }
  0xf9   :  { %624 = vst [vmem:[%s1343_s2 + $0x80] sm:$0xff] %v313_v51  ;;  %696 = vst [vmem:[%s1343_s2 + $0x2c0] sm:$0xff] %v433_v52 }
  0xfd   :  { %v317_v53 = vpop.f32.mrb[12].mxu0  ;;  %v437_v54 = vpop.f32.mrb[12].mxu1 }
  0xfe   :  { %626 = vst [vmem:[%s1343_s2 + $0x90] sm:$0xff] %v317_v53  ;;  %698 = vst [vmem:[%s1343_s2 + $0x2d0] sm:$0xff] %v437_v54  ;;  %v319_v55 = vpop.f32.mrb[13].mxu0  ;;  %v439_v56 = vpop.f32.mrb[13].mxu1 }
  0xff   :  { %627 = vst [vmem:[%s1343_s2 + $0x98] sm:$0xff] %v319_v55  ;;  %699 = vst [vmem:[%s1343_s2 + $0x2d8] sm:$0xff] %v439_v56  ;;  %v321_v57 = vpop.f32.mrb[14].mxu0  ;;  %v441_v58 = vpop.f32.mrb[14].mxu1 }
 0x100   :  { %629 = vst [vmem:[%s1343_s2 + $0xa8] sm:$0xff] %v321_v57  ;;  %701 = vst [vmem:[%s1343_s2 + $0x2e8] sm:$0xff] %v441_v58  ;;  %v323_v59 = vpop.f32.mrb[15].mxu0  ;;  %v443_v60 = vpop.f32.mrb[15].mxu1 }
 0x101   :  { %630 = vst [vmem:[%s1343_s2 + $0xb0] sm:$0xff] %v323_v59  ;;  %702 = vst [vmem:[%s1343_s2 + $0x2f0] sm:$0xff] %v443_v60 }
 0x105   :  { %v327_v61 = vpop.f32.mrb[16].mxu0  ;;  %v798_v62 = vpop.f32.mrb[16].mxu1 }
 0x106   :  { %632 = vst [vmem:[%s1343_s2 + $0xc0] sm:$0xff] %v327_v61  ;;  %616 = vst.msk [vmem:[%s1343_s2 + $0x40] sm:$0xff] %vm609_vm1, %v798_v62  ;;  %v329_v63 = vpop.f32.mrb[17].mxu0  ;;  %v480_v0 = vpop.f32.mrb[17].mxu1 }
 0x107   :  { %633 = vst [vmem:[%s1343_s2 + $0xc8] sm:$0xff] %v329_v63  ;;  %610 = vst.msk [vmem:[%s1343_s2 + $0x10] sm:$0xff] %vm609_vm1, %v480_v0  ;;  %v331_v1 = vpop.f32.mrb[18].mxu0  ;;  %v799_v2 = vpop.f32.mrb[18].mxu1 }
 0x108   :  { %635 = vst [vmem:[%s1343_s2 + $0xd8] sm:$0xff] %v331_v1  ;;  %619 = vst.msk [vmem:[%s1343_s2 + $0x58] sm:$0xff] %vm609_vm1, %v799_v2  ;;  %v333_v3 = vpop.f32.mrb[19].mxu0  ;;  %v483_v4 = vpop.f32.mrb[19].mxu1 }
 0x109   :  { %636 = vst [vmem:[%s1343_s2 + $0xe0] sm:$0xff] %v333_v3  ;;  %613 = vst.msk [vmem:[%s1343_s2 + $0x28] sm:$0xff] %vm609_vm1, %v483_v4 }
 0x10d   :  { %v337_v5 = vpop.f32.mrb[20].mxu0  ;;  %v802_v6 = vpop.f32.mrb[20].mxu1 }
 0x10e   :  { %638 = vst [vmem:[%s1343_s2 + $0xf0] sm:$0xff] %v337_v5  ;;  %628 = vst.msk [vmem:[%s1343_s2 + $0xa0] sm:$0xff] %vm609_vm1, %v802_v6  ;;  %v339_v7 = vpop.f32.mrb[21].mxu0  ;;  %v496_v8 = vpop.f32.mrb[21].mxu1 }
 0x10f   :  { %639 = vst [vmem:[%s1343_s2 + $0xf8] sm:$0xff] %v339_v7  ;;  %622 = vst.msk [vmem:[%s1343_s2 + $0x70] sm:$0xff] %vm609_vm1, %v496_v8  ;;  %v341_v9 = vpop.f32.mrb[22].mxu0  ;;  %v803_v10 = vpop.f32.mrb[22].mxu1 }
 0x110   :  { %641 = vst [vmem:[%s1343_s2 + $0x108] sm:$0xff] %v341_v9  ;;  %631 = vst.msk [vmem:[%s1343_s2 + $0xb8] sm:$0xff] %vm609_vm1, %v803_v10  ;;  %v343_v11 = vpop.f32.mrb[23].mxu0  ;;  %v499_v12 = vpop.f32.mrb[23].mxu1 }
 0x111   :  { %642 = vst [vmem:[%s1343_s2 + $0x110] sm:$0xff] %v343_v11  ;;  %625 = vst.msk [vmem:[%s1343_s2 + $0x88] sm:$0xff] %vm609_vm1, %v499_v12 }
 0x115   :  { %v347_v13 = vpop.f32.mrb[24].mxu0  ;;  %v806_v14 = vpop.f32.mrb[24].mxu1 }
 0x116   :  { %644 = vst [vmem:[%s1343_s2 + $0x120] sm:$0xff] %v347_v13  ;;  %640 = vst.msk [vmem:[%s1343_s2 + $0x100] sm:$0xff] %vm609_vm1, %v806_v14  ;;  %v349_v15 = vpop.f32.mrb[25].mxu0  ;;  %v512_v16 = vpop.f32.mrb[25].mxu1 }
 0x117   :  { %645 = vst [vmem:[%s1343_s2 + $0x128] sm:$0xff] %v349_v15  ;;  %634 = vst.msk [vmem:[%s1343_s2 + $0xd0] sm:$0xff] %vm609_vm1, %v512_v16  ;;  %v351_v17 = vpop.f32.mrb[26].mxu0  ;;  %v807_v18 = vpop.f32.mrb[26].mxu1 }
 0x118   :  { %647 = vst [vmem:[%s1343_s2 + $0x138] sm:$0xff] %v351_v17  ;;  %643 = vst.msk [vmem:[%s1343_s2 + $0x118] sm:$0xff] %vm609_vm1, %v807_v18  ;;  %v353_v19 = vpop.f32.mrb[27].mxu0  ;;  %v515_v20 = vpop.f32.mrb[27].mxu1 }
 0x119   :  { %648 = vst [vmem:[%s1343_s2 + $0x140] sm:$0xff] %v353_v19  ;;  %637 = vst.msk [vmem:[%s1343_s2 + $0xe8] sm:$0xff] %vm609_vm1, %v515_v20 }
 0x11d   :  { %v357_v21 = vpop.f32.mrb[28].mxu0  ;;  %v810_v22 = vpop.f32.mrb[28].mxu1 }
 0x11e   :  { %650 = vst [vmem:[%s1343_s2 + $0x150] sm:$0xff] %v357_v21  ;;  %652 = vst.msk [vmem:[%s1343_s2 + $0x160] sm:$0xff] %vm609_vm1, %v810_v22  ;;  %v359_v23 = vpop.f32.mrb[29].mxu0  ;;  %v528_v24 = vpop.f32.mrb[29].mxu1 }
 0x11f   :  { %651 = vst [vmem:[%s1343_s2 + $0x158] sm:$0xff] %v359_v23  ;;  %646 = vst.msk [vmem:[%s1343_s2 + $0x130] sm:$0xff] %vm609_vm1, %v528_v24  ;;  %v361_v25 = vpop.f32.mrb[30].mxu0  ;;  %v811_v26 = vpop.f32.mrb[30].mxu1 }
 0x120   :  { %653 = vst [vmem:[%s1343_s2 + $0x168] sm:$0xff] %v361_v25  ;;  %655 = vst.msk [vmem:[%s1343_s2 + $0x178] sm:$0xff] %vm609_vm1, %v811_v26  ;;  %v363_v27 = vpop.f32.mrb[31].mxu0  ;;  %v531_v28 = vpop.f32.mrb[31].mxu1 }
 0x121   :  { %654 = vst [vmem:[%s1343_s2 + $0x170] sm:$0xff] %v363_v27  ;;  %649 = vst.msk [vmem:[%s1343_s2 + $0x148] sm:$0xff] %vm609_vm1, %v531_v28 }
 0x125   :  { %v367_v29 = vpop.f32.mrb[32].mxu0  ;;  %v814_v30 = vpop.f32.mrb[32].mxu1 }
 0x126   :  { %656 = vst [vmem:[%s1343_s2 + $0x180] sm:$0xff] %v367_v29  ;;  %664 = vst.msk [vmem:[%s1343_s2 + $0x1c0] sm:$0xff] %vm609_vm1, %v814_v30  ;;  %v369_v31 = vpop.f32.mrb[33].mxu0  ;;  %v544_v32 = vpop.f32.mrb[33].mxu1 }
 0x127   :  { %657 = vst [vmem:[%s1343_s2 + $0x188] sm:$0xff] %v369_v31  ;;  %658 = vst.msk [vmem:[%s1343_s2 + $0x190] sm:$0xff] %vm609_vm1, %v544_v32  ;;  %v371_v33 = vpop.f32.mrb[34].mxu0  ;;  %v815_v34 = vpop.f32.mrb[34].mxu1 }
 0x128   :  { %659 = vst [vmem:[%s1343_s2 + $0x198] sm:$0xff] %v371_v33  ;;  %667 = vst.msk [vmem:[%s1343_s2 + $0x1d8] sm:$0xff] %vm609_vm1, %v815_v34  ;;  %v373_v35 = vpop.f32.mrb[35].mxu0  ;;  %v547_v36 = vpop.f32.mrb[35].mxu1 }
 0x129   :  { %660 = vst [vmem:[%s1343_s2 + $0x1a0] sm:$0xff] %v373_v35  ;;  %661 = vst.msk [vmem:[%s1343_s2 + $0x1a8] sm:$0xff] %vm609_vm1, %v547_v36 }
 0x12d   :  { %v377_v37 = vpop.f32.mrb[36].mxu0  ;;  %v818_v38 = vpop.f32.mrb[36].mxu1 }
 0x12e   :  { %662 = vst [vmem:[%s1343_s2 + $0x1b0] sm:$0xff] %v377_v37  ;;  %676 = vst.msk [vmem:[%s1343_s2 + $0x220] sm:$0xff] %vm609_vm1, %v818_v38  ;;  %v379_v39 = vpop.f32.mrb[37].mxu0  ;;  %v560_v40 = vpop.f32.mrb[37].mxu1 }
 0x12f   :  { %663 = vst [vmem:[%s1343_s2 + $0x1b8] sm:$0xff] %v379_v39  ;;  %670 = vst.msk [vmem:[%s1343_s2 + $0x1f0] sm:$0xff] %vm609_vm1, %v560_v40  ;;  %v381_v41 = vpop.f32.mrb[38].mxu0  ;;  %v819_v42 = vpop.f32.mrb[38].mxu1 }
 0x130   :  { %665 = vst [vmem:[%s1343_s2 + $0x1c8] sm:$0xff] %v381_v41  ;;  %679 = vst.msk [vmem:[%s1343_s2 + $0x238] sm:$0xff] %vm609_vm1, %v819_v42  ;;  %v383_v43 = vpop.f32.mrb[39].mxu0  ;;  %v563_v44 = vpop.f32.mrb[39].mxu1 }
 0x131   :  { %666 = vst [vmem:[%s1343_s2 + $0x1d0] sm:$0xff] %v383_v43  ;;  %673 = vst.msk [vmem:[%s1343_s2 + $0x208] sm:$0xff] %vm609_vm1, %v563_v44 }
 0x135   :  { %v387_v45 = vpop.f32.mrb[40].mxu0  ;;  %v822_v46 = vpop.f32.mrb[40].mxu1 }
 0x136   :  { %668 = vst [vmem:[%s1343_s2 + $0x1e0] sm:$0xff] %v387_v45  ;;  %688 = vst.msk [vmem:[%s1343_s2 + $0x280] sm:$0xff] %vm609_vm1, %v822_v46  ;;  %v389_v47 = vpop.f32.mrb[41].mxu0  ;;  %v576_v48 = vpop.f32.mrb[41].mxu1 }
 0x137   :  { %669 = vst [vmem:[%s1343_s2 + $0x1e8] sm:$0xff] %v389_v47  ;;  %682 = vst.msk [vmem:[%s1343_s2 + $0x250] sm:$0xff] %vm609_vm1, %v576_v48  ;;  %v391_v49 = vpop.f32.mrb[42].mxu0  ;;  %v823_v50 = vpop.f32.mrb[42].mxu1 }
 0x138   :  { %671 = vst [vmem:[%s1343_s2 + $0x1f8] sm:$0xff] %v391_v49  ;;  %691 = vst.msk [vmem:[%s1343_s2 + $0x298] sm:$0xff] %vm609_vm1, %v823_v50  ;;  %v393_v51 = vpop.f32.mrb[43].mxu0  ;;  %v579_v52 = vpop.f32.mrb[43].mxu1 }
 0x139   :  { %672 = vst [vmem:[%s1343_s2 + $0x200] sm:$0xff] %v393_v51  ;;  %685 = vst.msk [vmem:[%s1343_s2 + $0x268] sm:$0xff] %vm609_vm1, %v579_v52 }
 0x13d   :  { %v397_v53 = vpop.f32.mrb[44].mxu0  ;;  %v826_v54 = vpop.f32.mrb[44].mxu1 }
 0x13e   :  { %674 = vst [vmem:[%s1343_s2 + $0x210] sm:$0xff] %v397_v53  ;;  %700 = vst.msk [vmem:[%s1343_s2 + $0x2e0] sm:$0xff] %vm609_vm1, %v826_v54  ;;  %v399_v55 = vpop.f32.mrb[45].mxu0  ;;  %v592_v56 = vpop.f32.mrb[45].mxu1 }
 0x13f   :  { %675 = vst [vmem:[%s1343_s2 + $0x218] sm:$0xff] %v399_v55  ;;  %694 = vst.msk [vmem:[%s1343_s2 + $0x2b0] sm:$0xff] %vm609_vm1, %v592_v56  ;;  %v401_v57 = vpop.f32.mrb[46].mxu0  ;;  %v827_v58 = vpop.f32.mrb[46].mxu1 }
 0x140   :  { %677 = vst [vmem:[%s1343_s2 + $0x228] sm:$0xff] %v401_v57  ;;  %703 = vst.msk [vmem:[%s1343_s2 + $0x2f8] sm:$0xff] %vm609_vm1, %v827_v58  ;;  %v403_v59 = vpop.f32.mrb[47].mxu0  ;;  %v595_v60 = vpop.f32.mrb[47].mxu1 }
 0x141   :  { %678 = vst [vmem:[%s1343_s2 + $0x230] sm:$0xff] %v403_v59  ;;  %697 = vst.msk [vmem:[%s1343_s2 + $0x2c8] sm:$0xff] %vm609_vm1, %v595_v60 }

// kernel: run.10
= control target key start
LH: loop header
LB: loop body
LE: loop exit
PB: predicated region body
PF: predicated region fallthrough
CT: control target
= control target key end

     0   :  { %v587_v1 = vmov 0   ;;  %vm430_vm0 = vcmask 64512   ;;  %s939_s1 = inlined_call_operand.vmem [shape: bf16[128,136], index: 1, kind: input, shape index: {}]   ;;  %s940_s0 = inlined_call_operand.vmem [shape: bf16[256,128], index: 0, kind: input, shape index: {}]   ;;  %s941_s2 = inlined_call_operand.vmem [shape: f32[256,136], index: 2, kind: output, shape index: {}]  }
   0x1   :  { %v547_v0 = vld [vmem:[%s939_s1 + $0x4] ss:$8 sps:$4 sm:$0xff]   ;;  %268 = vmatprep.mubr.bf16.mxu0 %v587_v1  ;;  %348 = vmatprep.mubr.bf16.mxu1 %v587_v1  ;;  %v549_v2 = vld [vmem:[%s939_s1] ss:$8 sps:$4 sm:$0xff]   ;;  %v550_v3 = vld [vmem:[%s939_s1 + $0x14] ss:$8 sps:$4 sm:$0xff]  }
   0x2   :  { %236 = vmatprep.subr.bf16.mxu0 %v547_v0  ;;  %530 = vmatprep.subr.bf16.mxu1 %v547_v0  ;;  %v552_v4 = vld [vmem:[%s939_s1 + $0x10] ss:$8 sps:$4 sm:$0xff]   ;;  %v553_v5 = vld [vmem:[%s939_s1 + $0x24] ss:$8 sps:$4 sm:$0xff]   ;;  %v555_v6 = vld [vmem:[%s939_s1 + $0x20] ss:$8 sps:$4 sm:$0xff]  }
   0x3   :  { %237 = vmatpush1.bf16.msra.mxu0 %v549_v2  ;;  %538 = vmatpush1.bf16.msra.mxu1 %v549_v2  ;;  %v556_v7 = vld [vmem:[%s939_s1 + $0x34] ss:$8 sps:$4 sm:$0xff]   ;;  %v558_v8 = vld [vmem:[%s939_s1 + $0x30] ss:$8 sps:$4 sm:$0xff]   ;;  %v559_v9 = vld [vmem:[%s939_s1 + $0x44] ss:$8 sps:$4 sm:$0xff]  }
   0x4   :  { %238 = vmatprep.subr.bf16.mxu0 %v550_v3  ;;  %531 = vmatprep.subr.bf16.mxu1 %v550_v3  ;;  %v561_v10 = vld [vmem:[%s939_s1 + $0x40] ss:$8 sps:$4 sm:$0xff]   ;;  %v562_v11 = vld [vmem:[%s939_s1 + $0x54] ss:$8 sps:$4 sm:$0xff]   ;;  %v564_v12 = vld [vmem:[%s939_s1 + $0x50] ss:$8 sps:$4 sm:$0xff]  }
   0x5   :  { %v565_v13 = vld [vmem:[%s939_s1 + $0x64] ss:$8 sps:$4 sm:$0xff]   ;;  %v567_v14 = vld [vmem:[%s939_s1 + $0x60] ss:$8 sps:$4 sm:$0xff]   ;;  %v568_v15 = vld [vmem:[%s939_s1 + $0x74] ss:$8 sps:$4 sm:$0xff]  }
   0x6   :  { %v570_v16 = vld [vmem:[%s939_s1 + $0x70] ss:$8 sps:$4 sm:$0xff]   ;;  %v571_v17 = vld [vmem:[%s940_s0] sm:$0xff]   ;;  %v573_v19 = vld [vmem:[%s940_s0 + $0x8] sm:$0xff]  }
   0x7   :  { %239 = vmatpush1.bf16.msra.mxu0 %v552_v4  ;;  %539 = vmatpush1.bf16.msra.mxu1 %v552_v4  ;;  %v572_v18 = vld [vmem:[%s940_s0 + $0x40] sm:$0xff]   ;;  %v574_v20 = vld [vmem:[%s940_s0 + $0x48] sm:$0xff]   ;;  %v575_v21 = vld [vmem:[%s940_s0 + $0x10] sm:$0xff]  }
   0x8   :  { %240 = vmatprep.subr.bf16.mxu0 %v553_v5  ;;  %532 = vmatprep.subr.bf16.mxu1 %v553_v5  ;;  %v576_v22 = vld [vmem:[%s940_s0 + $0x50] sm:$0xff]   ;;  %v577_v23 = vld [vmem:[%s940_s0 + $0x18] sm:$0xff]   ;;  %v579_v25 = vld [vmem:[%s940_s0 + $0x20] sm:$0xff]  }
   0x9   :  { %v578_v24 = vld [vmem:[%s940_s0 + $0x58] sm:$0xff]   ;;  %v580_v26 = vld [vmem:[%s940_s0 + $0x60] sm:$0xff]   ;;  %v581_v27 = vld [vmem:[%s940_s0 + $0x28] sm:$0xff]  }
   0xa   :  { %v582_v28 = vld [vmem:[%s940_s0 + $0x68] sm:$0xff]   ;;  %v583_v29 = vld [vmem:[%s940_s0 + $0x30] sm:$0xff]   ;;  %v585_v31 = vld [vmem:[%s940_s0 + $0x38] sm:$0xff]  }
   0xb   :  { %241 = vmatpush1.bf16.msra.mxu0 %v555_v6  ;;  %540 = vmatpush1.bf16.msra.mxu1 %v555_v6  ;;  %v584_v30 = vld [vmem:[%s940_s0 + $0x70] sm:$0xff]   ;;  %v586_v32 = vld [vmem:[%s940_s0 + $0x78] sm:$0xff]  }
   0xc   :  { %242 = vmatprep.subr.bf16.mxu0 %v556_v7  ;;  %533 = vmatprep.subr.bf16.mxu1 %v556_v7 }
   0xf   :  { %243 = vmatpush1.bf16.msra.mxu0 %v558_v8  ;;  %541 = vmatpush1.bf16.msra.mxu1 %v558_v8 }
  0x10   :  { %244 = vmatprep.subr.bf16.mxu0 %v559_v9  ;;  %534 = vmatprep.subr.bf16.mxu1 %v559_v9 }
  0x13   :  { %245 = vmatpush1.bf16.msra.mxu0 %v561_v10  ;;  %542 = vmatpush1.bf16.msra.mxu1 %v561_v10 }
  0x14   :  { %246 = vmatprep.subr.bf16.mxu0 %v562_v11  ;;  %535 = vmatprep.subr.bf16.mxu1 %v562_v11 }
  0x17   :  { %247 = vmatpush1.bf16.msra.mxu0 %v564_v12  ;;  %543 = vmatpush1.bf16.msra.mxu1 %v564_v12 }
  0x18   :  { %248 = vmatprep.subr.bf16.mxu0 %v565_v13  ;;  %536 = vmatprep.subr.bf16.mxu1 %v565_v13 }
  0x1b   :  { %249 = vmatpush1.bf16.msra.mxu0 %v567_v14  ;;  %544 = vmatpush1.bf16.msra.mxu1 %v567_v14 }
  0x1c   :  { %250 = vmatprep.subr.bf16.mxu0 %v568_v15  ;;  %537 = vmatprep.subr.bf16.mxu1 %v568_v15 }
  0x1f   :  { %251 = vmatpush1.bf16.msra.mxu0 %v570_v16  ;;  %545 = vmatpush1.bf16.msra.mxu1 %v570_v16 }
  0x22   :  { %269 = vmatmul.mubr.bf16.vlgmr.msra.gmra.mrb[0].mxu0 %v571_v17  ;;  %349 = vmatmul.mubr.bf16.vlgmr.msra.gmra.mrb[0].mxu1 %v572_v18 }
  0x23   :  { %278 = vmatprep.mubr.bf16.mxu0 %v587_v1  ;;  %358 = vmatprep.mubr.bf16.mxu1 %v587_v1 }
  0x2a   :  { %279 = vmatmul.mubr.bf16.gmra.mrb[4].mxu0 %v573_v19  ;;  %359 = vmatmul.mubr.bf16.gmra.mrb[4].mxu1 %v574_v20 }
  0x2b   :  { %288 = vmatprep.mubr.bf16.mxu0 %v587_v1  ;;  %368 = vmatprep.mubr.bf16.mxu1 %v587_v1 }
  0x32   :  { %289 = vmatmul.mubr.bf16.gmra.mrb[8].mxu0 %v575_v21  ;;  %369 = vmatmul.mubr.bf16.gmra.mrb[8].mxu1 %v576_v22 }
  0x33   :  { %298 = vmatprep.mubr.bf16.mxu0 %v587_v1  ;;  %378 = vmatprep.mubr.bf16.mxu1 %v587_v1 }
  0x3a   :  { %299 = vmatmul.mubr.bf16.gmra.mrb[12].mxu0 %v577_v23  ;;  %379 = vmatmul.mubr.bf16.gmra.mrb[12].mxu1 %v578_v24 }
  0x3b   :  { %308 = vmatprep.mubr.bf16.mxu0 %v587_v1  ;;  %388 = vmatprep.mubr.bf16.mxu1 %v587_v1 }
  0x42   :  { %309 = vmatmul.mubr.bf16.gmra.mrb[16].mxu0 %v579_v25  ;;  %389 = vmatmul.mubr.bf16.gmra.mrb[16].mxu1 %v580_v26 }
  0x43   :  { %318 = vmatprep.mubr.bf16.mxu0 %v587_v1  ;;  %398 = vmatprep.mubr.bf16.mxu1 %v587_v1 }
  0x4a   :  { %319 = vmatmul.mubr.bf16.gmra.mrb[20].mxu0 %v581_v27  ;;  %399 = vmatmul.mubr.bf16.gmra.mrb[20].mxu1 %v582_v28 }
  0x4b   :  { %328 = vmatprep.mubr.bf16.mxu0 %v587_v1  ;;  %408 = vmatprep.mubr.bf16.mxu1 %v587_v1 }
  0x52   :  { %329 = vmatmul.mubr.bf16.gmra.mrb[24].mxu0 %v583_v29  ;;  %409 = vmatmul.mubr.bf16.gmra.mrb[24].mxu1 %v584_v30 }
  0x53   :  { %338 = vmatprep.mubr.bf16.mxu0 %v587_v1  ;;  %418 = vmatprep.mubr.bf16.mxu1 %v587_v1 }
  0x5a   :  { %339 = vmatmul.mubr.bf16.gmra.mrb[28].mxu0 %v585_v31  ;;  %419 = vmatmul.mubr.bf16.gmra.mrb[28].mxu1 %v586_v32 }
  0xf5   :  { %v270_v33 = vpop.f32.mrb[0].mxu0  ;;  %v350_v34 = vpop.f32.mrb[0].mxu1 }
  0xf6   :  { %429 = vst [vmem:[%s941_s2] sm:$0xff] %v270_v33  ;;  %462 = vst [vmem:[%s941_s2 + $0x100] sm:$0xff] %v350_v34  ;;  %v272_v35 = vpop.f32.mrb[1].mxu0  ;;  %v352_v36 = vpop.f32.mrb[1].mxu1 }
  0xf7   :  { %431 = vst.msk [vmem:[%s941_s2 + $0x8] sm:$0xff] %vm430_vm0, %v272_v35  ;;  %463 = vst.msk [vmem:[%s941_s2 + $0x108] sm:$0xff] %vm430_vm0, %v352_v36  ;;  %v274_v37 = vpop.f32.mrb[2].mxu0  ;;  %v354_v38 = vpop.f32.mrb[2].mxu1 }
  0xf8   :  { %432 = vst [vmem:[%s941_s2 + $0x10] sm:$0xff] %v274_v37  ;;  %464 = vst [vmem:[%s941_s2 + $0x110] sm:$0xff] %v354_v38  ;;  %v276_v39 = vpop.f32.mrb[3].mxu0  ;;  %v356_v40 = vpop.f32.mrb[3].mxu1 }
  0xf9   :  { %433 = vst.msk [vmem:[%s941_s2 + $0x18] sm:$0xff] %vm430_vm0, %v276_v39  ;;  %465 = vst.msk [vmem:[%s941_s2 + $0x118] sm:$0xff] %vm430_vm0, %v356_v40 }
  0xfd   :  { %v280_v41 = vpop.f32.mrb[4].mxu0  ;;  %v360_v42 = vpop.f32.mrb[4].mxu1 }
  0xfe   :  { %434 = vst [vmem:[%s941_s2 + $0x20] sm:$0xff] %v280_v41  ;;  %466 = vst [vmem:[%s941_s2 + $0x120] sm:$0xff] %v360_v42  ;;  %v282_v43 = vpop.f32.mrb[5].mxu0  ;;  %v362_v44 = vpop.f32.mrb[5].mxu1 }
  0xff   :  { %435 = vst.msk [vmem:[%s941_s2 + $0x28] sm:$0xff] %vm430_vm0, %v282_v43  ;;  %467 = vst.msk [vmem:[%s941_s2 + $0x128] sm:$0xff] %vm430_vm0, %v362_v44  ;;  %v284_v45 = vpop.f32.mrb[6].mxu0  ;;  %v364_v46 = vpop.f32.mrb[6].mxu1 }
 0x100   :  { %436 = vst [vmem:[%s941_s2 + $0x30] sm:$0xff] %v284_v45  ;;  %468 = vst [vmem:[%s941_s2 + $0x130] sm:$0xff] %v364_v46  ;;  %v286_v47 = vpop.f32.mrb[7].mxu0  ;;  %v366_v48 = vpop.f32.mrb[7].mxu1 }
 0x101   :  { %437 = vst.msk [vmem:[%s941_s2 + $0x38] sm:$0xff] %vm430_vm0, %v286_v47  ;;  %469 = vst.msk [vmem:[%s941_s2 + $0x138] sm:$0xff] %vm430_vm0, %v366_v48 }
 0x105   :  { %v290_v49 = vpop.f32.mrb[8].mxu0  ;;  %v370_v50 = vpop.f32.mrb[8].mxu1 }
 0x106   :  { %438 = vst [vmem:[%s941_s2 + $0x40] sm:$0xff] %v290_v49  ;;  %470 = vst [vmem:[%s941_s2 + $0x140] sm:$0xff] %v370_v50  ;;  %v292_v51 = vpop.f32.mrb[9].mxu0  ;;  %v372_v52 = vpop.f32.mrb[9].mxu1 }
 0x107   :  { %439 = vst.msk [vmem:[%s941_s2 + $0x48] sm:$0xff] %vm430_vm0, %v292_v51  ;;  %471 = vst.msk [vmem:[%s941_s2 + $0x148] sm:$0xff] %vm430_vm0, %v372_v52  ;;  %v294_v53 = vpop.f32.mrb[10].mxu0  ;;  %v374_v54 = vpop.f32.mrb[10].mxu1 }
 0x108   :  { %440 = vst [vmem:[%s941_s2 + $0x50] sm:$0xff] %v294_v53  ;;  %472 = vst [vmem:[%s941_s2 + $0x150] sm:$0xff] %v374_v54  ;;  %v296_v55 = vpop.f32.mrb[11].mxu0  ;;  %v376_v56 = vpop.f32.mrb[11].mxu1 }
 0x109   :  { %441 = vst.msk [vmem:[%s941_s2 + $0x58] sm:$0xff] %vm430_vm0, %v296_v55  ;;  %473 = vst.msk [vmem:[%s941_s2 + $0x158] sm:$0xff] %vm430_vm0, %v376_v56 }
 0x10d   :  { %v300_v57 = vpop.f32.mrb[12].mxu0  ;;  %v380_v58 = vpop.f32.mrb[12].mxu1 }
 0x10e   :  { %442 = vst [vmem:[%s941_s2 + $0x60] sm:$0xff] %v300_v57  ;;  %474 = vst [vmem:[%s941_s2 + $0x160] sm:$0xff] %v380_v58  ;;  %v302_v59 = vpop.f32.mrb[13].mxu0  ;;  %v382_v60 = vpop.f32.mrb[13].mxu1 }
 0x10f   :  { %443 = vst.msk [vmem:[%s941_s2 + $0x68] sm:$0xff] %vm430_vm0, %v302_v59  ;;  %475 = vst.msk [vmem:[%s941_s2 + $0x168] sm:$0xff] %vm430_vm0, %v382_v60  ;;  %v304_v61 = vpop.f32.mrb[14].mxu0  ;;  %v384_v62 = vpop.f32.mrb[14].mxu1 }
 0x110   :  { %444 = vst [vmem:[%s941_s2 + $0x70] sm:$0xff] %v304_v61  ;;  %476 = vst [vmem:[%s941_s2 + $0x170] sm:$0xff] %v384_v62  ;;  %v306_v63 = vpop.f32.mrb[15].mxu0  ;;  %v386_v0 = vpop.f32.mrb[15].mxu1 }
 0x111   :  { %445 = vst.msk [vmem:[%s941_s2 + $0x78] sm:$0xff] %vm430_vm0, %v306_v63  ;;  %477 = vst.msk [vmem:[%s941_s2 + $0x178] sm:$0xff] %vm430_vm0, %v386_v0 }
 0x115   :  { %v310_v1 = vpop.f32.mrb[16].mxu0  ;;  %v390_v2 = vpop.f32.mrb[16].mxu1 }
 0x116   :  { %446 = vst [vmem:[%s941_s2 + $0x80] sm:$0xff] %v310_v1  ;;  %478 = vst [vmem:[%s941_s2 + $0x180] sm:$0xff] %v390_v2  ;;  %v312_v3 = vpop.f32.mrb[17].mxu0  ;;  %v392_v4 = vpop.f32.mrb[17].mxu1 }
 0x117   :  { %447 = vst.msk [vmem:[%s941_s2 + $0x88] sm:$0xff] %vm430_vm0, %v312_v3  ;;  %479 = vst.msk [vmem:[%s941_s2 + $0x188] sm:$0xff] %vm430_vm0, %v392_v4  ;;  %v314_v5 = vpop.f32.mrb[18].mxu0  ;;  %v394_v6 = vpop.f32.mrb[18].mxu1 }
 0x118   :  { %448 = vst [vmem:[%s941_s2 + $0x90] sm:$0xff] %v314_v5  ;;  %480 = vst [vmem:[%s941_s2 + $0x190] sm:$0xff] %v394_v6  ;;  %v316_v7 = vpop.f32.mrb[19].mxu0  ;;  %v396_v8 = vpop.f32.mrb[19].mxu1 }
 0x119   :  { %449 = vst.msk [vmem:[%s941_s2 + $0x98] sm:$0xff] %vm430_vm0, %v316_v7  ;;  %481 = vst.msk [vmem:[%s941_s2 + $0x198] sm:$0xff] %vm430_vm0, %v396_v8 }
 0x11d   :  { %v320_v9 = vpop.f32.mrb[20].mxu0  ;;  %v400_v10 = vpop.f32.mrb[20].mxu1 }
 0x11e   :  { %450 = vst [vmem:[%s941_s2 + $0xa0] sm:$0xff] %v320_v9  ;;  %482 = vst [vmem:[%s941_s2 + $0x1a0] sm:$0xff] %v400_v10  ;;  %v322_v11 = vpop.f32.mrb[21].mxu0  ;;  %v402_v12 = vpop.f32.mrb[21].mxu1 }
 0x11f   :  { %451 = vst.msk [vmem:[%s941_s2 + $0xa8] sm:$0xff] %vm430_vm0, %v322_v11  ;;  %483 = vst.msk [vmem:[%s941_s2 + $0x1a8] sm:$0xff] %vm430_vm0, %v402_v12  ;;  %v324_v13 = vpop.f32.mrb[22].mxu0  ;;  %v404_v14 = vpop.f32.mrb[22].mxu1 }
 0x120   :  { %452 = vst [vmem:[%s941_s2 + $0xb0] sm:$0xff] %v324_v13  ;;  %484 = vst [vmem:[%s941_s2 + $0x1b0] sm:$0xff] %v404_v14  ;;  %v326_v15 = vpop.f32.mrb[23].mxu0  ;;  %v406_v16 = vpop.f32.mrb[23].mxu1 }
 0x121   :  { %453 = vst.msk [vmem:[%s941_s2 + $0xb8] sm:$0xff] %vm430_vm0, %v326_v15  ;;  %485 = vst.msk [vmem:[%s941_s2 + $0x1b8] sm:$0xff] %vm430_vm0, %v406_v16 }
 0x125   :  { %v330_v17 = vpop.f32.mrb[24].mxu0  ;;  %v410_v18 = vpop.f32.mrb[24].mxu1 }
 0x126   :  { %454 = vst [vmem:[%s941_s2 + $0xc0] sm:$0xff] %v330_v17  ;;  %486 = vst [vmem:[%s941_s2 + $0x1c0] sm:$0xff] %v410_v18  ;;  %v332_v19 = vpop.f32.mrb[25].mxu0  ;;  %v412_v20 = vpop.f32.mrb[25].mxu1 }
 0x127   :  { %455 = vst.msk [vmem:[%s941_s2 + $0xc8] sm:$0xff] %vm430_vm0, %v332_v19  ;;  %487 = vst.msk [vmem:[%s941_s2 + $0x1c8] sm:$0xff] %vm430_vm0, %v412_v20  ;;  %v334_v21 = vpop.f32.mrb[26].mxu0  ;;  %v414_v22 = vpop.f32.mrb[26].mxu1 }
 0x128   :  { %456 = vst [vmem:[%s941_s2 + $0xd0] sm:$0xff] %v334_v21  ;;  %488 = vst [vmem:[%s941_s2 + $0x1d0] sm:$0xff] %v414_v22  ;;  %v336_v23 = vpop.f32.mrb[27].mxu0  ;;  %v416_v24 = vpop.f32.mrb[27].mxu1 }
 0x129   :  { %457 = vst.msk [vmem:[%s941_s2 + $0xd8] sm:$0xff] %vm430_vm0, %v336_v23  ;;  %489 = vst.msk [vmem:[%s941_s2 + $0x1d8] sm:$0xff] %vm430_vm0, %v416_v24 }
 0x12d   :  { %v340_v25 = vpop.f32.mrb[28].mxu0  ;;  %v420_v26 = vpop.f32.mrb[28].mxu1 }
 0x12e   :  { %458 = vst [vmem:[%s941_s2 + $0xe0] sm:$0xff] %v340_v25  ;;  %490 = vst [vmem:[%s941_s2 + $0x1e0] sm:$0xff] %v420_v26  ;;  %v342_v27 = vpop.f32.mrb[29].mxu0  ;;  %v422_v28 = vpop.f32.mrb[29].mxu1 }
 0x12f   :  { %459 = vst.msk [vmem:[%s941_s2 + $0xe8] sm:$0xff] %vm430_vm0, %v342_v27  ;;  %491 = vst.msk [vmem:[%s941_s2 + $0x1e8] sm:$0xff] %vm430_vm0, %v422_v28  ;;  %v344_v29 = vpop.f32.mrb[30].mxu0  ;;  %v424_v30 = vpop.f32.mrb[30].mxu1 }
 0x130   :  { %460 = vst [vmem:[%s941_s2 + $0xf0] sm:$0xff] %v344_v29  ;;  %492 = vst [vmem:[%s941_s2 + $0x1f0] sm:$0xff] %v424_v30  ;;  %v346_v31 = vpop.f32.mrb[31].mxu0  ;;  %v426_v32 = vpop.f32.mrb[31].mxu1 }
 0x131   :  { %461 = vst.msk [vmem:[%s941_s2 + $0xf8] sm:$0xff] %vm430_vm0, %v346_v31  ;;  %493 = vst.msk [vmem:[%s941_s2 + $0x1f8] sm:$0xff] %vm430_vm0, %v426_v32 }

// kernel: run.14
= control target key start
LH: loop header
LB: loop body
LE: loop exit
PB: predicated region body
PF: predicated region fallthrough
CT: control target
= control target key end

     0   :  { %vm365_vm0 = vcmask 539648   ;;  %s753_s1 = inlined_call_operand.vmem [shape: bf16[128,66], index: 1, kind: input, shape index: {}]   ;;  %s754_s0 = inlined_call_operand.vmem [shape: bf16[256,128], index: 0, kind: input, shape index: {}]   ;;  %s755_s2 = inlined_call_operand.vmem [shape: f32[256,66], index: 2, kind: output, shape index: {}]  }
   0x1   :  { %v514_v0 = vld [vmem:[%s753_s1] sm:$0xff]   ;;  %v515_v1 = vld [vmem:[%s753_s1 + $0x8] sm:$0xff]   ;;  %v516_v2 = vld [vmem:[%s753_s1 + $0x10] sm:$0xff]  }
   0x2   :  { %450 = vmatprep.subr.bf16.mxu0 %v514_v0  ;;  %498 = vmatprep.subr.bf16.mxu1 %v514_v0  ;;  %v517_v3 = vld [vmem:[%s753_s1 + $0x18] sm:$0xff]   ;;  %v522_v4 = vld [vmem:[%s754_s0] sm:$0xff]   ;;  %v519_v7 = vld [vmem:[%s753_s1 + $0x28] sm:$0xff]  }
   0x3   :  { %451 = vmatpush3.bf16.msra.mxu0 %v514_v0  ;;  %506 = vmatpush3.bf16.msra.mxu1 %v514_v0  ;;  %v523_v5 = vld [vmem:[%s754_s0 + $0x40] sm:$0xff]   ;;  %v520_v8 = vld [vmem:[%s753_s1 + $0x30] sm:$0xff]   ;;  %v521_v9 = vld [vmem:[%s753_s1 + $0x38] sm:$0xff]  }
   0x4   :  { %452 = vmatprep.subr.bf16.mxu0 %v515_v1  ;;  %499 = vmatprep.subr.bf16.mxu1 %v515_v1  ;;  %v518_v6 = vld [vmem:[%s753_s1 + $0x20] sm:$0xff]   ;;  %v524_v10 = vld [vmem:[%s754_s0 + $0x8] sm:$0xff]   ;;  %v526_v12 = vld [vmem:[%s754_s0 + $0x10] sm:$0xff]  }
   0x5   :  { %466 = vmatprep.mubr.bf16.mxu0 %v522_v4  ;;  %482 = vmatprep.mubr.bf16.mxu1 %v523_v5  ;;  %v525_v11 = vld [vmem:[%s754_s0 + $0x48] sm:$0xff]   ;;  %v527_v13 = vld [vmem:[%s754_s0 + $0x50] sm:$0xff]   ;;  %v528_v14 = vld [vmem:[%s754_s0 + $0x18] sm:$0xff]  }
   0x6   :  { %v529_v15 = vld [vmem:[%s754_s0 + $0x58] sm:$0xff]   ;;  %v530_v16 = vld [vmem:[%s754_s0 + $0x20] sm:$0xff]   ;;  %v532_v18 = vld [vmem:[%s754_s0 + $0x28] sm:$0xff]  }
   0x7   :  { %453 = vmatpush3.bf16.msra.mxu0 %v515_v1  ;;  %507 = vmatpush3.bf16.msra.mxu1 %v515_v1  ;;  %v531_v17 = vld [vmem:[%s754_s0 + $0x60] sm:$0xff]   ;;  %v533_v19 = vld [vmem:[%s754_s0 + $0x68] sm:$0xff]   ;;  %v534_v20 = vld [vmem:[%s754_s0 + $0x30] sm:$0xff]  }
   0x8   :  { %454 = vmatprep.subr.bf16.mxu0 %v516_v2  ;;  %500 = vmatprep.subr.bf16.mxu1 %v516_v2  ;;  %v535_v21 = vld [vmem:[%s754_s0 + $0x70] sm:$0xff]   ;;  %v536_v22 = vld [vmem:[%s754_s0 + $0x38] sm:$0xff]  }
   0x9   :  { %v537_v23 = vld [vmem:[%s754_s0 + $0x78] sm:$0xff]  }
   0xb   :  { %455 = vmatpush3.bf16.msra.mxu0 %v516_v2  ;;  %508 = vmatpush3.bf16.msra.mxu1 %v516_v2 }
   0xc   :  { %456 = vmatprep.subr.bf16.mxu0 %v517_v3  ;;  %501 = vmatprep.subr.bf16.mxu1 %v517_v3 }
   0xf   :  { %457 = vmatpush3.bf16.msra.mxu0 %v517_v3  ;;  %509 = vmatpush3.bf16.msra.mxu1 %v517_v3 }
  0x10   :  { %458 = vmatprep.subr.bf16.mxu0 %v518_v6  ;;  %502 = vmatprep.subr.bf16.mxu1 %v518_v6 }
  0x13   :  { %459 = vmatpush3.bf16.msra.mxu0 %v518_v6  ;;  %510 = vmatpush3.bf16.msra.mxu1 %v518_v6 }
  0x14   :  { %460 = vmatprep.subr.bf16.mxu0 %v519_v7  ;;  %503 = vmatprep.subr.bf16.mxu1 %v519_v7 }
  0x17   :  { %461 = vmatpush3.bf16.msra.mxu0 %v519_v7  ;;  %511 = vmatpush3.bf16.msra.mxu1 %v519_v7 }
  0x18   :  { %462 = vmatprep.subr.bf16.mxu0 %v520_v8  ;;  %504 = vmatprep.subr.bf16.mxu1 %v520_v8 }
  0x1b   :  { %463 = vmatpush3.bf16.msra.mxu0 %v520_v8  ;;  %512 = vmatpush3.bf16.msra.mxu1 %v520_v8 }
  0x1c   :  { %464 = vmatprep.subr.bf16.mxu0 %v521_v9  ;;  %505 = vmatprep.subr.bf16.mxu1 %v521_v9 }
  0x1f   :  { %465 = vmatpush3.bf16.msra.mxu0 %v521_v9  ;;  %513 = vmatpush3.bf16.msra.mxu1 %v521_v9 }
  0x22   :  { %467 = vmatmul.mubr.bf16.vlgmr.msra.gmra.mrb[0].mxu0 %v524_v10  ;;  %483 = vmatmul.mubr.bf16.vlgmr.msra.gmra.mrb[0].mxu1 %v525_v11 }
  0x23   :  { %470 = vmatprep.mubr.bf16.mxu0 %v526_v12  ;;  %486 = vmatprep.mubr.bf16.mxu1 %v527_v13 }
  0x2a   :  { %471 = vmatmul.mubr.bf16.gmra.mrb[4].mxu0 %v528_v14  ;;  %487 = vmatmul.mubr.bf16.gmra.mrb[4].mxu1 %v529_v15 }
  0x2b   :  { %474 = vmatprep.mubr.bf16.mxu0 %v530_v16  ;;  %490 = vmatprep.mubr.bf16.mxu1 %v531_v17 }
  0x32   :  { %475 = vmatmul.mubr.bf16.gmra.mrb[8].mxu0 %v532_v18  ;;  %491 = vmatmul.mubr.bf16.gmra.mrb[8].mxu1 %v533_v19 }
  0x33   :  { %478 = vmatprep.mubr.bf16.mxu0 %v534_v20  ;;  %494 = vmatprep.mubr.bf16.mxu1 %v535_v21 }
  0x3a   :  { %479 = vmatmul.mubr.bf16.gmra.mrb[12].mxu0 %v536_v22  ;;  %495 = vmatmul.mubr.bf16.gmra.mrb[12].mxu1 %v537_v23 }
  0xf5   :  { %v468_v24 = vpop.f32.mrb[0].mxu0  ;;  %v484_v25 = vpop.f32.mrb[0].mxu1 }
  0xf6   :  { %368 = vst.msk [vmem:[%s755_s2 + $0x10] sm:$0xff] %vm365_vm0, %v468_v24  ;;  %384 = vst.msk [vmem:[%s755_s2 + $0x90] sm:$0xff] %vm365_vm0, %v484_v25  ;;  %v238_v26 = vpop.f32.mrb[1].mxu0  ;;  %v302_v27 = vpop.f32.mrb[1].mxu1 }
  0xf7   :  { %366 = vst.msk [vmem:[%s755_s2] sm:$0xff] %vm365_vm0, %v238_v26  ;;  %382 = vst.msk [vmem:[%s755_s2 + $0x80] sm:$0xff] %vm365_vm0, %v302_v27  ;;  %v469_v28 = vpop.f32.mrb[2].mxu0  ;;  %v485_v29 = vpop.f32.mrb[2].mxu1 }
  0xf8   :  { %369 = vst.msk [vmem:[%s755_s2 + $0x18] sm:$0xff] %vm365_vm0, %v469_v28  ;;  %385 = vst.msk [vmem:[%s755_s2 + $0x98] sm:$0xff] %vm365_vm0, %v485_v29  ;;  %v241_v30 = vpop.f32.mrb[3].mxu0  ;;  %v305_v31 = vpop.f32.mrb[3].mxu1 }
  0xf9   :  { %367 = vst.msk [vmem:[%s755_s2 + $0x8] sm:$0xff] %vm365_vm0, %v241_v30  ;;  %383 = vst.msk [vmem:[%s755_s2 + $0x88] sm:$0xff] %vm365_vm0, %v305_v31 }
  0xfd   :  { %v472_v32 = vpop.f32.mrb[4].mxu0  ;;  %v488_v33 = vpop.f32.mrb[4].mxu1 }
  0xfe   :  { %372 = vst.msk [vmem:[%s755_s2 + $0x30] sm:$0xff] %vm365_vm0, %v472_v32  ;;  %388 = vst.msk [vmem:[%s755_s2 + $0xb0] sm:$0xff] %vm365_vm0, %v488_v33  ;;  %v254_v34 = vpop.f32.mrb[5].mxu0  ;;  %v318_v35 = vpop.f32.mrb[5].mxu1 }
  0xff   :  { %370 = vst.msk [vmem:[%s755_s2 + $0x20] sm:$0xff] %vm365_vm0, %v254_v34  ;;  %386 = vst.msk [vmem:[%s755_s2 + $0xa0] sm:$0xff] %vm365_vm0, %v318_v35  ;;  %v473_v36 = vpop.f32.mrb[6].mxu0  ;;  %v489_v37 = vpop.f32.mrb[6].mxu1 }
 0x100   :  { %373 = vst.msk [vmem:[%s755_s2 + $0x38] sm:$0xff] %vm365_vm0, %v473_v36  ;;  %389 = vst.msk [vmem:[%s755_s2 + $0xb8] sm:$0xff] %vm365_vm0, %v489_v37  ;;  %v257_v38 = vpop.f32.mrb[7].mxu0  ;;  %v321_v39 = vpop.f32.mrb[7].mxu1 }
 0x101   :  { %371 = vst.msk [vmem:[%s755_s2 + $0x28] sm:$0xff] %vm365_vm0, %v257_v38  ;;  %387 = vst.msk [vmem:[%s755_s2 + $0xa8] sm:$0xff] %vm365_vm0, %v321_v39 }
 0x105   :  { %v476_v40 = vpop.f32.mrb[8].mxu0  ;;  %v492_v41 = vpop.f32.mrb[8].mxu1 }
 0x106   :  { %376 = vst.msk [vmem:[%s755_s2 + $0x50] sm:$0xff] %vm365_vm0, %v476_v40  ;;  %392 = vst.msk [vmem:[%s755_s2 + $0xd0] sm:$0xff] %vm365_vm0, %v492_v41  ;;  %v270_v42 = vpop.f32.mrb[9].mxu0  ;;  %v334_v43 = vpop.f32.mrb[9].mxu1 }
 0x107   :  { %374 = vst.msk [vmem:[%s755_s2 + $0x40] sm:$0xff] %vm365_vm0, %v270_v42  ;;  %390 = vst.msk [vmem:[%s755_s2 + $0xc0] sm:$0xff] %vm365_vm0, %v334_v43  ;;  %v477_v44 = vpop.f32.mrb[10].mxu0  ;;  %v493_v45 = vpop.f32.mrb[10].mxu1 }
 0x108   :  { %377 = vst.msk [vmem:[%s755_s2 + $0x58] sm:$0xff] %vm365_vm0, %v477_v44  ;;  %393 = vst.msk [vmem:[%s755_s2 + $0xd8] sm:$0xff] %vm365_vm0, %v493_v45  ;;  %v273_v46 = vpop.f32.mrb[11].mxu0  ;;  %v337_v47 = vpop.f32.mrb[11].mxu1 }
 0x109   :  { %375 = vst.msk [vmem:[%s755_s2 + $0x48] sm:$0xff] %vm365_vm0, %v273_v46  ;;  %391 = vst.msk [vmem:[%s755_s2 + $0xc8] sm:$0xff] %vm365_vm0, %v337_v47 }
 0x10d   :  { %v480_v48 = vpop.f32.mrb[12].mxu0  ;;  %v496_v49 = vpop.f32.mrb[12].mxu1 }
 0x10e   :  { %380 = vst.msk [vmem:[%s755_s2 + $0x70] sm:$0xff] %vm365_vm0, %v480_v48  ;;  %396 = vst.msk [vmem:[%s755_s2 + $0xf0] sm:$0xff] %vm365_vm0, %v496_v49  ;;  %v286_v50 = vpop.f32.mrb[13].mxu0  ;;  %v350_v51 = vpop.f32.mrb[13].mxu1 }
 0x10f   :  { %378 = vst.msk [vmem:[%s755_s2 + $0x60] sm:$0xff] %vm365_vm0, %v286_v50  ;;  %394 = vst.msk [vmem:[%s755_s2 + $0xe0] sm:$0xff] %vm365_vm0, %v350_v51  ;;  %v481_v52 = vpop.f32.mrb[14].mxu0  ;;  %v497_v53 = vpop.f32.mrb[14].mxu1 }
 0x110   :  { %381 = vst.msk [vmem:[%s755_s2 + $0x78] sm:$0xff] %vm365_vm0, %v481_v52  ;;  %397 = vst.msk [vmem:[%s755_s2 + $0xf8] sm:$0xff] %vm365_vm0, %v497_v53  ;;  %v289_v54 = vpop.f32.mrb[15].mxu0  ;;  %v353_v55 = vpop.f32.mrb[15].mxu1 }
 0x111   :  { %379 = vst.msk [vmem:[%s755_s2 + $0x68] sm:$0xff] %vm365_vm0, %v289_v54  ;;  %395 = vst.msk [vmem:[%s755_s2 + $0xe8] sm:$0xff] %vm365_vm0, %v353_v55 }

// kernel: run.9
= control target key start
LH: loop header
LB: loop body
LE: loop exit
PB: predicated region body
PF: predicated region fallthrough
CT: control target
= control target key end

     0   :  { %s5930_s18 = smov 0   ;;  %s5932_s19 = smov 0   ;;  %s8702_s0 = inlined_call_operand.vmem [shape: f32[4,256], index: 0, kind: input, shape index: {}]   ;;  %s8703_s1 = inlined_call_operand.vmem [shape: f32[256,4], index: 1, kind: input, shape index: {}]   ;;  %s8704_s2 = inlined_call_operand.vmem [shape: bf16[256,128], index: 2, kind: input, shape index: {}]   ;;  %s8705_s3 = inlined_call_operand.vmem [shape: s8[256,256], index: 3, kind: input, shape index: {}]   ;;  %s8706_s4 = inlined_call_operand.vmem [shape: f32[256,128], index: 4, kind: input, shape index: {}]   ;;  %s8707_s5 = inlined_call_operand.vmem [shape: f32[256,128], index: 5, kind: output, shape index: {}]  }
   0x1   :  { %s5934_s20 = smov 0   ;;  %s5936_s21 = smov 0  }
   0x2   :  { %s5938_s22 = smov 0   ;;  %s5940_s23 = smov 0  }
   0x3   :  { %s5942_s24 = smov 0  }
   0x4 LB: > { %s24_s25 = sadd.s32 1, %s5877_s22  ;;  %s27_s26 = sadd.s32 1, %s5881_s23  ;;  %s5885_s24 = sphi %s5942_s24, %s15_s24   ;;  %s5881_s23 = sphi %s5940_s23, %s9264_s23   ;;  %s5877_s22 = sphi %s5938_s22, %s9263_s22   ;;  %s5873_s21 = sphi %s5936_s21, %s9262_s21   ;;  %s5869_s20 = sphi %s5934_s20, %s9261_s20   ;;  %s5865_s19 = sphi %s5932_s19, %s9260_s19   ;;  %s5861_s18 = sphi %s5930_s18, %s9259_s18  }
   0x5   : > { %p25_p0 = scmp.ge.s32.totalorder %s24_s25, 2  ;;  %p121_p1 = scmp.ne.s32.totalorder %s5865_s19, %s5861_s18 }
   0x6   : > { %p122_p2 = scmp.eq.s32.totalorder %s5885_s24, 0  ;;  %s114_s30 = sadd.s32 1, %s5865_s19 }
   0x7   : > { %s9266_s25 = smov (%p25_p0, %s24_s25), 0  ;;  %s9268_s26 = smov (!%p25_p0, %s27_s26), %s5881_s23 }
   0x8   : > { %p123_p3 = por %p122_p2, %p121_p1  ;;  %p29_p4 = scmp.ge.s32.totalorder %s9268_s26, 2 }
   0x9   : > { %s110_s27 = ssub.s32 %s5877_s22, %s9266_s25  ;;  %p5064_p6 = scmp.ge.s32.totalorder %s5885_s24, 4 }
   0xa   : > { %s9270_s26 = smov (%p29_p4, %s9268_s26), 0 }
   0xb   : > { %s109_s28 = ssub.s32 %s5881_s23, %s9270_s26  ;;  %199 = sbr.rel (%p5064_p6) target bundleno = 26 (0x1a), region = 16 }
   0xc   : > { %s111_s29 = sor.u32 %s110_s27, %s109_s28 }
   0xd   : > { %p112_p5 = scmp.eq.s32.totalorder %s111_s29, 0 }
   0xf   : > { %s5981_s6 = scalar_select %p112_p5, %s5865_s19, %s114_s30  }
  0x12   : > { %227 = sbr.rel (!%p123_p3) target bundleno = 26 (0x1a), region = 32  ;;  %s229_s7 = sand.u32 (%p123_p3), 1, %s5865_s19  }
  0x13   : > { %s5120_s8 = sshll.u32 (%p123_p3), %s5881_s23, 3  ;;  %s5065_s9 = sshll.u32 (%p123_p3), %s229_s7, 5 }
  0x14   : > { %s234_s10 = sadd.s32 (%p123_p3), %s5877_s22, %s5120_s8  ;;  %s231_s15 = scalar_lea.vmem (%p123_p3), [#allocation5], %s5065_s9 }
  0x15   : > { %s5068_s11 = sshll.u32 (%p123_p3), %s234_s10, 3 }
  0x16   : > { %s236_s14 = scalar_lea.vmem (%p123_p3), %s8705_s3, %s5068_s11 }
  0x17   : > { %v270_v0 = vld [vmem:[%s236_s14] sm:$0xff] (%p123_p3)  ;;  %v272_v1 = vld [vmem:[%s236_s14 + $0x10] sm:$0xff] (%p123_p3) }
  0x18   : > { %v274_v2 = vld [vmem:[%s236_s14 + $0x20] sm:$0xff] (%p123_p3)  ;;  %271 = vst [vmem:[%s231_s15] sm:$0xff] (%p123_p3), %v270_v0  ;;  %273 = vst [vmem:[%s231_s15 + $0x8] sm:$0xff] (%p123_p3), %v272_v1  ;;  %v276_v3 = vld [vmem:[%s236_s14 + $0x30] sm:$0xff] (%p123_p3) }
  0x19   : > { %275 = vst [vmem:[%s231_s15 + $0x10] sm:$0xff] %v274_v2  ;;  %277 = vst [vmem:[%s231_s15 + $0x18] sm:$0xff] %v276_v3 }
  0x1a PF: > { %p5069_p7 = scmp.ge.s32.totalorder %s5885_s24, 1  ;;  %p291_p8 = scmp.lt.s32.totalorder %s5885_s24, 5 }
  0x1c   : > { %p292_p9 = pnand %p5069_p7, %p291_p8 }
  0x1e   : > { %295 = sbr.rel (%p292_p9) target bundleno = 2234 (0x8ba), region = 74 }
  0x25   : > { %s298_s16 = sand.u32 1, %s5861_s18   ;;  %p344_p10 = scmp.lt.s32.totalorder %s5869_s20, 1 }
  0x26   : > { %s5070_s17 = sshll.u32 %s298_s16, 5  ;;  %s5072_s27 = sshll.u32 %s5873_s21, 4 }
  0x27   : > { %p349_p11 = scmp.lt.s32.totalorder %s5072_s27, 31  ;;  %s5074_s30 = sshll.u32 %s5869_s20, 4 }
  0x28   : > { %s345_s28 = scalar_select %p344_p10, %s5869_s20, 1 }
  0x29   : > { %s9272_s27 = smov (!%p349_p11, %s5072_s27), 31  ;;  %p355_p12 = scmp.lt.s32.totalorder %s5074_s30, 31 }
  0x2a   : > { %s5071_s29 = sshll.u32 %s345_s28, 2  ;;  %s5073_s10 = sshll.u32 %s9272_s27, 3 }
  0x2b   : > { %s6000_s9 = scalar_lea.vmem %s8702_s0, %s5071_s29  ;;  %s6005_s13 = scalar_lea.vmem %s8703_s1, %s5073_s10 }
  0x2c   : > { %s6010_s21 = scalar_lea.vmem %s8706_s4, %s5073_s10  ;;  %s6015_s28 = scalar_lea.vmem %s8707_s5, %s5073_s10 }
  0x2d   : > { %s9274_s30 = smov (!%p355_p12, %s5074_s30), 31  ;;  %s6022_s11 = scalar_lea.vmem [#allocation5], %s5070_s17 }
  0x2e   : > { %s5075_s29 = sshll.u32 %s9274_s30, 2  ;;  %p5080_p13 = scmp.ne.s32.totalorder %s5869_s20, 0 }
  0x2f   : > { %s6020_s8 = scalar_lea.vmem %s8704_s2, %s5075_s29  ;;  %vm379_vm0 = vcmask (!%p5080_p13), 7168   ;;  %vm508_vm1 = vcmask (!%p5080_p13), 261120   ;;  %v5887_v4 = vmov (!%p5080_p13), -1e+30   ;;  %v5888_v5 = vmov (!%p5080_p13), 0.0  }
  0x30   : > { %378 = sbr.rel (%p5080_p13) target bundleno = 144 (0x90), region = 82  ;;  %380 = vst.msk [vmem:[#allocation2] sm:$0xff] (!%p5080_p13), %vm379_vm0, %v5887_v4  ;;  %381 = vst.msk [vmem:[#allocation2 + $0x8] sm:$0xff] (!%p5080_p13), %vm379_vm0, %v5887_v4 }
  0x31   : > { %382 = vst.msk [vmem:[#allocation2 + $0x10] sm:$0xff] (!%p5080_p13), %vm379_vm0, %v5887_v4  ;;  %383 = vst.msk [vmem:[#allocation2 + $0x18] sm:$0xff] (!%p5080_p13), %vm379_vm0, %v5887_v4 }
  0x32   : > { %384 = vst.msk [vmem:[#allocation2 + $0x20] sm:$0xff] (!%p5080_p13), %vm379_vm0, %v5887_v4  ;;  %385 = vst.msk [vmem:[#allocation2 + $0x28] sm:$0xff] (!%p5080_p13), %vm379_vm0, %v5887_v4 }
  0x33   : > { %386 = vst.msk [vmem:[#allocation2 + $0x30] sm:$0xff] (!%p5080_p13), %vm379_vm0, %v5887_v4  ;;  %387 = vst.msk [vmem:[#allocation2 + $0x38] sm:$0xff] (!%p5080_p13), %vm379_vm0, %v5887_v4 }
  0x34   : > { %388 = vst.msk [vmem:[#allocation2 + $0x40] sm:$0xff] (!%p5080_p13), %vm379_vm0, %v5887_v4  ;;  %389 = vst.msk [vmem:[#allocation2 + $0x48] sm:$0xff] (!%p5080_p13), %vm379_vm0, %v5887_v4 }
  0x35   : > { %390 = vst.msk [vmem:[#allocation2 + $0x50] sm:$0xff] (!%p5080_p13), %vm379_vm0, %v5887_v4  ;;  %391 = vst.msk [vmem:[#allocation2 + $0x58] sm:$0xff] (!%p5080_p13), %vm379_vm0, %v5887_v4 }
  0x36   : > { %392 = vst.msk [vmem:[#allocation2 + $0x60] sm:$0xff] (!%p5080_p13), %vm379_vm0, %v5887_v4  ;;  %393 = vst.msk [vmem:[#allocation2 + $0x68] sm:$0xff] (!%p5080_p13), %vm379_vm0, %v5887_v4 }
  0x37   : > { %394 = vst.msk [vmem:[#allocation2 + $0x70] sm:$0xff] %vm379_vm0, %v5887_v4  ;;  %395 = vst.msk [vmem:[#allocation2 + $0x78] sm:$0xff] %vm379_vm0, %v5887_v4 }
  0x38   : > { %396 = vst.msk [vmem:[#allocation2 + $0x80] sm:$0xff] %vm379_vm0, %v5887_v4  ;;  %397 = vst.msk [vmem:[#allocation2 + $0x88] sm:$0xff] %vm379_vm0, %v5887_v4 }
  0x39   : > { %398 = vst.msk [vmem:[#allocation2 + $0x90] sm:$0xff] %vm379_vm0, %v5887_v4  ;;  %399 = vst.msk [vmem:[#allocation2 + $0x98] sm:$0xff] %vm379_vm0, %v5887_v4 }
  0x3a   : > { %400 = vst.msk [vmem:[#allocation2 + $0xa0] sm:$0xff] %vm379_vm0, %v5887_v4  ;;  %401 = vst.msk [vmem:[#allocation2 + $0xa8] sm:$0xff] %vm379_vm0, %v5887_v4 }
  0x3b   : > { %402 = vst.msk [vmem:[#allocation2 + $0xb0] sm:$0xff] %vm379_vm0, %v5887_v4  ;;  %403 = vst.msk [vmem:[#allocation2 + $0xb8] sm:$0xff] %vm379_vm0, %v5887_v4 }
  0x3c   : > { %404 = vst.msk [vmem:[#allocation2 + $0xc0] sm:$0xff] %vm379_vm0, %v5887_v4  ;;  %405 = vst.msk [vmem:[#allocation2 + $0xc8] sm:$0xff] %vm379_vm0, %v5887_v4 }
  0x3d   : > { %406 = vst.msk [vmem:[#allocation2 + $0xd0] sm:$0xff] %vm379_vm0, %v5887_v4  ;;  %407 = vst.msk [vmem:[#allocation2 + $0xd8] sm:$0xff] %vm379_vm0, %v5887_v4 }
  0x3e   : > { %408 = vst.msk [vmem:[#allocation2 + $0xe0] sm:$0xff] %vm379_vm0, %v5887_v4  ;;  %409 = vst.msk [vmem:[#allocation2 + $0xe8] sm:$0xff] %vm379_vm0, %v5887_v4 }
  0x3f   : > { %410 = vst.msk [vmem:[#allocation2 + $0xf0] sm:$0xff] %vm379_vm0, %v5887_v4  ;;  %411 = vst.msk [vmem:[#allocation2 + $0xf8] sm:$0xff] %vm379_vm0, %v5887_v4 }
  0x40   : > { %412 = vst.msk [vmem:[#allocation2 + $0x100] sm:$0xff] %vm379_vm0, %v5887_v4  ;;  %413 = vst.msk [vmem:[#allocation2 + $0x108] sm:$0xff] %vm379_vm0, %v5887_v4 }
  0x41   : > { %414 = vst.msk [vmem:[#allocation2 + $0x110] sm:$0xff] %vm379_vm0, %v5887_v4  ;;  %415 = vst.msk [vmem:[#allocation2 + $0x118] sm:$0xff] %vm379_vm0, %v5887_v4 }
  0x42   : > { %416 = vst.msk [vmem:[#allocation2 + $0x120] sm:$0xff] %vm379_vm0, %v5887_v4  ;;  %417 = vst.msk [vmem:[#allocation2 + $0x128] sm:$0xff] %vm379_vm0, %v5887_v4 }
  0x43   : > { %418 = vst.msk [vmem:[#allocation2 + $0x130] sm:$0xff] %vm379_vm0, %v5887_v4  ;;  %419 = vst.msk [vmem:[#allocation2 + $0x138] sm:$0xff] %vm379_vm0, %v5887_v4 }
  0x44   : > { %420 = vst.msk [vmem:[#allocation2 + $0x140] sm:$0xff] %vm379_vm0, %v5887_v4  ;;  %421 = vst.msk [vmem:[#allocation2 + $0x148] sm:$0xff] %vm379_vm0, %v5887_v4 }
  0x45   : > { %422 = vst.msk [vmem:[#allocation2 + $0x150] sm:$0xff] %vm379_vm0, %v5887_v4  ;;  %423 = vst.msk [vmem:[#allocation2 + $0x158] sm:$0xff] %vm379_vm0, %v5887_v4 }
  0x46   : > { %424 = vst.msk [vmem:[#allocation2 + $0x160] sm:$0xff] %vm379_vm0, %v5887_v4  ;;  %425 = vst.msk [vmem:[#allocation2 + $0x168] sm:$0xff] %vm379_vm0, %v5887_v4 }
  0x47   : > { %426 = vst.msk [vmem:[#allocation2 + $0x170] sm:$0xff] %vm379_vm0, %v5887_v4  ;;  %427 = vst.msk [vmem:[#allocation2 + $0x178] sm:$0xff] %vm379_vm0, %v5887_v4 }
  0x48   : > { %428 = vst.msk [vmem:[#allocation2 + $0x180] sm:$0xff] %vm379_vm0, %v5887_v4  ;;  %429 = vst.msk [vmem:[#allocation2 + $0x188] sm:$0xff] %vm379_vm0, %v5887_v4 }
  0x49   : > { %430 = vst.msk [vmem:[#allocation2 + $0x190] sm:$0xff] %vm379_vm0, %v5887_v4  ;;  %431 = vst.msk [vmem:[#allocation2 + $0x198] sm:$0xff] %vm379_vm0, %v5887_v4 }
  0x4a   : > { %432 = vst.msk [vmem:[#allocation2 + $0x1a0] sm:$0xff] %vm379_vm0, %v5887_v4  ;;  %433 = vst.msk [vmem:[#allocation2 + $0x1a8] sm:$0xff] %vm379_vm0, %v5887_v4 }
  0x4b   : > { %434 = vst.msk [vmem:[#allocation2 + $0x1b0] sm:$0xff] %vm379_vm0, %v5887_v4  ;;  %435 = vst.msk [vmem:[#allocation2 + $0x1b8] sm:$0xff] %vm379_vm0, %v5887_v4 }
  0x4c   : > { %436 = vst.msk [vmem:[#allocation2 + $0x1c0] sm:$0xff] %vm379_vm0, %v5887_v4  ;;  %437 = vst.msk [vmem:[#allocation2 + $0x1c8] sm:$0xff] %vm379_vm0, %v5887_v4 }
  0x4d   : > { %438 = vst.msk [vmem:[#allocation2 + $0x1d0] sm:$0xff] %vm379_vm0, %v5887_v4  ;;  %439 = vst.msk [vmem:[#allocation2 + $0x1d8] sm:$0xff] %vm379_vm0, %v5887_v4 }
  0x4e   : > { %440 = vst.msk [vmem:[#allocation2 + $0x1e0] sm:$0xff] %vm379_vm0, %v5887_v4  ;;  %441 = vst.msk [vmem:[#allocation2 + $0x1e8] sm:$0xff] %vm379_vm0, %v5887_v4 }
  0x4f   : > { %442 = vst.msk [vmem:[#allocation2 + $0x1f0] sm:$0xff] %vm379_vm0, %v5887_v4  ;;  %443 = vst.msk [vmem:[#allocation2 + $0x1f8] sm:$0xff] %vm379_vm0, %v5887_v4 }
  0x50   : > { %444 = vst.msk [vmem:[#allocation3] sm:$0xff] %vm379_vm0, %v5888_v5  ;;  %445 = vst.msk [vmem:[#allocation3 + $0x8] sm:$0xff] %vm379_vm0, %v5888_v5 }
  0x51   : > { %446 = vst.msk [vmem:[#allocation3 + $0x10] sm:$0xff] %vm379_vm0, %v5888_v5  ;;  %447 = vst.msk [vmem:[#allocation3 + $0x18] sm:$0xff] %vm379_vm0, %v5888_v5 }
  0x52   : > { %448 = vst.msk [vmem:[#allocation3 + $0x20] sm:$0xff] %vm379_vm0, %v5888_v5  ;;  %449 = vst.msk [vmem:[#allocation3 + $0x28] sm:$0xff] %vm379_vm0, %v5888_v5 }
  0x53   : > { %450 = vst.msk [vmem:[#allocation3 + $0x30] sm:$0xff] %vm379_vm0, %v5888_v5  ;;  %451 = vst.msk [vmem:[#allocation3 + $0x38] sm:$0xff] %vm379_vm0, %v5888_v5 }
  0x54   : > { %452 = vst.msk [vmem:[#allocation3 + $0x40] sm:$0xff] %vm379_vm0, %v5888_v5  ;;  %453 = vst.msk [vmem:[#allocation3 + $0x48] sm:$0xff] %vm379_vm0, %v5888_v5 }
  0x55   : > { %454 = vst.msk [vmem:[#allocation3 + $0x50] sm:$0xff] %vm379_vm0, %v5888_v5  ;;  %455 = vst.msk [vmem:[#allocation3 + $0x58] sm:$0xff] %vm379_vm0, %v5888_v5 }
  0x56   : > { %456 = vst.msk [vmem:[#allocation3 + $0x60] sm:$0xff] %vm379_vm0, %v5888_v5  ;;  %457 = vst.msk [vmem:[#allocation3 + $0x68] sm:$0xff] %vm379_vm0, %v5888_v5 }
  0x57   : > { %458 = vst.msk [vmem:[#allocation3 + $0x70] sm:$0xff] %vm379_vm0, %v5888_v5  ;;  %459 = vst.msk [vmem:[#allocation3 + $0x78] sm:$0xff] %vm379_vm0, %v5888_v5 }
  0x58   : > { %460 = vst.msk [vmem:[#allocation3 + $0x80] sm:$0xff] %vm379_vm0, %v5888_v5  ;;  %461 = vst.msk [vmem:[#allocation3 + $0x88] sm:$0xff] %vm379_vm0, %v5888_v5 }
  0x59   : > { %462 = vst.msk [vmem:[#allocation3 + $0x90] sm:$0xff] %vm379_vm0, %v5888_v5  ;;  %463 = vst.msk [vmem:[#allocation3 + $0x98] sm:$0xff] %vm379_vm0, %v5888_v5 }
  0x5a   : > { %464 = vst.msk [vmem:[#allocation3 + $0xa0] sm:$0xff] %vm379_vm0, %v5888_v5  ;;  %465 = vst.msk [vmem:[#allocation3 + $0xa8] sm:$0xff] %vm379_vm0, %v5888_v5 }
  0x5b   : > { %466 = vst.msk [vmem:[#allocation3 + $0xb0] sm:$0xff] %vm379_vm0, %v5888_v5  ;;  %467 = vst.msk [vmem:[#allocation3 + $0xb8] sm:$0xff] %vm379_vm0, %v5888_v5 }
  0x5c   : > { %468 = vst.msk [vmem:[#allocation3 + $0xc0] sm:$0xff] %vm379_vm0, %v5888_v5  ;;  %469 = vst.msk [vmem:[#allocation3 + $0xc8] sm:$0xff] %vm379_vm0, %v5888_v5 }
  0x5d   : > { %470 = vst.msk [vmem:[#allocation3 + $0xd0] sm:$0xff] %vm379_vm0, %v5888_v5  ;;  %471 = vst.msk [vmem:[#allocation3 + $0xd8] sm:$0xff] %vm379_vm0, %v5888_v5 }
  0x5e   : > { %472 = vst.msk [vmem:[#allocation3 + $0xe0] sm:$0xff] %vm379_vm0, %v5888_v5  ;;  %473 = vst.msk [vmem:[#allocation3 + $0xe8] sm:$0xff] %vm379_vm0, %v5888_v5 }
  0x5f   : > { %474 = vst.msk [vmem:[#allocation3 + $0xf0] sm:$0xff] %vm379_vm0, %v5888_v5  ;;  %475 = vst.msk [vmem:[#allocation3 + $0xf8] sm:$0xff] %vm379_vm0, %v5888_v5 }
  0x60   : > { %476 = vst.msk [vmem:[#allocation3 + $0x100] sm:$0xff] %vm379_vm0, %v5888_v5  ;;  %477 = vst.msk [vmem:[#allocation3 + $0x108] sm:$0xff] %vm379_vm0, %v5888_v5 }
  0x61   : > { %478 = vst.msk [vmem:[#allocation3 + $0x110] sm:$0xff] %vm379_vm0, %v5888_v5  ;;  %479 = vst.msk [vmem:[#allocation3 + $0x118] sm:$0xff] %vm379_vm0, %v5888_v5 }
  0x62   : > { %480 = vst.msk [vmem:[#allocation3 + $0x120] sm:$0xff] %vm379_vm0, %v5888_v5  ;;  %481 = vst.msk [vmem:[#allocation3 + $0x128] sm:$0xff] %vm379_vm0, %v5888_v5 }
  0x63   : > { %482 = vst.msk [vmem:[#allocation3 + $0x130] sm:$0xff] %vm379_vm0, %v5888_v5  ;;  %483 = vst.msk [vmem:[#allocation3 + $0x138] sm:$0xff] %vm379_vm0, %v5888_v5 }
  0x64   : > { %484 = vst.msk [vmem:[#allocation3 + $0x140] sm:$0xff] %vm379_vm0, %v5888_v5  ;;  %485 = vst.msk [vmem:[#allocation3 + $0x148] sm:$0xff] %vm379_vm0, %v5888_v5 }
  0x65   : > { %486 = vst.msk [vmem:[#allocation3 + $0x150] sm:$0xff] %vm379_vm0, %v5888_v5  ;;  %487 = vst.msk [vmem:[#allocation3 + $0x158] sm:$0xff] %vm379_vm0, %v5888_v5 }
  0x66   : > { %488 = vst.msk [vmem:[#allocation3 + $0x160] sm:$0xff] %vm379_vm0, %v5888_v5  ;;  %489 = vst.msk [vmem:[#allocation3 + $0x168] sm:$0xff] %vm379_vm0, %v5888_v5 }
  0x67   : > { %490 = vst.msk [vmem:[#allocation3 + $0x170] sm:$0xff] %vm379_vm0, %v5888_v5  ;;  %491 = vst.msk [vmem:[#allocation3 + $0x178] sm:$0xff] %vm379_vm0, %v5888_v5 }
  0x68   : > { %492 = vst.msk [vmem:[#allocation3 + $0x180] sm:$0xff] %vm379_vm0, %v5888_v5  ;;  %493 = vst.msk [vmem:[#allocation3 + $0x188] sm:$0xff] %vm379_vm0, %v5888_v5 }
  0x69   : > { %494 = vst.msk [vmem:[#allocation3 + $0x190] sm:$0xff] %vm379_vm0, %v5888_v5  ;;  %495 = vst.msk [vmem:[#allocation3 + $0x198] sm:$0xff] %vm379_vm0, %v5888_v5 }
  0x6a   : > { %496 = vst.msk [vmem:[#allocation3 + $0x1a0] sm:$0xff] %vm379_vm0, %v5888_v5  ;;  %497 = vst.msk [vmem:[#allocation3 + $0x1a8] sm:$0xff] %vm379_vm0, %v5888_v5 }
  0x6b   : > { %498 = vst.msk [vmem:[#allocation3 + $0x1b0] sm:$0xff] %vm379_vm0, %v5888_v5  ;;  %499 = vst.msk [vmem:[#allocation3 + $0x1b8] sm:$0xff] %vm379_vm0, %v5888_v5 }
  0x6c   : > { %500 = vst.msk [vmem:[#allocation3 + $0x1c0] sm:$0xff] %vm379_vm0, %v5888_v5  ;;  %501 = vst.msk [vmem:[#allocation3 + $0x1c8] sm:$0xff] %vm379_vm0, %v5888_v5 }
  0x6d   : > { %502 = vst.msk [vmem:[#allocation3 + $0x1d0] sm:$0xff] %vm379_vm0, %v5888_v5  ;;  %503 = vst.msk [vmem:[#allocation3 + $0x1d8] sm:$0xff] %vm379_vm0, %v5888_v5 }
  0x6e   : > { %504 = vst.msk [vmem:[#allocation3 + $0x1e0] sm:$0xff] %vm379_vm0, %v5888_v5  ;;  %505 = vst.msk [vmem:[#allocation3 + $0x1e8] sm:$0xff] %vm379_vm0, %v5888_v5 }
  0x6f   : > { %506 = vst.msk [vmem:[#allocation3 + $0x1f0] sm:$0xff] %vm379_vm0, %v5888_v5  ;;  %507 = vst.msk [vmem:[#allocation3 + $0x1f8] sm:$0xff] %vm379_vm0, %v5888_v5 }
  0x70   : > { %509 = vst.msk [vmem:[#allocation4] sm:$0xff] %vm508_vm1, %v5888_v5  ;;  %510 = vst.msk [vmem:[#allocation4 + $0x8] sm:$0xff] %vm508_vm1, %v5888_v5 }
  0x71   : > { %511 = vst.msk [vmem:[#allocation4 + $0x10] sm:$0xff] %vm508_vm1, %v5888_v5  ;;  %512 = vst.msk [vmem:[#allocation4 + $0x18] sm:$0xff] %vm508_vm1, %v5888_v5 }
  0x72   : > { %513 = vst.msk [vmem:[#allocation4 + $0x20] sm:$0xff] %vm508_vm1, %v5888_v5  ;;  %514 = vst.msk [vmem:[#allocation4 + $0x28] sm:$0xff] %vm508_vm1, %v5888_v5 }
  0x73   : > { %515 = vst.msk [vmem:[#allocation4 + $0x30] sm:$0xff] %vm508_vm1, %v5888_v5  ;;  %516 = vst.msk [vmem:[#allocation4 + $0x38] sm:$0xff] %vm508_vm1, %v5888_v5 }
  0x74   : > { %517 = vst.msk [vmem:[#allocation4 + $0x40] sm:$0xff] %vm508_vm1, %v5888_v5  ;;  %518 = vst.msk [vmem:[#allocation4 + $0x48] sm:$0xff] %vm508_vm1, %v5888_v5 }
  0x75   : > { %519 = vst.msk [vmem:[#allocation4 + $0x50] sm:$0xff] %vm508_vm1, %v5888_v5  ;;  %520 = vst.msk [vmem:[#allocation4 + $0x58] sm:$0xff] %vm508_vm1, %v5888_v5 }
  0x76   : > { %521 = vst.msk [vmem:[#allocation4 + $0x60] sm:$0xff] %vm508_vm1, %v5888_v5  ;;  %522 = vst.msk [vmem:[#allocation4 + $0x68] sm:$0xff] %vm508_vm1, %v5888_v5 }
  0x77   : > { %523 = vst.msk [vmem:[#allocation4 + $0x70] sm:$0xff] %vm508_vm1, %v5888_v5  ;;  %524 = vst.msk [vmem:[#allocation4 + $0x78] sm:$0xff] %vm508_vm1, %v5888_v5 }
  0x78   : > { %525 = vst.msk [vmem:[#allocation4 + $0x80] sm:$0xff] %vm508_vm1, %v5888_v5  ;;  %526 = vst.msk [vmem:[#allocation4 + $0x88] sm:$0xff] %vm508_vm1, %v5888_v5 }
  0x79   : > { %527 = vst.msk [vmem:[#allocation4 + $0x90] sm:$0xff] %vm508_vm1, %v5888_v5  ;;  %528 = vst.msk [vmem:[#allocation4 + $0x98] sm:$0xff] %vm508_vm1, %v5888_v5 }
  0x7a   : > { %529 = vst.msk [vmem:[#allocation4 + $0xa0] sm:$0xff] %vm508_vm1, %v5888_v5  ;;  %530 = vst.msk [vmem:[#allocation4 + $0xa8] sm:$0xff] %vm508_vm1, %v5888_v5 }
  0x7b   : > { %531 = vst.msk [vmem:[#allocation4 + $0xb0] sm:$0xff] %vm508_vm1, %v5888_v5  ;;  %532 = vst.msk [vmem:[#allocation4 + $0xb8] sm:$0xff] %vm508_vm1, %v5888_v5 }
  0x7c   : > { %533 = vst.msk [vmem:[#allocation4 + $0xc0] sm:$0xff] %vm508_vm1, %v5888_v5  ;;  %534 = vst.msk [vmem:[#allocation4 + $0xc8] sm:$0xff] %vm508_vm1, %v5888_v5 }
  0x7d   : > { %535 = vst.msk [vmem:[#allocation4 + $0xd0] sm:$0xff] %vm508_vm1, %v5888_v5  ;;  %536 = vst.msk [vmem:[#allocation4 + $0xd8] sm:$0xff] %vm508_vm1, %v5888_v5 }
  0x7e   : > { %537 = vst.msk [vmem:[#allocation4 + $0xe0] sm:$0xff] %vm508_vm1, %v5888_v5  ;;  %538 = vst.msk [vmem:[#allocation4 + $0xe8] sm:$0xff] %vm508_vm1, %v5888_v5 }
  0x7f   : > { %539 = vst.msk [vmem:[#allocation4 + $0xf0] sm:$0xff] %vm508_vm1, %v5888_v5  ;;  %540 = vst.msk [vmem:[#allocation4 + $0xf8] sm:$0xff] %vm508_vm1, %v5888_v5 }
  0x80   : > { %541 = vst.msk [vmem:[#allocation4 + $0x100] sm:$0xff] %vm508_vm1, %v5888_v5  ;;  %542 = vst.msk [vmem:[#allocation4 + $0x108] sm:$0xff] %vm508_vm1, %v5888_v5 }
  0x81   : > { %543 = vst.msk [vmem:[#allocation4 + $0x110] sm:$0xff] %vm508_vm1, %v5888_v5  ;;  %544 = vst.msk [vmem:[#allocation4 + $0x118] sm:$0xff] %vm508_vm1, %v5888_v5 }
  0x82   : > { %545 = vst.msk [vmem:[#allocation4 + $0x120] sm:$0xff] %vm508_vm1, %v5888_v5  ;;  %546 = vst.msk [vmem:[#allocation4 + $0x128] sm:$0xff] %vm508_vm1, %v5888_v5 }
  0x83   : > { %547 = vst.msk [vmem:[#allocation4 + $0x130] sm:$0xff] %vm508_vm1, %v5888_v5  ;;  %548 = vst.msk [vmem:[#allocation4 + $0x138] sm:$0xff] %vm508_vm1, %v5888_v5 }
  0x84   : > { %549 = vst.msk [vmem:[#allocation4 + $0x140] sm:$0xff] %vm508_vm1, %v5888_v5  ;;  %550 = vst.msk [vmem:[#allocation4 + $0x148] sm:$0xff] %vm508_vm1, %v5888_v5 }
  0x85   : > { %551 = vst.msk [vmem:[#allocation4 + $0x150] sm:$0xff] %vm508_vm1, %v5888_v5  ;;  %552 = vst.msk [vmem:[#allocation4 + $0x158] sm:$0xff] %vm508_vm1, %v5888_v5 }
  0x86   : > { %553 = vst.msk [vmem:[#allocation4 + $0x160] sm:$0xff] %vm508_vm1, %v5888_v5  ;;  %554 = vst.msk [vmem:[#allocation4 + $0x168] sm:$0xff] %vm508_vm1, %v5888_v5 }
  0x87   : > { %555 = vst.msk [vmem:[#allocation4 + $0x170] sm:$0xff] %vm508_vm1, %v5888_v5  ;;  %556 = vst.msk [vmem:[#allocation4 + $0x178] sm:$0xff] %vm508_vm1, %v5888_v5 }
  0x88   : > { %557 = vst.msk [vmem:[#allocation4 + $0x180] sm:$0xff] %vm508_vm1, %v5888_v5  ;;  %558 = vst.msk [vmem:[#allocation4 + $0x188] sm:$0xff] %vm508_vm1, %v5888_v5 }
  0x89   : > { %559 = vst.msk [vmem:[#allocation4 + $0x190] sm:$0xff] %vm508_vm1, %v5888_v5  ;;  %560 = vst.msk [vmem:[#allocation4 + $0x198] sm:$0xff] %vm508_vm1, %v5888_v5 }
  0x8a   : > { %561 = vst.msk [vmem:[#allocation4 + $0x1a0] sm:$0xff] %vm508_vm1, %v5888_v5  ;;  %562 = vst.msk [vmem:[#allocation4 + $0x1a8] sm:$0xff] %vm508_vm1, %v5888_v5 }
  0x8b   : > { %563 = vst.msk [vmem:[#allocation4 + $0x1b0] sm:$0xff] %vm508_vm1, %v5888_v5  ;;  %564 = vst.msk [vmem:[#allocation4 + $0x1b8] sm:$0xff] %vm508_vm1, %v5888_v5 }
  0x8c   : > { %565 = vst.msk [vmem:[#allocation4 + $0x1c0] sm:$0xff] %vm508_vm1, %v5888_v5  ;;  %566 = vst.msk [vmem:[#allocation4 + $0x1c8] sm:$0xff] %vm508_vm1, %v5888_v5 }
  0x8d   : > { %567 = vst.msk [vmem:[#allocation4 + $0x1d0] sm:$0xff] %vm508_vm1, %v5888_v5  ;;  %568 = vst.msk [vmem:[#allocation4 + $0x1d8] sm:$0xff] %vm508_vm1, %v5888_v5 }
  0x8e   : > { %569 = vst.msk [vmem:[#allocation4 + $0x1e0] sm:$0xff] %vm508_vm1, %v5888_v5  ;;  %570 = vst.msk [vmem:[#allocation4 + $0x1e8] sm:$0xff] %vm508_vm1, %v5888_v5 }
  0x8f   : > { %571 = vst.msk [vmem:[#allocation4 + $0x1f0] sm:$0xff] %vm508_vm1, %v5888_v5  ;;  %572 = vst.msk [vmem:[#allocation4 + $0x1f8] sm:$0xff] %vm508_vm1, %v5888_v5 }
  0x90 PF: > { %v641_v6 = vld [vmem:[%s6005_s13] sm:$0xff]  ;;  %v643_v7 = vld [vmem:[%s6005_s13 + $0x10] sm:$0xff]  ;;  %v5889_v8 = vmov 1   ;;  %v8708_v9 = vmov 0   ;;  %v644_v10 = vld [vmem:[%s6005_s13 + $0x18] sm:$0xff]  ;;  %vm1439_vm2 = vcmask 7168  }
  0x91   : > { %5383 = vset.pattern.permute.xlu0 %v5889_v8  ;;  %5382 = vset.pattern.permute.xlu1 %v8708_v9  ;;  %v646_v11 = vld [vmem:[%s6005_s13 + $0x28] sm:$0xff]  ;;  %v648_v12 = vld [vmem:[%s6005_s13 + $0x38] sm:$0xff]  ;;  %v645_v18 = vld [vmem:[%s6005_s13 + $0x20] sm:$0xff]  ;;  %s5892_s17 = smov 96   ;;  %vm1472_vm3 = vcmask 261120   ;;  %s5894_s30 = smov 64  }
  0x92   : > { %1495 = vperm.xlu0 %5383, %v641_v6   ;;  %674 = vperm.xlu1 %5382, %v643_v7   ;;  %v650_v13 = vld [vmem:[%s6005_s13 + $0x48] sm:$0xff]  ;;  %v652_v14 = vld [vmem:[%s6005_s13 + $0x58] sm:$0xff]  ;;  %v647_v19 = vld [vmem:[%s6005_s13 + $0x30] sm:$0xff]  ;;  %p5117_p0 = scmp.ne.s32.totalorder %s5869_s20, 1 }
  0x93   : > { %v654_v15 = vld [vmem:[%s6005_s13 + $0x68] sm:$0xff]  ;;  %v656_v16 = vld [vmem:[%s6005_s13 + $0x78] sm:$0xff]  ;;  %v649_v20 = vld [vmem:[%s6005_s13 + $0x40] sm:$0xff]  ;;  %s5897_s20 = smov (!%p5117_p0), 32   ;;  %s5898_s10 = smov (!%p5117_p0), 64   ;;  %vm4839_vm4 = vcmask (!%p5117_p0), 523264  }
  0x94   : > { %v642_v17 = vld [vmem:[%s6005_s13 + $0x8] sm:$0xff]  ;;  %v651_v21 = vld [vmem:[%s6005_s13 + $0x50] sm:$0xff]  ;;  %v653_v22 = vld [vmem:[%s6005_s13 + $0x60] sm:$0xff]  ;;  %s5899_s12 = smov (!%p5117_p0), 96   ;;  %vm4856_vm5 = vcmask (!%p5117_p0), 785408  }
  0x95   : > { %v655_v23 = vld [vmem:[%s6005_s13 + $0x70] sm:$0xff]  ;;  %v573_v34 = vld [vmem:[%s6022_s11] sm:$0xff]  ;;  %v574_v43 = vld [vmem:[%s6022_s11 + $0x8] sm:$0xff] }
  0x96   : > { %1507 = vperm.xlu0 %5383, %v644_v10   ;;  %679 = vperm.xlu1 %5382, %v644_v10   ;;  %v577_v37 = vunpack.c.0.s8 %v573_v34  ;;  %v579_v38 = vunpack.c.2.s8 %v573_v34  ;;  %v578_v40 = vunpack.c.1.s8 %v573_v34  ;;  %v6453_v44 = vld [vmem:[%s6000_s9] ss:$0 sm:$0xff]  ;;  %v581_v45 = vunpack.c.0.s8 %v574_v43  ;;  %v6474_v1 = vld [vmem:[%s6022_s11 + $0x10] sm:$0xff] }
  0x97   : > { %v580_v51 = vunpack.c.3.s8 %v573_v34  ;;  %v583_v58 = vunpack.c.2.s8 %v574_v43  ;;  %v582_v0 = vunpack.c.1.s8 %v574_v43  ;;  %v585_v5 = vunpack.c.0.s8 %v6474_v1 }
  0x98   : > { %v6449_v42 = vcvt.s32.f32 %v577_v37  ;;  %v6456_v47 = vcvt.s32.f32 %v579_v38  ;;  %v6458_v48 = vcvt.s32.f32 %v578_v40  ;;  %v6462_v53 = vcvt.s32.f32 %v581_v45 }
  0x99   : > { %v6471_v63 = vcvt.s32.f32 %v580_v51  ;;  %v6481_v10 = vcvt.s32.f32 %v583_v58  ;;  %v587_v34 = vunpack.c.2.s8 %v6474_v1  ;;  %v586_v51 = vunpack.c.1.s8 %v6474_v1 }
  0x9a   : > { %1515 = vperm.xlu0 %5383, %v646_v11   ;;  %689 = vperm.xlu1 %5382, %v646_v11   ;;  %8897 = vst [vmem:[#allocation6_spill] sm:$0xff] %v6449_v42  ;;  %8898 = vst [vmem:[#allocation7_spill] sm:$0xff] %v6456_v47  ;;  %v609_v50 = vsub.f32 1.0, %v6449_v42  ;;  %v611_v57 = vsub.f32 1.0, %v6456_v47  ;;  %v610_v60 = vsub.f32 1.0, %v6458_v48  ;;  %v613_v4 = vsub.f32 1.0, %v6462_v53 }
  0x9b   : > { %8899 = vst [vmem:[#allocation8_spill] sm:$0xff] %v6458_v48  ;;  %8900 = vst [vmem:[#allocation9_spill] sm:$0xff] %v6462_v53 }
  0x9c   : > { %v6469_v62 = vmul.f32 -1e+30, %v609_v50  ;;  %8902 = vst [vmem:[#allocation11_spill] sm:$0xff] %v6471_v63  ;;  %8904 = vst [vmem:[#allocation13_spill] sm:$0xff] %v6481_v10 }
  0x9e   : > { %1523 = vperm.xlu0 %5383, %v648_v12   ;;  %699 = vperm.xlu1 %5382, %v648_v12   ;;  %8901 = vst [vmem:[#allocation10_spill] sm:$0xff] %v6469_v62 }
  0xa2   : > { %1531 = vperm.xlu0 %5383, %v650_v13   ;;  %709 = vperm.xlu1 %5382, %v650_v13  }
  0xa6   : > { %1539 = vperm.xlu0 %5383, %v652_v14   ;;  %719 = vperm.xlu1 %5382, %v652_v14   ;;  %v6487_v14 = vmul.f32 -1e+30, %v610_v60 }
  0xa8   : > { %8905 = vst [vmem:[#allocation14_spill] sm:$0xff] %v6487_v14 }
  0xaa   : > { %1547 = vperm.xlu0 %5383, %v654_v15   ;;  %729 = vperm.xlu1 %5382, %v654_v15  }
  0xae   : > { %1555 = vperm.xlu0 %5383, %v656_v16   ;;  %739 = vperm.xlu1 %5382, %v656_v16  }
  0xb2   : > { %5385 = vset.pattern.permute.xlu0 %v8708_v9  ;;  %5384 = vset.pattern.permute.xlu1 %v5889_v8 }
  0xb3   : > { %664 = vperm.xlu0 %5385, %v641_v6   ;;  %1499 = vperm.xlu1 %5384, %v642_v17  }
  0xb7   : > { %669 = vperm.xlu0 %5385, %v642_v17   ;;  %1503 = vperm.xlu1 %5384, %v643_v7   ;;  %v6479_v7 = vmul.f32 -1e+30, %v611_v57  ;;  %v612_v17 = vsub.f32 1.0, %v6471_v63 }
  0xb9   : > { %8903 = vst [vmem:[#allocation12_spill] sm:$0xff] %v6479_v7 }
  0xbb   : > { %684 = vperm.xlu0 %5385, %v645_v18   ;;  %1511 = vperm.xlu1 %5384, %v645_v18   ;;  %v6492_v18 = vcvt.s32.f32 %v582_v0  ;;  %v6534_v0 = vcvt.s32.f32 %v587_v34 }
  0xbd   : > { %8906 = vst [vmem:[#allocation15_spill] sm:$0xff] %v6492_v18  ;;  %8912 = vst [vmem:[#allocation21_spill] sm:$0xff] %v6534_v0 }
  0xbf   : > { %694 = vperm.xlu0 %5385, %v647_v19   ;;  %1519 = vperm.xlu1 %5384, %v647_v19   ;;  %v584_v19 = vunpack.c.3.s8 %v574_v43 }
  0xc1   : > { %v6514_v50 = vcvt.s32.f32 %v584_v19 }
  0xc3   : > { %704 = vperm.xlu0 %5385, %v649_v20   ;;  %1527 = vperm.xlu1 %5384, %v649_v20   ;;  %8910 = vst [vmem:[#allocation19_spill] sm:$0xff] %v6514_v50 }
  0xc7   : > { %714 = vperm.xlu0 %5385, %v651_v21   ;;  %1535 = vperm.xlu1 %5384, %v651_v21  }
  0xcb   : > { %724 = vperm.xlu0 %5385, %v653_v22   ;;  %1543 = vperm.xlu1 %5384, %v653_v22   ;;  %v6496_v22 = vmul.f32 -1e+30, %v613_v4 }
  0xcd   : > { %8907 = vst [vmem:[#allocation16_spill] sm:$0xff] %v6496_v22 }
  0xcf   : > { %734 = vperm.xlu0 %5385, %v655_v23   ;;  %1551 = vperm.xlu1 %5384, %v655_v23   ;;  %v6498_v23 = vcvt.s32.f32 %v585_v5 }
  0xd1   : > { %8908 = vst [vmem:[#allocation17_spill] sm:$0xff] %v6498_v23  ;;  %v617_v57 = vsub.f32 1.0, %v6498_v23 }
  0xd3   : > { %5386 = vset.pattern.permute.xlu1 %v8708_v9 }
 0x111   : > { %v6428_v24 = vpop.permute.xlu0 %1495  ;;  %v675_v25 = vpop.permute.xlu1 %674 }
 0x112   : > { %v744_v46 = vadd.f32 %v6453_v44, %v675_v25 }
 0x114   : > { %v760_v54 = vmul.f32 0.2, %v744_v46 }
 0x115   : > { %v6430_v26 = vpop.permute.xlu0 %1507  ;;  %v680_v27 = vpop.permute.xlu1 %679 }
 0x116   : > { %v745_v55 = vadd.f32 %v6453_v44, %v680_v27  ;;  %v776_v8 = vmax.f32 %v744_v46, %v760_v54  ;;  %v6511_v46 = vmul.f32 -1e+30, %v612_v17 }
 0x118   : > { %v761_v6 = vmul.f32 0.2, %v745_v55  ;;  %v6501_v25 = vadd.f32 %v776_v8, %v6479_v7  ;;  %8909 = vst [vmem:[#allocation18_spill] sm:$0xff] %v6511_v46 }
 0x119   : > { %v6432_v28 = vpop.permute.xlu0 %1515  ;;  %v690_v29 = vpop.permute.xlu1 %689 }
 0x11a   : > { %v747_v11 = vadd.f32 %v6453_v44, %v690_v29  ;;  %v777_v27 = vmax.f32 %v745_v55, %v761_v6  ;;  %v615_v29 = vsub.f32 1.0, %v6481_v10 }
 0x11c   : > { %v763_v37 = vmul.f32 0.2, %v747_v11  ;;  %v6530_v60 = vadd.f32 %v777_v27, %v6511_v46 }
 0x11d   : > { %v6434_v30 = vpop.permute.xlu0 %1523  ;;  %v700_v32 = vpop.permute.xlu1 %699 }
 0x11e   : > { %v6506_v38 = vadd.f32 %v6453_v44, %v700_v32  ;;  %v779_v5 = vmax.f32 %v747_v11, %v763_v37 }
 0x121   : > { %v6436_v31 = vpop.permute.xlu0 %1531  ;;  %v6441_v35 = vpop.permute.xlu1 %709 }
 0x125   : > { %v6438_v33 = vpop.permute.xlu0 %1539  ;;  %v6447_v41 = vpop.permute.xlu1 %719 }
 0x126   : > { %v753_v27 = vadd.f32 %v6453_v44, %v6447_v41 }
 0x129   : > { %v6443_v36 = vpop.permute.xlu0 %1547  ;;  %v6465_v56 = vpop.permute.xlu1 %729 }
 0x12d   : > { %v6445_v39 = vpop.permute.xlu0 %1555  ;;  %v6489_v15 = vpop.permute.xlu1 %739 }
 0x132   : > { %v665_v49 = vpop.permute.xlu0 %664  ;;  %v6520_v54 = vpop.permute.xlu1 %1499 }
 0x133   : > { %v742_v52 = vadd.f32 %v6453_v44, %v665_v49  ;;  %v614_v49 = vsub.f32 1.0, %v6492_v18 }
 0x135   : > { %v758_v59 = vmul.f32 0.2, %v742_v52  ;;  %v6540_v8 = vmul.f32 -1e+30, %v614_v49 }
 0x136   : > { %v670_v61 = vpop.permute.xlu0 %669 }
 0x137   : > { %v743_v2 = vadd.f32 %v6453_v44, %v670_v61  ;;  %v774_v3 = vmax.f32 %v742_v52, %v758_v59  ;;  %v6518_v52 = vld [vmem:[%s6022_s11 + $0x18] sm:$0xff]  ;;  %v751_v59 = vadd.f32 %v6453_v44, %v6441_v35  ;;  %v6532_v61 = vmul.f32 -1e+30, %v615_v29  ;;  %8913 = vst [vmem:[#allocation22_spill] sm:$0xff] %v6540_v8 }
 0x138   : > { %v589_v58 = vunpack.c.0.s8 %v6518_v52  ;;  %v6543_v35 = vcvt.s32.f32 %v586_v51  ;;  %v619_v29 = vsub.f32 1.0, %v6534_v0  ;;  %v591_v34 = vunpack.c.2.s8 %v6518_v52 }
 0x139   : > { %v759_v12 = vmul.f32 0.2, %v743_v2  ;;  %v6485_v13 = vadd.f32 %v774_v3, %v6469_v62  ;;  %8911 = vst [vmem:[#allocation20_spill] sm:$0xff] %v6532_v61  ;;  %v767_v11 = vmul.f32 0.2, %v751_v59 }
 0x13a   : > { %v685_v16 = vpop.permute.xlu0 %684  ;;  %8914 = vst [vmem:[#allocation23_spill] sm:$0xff] %v6543_v35 }
 0x13b   : > { %v746_v20 = vadd.f32 %v6453_v44, %v685_v16  ;;  %822 = vmax.xlane.f32.xlu0 %v6485_v13  ;;  %v775_v21 = vmax.f32 %v743_v2, %v759_v12  ;;  %v765_v2 = vmul.f32 0.2, %v6506_v38  ;;  %v616_v12 = vsub.f32 1.0, %v6514_v50 }
 0x13c   : > { %v588_v16 = vunpack.c.3.s8 %v6474_v1  ;;  %v6557_v1 = vpop.permute.xlu1 %1503 }
 0x13d   : > { %v762_v40 = vmul.f32 0.2, %v746_v20  ;;  %v6509_v43 = vadd.f32 %v775_v21, %v6487_v14  ;;  %v6551_v21 = vcvt.s32.f32 %v589_v58  ;;  %v781_v49 = vmax.f32 %v6506_v38, %v765_v2 }
 0x13e   : > { %v695_v45 = vpop.permute.xlu0 %694  ;;  %v6567_v41 = vcvt.s32.f32 %v588_v16  ;;  %v6576_v38 = vmul.f32 -1e+30, %v619_v29  ;;  %v783_v2 = vmax.f32 %v751_v59, %v767_v11  ;;  %v6581_v16 = vld [vmem:[%s6000_s9 + $0x1] ss:$0 sm:$0xff] }
 0x13f   : > { %v748_v32 = vadd.f32 %v6453_v44, %v695_v45  ;;  %824 = vmax.xlane.f32.xlu1 %v6509_v43  ;;  %826 = vmax.xlane.f32.xlu0 %v6501_v25  ;;  %v778_v55 = vmax.f32 %v746_v20, %v762_v40  ;;  %v6549_v20 = vmul.f32 -1e+30, %v617_v57  ;;  %8916 = vst [vmem:[#allocation25_spill] sm:$0xff] %v6551_v21 }
 0x140   : > { %v6563_v45 = vadd.f32 %v779_v5, %v6540_v8  ;;  %8917 = vst [vmem:[#allocation26_spill] sm:$0xff] %v6567_v41  ;;  %v621_v5 = vsub.f32 1.0, %v6551_v21  ;;  %8919 = vst [vmem:[#allocation28_spill] sm:$0xff] %v6576_v38  ;;  %v620_v29 = vsub.f32 1.0, %v6567_v41  ;;  %v1512_v11 = vpop.permute.xlu1 %1511 }
 0x141   : > { %v764_v3 = vmul.f32 0.2, %v748_v32  ;;  %v6538_v4 = vadd.f32 %v778_v55, %v6496_v22  ;;  %8915 = vst [vmem:[#allocation24_spill] sm:$0xff] %v6549_v20  ;;  %v590_v55 = vunpack.c.1.s8 %v6518_v52 }
 0x142   : > { %v705_v6 = vpop.permute.xlu0 %704 }
 0x143   : > { %v750_v17 = vadd.f32 %v6453_v44, %v705_v6  ;;  %830 = vmax.xlane.f32.xlu1 %v6538_v4  ;;  %828 = vmax.xlane.f32.xlu0 %v6530_v60  ;;  %v780_v19 = vmax.f32 %v748_v32, %v764_v3  ;;  %v618_v32 = vsub.f32 1.0, %v6543_v35  ;;  %v6573_v3 = vmul.f32 -1e+30, %v616_v12 }
 0x144   : > { %v769_v6 = vmul.f32 0.2, %v753_v27  ;;  %v6594_v59 = vcvt.s32.f32 %v590_v55 }
 0x145   : > { %v766_v37 = vmul.f32 0.2, %v750_v17  ;;  %v6560_v40 = vadd.f32 %v780_v19, %v6532_v61  ;;  %8918 = vst [vmem:[#allocation27_spill] sm:$0xff] %v6573_v3  ;;  %v6578_v19 = vcvt.s32.f32 %v591_v34  ;;  %v6589_v12 = vadd.f32 %v781_v49, %v6573_v3 }
 0x146   : > { %v715_v51 = vpop.permute.xlu0 %714  ;;  %8922 = vst [vmem:[#allocation31_spill] sm:$0xff] %v6594_v59  ;;  %v592_v49 = vunpack.c.3.s8 %v6518_v52  ;;  %v785_v55 = vmax.f32 %v753_v27, %v769_v6  ;;  %v622_v52 = vsub.f32 1.0, %v6594_v59 }
 0x147   : > { %v752_v57 = vadd.f32 %v6453_v44, %v715_v51  ;;  %834 = vmax.xlane.f32.xlu1 %v6560_v40  ;;  %832 = vmax.xlane.f32.xlu0 %v6563_v45  ;;  %v782_v58 = vmax.f32 %v750_v17, %v766_v37  ;;  %8920 = vst [vmem:[#allocation29_spill] sm:$0xff] %v6578_v19  ;;  %v6591_v37 = vmul.f32 -1e+30, %v618_v32  ;;  %v623_v41 = vsub.f32 1.0, %v6578_v19 }
 0x148   : > { %v755_v51 = vadd.f32 %v6453_v44, %v6465_v56  ;;  %v1558_v32 = vadd.f32 %v6581_v16, %v6428_v24  ;;  %v6619_v6 = vcvt.s32.f32 %v592_v49 }
 0x149   : > { %v768_v9 = vmul.f32 0.2, %v752_v57  ;;  %v6586_v0 = vadd.f32 %v782_v58, %v6549_v20  ;;  %8921 = vst [vmem:[#allocation30_spill] sm:$0xff] %v6591_v37  ;;  %v6599_v58 = vmul.f32 -1e+30, %v621_v5  ;;  %v6605_v21 = vadd.f32 %v783_v2, %v6591_v37 }
 0x14a   : > { %v725_v17 = vpop.permute.xlu0 %724  ;;  %v771_v35 = vmul.f32 0.2, %v755_v51  ;;  %v6613_v5 = vmul.f32 -1e+30, %v620_v29  ;;  %8925 = vst [vmem:[#allocation34_spill] sm:$0xff] %v6619_v6 }
 0x14b   : > { %v754_v34 = vadd.f32 %v6453_v44, %v725_v17  ;;  %838 = vmax.xlane.f32.xlu1 %v6586_v0  ;;  %836 = vmax.xlane.f32.xlu0 %v6589_v12  ;;  %v784_v56 = vmax.f32 %v752_v57, %v768_v9  ;;  %8923 = vst [vmem:[#allocation32_spill] sm:$0xff] %v6599_v58  ;;  %v1574_v2 = vmul.f32 0.2, %v1558_v32  ;;  %v6628_v19 = vmul.f32 -1e+30, %v623_v41 }
 0x14c   : > { %v757_v17 = vadd.f32 %v6453_v44, %v6489_v15  ;;  %8924 = vst [vmem:[#allocation33_spill] sm:$0xff] %v6613_v5  ;;  %v1559_v15 = vadd.f32 %v6581_v16, %v6520_v54  ;;  %v6626_v29 = vadd.f32 %v785_v55, %v6613_v5  ;;  %v1560_v41 = vadd.f32 %v6581_v16, %v6557_v1 }
 0x14d   : > { %v770_v23 = vmul.f32 0.2, %v754_v34  ;;  %v6611_v9 = vadd.f32 %v784_v56, %v6576_v38  ;;  %v1561_v56 = vadd.f32 %v6581_v16, %v6430_v26  ;;  %8926 = vst [vmem:[#allocation35_spill] sm:$0xff] %v6628_v19  ;;  %v624_v26 = vsub.f32 1.0, %v6619_v6 }
 0x14e   : > { %v735_v57 = vpop.permute.xlu0 %734  ;;  %v1575_v49 = vmul.f32 0.2, %v1559_v15  ;;  %v1590_v10 = vmax.f32 %v1558_v32, %v1574_v2  ;;  %v1576_v1 = vmul.f32 0.2, %v1560_v41  ;;  %v1562_v32 = vadd.f32 %v6581_v16, %v1512_v11 }
 0x14f   : > { %v756_v24 = vadd.f32 %v6453_v44, %v735_v57  ;;  %842 = vmax.xlane.f32.xlu1 %v6611_v9  ;;  %840 = vmax.xlane.f32.xlu0 %v6605_v21  ;;  %v786_v27 = vmax.f32 %v754_v34, %v770_v23  ;;  %v1520_v44 = vpop.permute.xlu1 %1519  ;;  %v773_v57 = vmul.f32 0.2, %v757_v17  ;;  %v787_v23 = vmax.f32 %v755_v51, %v771_v35 }
 0x150   : > { %v6633_v34 = vmul.f32 -1e+30, %v622_v52  ;;  %v1577_v55 = vmul.f32 0.2, %v1561_v56  ;;  %v1564_v11 = vadd.f32 %v6581_v16, %v1520_v44 }
 0x151   : > { %v772_v59 = vmul.f32 0.2, %v756_v24  ;;  %v6631_v50 = vadd.f32 %v786_v27, %v6599_v58  ;;  %v1563_v27 = vadd.f32 %v6581_v16, %v6432_v28  ;;  %v789_v52 = vmax.f32 %v757_v17, %v773_v57 }
 0x152   : > { %8927 = vst [vmem:[#allocation36_spill] sm:$0xff] %v6633_v34  ;;  %v6646_v51 = vadd.f32 %v787_v23, %v6633_v34  ;;  %v6654_v28 = vadd.f32 %v1590_v10, %v6469_v62  ;;  %v1565_v23 = vadd.f32 %v6581_v16, %v6434_v30  ;;  %v1593_v57 = vmax.f32 %v1561_v56, %v1577_v55 }
 0x153   : > { %846 = vmax.xlane.f32.xlu1 %v6631_v50  ;;  %844 = vmax.xlane.f32.xlu0 %v6626_v29  ;;  %v788_v54 = vmax.f32 %v756_v24, %v772_v59  ;;  %v1528_v18 = vpop.permute.xlu1 %1527  ;;  %v6650_v59 = vmul.f32 -1e+30, %v624_v26  ;;  %v1591_v24 = vmax.f32 %v1559_v15, %v1575_v49  ;;  %v1579_v2 = vmul.f32 0.2, %v1563_v27 }
 0x154   : > { %v1592_v10 = vmax.f32 %v1560_v41, %v1576_v1  ;;  %v1581_v49 = vmul.f32 0.2, %v1565_v23  ;;  %v1567_v30 = vadd.f32 %v6581_v16, %v6436_v31  ;;  %v1580_v55 = vmul.f32 0.2, %v1564_v11 }
 0x155   : > { %v6643_v35 = vadd.f32 %v788_v54, %v6628_v19  ;;  %8928 = vst [vmem:[#allocation37_spill] sm:$0xff] %v6650_v59  ;;  %v6659_v17 = vadd.f32 %v789_v52, %v6650_v59  ;;  %v1578_v54 = vmul.f32 0.2, %v1562_v32  ;;  %v6664_v26 = vadd.f32 %v1591_v24, %v6487_v14 }
 0x156   : > { %v6670_v52 = vadd.f32 %v1593_v57, %v6511_v46  ;;  %v1595_v56 = vmax.f32 %v1563_v27, %v1579_v2  ;;  %v6675_v24 = vadd.f32 %v1592_v10, %v6479_v7  ;;  %v1566_v44 = vadd.f32 %v6581_v16, %v1528_v18  ;;  %v6793_v46 = vld [vmem:[#allocation2 + $0x50] sm:$0xff]  ;;  %v6795_v7 = vld [vmem:[#allocation2 + $0x48] sm:$0xff] }
 0x157   : > { %850 = vmax.xlane.f32.xlu1 %v6643_v35  ;;  %848 = vmax.xlane.f32.xlu0 %v6646_v51  ;;  %v1536_v15 = vpop.permute.xlu1 %1535  ;;  %v1594_v41 = vmax.f32 %v1562_v32, %v1578_v54  ;;  %v1583_v1 = vmul.f32 0.2, %v1567_v30  ;;  %v1569_v14 = vadd.f32 %v6581_v16, %v6438_v33  ;;  %v1597_v57 = vmax.f32 %v1565_v23, %v1581_v49 }
 0x158   : > { %v6681_v31 = vadd.f32 %v1595_v56, %v6540_v8  ;;  %v1582_v2 = vmul.f32 0.2, %v1566_v44  ;;  %v1568_v18 = vadd.f32 %v6581_v16, %v1536_v15  ;;  %v1596_v32 = vmax.f32 %v1564_v11, %v1580_v55 }
 0x159   : > { %v6686_v10 = vadd.f32 %v1594_v41, %v6496_v22  ;;  %v1585_v54 = vmul.f32 0.2, %v1569_v14  ;;  %v1571_v33 = vadd.f32 %v6581_v16, %v6443_v36  ;;  %v6692_v56 = vadd.f32 %v1597_v57, %v6573_v3  ;;  %v5399_v22 = vld [vmem:[%s6020_s8 + $0x28] sm:$0xff]  }
 0x15a   : > { %v1599_v23 = vmax.f32 %v1567_v30, %v1583_v1  ;;  %v1584_v49 = vmul.f32 0.2, %v1568_v18  ;;  %v6697_v8 = vadd.f32 %v1596_v32, %v6532_v61  ;;  %v1598_v15 = vmax.f32 %v1566_v44, %v1582_v2 }
 0x15b   : > { %1639 = vmax.xlane.f32.xlu1 %v6654_v28  ;;  %852 = vmax.xlane.f32.xlu0 %v6659_v17  ;;  %v1544_v27 = vpop.permute.xlu1 %1543  ;;  %v1587_v55 = vmul.f32 0.2, %v1571_v33  ;;  %v1573_v36 = vadd.f32 %v6581_v16, %v6445_v39  ;;  %v1601_v30 = vmax.f32 %v1569_v14, %v1585_v54 }
 0x15c   : > { %v1570_v41 = vadd.f32 %v6581_v16, %v1544_v27  ;;  %v6703_v57 = vadd.f32 %v1599_v23, %v6591_v37  ;;  %v6708_v32 = vadd.f32 %v1598_v15, %v6549_v20  ;;  %v1600_v44 = vmax.f32 %v1568_v18, %v1584_v49  ;;  %v6780_v37 = vld [vmem:[#allocation2 + $0x38] sm:$0xff] }
 0x15d   : > { %v1589_v2 = vmul.f32 0.2, %v1573_v36  ;;  %v6712_v3 = vadd.f32 %v1601_v30, %v6613_v5  ;;  %v1603_v39 = vmax.f32 %v1571_v33, %v1587_v55  ;;  %v5395_v55 = vld [vmem:[%s6020_s8 + $0x8] sm:$0xff]   ;;  %v5398_v5 = vld [vmem:[%s6020_s8 + $0x20] sm:$0xff]  }
 0x15e   : > { %v1586_v1 = vmul.f32 0.2, %v1570_v41  ;;  %v6717_v54 = vadd.f32 %v1600_v44, %v6576_v38  ;;  %v6743_v44 = vld [vmem:[#allocation2 + $0x10] sm:$0xff]  ;;  %v6778_v38 = vld [vmem:[#allocation2 + $0x40] sm:$0xff] }
 0x15f   : > { %1645 = vmax.xlane.f32.xlu1 %v6670_v52  ;;  %1641 = vmax.xlane.f32.xlu0 %v6664_v26  ;;  %v1552_v11 = vpop.permute.xlu1 %1551  ;;  %v6720_v15 = vadd.f32 %v1603_v39, %v6633_v34  ;;  %v6767_v34 = vld [vmem:[#allocation2 + $0x28] sm:$0xff] }
 0x160   : > { %v1572_v27 = vadd.f32 %v6581_v16, %v1552_v11  ;;  %8929 = vst [vmem:[#allocation38_spill] sm:$0xff] %v6717_v54  ;;  %v1602_v23 = vmax.f32 %v1570_v41, %v1586_v1  ;;  %v1605_v16 = vmax.f32 %v1573_v36, %v1589_v2  ;;  %v5394_v11 = vld [vmem:[%s6020_s8] sm:$0xff]  }
 0x161   : > { %5185 = vmatprep.subr.bf16.mxu0 %v5394_v11  ;;  %v6738_v36 = vld [vmem:[#allocation2] sm:$0xff] }
 0x162   : > { %v1588_v14 = vmul.f32 0.2, %v1572_v27  ;;  %v6725_v18 = vadd.f32 %v1602_v23, %v6599_v58  ;;  %v6728_v49 = vadd.f32 %v1605_v16, %v6650_v59  ;;  %5186 = vmatpush3.bf16.msra.mxu0 %v5394_v11  ;;  %v5396_v16 = vld [vmem:[%s6020_s8 + $0x10] sm:$0xff]   ;;  %v6754_v11 = vld [vmem:[#allocation2 + $0x18] sm:$0xff] }
 0x163   : > { %1649 = vmax.xlane.f32.xlu1 %v6681_v31  ;;  %1643 = vmax.xlane.f32.xlu0 %v6675_v24  ;;  %v5397_v59 = vld [vmem:[%s6020_s8 + $0x18] sm:$0xff]  }
 0x164   : > { %8930 = vst [vmem:[#allocation39_spill] sm:$0xff] %v6725_v18  ;;  %v1604_v33 = vmax.f32 %v1572_v27, %v1588_v14  ;;  %8931 = vst [vmem:[#allocation40_spill] sm:$0xff] %v6728_v49  ;;  %5187 = vmatprep.subr.bf16.mxu0 %v5395_v55  ;;  %v807_v27 = vld [vmem:[#allocation2 + $0x8] sm:$0xff] }
 0x166   : > { %v6733_v41 = vadd.f32 %v1604_v33, %v6628_v19  ;;  %5188 = vmatpush3.bf16.msra.mxu0 %v5395_v55  ;;  %v6752_v33 = vld [vmem:[#allocation2 + $0x20] sm:$0xff]  ;;  %v6765_v19 = vld [vmem:[#allocation2 + $0x30] sm:$0xff] }
 0x167   : > { %1653 = vmax.xlane.f32.xlu1 %v6692_v56  ;;  %1647 = vmax.xlane.f32.xlu0 %v6686_v10 }
 0x168   : > { %8932 = vst [vmem:[#allocation41_spill] sm:$0xff] %v6733_v41  ;;  %5189 = vmatprep.subr.bf16.mxu0 %v5396_v16 }
 0x16a   : > { %5190 = vmatpush3.bf16.msra.mxu0 %v5396_v16 }
 0x16b   : > { %1657 = vmax.xlane.f32.xlu1 %v6703_v57  ;;  %1651 = vmax.xlane.f32.xlu0 %v6697_v8 }
 0x16c   : > { %5191 = vmatprep.subr.bf16.mxu0 %v5397_v59 }
 0x16e   : > { %5192 = vmatpush3.bf16.msra.mxu0 %v5397_v59 }
 0x16f   : > { %1661 = vmax.xlane.f32.xlu1 %v6712_v3  ;;  %1655 = vmax.xlane.f32.xlu0 %v6708_v32 }
 0x170   : > { %5193 = vmatprep.subr.bf16.mxu0 %v5398_v5 }
 0x172   : > { %5194 = vmatpush3.bf16.msra.mxu0 %v5398_v5 }
 0x173   : > { %1665 = vmax.xlane.f32.xlu1 %v6720_v15  ;;  %1659 = vmax.xlane.f32.xlu0 %v6717_v54  ;;  %v6835_v54 = vld [vmem:[#allocation2 + $0x68] sm:$0xff] }
 0x174   : > { %5195 = vmatprep.subr.bf16.mxu0 %v5399_v22 }
 0x176   : > { %5196 = vmatpush3.bf16.msra.mxu0 %v5399_v22 }
 0x177   : > { %1669 = vmax.xlane.f32.xlu1 %v6728_v49  ;;  %1663 = vmax.xlane.f32.xlu0 %v6725_v18  ;;  %v6815_v18 = vld [vmem:[#allocation2 + $0x58] sm:$0xff] }
 0x17b   : > { %1667 = vmax.xlane.f32.xlu0 %v6733_v41  ;;  %v6813_v41 = vld [vmem:[#allocation2 + $0x60] sm:$0xff] }
 0x1c8   : > { %v823_v30 = vpop.xlane.xlu0 %822 }
 0x1c9   : > { %v6741_v1 = vmax.f32 %v6738_v36, %v823_v30 }
 0x1cb   : > { %1440 = vst.msk [vmem:[#allocation2] sm:$0xff] %vm1439_vm2, %v6741_v1  ;;  %920 = vperm.xlu1 %5386, %v6741_v1   ;;  %v870_v62 = vsub.f32 %v6738_v36, %v6741_v1  ;;  %v5400_v1 = vld [vmem:[%s6020_s8 + $0x30] sm:$0xff]  }
 0x1cc   : > { %v825_v2 = vpop.xlane.xlu1 %824  ;;  %v827_v39 = vpop.xlane.xlu0 %826  ;;  %5197 = vmatprep.subr.bf16.mxu0 %v5400_v1 }
 0x1cd   : > { %v855_v14 = vmax.f32 %v807_v27, %v825_v2  ;;  %v6749_v23 = vmax.f32 %v6743_v44, %v827_v39  ;;  %v886_v49 = vmul.f32 1.442695, %v870_v62  ;;  %5198 = vmatpush3.bf16.msra.mxu0 %v5400_v1 }
 0x1cf   : > { %1441 = vst.msk [vmem:[#allocation2 + $0x8] sm:$0xff] %vm1439_vm2, %v855_v14  ;;  %1442 = vst.msk [vmem:[#allocation2 + $0x10] sm:$0xff] %vm1439_vm2, %v6749_v23  ;;  %925 = vperm.xlu0 %5385, %v855_v14   ;;  %930 = vperm.xlu1 %5386, %v6749_v23   ;;  %v871_v20 = vsub.f32 %v807_v27, %v855_v14 }
 0x1d0   : > { %v831_v55 = vpop.xlane.xlu1 %830  ;;  %v829_v30 = vpop.xlane.xlu0 %828 }
 0x1d1   : > { %v858_v2 = vmax.f32 %v6752_v33, %v831_v55  ;;  %v6762_v39 = vmax.f32 %v6754_v11, %v829_v30 }
 0x1d3   : > { %1444 = vst.msk [vmem:[#allocation2 + $0x20] sm:$0xff] %vm1439_vm2, %v858_v2  ;;  %1443 = vst.msk [vmem:[#allocation2 + $0x18] sm:$0xff] %vm1439_vm2, %v6762_v39  ;;  %940 = vperm.xlu0 %5385, %v858_v2   ;;  %935 = vperm.xlu1 %5386, %v6762_v39   ;;  %v874_v5 = vsub.f32 %v6752_v33, %v858_v2 }
 0x1d4   : > { %v835_v58 = vpop.xlane.xlu1 %834  ;;  %v833_v55 = vpop.xlane.xlu0 %832 }
 0x1d5   : > { %v860_v30 = vmax.f32 %v6765_v19, %v835_v58  ;;  %v6775_v16 = vmax.f32 %v6767_v34, %v833_v55  ;;  %v894_v22 = vmul.f32 1.442695, %v874_v5 }
 0x1d7   : > { %1446 = vst.msk [vmem:[#allocation2 + $0x30] sm:$0xff] %vm1439_vm2, %v860_v30  ;;  %1445 = vst.msk [vmem:[#allocation2 + $0x28] sm:$0xff] %vm1439_vm2, %v6775_v16  ;;  %950 = vperm.xlu0 %5385, %v860_v30   ;;  %945 = vperm.xlu1 %5386, %v6775_v16   ;;  %v876_v33 = vsub.f32 %v6765_v19, %v860_v30  ;;  %v873_v19 = vsub.f32 %v6754_v11, %v6762_v39 }
 0x1d8   : > { %v839_v58 = vpop.xlane.xlu1 %838  ;;  %v837_v61 = vpop.xlane.xlu0 %836 }
 0x1d9   : > { %v6787_v55 = vmax.f32 %v6778_v38, %v839_v58  ;;  %v6790_v59 = vmax.f32 %v6780_v37, %v837_v61  ;;  %v888_v61 = vmul.f32 1.442695, %v871_v20  ;;  %v872_v20 = vsub.f32 %v6743_v44, %v6749_v23  ;;  %v5401_v23 = vld [vmem:[%s6020_s8 + $0x38] sm:$0xff]  }
 0x1da   : > { %v898_v30 = vmul.f32 1.442695, %v876_v33  ;;  %5199 = vmatprep.subr.bf16.mxu0 %v5401_v23  ;;  %v892_v33 = vmul.f32 1.442695, %v873_v19 }
 0x1db   : > { %1448 = vst.msk [vmem:[#allocation2 + $0x40] sm:$0xff] %vm1439_vm2, %v6787_v55  ;;  %1447 = vst.msk [vmem:[#allocation2 + $0x38] sm:$0xff] %vm1439_vm2, %v6790_v59  ;;  %960 = vperm.xlu0 %5385, %v6787_v55   ;;  %955 = vperm.xlu1 %5386, %v6790_v59   ;;  %5426 = vpow2.f32 %v888_v61  ;;  %v890_v61 = vmul.f32 1.442695, %v872_v20  ;;  %v878_v5 = vsub.f32 %v6778_v38, %v6787_v55 }
 0x1dc   : > { %v843_v27 = vpop.xlane.xlu1 %842  ;;  %v841_v14 = vpop.xlane.xlu0 %840  ;;  %5428 = vpow2.f32 %v886_v49  ;;  %5200 = vmatpush3.bf16.msra.mxu0 %v5401_v23  ;;  %v875_v20 = vsub.f32 %v6767_v34, %v6775_v16 }
 0x1dd   : > { %v6807_v58 = vmax.f32 %v6793_v46, %v843_v27  ;;  %v6810_v36 = vmax.f32 %v6795_v7, %v841_v14  ;;  %v6833_v14 = vld [vmem:[#allocation2 + $0x70] sm:$0xff]  ;;  %5430 = vpow2.f32 %v894_v22  ;;  %v6857_v22 = vld [vmem:[#allocation2 + $0x78] sm:$0xff]  ;;  %v902_v38 = vmul.f32 1.442695, %v878_v5 }
 0x1de   : > { %5432 = vpow2.f32 %v890_v61  ;;  %v896_v19 = vmul.f32 1.442695, %v875_v20 }
 0x1df   : > { %1450 = vst.msk [vmem:[#allocation2 + $0x50] sm:$0xff] %vm1439_vm2, %v6807_v58  ;;  %1449 = vst.msk [vmem:[#allocation2 + $0x48] sm:$0xff] %vm1439_vm2, %v6810_v36  ;;  %970 = vperm.xlu0 %5385, %v6807_v58   ;;  %965 = vperm.xlu1 %5386, %v6810_v36   ;;  %5434 = vpow2.f32 %v898_v30  ;;  %v880_v34 = vsub.f32 %v6793_v46, %v6807_v58  ;;  %v877_v30 = vsub.f32 %v6780_v37, %v6790_v59  ;;  %v6901_v46 = vld [vmem:[#allocation2 + $0xa8] sm:$0xff] }
 0x1e0   : > { %v847_v2 = vpop.xlane.xlu1 %846  ;;  %v845_v27 = vpop.xlane.xlu0 %844  ;;  %5436 = vpow2.f32 %v892_v33  ;;  %8936 = vst [vmem:[#allocation45_spill] sm:$0xff] %v6901_v46 }
 0x1e1   : > { %v6827_v62 = vmax.f32 %v6813_v41, %v847_v2  ;;  %v6830_v44 = vmax.f32 %v6815_v18, %v845_v27  ;;  %v6855_v2 = vld [vmem:[#allocation2 + $0x80] sm:$0xff]  ;;  %5438 = vpow2.f32 %v902_v38  ;;  %v906_v58 = vmul.f32 1.442695, %v880_v34  ;;  %v6903_v38 = vld [vmem:[#allocation2 + $0x90] sm:$0xff] }
 0x1e2   : > { %8933 = vst [vmem:[#allocation42_spill] sm:$0xff] %v6855_v2  ;;  %5440 = vpow2.f32 %v896_v19  ;;  %8937 = vst [vmem:[#allocation46_spill] sm:$0xff] %v6903_v38  ;;  %v900_v34 = vmul.f32 1.442695, %v877_v30  ;;  %v6929_v19 = vld [vmem:[#allocation2 + $0xb8] sm:$0xff] }
 0x1e3   : > { %1452 = vst.msk [vmem:[#allocation2 + $0x60] sm:$0xff] %vm1439_vm2, %v6827_v62  ;;  %1451 = vst.msk [vmem:[#allocation2 + $0x58] sm:$0xff] %vm1439_vm2, %v6830_v44  ;;  %980 = vperm.xlu0 %5385, %v6827_v62   ;;  %975 = vperm.xlu1 %5386, %v6830_v44   ;;  %v882_v5 = vsub.f32 %v6813_v41, %v6827_v62  ;;  %v879_v41 = vsub.f32 %v6795_v7, %v6810_v36  ;;  %5442 = vpow2.f32 %v906_v58 }
 0x1e4   : > { %v851_v49 = vpop.xlane.xlu1 %850  ;;  %v849_v1 = vpop.xlane.xlu0 %848  ;;  %8939 = vst [vmem:[#allocation48_spill] sm:$0xff] %v6929_v19  ;;  %5444 = vpow2.f32 %v900_v34 }
 0x1e5   : > { %v6848_v11 = vmax.f32 %v6833_v14, %v851_v49  ;;  %v6851_v39 = vmax.f32 %v6835_v54, %v849_v1  ;;  %v6873_v61 = vpop.eup %5426  ;;  %v6875_v49 = vld [vmem:[#allocation2 + $0x98] sm:$0xff]  ;;  %v6877_v1 = vld [vmem:[#allocation2 + $0x88] sm:$0xff]  ;;  %v910_v30 = vmul.f32 1.442695, %v882_v5  ;;  %v904_v58 = vmul.f32 1.442695, %v879_v41 }
 0x1e6   : > { %8934 = vst [vmem:[#allocation43_spill] sm:$0xff] %v6875_v49  ;;  %8935 = vst [vmem:[#allocation44_spill] sm:$0xff] %v6877_v1  ;;  %v6891_v59 = vpop.eup %5428  ;;  %v881_v5 = vsub.f32 %v6815_v18, %v6830_v44  ;;  %v6981_v44 = vld [vmem:[#allocation2 + $0xd8] sm:$0xff] }
 0x1e7   : > { %1454 = vst.msk [vmem:[#allocation2 + $0x70] sm:$0xff] %vm1439_vm2, %v6848_v11  ;;  %1453 = vst.msk [vmem:[#allocation2 + $0x68] sm:$0xff] %vm1439_vm2, %v6851_v39  ;;  %990 = vperm.xlu0 %5385, %v6848_v11   ;;  %985 = vperm.xlu1 %5386, %v6851_v39   ;;  %v884_v7 = vsub.f32 %v6833_v14, %v6848_v11  ;;  %5446 = vpow2.f32 %v910_v30  ;;  %v6955_v11 = vld [vmem:[#allocation2 + $0xc8] sm:$0xff] }
 0x1e8   : > { %v1640_v16 = vpop.xlane.xlu1 %1639  ;;  %v853_v55 = vpop.xlane.xlu0 %852  ;;  %8942 = vst [vmem:[#allocation51_spill] sm:$0xff] %v6955_v11  ;;  %5448 = vpow2.f32 %v904_v58  ;;  %v883_v58 = vsub.f32 %v6835_v54, %v6851_v39  ;;  %8947 = vst [vmem:[#allocation56_spill] sm:$0xff] %v6981_v44  ;;  %v7007_v54 = vld [vmem:[#allocation2 + $0xe8] sm:$0xff] }
 0x1e9   : > { %v6868_v27 = vmax.f32 %v6855_v2, %v1640_v16  ;;  %v6871_v23 = vmax.f32 %v6857_v22, %v853_v55  ;;  %v6899_v55 = vpop.eup %5430  ;;  %v914_v34 = vmul.f32 1.442695, %v884_v7  ;;  %v908_v7 = vmul.f32 1.442695, %v881_v5  ;;  %8953 = vst [vmem:[#allocation62_spill] sm:$0xff] %v7007_v54 }
 0x1ea   : > { %v912_v39 = vmul.f32 1.442695, %v883_v58 }
 0x1eb   : > { %2274 = vst.msk [vmem:[#allocation2 + $0x80] sm:$0xff] %vm1439_vm2, %v6868_v27  ;;  %1455 = vst.msk [vmem:[#allocation2 + $0x78] sm:$0xff] %vm1439_vm2, %v6871_v23  ;;  %1165 = vperm.xlu0 %5385, %v6873_v61   ;;  %995 = vperm.xlu1 %5386, %v6871_v23   ;;  %5450 = vpow2.f32 %v914_v34  ;;  %v885_v34 = vsub.f32 %v6857_v22, %v6871_v23  ;;  %v7033_v22 = vld [vmem:[#allocation2 + $0xe0] sm:$0xff] }
 0x1ec   : > { %v1646_v20 = vpop.xlane.xlu1 %1645  ;;  %v1642_v37 = vpop.xlane.xlu0 %1641  ;;  %5452 = vpow2.f32 %v908_v7  ;;  %8960 = vst [vmem:[#allocation69_spill] sm:$0xff] %v7033_v22 }
 0x1ed   : > { %v6894_v33 = vmax.f32 %v6875_v49, %v1646_v20  ;;  %v6897_v16 = vmax.f32 %v6877_v1, %v1642_v37  ;;  %v6919_v37 = vpop.eup %5432  ;;  %v6931_v1 = vld [vmem:[#allocation2 + $0xa0] sm:$0xff]  ;;  %5454 = vpow2.f32 %v912_v39  ;;  %v916_v23 = vmul.f32 1.442695, %v885_v34 }
 0x1ee   : > { %v6927_v2 = vpop.eup %5434  ;;  %8940 = vst [vmem:[#allocation49_spill] sm:$0xff] %v6931_v1 }
 0x1ef   : > { %2277 = vst.msk [vmem:[#allocation2 + $0x98] sm:$0xff] %vm1439_vm2, %v6894_v33  ;;  %1180 = vperm.xlu0 %5385, %v6899_v55   ;;  %1160 = vperm.xlu1 %5386, %v6891_v59   ;;  %2275 = vst.msk [vmem:[#allocation2 + $0x88] sm:$0xff] %vm1439_vm2, %v6897_v16  ;;  %5456 = vpow2.f32 %v916_v23 }
 0x1f0   : > { %v1650_v36 = vpop.xlane.xlu1 %1649  ;;  %v1644_v20 = vpop.xlane.xlu0 %1643  ;;  %8938 = vst [vmem:[#allocation47_spill] sm:$0xff] %v6927_v2 }
 0x1f1   : > { %v6922_v62 = vmax.f32 %v6901_v46, %v1650_v36  ;;  %v6925_v49 = vmax.f32 %v6903_v38, %v1644_v20  ;;  %v6945_v20 = vpop.eup %5436  ;;  %v6957_v38 = vld [vmem:[#allocation2 + $0xb0] sm:$0xff] }
 0x1f2   : > { %8943 = vst [vmem:[#allocation52_spill] sm:$0xff] %v6957_v38 }
 0x1f3   : > { %2279 = vst.msk [vmem:[#allocation2 + $0xa8] sm:$0xff] %vm1439_vm2, %v6922_v62  ;;  %1190 = vperm.xlu0 %5385, %v6927_v2   ;;  %1170 = vperm.xlu1 %5386, %v6919_v37   ;;  %2276 = vst.msk [vmem:[#allocation2 + $0x90] sm:$0xff] %vm1439_vm2, %v6925_v49  ;;  %v6953_v2 = vpop.eup %5438 }
 0x1f4   : > { %v1654_v41 = vpop.xlane.xlu1 %1653  ;;  %v1648_v36 = vpop.xlane.xlu0 %1647  ;;  %8941 = vst [vmem:[#allocation50_spill] sm:$0xff] %v6953_v2 }
 0x1f5   : > { %v6948_v14 = vmax.f32 %v6929_v19, %v1654_v41  ;;  %v6951_v46 = vmax.f32 %v6931_v1, %v1648_v36  ;;  %v6969_v30 = vpop.eup %5440  ;;  %v6983_v1 = vld [vmem:[#allocation2 + $0xc0] sm:$0xff] }
 0x1f6   : > { %8944 = vst [vmem:[#allocation53_spill] sm:$0xff] %v6969_v30  ;;  %8948 = vst [vmem:[#allocation57_spill] sm:$0xff] %v6983_v1 }
 0x1f7   : > { %2281 = vst.msk [vmem:[#allocation2 + $0xb8] sm:$0xff] %vm1439_vm2, %v6948_v14  ;;  %1200 = vperm.xlu0 %5385, %v6953_v2   ;;  %1175 = vperm.xlu1 %5386, %v6945_v20   ;;  %2278 = vst.msk [vmem:[#allocation2 + $0xa0] sm:$0xff] %vm1439_vm2, %v6951_v46  ;;  %v6979_v2 = vpop.eup %5442 }
 0x1f8   : > { %v1658_v41 = vpop.xlane.xlu1 %1657  ;;  %v1652_v36 = vpop.xlane.xlu0 %1651  ;;  %8946 = vst [vmem:[#allocation55_spill] sm:$0xff] %v6979_v2 }
 0x1f9   : > { %v6974_v18 = vmax.f32 %v6955_v11, %v1658_v41  ;;  %v6977_v19 = vmax.f32 %v6957_v38, %v1652_v36  ;;  %v6997_v5 = vpop.eup %5444  ;;  %v7009_v38 = vld [vmem:[#allocation2 + $0xd0] sm:$0xff] }
 0x1fa   : > { %8949 = vst [vmem:[#allocation58_spill] sm:$0xff] %v6997_v5  ;;  %8954 = vst [vmem:[#allocation63_spill] sm:$0xff] %v7009_v38 }
 0x1fb   : > { %8945 = vst [vmem:[#allocation54_spill] sm:$0xff] %v6974_v18  ;;  %2283 = vst.msk [vmem:[#allocation2 + $0xc8] sm:$0xff] %vm1439_vm2, %v6974_v18  ;;  %1210 = vperm.xlu0 %5385, %v6979_v2   ;;  %1185 = vperm.xlu1 %5386, %v6969_v30   ;;  %v7005_v30 = vpop.eup %5446 }
 0x1fc   : > { %2280 = vst.msk [vmem:[#allocation2 + $0xb0] sm:$0xff] %vm1439_vm2, %v6977_v19  ;;  %v1662_v41 = vpop.xlane.xlu1 %1661  ;;  %v1656_v36 = vpop.xlane.xlu0 %1655  ;;  %8952 = vst [vmem:[#allocation61_spill] sm:$0xff] %v7005_v30 }
 0x1fd   : > { %v7000_v11 = vmax.f32 %v6981_v44, %v1662_v41  ;;  %v7003_v2 = vmax.f32 %v6983_v1, %v1656_v36  ;;  %v7021_v36 = vpop.eup %5448 }
 0x1fe   : > { %8955 = vst [vmem:[#allocation64_spill] sm:$0xff] %v7021_v36 }
 0x1ff   : > { %8950 = vst [vmem:[#allocation59_spill] sm:$0xff] %v7000_v11  ;;  %8951 = vst [vmem:[#allocation60_spill] sm:$0xff] %v7003_v2  ;;  %1220 = vperm.xlu0 %5385, %v7005_v30   ;;  %1195 = vperm.xlu1 %5386, %v6997_v5   ;;  %v7029_v30 = vpop.eup %5450  ;;  %v7031_v5 = vld [vmem:[#allocation2 + $0xf8] sm:$0xff] }
 0x200   : > { %2285 = vst.msk [vmem:[#allocation2 + $0xd8] sm:$0xff] %vm1439_vm2, %v7000_v11  ;;  %2282 = vst.msk [vmem:[#allocation2 + $0xc0] sm:$0xff] %vm1439_vm2, %v7003_v2  ;;  %v1666_v58 = vpop.xlane.xlu1 %1665  ;;  %v1660_v41 = vpop.xlane.xlu0 %1659 }
 0x201   : > { %v7024_v7 = vmax.f32 %v7007_v54, %v1666_v58  ;;  %v7027_v44 = vmax.f32 %v7009_v38, %v1660_v41  ;;  %8958 = vst [vmem:[#allocation67_spill] sm:$0xff] %v7029_v30  ;;  %8959 = vst [vmem:[#allocation68_spill] sm:$0xff] %v7031_v5  ;;  %v7051_v54 = vpop.eup %5452 }
 0x202   : > { %v7068_v34 = vpop.eup %5454 }
 0x203   : > { %8956 = vst [vmem:[#allocation65_spill] sm:$0xff] %v7024_v7  ;;  %8957 = vst [vmem:[#allocation66_spill] sm:$0xff] %v7027_v44  ;;  %1230 = vperm.xlu0 %5385, %v7029_v30   ;;  %1205 = vperm.xlu1 %5386, %v7021_v36   ;;  %v7053_v30 = vld [vmem:[#allocation2 + $0xf0] sm:$0xff]  ;;  %v7076_v23 = vpop.eup %5456 }
 0x204   : > { %2287 = vst.msk [vmem:[#allocation2 + $0xe8] sm:$0xff] %vm1439_vm2, %v7024_v7  ;;  %2284 = vst.msk [vmem:[#allocation2 + $0xd0] sm:$0xff] %vm1439_vm2, %v7027_v44  ;;  %v1670_v58 = vpop.xlane.xlu1 %1669  ;;  %v1664_v41 = vpop.xlane.xlu0 %1663 }
 0x205   : > { %v7046_v1 = vmax.f32 %v7031_v5, %v1670_v58  ;;  %v7049_v39 = vmax.f32 %v7033_v22, %v1664_v41  ;;  %8963 = vst [vmem:[#allocation72_spill] sm:$0xff] %v7053_v30 }
 0x207   : > { %8961 = vst [vmem:[#allocation70_spill] sm:$0xff] %v7046_v1  ;;  %8962 = vst [vmem:[#allocation71_spill] sm:$0xff] %v7049_v39  ;;  %1737 = vperm.xlu0 %5385, %v6868_v27   ;;  %1215 = vperm.xlu1 %5386, %v7051_v54  }
 0x208   : > { %2289 = vst.msk [vmem:[#allocation2 + $0xf8] sm:$0xff] %vm1439_vm2, %v7046_v1  ;;  %2286 = vst.msk [vmem:[#allocation2 + $0xe0] sm:$0xff] %vm1439_vm2, %v7049_v39  ;;  %v1668_v58 = vpop.xlane.xlu0 %1667 }
 0x209   : > { %v7066_v41 = vmax.f32 %v7053_v30, %v1668_v58 }
 0x20b   : > { %8964 = vst [vmem:[#allocation73_spill] sm:$0xff] %v7066_v41  ;;  %1782 = vperm.xlu0 %5385, %v6974_v18   ;;  %1225 = vperm.xlu1 %5386, %v7068_v34   ;;  %2288 = vst.msk [vmem:[#allocation2 + $0xf0] sm:$0xff] %vm1439_vm2, %v7066_v41 }
 0x20f   : > { %1792 = vperm.xlu0 %5385, %v7000_v11   ;;  %1235 = vperm.xlu1 %5386, %v7076_v23  }
 0x213   : > { %1802 = vperm.xlu0 %5385, %v7024_v7   ;;  %1742 = vperm.xlu1 %5386, %v6897_v16  }
 0x217   : > { %1812 = vperm.xlu0 %5385, %v7046_v1   ;;  %1747 = vperm.xlu1 %5386, %v6925_v49  }
 0x21b   : > { %1752 = vperm.xlu1 %5386, %v6894_v33  }
 0x21f   : > { %1757 = vperm.xlu1 %5386, %v6951_v46  }
 0x223   : > { %1762 = vperm.xlu1 %5386, %v6922_v62  }
 0x227   : > { %1767 = vperm.xlu1 %5386, %v6977_v19  }
 0x22b   : > { %1772 = vperm.xlu1 %5386, %v6948_v14  }
 0x22f   : > { %1777 = vperm.xlu1 %5386, %v7003_v2  }
 0x233   : > { %1787 = vperm.xlu1 %5386, %v7027_v44  }
 0x237   : > { %1797 = vperm.xlu1 %5386, %v7049_v39  }
 0x23b   : > { %1807 = vperm.xlu1 %5386, %v7066_v41  }
 0x24a   : > { %v921_v58 = vpop.permute.xlu1 %920 }
 0x24b   : > { %v998_v36 = vsub.f32 %v6485_v13, %v921_v58 }
 0x24d   : > { %v1014_v30 = vmul.f32 1.442695, %v998_v36 }
 0x24e   : > { %v931_v1 = vpop.permute.xlu1 %930  ;;  %v926_v5 = vpop.permute.xlu0 %925 }
 0x24f   : > { %5458 = vpow2.f32 %v1014_v30  ;;  %v1000_v22 = vsub.f32 %v6501_v25, %v931_v1  ;;  %v999_v7 = vsub.f32 %v6509_v43, %v926_v5 }
 0x251   : > { %v1018_v38 = vmul.f32 1.442695, %v1000_v22  ;;  %v1016_v11 = vmul.f32 1.442695, %v999_v7 }
 0x252   : > { %v936_v2 = vpop.permute.xlu1 %935  ;;  %v941_v18 = vpop.permute.xlu0 %940 }
 0x253   : > { %5460 = vpow2.f32 %v1018_v38  ;;  %v1001_v39 = vsub.f32 %v6530_v60, %v936_v2  ;;  %v1002_v41 = vsub.f32 %v6538_v4, %v941_v18 }
 0x254   : > { %5462 = vpow2.f32 %v1016_v11 }
 0x255   : > { %v1020_v44 = vmul.f32 1.442695, %v1001_v39  ;;  %v1022_v13 = vmul.f32 1.442695, %v1002_v41 }
 0x256   : > { %v946_v36 = vpop.permute.xlu1 %945  ;;  %v951_v58 = vpop.permute.xlu0 %950 }
 0x257   : > { %5464 = vpow2.f32 %v1020_v44  ;;  %v1003_v30 = vsub.f32 %v6563_v45, %v946_v36  ;;  %v1004_v25 = vsub.f32 %v6560_v40, %v951_v58 }
 0x258   : > { %5466 = vpow2.f32 %v1022_v13 }
 0x259   : > { %v5459_v43 = vpop.eup %5458  ;;  %v1024_v1 = vmul.f32 1.442695, %v1003_v30  ;;  %v1026_v5 = vmul.f32 1.442695, %v1004_v25 }
 0x25a   : > { %v956_v7 = vpop.permute.xlu1 %955  ;;  %v961_v38 = vpop.permute.xlu0 %960  ;;  %v1046_v60 = vmul.f32 %v5459_v43, %v6449_v42 }
 0x25b   : > { %5468 = vpow2.f32 %v1024_v1  ;;  %v1005_v4 = vsub.f32 %v6589_v12, %v956_v7  ;;  %v1006_v2 = vsub.f32 %v6586_v0, %v961_v38 }
 0x25c   : > { %5470 = vpow2.f32 %v1026_v5  ;;  %1094 = vadd.xlane.f32.xlu0 %v1046_v60 }
 0x25d   : > { %v5461_v11 = vpop.eup %5460  ;;  %v1028_v18 = vmul.f32 1.442695, %v1005_v4  ;;  %v1030_v45 = vmul.f32 1.442695, %v1006_v2 }
 0x25e   : > { %v5463_v44 = vpop.eup %5462  ;;  %v966_v40 = vpop.permute.xlu1 %965  ;;  %v1048_v39 = vmul.f32 %v5461_v11, %v6456_v47 }
 0x25f   : > { %v971_v22 = vpop.permute.xlu0 %970  ;;  %5472 = vpow2.f32 %v1028_v18  ;;  %v1007_v41 = vsub.f32 %v6605_v21, %v966_v40  ;;  %v1047_v36 = vmul.f32 %v5463_v44, %v6458_v48  ;;  %v8965_v44 = vld [vmem:[#allocation15_spill] sm:$0xff] }
 0x260   : > { %v1008_v13 = vsub.f32 %v6611_v9, %v971_v22  ;;  %5474 = vpow2.f32 %v1030_v45  ;;  %1098 = vadd.xlane.f32.xlu0 %v1048_v39  ;;  %v8966_v22 = vld [vmem:[#allocation13_spill] sm:$0xff] }
 0x261   : > { %v5465_v0 = vpop.eup %5464  ;;  %v1032_v12 = vmul.f32 1.442695, %v1007_v41  ;;  %1096 = vadd.xlane.f32.xlu1 %v1047_v36  ;;  %v1254_v30 = vpack.c.bf16 %v1047_v36, %v1046_v60 }
 0x262   : > { %v1034_v58 = vmul.f32 1.442695, %v1008_v13  ;;  %v5467_v25 = vpop.eup %5466  ;;  %v976_v43 = vpop.permute.xlu1 %975  ;;  %v1049_v5 = vmul.f32 %v5465_v0, %v6471_v63 }
 0x263   : > { %v981_v1 = vpop.permute.xlu0 %980  ;;  %5476 = vpow2.f32 %v1032_v12  ;;  %v1009_v7 = vsub.f32 %v6626_v29, %v976_v43  ;;  %5201 = vmatprep.mubr.bf16.mxu0 %v1254_v30  ;;  %v1050_v9 = vmul.f32 %v5467_v25, %v6462_v53  ;;  %v8967_v25 = vld [vmem:[#allocation19_spill] sm:$0xff] }
 0x264   : > { %v1010_v21 = vsub.f32 %v6631_v50, %v981_v1  ;;  %5478 = vpow2.f32 %v1034_v58  ;;  %1100 = vadd.xlane.f32.xlu0 %v1049_v5  ;;  %v1255_v38 = vpack.c.bf16 %v1049_v5, %v1048_v39 }
 0x265   : > { %v5469_v4 = vpop.eup %5468  ;;  %v1036_v2 = vmul.f32 1.442695, %v1009_v7  ;;  %1102 = vadd.xlane.f32.xlu1 %v1050_v9 }
 0x266   : > { %v1038_v11 = vmul.f32 1.442695, %v1010_v21  ;;  %v5471_v60 = vpop.eup %5470  ;;  %v986_v18 = vpop.permute.xlu1 %985  ;;  %5202 = vmatmul.mubr.bf16.vlgmr.msra.gmra.mrb[0].mxu0 %v1255_v38  ;;  %v1051_v40 = vmul.f32 %v5469_v4, %v8965_v44 }
 0x267   : > { %v991_v45 = vpop.permute.xlu0 %990  ;;  %5480 = vpow2.f32 %v1036_v2  ;;  %v1011_v29 = vsub.f32 %v6646_v51, %v986_v18  ;;  %v1052_v41 = vmul.f32 %v5471_v60, %v8966_v22 }
 0x268   : > { %v1012_v50 = vsub.f32 %v6643_v35, %v991_v45  ;;  %5482 = vpow2.f32 %v1038_v11  ;;  %1104 = vadd.xlane.f32.xlu0 %v1051_v40  ;;  %v1256_v39 = vpack.c.bf16 %v1051_v40, %v1050_v9  ;;  %v8968_v35 = vld [vmem:[#allocation17_spill] sm:$0xff]  ;;  %v5891_v9 = vmov 2   ;;  %v8969_v11 = vld [vmem:[#allocation23_spill] sm:$0xff] }
 0x269   : > { %v5473_v13 = vpop.eup %5472  ;;  %v1040_v36 = vmul.f32 1.442695, %v1011_v29  ;;  %1106 = vadd.xlane.f32.xlu1 %v1052_v41  ;;  %5388 = vset.pattern.permute.xlu0 %v5891_v9 }
 0x26a   : > { %v1042_v0 = vmul.f32 1.442695, %v1012_v50  ;;  %v5475_v12 = vpop.eup %5474  ;;  %v996_v58 = vpop.permute.xlu1 %995  ;;  %5205 = vmatprep.mubr.bf16.mxu0 %v1256_v39  ;;  %v1053_v43 = vmul.f32 %v5473_v13, %v8967_v25  ;;  %5387 = vset.pattern.permute.xlu1 %v5891_v9  ;;  %v8971_v39 = vld [vmem:[#allocation26_spill] sm:$0xff] }
 0x26b   : > { %v7115_v30 = vpop.permute.xlu0 %1165  ;;  %5484 = vpow2.f32 %v1040_v36  ;;  %v1013_v51 = vsub.f32 %v6659_v17, %v996_v58  ;;  %v1054_v1 = vmul.f32 %v5475_v12, %v8968_v35  ;;  %v8970_v17 = vld [vmem:[#allocation21_spill] sm:$0xff] }
 0x26c   : > { %5486 = vpow2.f32 %v1042_v0  ;;  %1108 = vadd.xlane.f32.xlu0 %v1053_v43  ;;  %v1257_v5 = vpack.c.bf16 %v1053_v43, %v1052_v41  ;;  %v8972_v36 = vld [vmem:[#allocation25_spill] sm:$0xff] }
 0x26d   : > { %v5477_v7 = vpop.eup %5476  ;;  %v1044_v21 = vmul.f32 1.442695, %v1013_v51  ;;  %1110 = vadd.xlane.f32.xlu1 %v1054_v1 }
 0x26e   : > { %v5479_v38 = vpop.eup %5478  ;;  %v7120_v4 = vpop.permute.xlu1 %1160  ;;  %5206 = vmatmul.mubr.bf16.gmra.mrb[4].mxu0 %v1257_v5  ;;  %v1055_v60 = vmul.f32 %v5477_v7, %v8969_v11  ;;  %v8974_v5 = vld [vmem:[#allocation31_spill] sm:$0xff] }
 0x26f   : > { %v7122_v2 = vpop.permute.xlu0 %1180  ;;  %5488 = vpow2.f32 %v1044_v21  ;;  %v1056_v18 = vmul.f32 %v5479_v38, %v8970_v17  ;;  %v8975_v21 = vld [vmem:[#allocation29_spill] sm:$0xff] }
 0x270   : > { %1112 = vadd.xlane.f32.xlu0 %v1055_v60  ;;  %v1258_v45 = vpack.c.bf16 %v1055_v60, %v1054_v1 }
 0x271   : > { %v5481_v40 = vpop.eup %5480  ;;  %1114 = vadd.xlane.f32.xlu1 %v1056_v18 }
 0x272   : > { %v5483_v29 = vpop.eup %5482  ;;  %v7126_v50 = vpop.permute.xlu1 %1170  ;;  %5209 = vmatprep.mubr.bf16.mxu0 %v1258_v45  ;;  %v1057_v13 = vmul.f32 %v5481_v40, %v8971_v39 }
 0x273   : > { %v7128_v41 = vpop.permute.xlu0 %1190  ;;  %v1058_v0 = vmul.f32 %v5483_v29, %v8972_v36 }
 0x274   : > { %1116 = vadd.xlane.f32.xlu0 %v1057_v13  ;;  %v1259_v12 = vpack.c.bf16 %v1057_v13, %v1056_v18 }
 0x275   : > { %v5485_v58 = vpop.eup %5484  ;;  %1118 = vadd.xlane.f32.xlu1 %v1058_v0 }
 0x276   : > { %v5487_v43 = vpop.eup %5486  ;;  %v7132_v51 = vpop.permute.xlu1 %1175  ;;  %5210 = vmatmul.mubr.bf16.gmra.mrb[8].mxu0 %v1259_v12  ;;  %v1059_v7 = vmul.f32 %v5485_v58, %v8974_v5 }
 0x277   : > { %v7134_v1 = vpop.permute.xlu0 %1200  ;;  %v1060_v9 = vmul.f32 %v5487_v43, %v8975_v21 }
 0x278   : > { %8973 = vst [vmem:[#allocation74_spill] sm:$0xff] %v7134_v1  ;;  %1120 = vadd.xlane.f32.xlu0 %v1059_v7  ;;  %v1260_v38 = vpack.c.bf16 %v1059_v7, %v1058_v0 }
 0x279   : > { %v5489_v60 = vpop.eup %5488  ;;  %1122 = vadd.xlane.f32.xlu1 %v1060_v9 }
 0x27a   : > { %v7138_v45 = vpop.permute.xlu1 %1185  ;;  %5213 = vmatprep.mubr.bf16.mxu0 %v1260_v38  ;;  %v1061_v40 = vmul.f32 %v5489_v60, %v6619_v6 }
 0x27b   : > { %8976 = vst [vmem:[#allocation75_spill] sm:$0xff] %v7138_v45  ;;  %v7140_v18 = vpop.permute.xlu0 %1210 }
 0x27c   : > { %8977 = vst [vmem:[#allocation76_spill] sm:$0xff] %v7140_v18  ;;  %1124 = vadd.xlane.f32.xlu0 %v1061_v40  ;;  %v1261_v29 = vpack.c.bf16 %v1061_v40, %v1060_v9 }
 0x27e   : > { %v7143_v13 = vpop.permute.xlu1 %1195  ;;  %5214 = vmatmul.mubr.bf16.gmra.mrb[12].mxu0 %v1261_v29 }
 0x27f   : > { %v7145_v12 = vpop.permute.xlu0 %1220 }
 0x280   : > { %8978 = vst [vmem:[#allocation77_spill] sm:$0xff] %v7145_v12 }
 0x282   : > { %v7147_v58 = vpop.permute.xlu1 %1205 }
 0x283   : > { %8979 = vst [vmem:[#allocation78_spill] sm:$0xff] %v7147_v58  ;;  %v7149_v43 = vpop.permute.xlu0 %1230 }
 0x284   : > { %8980 = vst [vmem:[#allocation79_spill] sm:$0xff] %v7149_v43 }
 0x286   : > { %v7151_v0 = vpop.permute.xlu1 %1215 }
 0x287   : > { %8981 = vst [vmem:[#allocation80_spill] sm:$0xff] %v7151_v0  ;;  %v1738_v7 = vpop.permute.xlu0 %1737 }
 0x288   : > { %v1815_v38 = vsub.f32 %v6654_v28, %v1738_v7 }
 0x28a   : > { %v1831_v1 = vmul.f32 1.442695, %v1815_v38  ;;  %v7154_v18 = vpop.permute.xlu1 %1225 }
 0x28b   : > { %8982 = vst [vmem:[#allocation81_spill] sm:$0xff] %v7154_v18 }
 0x28c   : > { %5490 = vpow2.f32 %v1831_v1 }
 0x28e   : > { %v7156_v60 = vpop.permute.xlu1 %1235 }
 0x28f   : > { %8983 = vst [vmem:[#allocation82_spill] sm:$0xff] %v7156_v60 }
 0x292   : > { %v1743_v9 = vpop.permute.xlu1 %1742 }
 0x293   : > { %v1816_v40 = vsub.f32 %v6664_v26, %v1743_v9  ;;  %v1783_v26 = vpop.permute.xlu0 %1782 }
 0x295   : > { %v1833_v12 = vmul.f32 1.442695, %v1816_v40 }
 0x296   : > { %v5491_v29 = vpop.eup %5490  ;;  %v1748_v45 = vpop.permute.xlu1 %1747 }
 0x297   : > { %v1863_v58 = vmul.f32 %v5491_v29, %v6449_v42  ;;  %5492 = vpow2.f32 %v1833_v12  ;;  %v1817_v43 = vsub.f32 %v6675_v24, %v1748_v45 }
 0x299   : > { %1912 = vadd.xlane.f32.xlu1 %v1863_v58  ;;  %v1835_v0 = vmul.f32 1.442695, %v1817_v43 }
 0x29a   : > { %v1753_v28 = vpop.permute.xlu1 %1752 }
 0x29b   : > { %5494 = vpow2.f32 %v1835_v0  ;;  %v1818_v7 = vsub.f32 %v6670_v52, %v1753_v28  ;;  %v1793_v0 = vpop.permute.xlu0 %1792 }
 0x29d   : > { %v1837_v1 = vmul.f32 1.442695, %v1818_v7  ;;  %v1824_v7 = vsub.f32 %v6703_v57, %v1783_v26 }
 0x29e   : > { %v1758_v38 = vpop.permute.xlu1 %1757 }
 0x29f   : > { %5496 = vpow2.f32 %v1837_v1  ;;  %v1819_v18 = vsub.f32 %v6686_v10, %v1758_v38  ;;  %v1803_v38 = vpop.permute.xlu0 %1802 }
 0x2a1   : > { %v5493_v9 = vpop.eup %5492  ;;  %v1839_v40 = vmul.f32 1.442695, %v1819_v18 }
 0x2a2   : > { %v1763_v60 = vpop.permute.xlu1 %1762  ;;  %v1864_v29 = vmul.f32 %v5493_v9, %v6458_v48  ;;  %v1064_v9 = vld [vmem:[#allocation3 + $0x10] sm:$0xff]  ;;  %v9048_v48 = vld [vmem:[#allocation81_spill] sm:$0xff] }
 0x2a3   : > { %5498 = vpow2.f32 %v1839_v40  ;;  %v1820_v24 = vsub.f32 %v6681_v31, %v1763_v60  ;;  %v1849_v40 = vmul.f32 1.442695, %v1824_v7 }
 0x2a4   : > { %1914 = vadd.xlane.f32.xlu0 %v1864_v29  ;;  %v2073_v45 = vpack.c.bf16 %v1864_v29, %v1863_v58  ;;  %v1826_v29 = vsub.f32 %v6712_v3, %v1793_v0  ;;  %v8984_v0 = vld [vmem:[#allocation38_spill] sm:$0xff] }
 0x2a5   : > { %v5495_v12 = vpop.eup %5494  ;;  %v1841_v43 = vmul.f32 1.442695, %v1820_v24 }
 0x2a6   : > { %v1768_v52 = vpop.permute.xlu1 %1767  ;;  %5233 = vmatprep.mubr.bf16.mxu1 %v2073_v45  ;;  %v7166_v28 = vmul.f32 %v5495_v12, %v6456_v47  ;;  %v1853_v12 = vmul.f32 1.442695, %v1826_v29  ;;  %v8986_v29 = vld [vmem:[#allocation39_spill] sm:$0xff] }
 0x2a7   : > { %5500 = vpow2.f32 %v1841_v43  ;;  %v1821_v10 = vsub.f32 %v6697_v8, %v1768_v52  ;;  %v1828_v43 = vsub.f32 %v6720_v15, %v1803_v38 }
 0x2a8   : > { %1916 = vadd.xlane.f32.xlu0 %v7166_v28 }
 0x2a9   : > { %v5497_v18 = vpop.eup %5496  ;;  %v1843_v1 = vmul.f32 1.442695, %v1821_v10  ;;  %v1813_v10 = vpop.permute.xlu0 %1812 }
 0x2aa   : > { %v1773_v31 = vpop.permute.xlu1 %1772  ;;  %v7172_v58 = vmul.f32 %v5497_v18, %v6471_v63 }
 0x2ab   : > { %5502 = vpow2.f32 %v1843_v1  ;;  %v1822_v60 = vsub.f32 %v6692_v56, %v1773_v31  ;;  %v1857_v31 = vmul.f32 1.442695, %v1828_v43 }
 0x2ac   : > { %1918 = vadd.xlane.f32.xlu1 %v7172_v58 }
 0x2ad   : > { %v5499_v8 = vpop.eup %5498  ;;  %v1845_v24 = vmul.f32 1.442695, %v1822_v60  ;;  %v8985_v60 = vld [vmem:[#allocation40_spill] sm:$0xff] }
 0x2ae   : > { %v1778_v57 = vpop.permute.xlu1 %1777  ;;  %v7180_v26 = vmul.f32 %v5499_v8, %v6462_v53  ;;  %v1830_v8 = vsub.f32 %v8985_v60, %v1813_v10  ;;  %v8987_v10 = vld [vmem:[#allocation41_spill] sm:$0xff] }
 0x2af   : > { %5504 = vpow2.f32 %v1845_v24  ;;  %v1823_v45 = vsub.f32 %v6708_v32, %v1778_v57 }
 0x2b0   : > { %1920 = vadd.xlane.f32.xlu0 %v7180_v26  ;;  %5506 = vpow2.f32 %v1849_v40 }
 0x2b1   : > { %v5501_v56 = vpop.eup %5500  ;;  %v1847_v52 = vmul.f32 1.442695, %v1823_v45  ;;  %v1861_v45 = vmul.f32 1.442695, %v1830_v8 }
 0x2b2   : > { %v1788_v18 = vpop.permute.xlu1 %1787  ;;  %v7186_v3 = vmul.f32 %v5501_v56, %v8965_v44 }
 0x2b3   : > { %5508 = vpow2.f32 %v1847_v52  ;;  %v1825_v7 = vsub.f32 %v8984_v0, %v1788_v18  ;;  %v5408_v0 = vld [vmem:[%s6020_s8 + $0x28] sm:$0xff]  }
 0x2b4   : > { %1922 = vadd.xlane.f32.xlu1 %v7186_v3  ;;  %5510 = vpow2.f32 %v1853_v12 }
 0x2b5   : > { %v5503_v1 = vpop.eup %5502  ;;  %v1851_v15 = vmul.f32 1.442695, %v1825_v7 }
 0x2b6   : > { %v1798_v38 = vpop.permute.xlu1 %1797  ;;  %v7194_v40 = vmul.f32 %v5503_v1, %v8966_v22  ;;  %v9003_v22 = vld [vmem:[#allocation43_spill] sm:$0xff] }
 0x2b7   : > { %5512 = vpow2.f32 %v1851_v15  ;;  %v1827_v24 = vsub.f32 %v8986_v29, %v1798_v38  ;;  %v1062_v15 = vld [vmem:[#allocation3] sm:$0xff] }
 0x2b8   : > { %1924 = vadd.xlane.f32.xlu0 %v7194_v40  ;;  %5514 = vpow2.f32 %v1857_v31  ;;  %v1078_v32 = vmul.f32 %v6891_v59, %v1062_v15  ;;  %v1065_v59 = vld [vmem:[#allocation3 + $0x18] sm:$0xff] }
 0x2b9   : > { %v5505_v57 = vpop.eup %5504  ;;  %v1855_v56 = vmul.f32 1.442695, %v1827_v24 }
 0x2ba   : > { %v1808_v52 = vpop.permute.xlu1 %1807  ;;  %v7199_v12 = vmul.f32 %v5505_v57, %v8967_v25  ;;  %v5507_v43 = vpop.eup %5506 }
 0x2bb   : > { %5516 = vpow2.f32 %v1855_v56  ;;  %v1829_v18 = vsub.f32 %v8987_v10, %v1808_v52  ;;  %v7209_v60 = vmul.f32 %v5507_v43, %v8969_v11  ;;  %v5690_v11 = vld [vmem:[%s6005_s13 + $0x40] sm:$0xff] }
 0x2bc   : > { %1926 = vadd.xlane.f32.xlu1 %v7199_v12  ;;  %5518 = vpow2.f32 %v1861_v45  ;;  %v5406_v45 = vld [vmem:[%s6020_s8 + $0x18] sm:$0xff]  }
 0x2bd   : > { %v5509_v7 = vpop.eup %5508  ;;  %v1859_v1 = vmul.f32 1.442695, %v1829_v18  ;;  %v5404_v18 = vld [vmem:[%s6020_s8 + $0x8] sm:$0xff]  }
 0x2be   : > { %v7206_v31 = vmul.f32 %v5509_v7, %v8968_v35  ;;  %v5511_v8 = vpop.eup %5510 }
 0x2bf   : > { %5520 = vpow2.f32 %v1859_v1  ;;  %v7219_v24 = vmul.f32 %v5511_v8, %v8971_v39  ;;  %v7294_v39 = vld [vmem:[%s6005_s13 + $0x30] sm:$0xff] }
 0x2c0   : > { %1928 = vadd.xlane.f32.xlu0 %v7206_v31  ;;  %1930 = vadd.xlane.f32.xlu1 %v7209_v60 }
 0x2c1   : > { %v5513_v38 = vpop.eup %5512 }
 0x2c2   : > { %v7216_v29 = vmul.f32 %v5513_v38, %v8970_v17  ;;  %v5515_v57 = vpop.eup %5514 }
 0x2c3   : > { %v7229_v43 = vmul.f32 %v5515_v57, %v8974_v5  ;;  %v5402_v57 = vld [vmem:[%s6020_s8] sm:$0xff]  }
 0x2c4   : > { %1932 = vadd.xlane.f32.xlu0 %v7216_v29  ;;  %1934 = vadd.xlane.f32.xlu1 %v7219_v24  ;;  %v7282_v5 = vld [vmem:[%s6005_s13 + $0x20] sm:$0xff] }
 0x2c5   : > { %v5517_v56 = vpop.eup %5516 }
 0x2c6   : > { %v7226_v52 = vmul.f32 %v5517_v56, %v8972_v36  ;;  %v5519_v10 = vpop.eup %5518  ;;  %v5403_v56 = vld [vmem:[%s6020_s8 + $0x10] sm:$0xff]  }
 0x2c7   : > { %v7239_v8 = vmul.f32 %v5519_v10, %v6619_v6  ;;  %v5407_v10 = vld [vmem:[%s6020_s8 + $0x30] sm:$0xff]  }
 0x2c8   : > { %1936 = vadd.xlane.f32.xlu0 %v7226_v52  ;;  %1938 = vadd.xlane.f32.xlu1 %v7229_v43 }
 0x2c9   : > { %v5521_v7 = vpop.eup %5520 }
 0x2ca   : > { %v7236_v1 = vmul.f32 %v5521_v7, %v8975_v21  ;;  %v5405_v7 = vld [vmem:[%s6020_s8 + $0x20] sm:$0xff]   ;;  %v5409_v21 = vld [vmem:[%s6020_s8 + $0x38] sm:$0xff]  }
 0x2cc   : > { %1940 = vadd.xlane.f32.xlu0 %v7236_v1  ;;  %1942 = vadd.xlane.f32.xlu1 %v7239_v8 }
 0x2dd   : > { %2137 = vrot.lane.b32.xlu1 %v5402_v57, %s5892_s17  ;;  %v1063_v57 = vld [vmem:[#allocation3 + $0x8] sm:$0xff] }
 0x2e1   : > { %2141 = vrot.lane.b32.xlu1 %v5403_v56, %s5892_s17  ;;  %v1079_v56 = vmul.f32 %v6873_v61, %v1063_v57 }
 0x2e2   : > { %2139 = vrot.lane.b32.xlu0 %v5404_v18, %s5892_s17  ;;  %v1080_v18 = vmul.f32 %v6919_v37, %v1064_v9  ;;  %v7266_v37 = vld [vmem:[%s6005_s13 + $0x10] sm:$0xff] }
 0x2e5   : > { %2145 = vrot.lane.b32.xlu1 %v5405_v7, %s5892_s17  ;;  %v7258_v7 = vld [vmem:[%s6005_s13] sm:$0xff] }
 0x2e6   : > { %2143 = vrot.lane.b32.xlu0 %v5406_v45, %s5892_s17 }
 0x2e9   : > { %2149 = vrot.lane.b32.xlu1 %v5407_v10, %s5892_s17  ;;  %v1095_v38 = vpop.xlane.xlu0 %1094 }
 0x2ea   : > { %v1126_v6 = vadd.f32 %v1095_v38, %v1078_v32  ;;  %2147 = vrot.lane.b32.xlu0 %v5408_v0, %s5892_s17  ;;  %v1066_v32 = vld [vmem:[#allocation3 + $0x20] sm:$0xff]  ;;  %v1067_v38 = vld [vmem:[#allocation3 + $0x28] sm:$0xff] }
 0x2eb   : > { %v1082_v61 = vmul.f32 %v6899_v55, %v1066_v32  ;;  %v8989_v55 = vld [vmem:[#allocation47_spill] sm:$0xff] }
 0x2ec   : > { %1456 = vst.msk [vmem:[#allocation3] sm:$0xff] %vm1439_vm2, %v1126_v6  ;;  %v1081_v6 = vmul.f32 %v6945_v20, %v1065_v59 }
 0x2ed   : > { %2328 = vperm.xlu1 %5387, %v7258_v7   ;;  %v1099_v45 = vpop.xlane.xlu0 %1098 }
 0x2ee   : > { %v1097_v15 = vpop.xlane.xlu1 %1096  ;;  %v1128_v10 = vadd.f32 %v1099_v45, %v1080_v18  ;;  %2151 = vrot.lane.b32.xlu0 %v5409_v21, %s5892_s17  ;;  %v7270_v18 = vld [vmem:[%s6005_s13 + $0x8] sm:$0xff]  ;;  %v8988_v45 = vld [vmem:[#allocation53_spill] sm:$0xff] }
 0x2ef   : > { %v1127_v0 = vadd.f32 %v1097_v15, %v1079_v56  ;;  %v1068_v56 = vld [vmem:[#allocation3 + $0x30] sm:$0xff]  ;;  %v1083_v59 = vmul.f32 %v8988_v45, %v1067_v38  ;;  %v7290_v45 = vld [vmem:[%s6005_s13 + $0x28] sm:$0xff] }
 0x2f0   : > { %1458 = vst.msk [vmem:[#allocation3 + $0x10] sm:$0xff] %vm1439_vm2, %v1128_v10  ;;  %v1084_v15 = vmul.f32 %v8989_v55, %v1068_v56  ;;  %v7278_v10 = vld [vmem:[%s6005_s13 + $0x18] sm:$0xff]  ;;  %v8991_v56 = vld [vmem:[#allocation50_spill] sm:$0xff]  ;;  %v1071_v55 = vld [vmem:[#allocation3 + $0x48] sm:$0xff] }
 0x2f1   : > { %1457 = vst.msk [vmem:[#allocation3 + $0x8] sm:$0xff] %vm1439_vm2, %v1127_v0  ;;  %2336 = vperm.xlu1 %5387, %v7266_v37   ;;  %v1101_v9 = vpop.xlane.xlu0 %1100  ;;  %v1069_v0 = vld [vmem:[#allocation3 + $0x38] sm:$0xff] }
 0x2f2   : > { %v1103_v57 = vpop.xlane.xlu1 %1102  ;;  %v1129_v21 = vadd.f32 %v1101_v9, %v1081_v6  ;;  %2332 = vperm.xlu0 %5388, %v7270_v18  }
 0x2f3   : > { %v1130_v20 = vadd.f32 %v1103_v57, %v1082_v61  ;;  %v1070_v61 = vld [vmem:[#allocation3 + $0x40] sm:$0xff] }
 0x2f4   : > { %1459 = vst.msk [vmem:[#allocation3 + $0x18] sm:$0xff] %vm1439_vm2, %v1129_v21  ;;  %v8990_v57 = vld [vmem:[#allocation58_spill] sm:$0xff] }
 0x2f5   : > { %1460 = vst.msk [vmem:[#allocation3 + $0x20] sm:$0xff] %vm1439_vm2, %v1130_v20  ;;  %2340 = vperm.xlu1 %5387, %v7278_v10   ;;  %v1105_v32 = vpop.xlane.xlu0 %1104  ;;  %v1085_v21 = vmul.f32 %v8990_v57, %v1069_v0  ;;  %v1086_v20 = vmul.f32 %v8991_v56, %v1070_v61  ;;  %v8993_v61 = vld [vmem:[#allocation55_spill] sm:$0xff]  ;;  %v7302_v57 = vld [vmem:[%s6005_s13 + $0x38] sm:$0xff] }
 0x2f6   : > { %v1107_v6 = vpop.xlane.xlu1 %1106  ;;  %v1131_v9 = vadd.f32 %v1105_v32, %v1083_v59  ;;  %2344 = vperm.xlu0 %5388, %v7282_v5   ;;  %v1073_v56 = vld [vmem:[#allocation3 + $0x58] sm:$0xff] }
 0x2f7   : > { %v1132_v38 = vadd.f32 %v1107_v6, %v1084_v15  ;;  %v1072_v15 = vld [vmem:[#allocation3 + $0x50] sm:$0xff] }
 0x2f8   : > { %1461 = vst.msk [vmem:[#allocation3 + $0x28] sm:$0xff] %vm1439_vm2, %v1131_v9  ;;  %v8992_v6 = vld [vmem:[#allocation64_spill] sm:$0xff] }
 0x2f9   : > { %1462 = vst.msk [vmem:[#allocation3 + $0x30] sm:$0xff] %vm1439_vm2, %v1132_v38  ;;  %2348 = vperm.xlu1 %5387, %v7290_v45   ;;  %v1109_v59 = vpop.xlane.xlu0 %1108  ;;  %v1087_v9 = vmul.f32 %v8992_v6, %v1071_v55  ;;  %v1088_v38 = vmul.f32 %v8993_v61, %v1072_v15  ;;  %v1089_v55 = vmul.f32 %v7051_v54, %v1073_v56  ;;  %v1075_v61 = vld [vmem:[#allocation3 + $0x68] sm:$0xff] }
 0x2fa   : > { %v1111_v32 = vpop.xlane.xlu1 %1110  ;;  %v1133_v36 = vadd.f32 %v1109_v59, %v1085_v21  ;;  %2352 = vperm.xlu0 %5388, %v7294_v39   ;;  %v8995_v56 = vld [vmem:[#allocation67_spill] sm:$0xff] }
 0x2fb   : > { %v1134_v0 = vadd.f32 %v1111_v32, %v1086_v20  ;;  %v1074_v20 = vld [vmem:[#allocation3 + $0x60] sm:$0xff]  ;;  %v8994_v32 = vld [vmem:[#allocation61_spill] sm:$0xff] }
 0x2fc   : > { %1463 = vst.msk [vmem:[#allocation3 + $0x38] sm:$0xff] %vm1439_vm2, %v1133_v36  ;;  %v1090_v15 = vmul.f32 %v8994_v32, %v1074_v20  ;;  %v7323_v20 = vld [vmem:[%s6005_s13 + $0x58] sm:$0xff] }
 0x2fd   : > { %1464 = vst.msk [vmem:[#allocation3 + $0x40] sm:$0xff] %vm1439_vm2, %v1134_v0  ;;  %2356 = vperm.xlu1 %5387, %v7302_v57   ;;  %v1113_v21 = vpop.xlane.xlu0 %1112  ;;  %v7311_v0 = vld [vmem:[%s6005_s13 + $0x48] sm:$0xff] }
 0x2fe   : > { %v1115_v59 = vpop.xlane.xlu1 %1114  ;;  %v1135_v17 = vadd.f32 %v1113_v21, %v1087_v9  ;;  %2360 = vperm.xlu0 %5388, %v5690_v11   ;;  %v7315_v21 = vld [vmem:[%s6005_s13 + $0x50] sm:$0xff] }
 0x2ff   : > { %v1136_v36 = vadd.f32 %v1115_v59, %v1088_v38  ;;  %v1091_v38 = vmul.f32 %v7068_v34, %v1075_v61  ;;  %v5695_v61 = vld [vmem:[%s6005_s13 + $0x68] sm:$0xff] }
 0x300   : > { %1465 = vst.msk [vmem:[#allocation3 + $0x48] sm:$0xff] %vm1439_vm2, %v1135_v17  ;;  %v1076_v17 = vld [vmem:[#allocation3 + $0x70] sm:$0xff] }
 0x301   : > { %1466 = vst.msk [vmem:[#allocation3 + $0x50] sm:$0xff] %vm1439_vm2, %v1136_v36  ;;  %2364 = vperm.xlu1 %5387, %v7311_v0   ;;  %v1117_v6 = vpop.xlane.xlu0 %1116  ;;  %v1092_v59 = vmul.f32 %v8995_v56, %v1076_v17  ;;  %v8996_v56 = vmov 0  }
 0x302   : > { %v1119_v9 = vpop.xlane.xlu1 %1118  ;;  %v1137_v11 = vadd.f32 %v1117_v6, %v1089_v55  ;;  %2368 = vperm.xlu0 %5388, %v7315_v21   ;;  %v1077_v55 = vld [vmem:[#allocation3 + $0x78] sm:$0xff] }
 0x303   : > { %v1138_v54 = vadd.f32 %v1119_v9, %v1090_v15  ;;  %v7327_v15 = vld [vmem:[%s6005_s13 + $0x60] sm:$0xff]  ;;  %v1093_v34 = vmul.f32 %v7076_v23, %v1077_v55  ;;  %v8999_v55 = vld [vmem:[#allocation44_spill] sm:$0xff] }
 0x304   : > { %1467 = vst.msk [vmem:[#allocation3 + $0x58] sm:$0xff] %vm1439_vm2, %v1137_v11 }
 0x305   : > { %1468 = vst.msk [vmem:[#allocation3 + $0x60] sm:$0xff] %vm1439_vm2, %v1138_v54  ;;  %2372 = vperm.xlu1 %5387, %v7323_v20   ;;  %v1121_v36 = vpop.xlane.xlu0 %1120  ;;  %v7335_v54 = vld [vmem:[%s6005_s13 + $0x70] sm:$0xff] }
 0x306   : > { %v1123_v32 = vpop.xlane.xlu1 %1122  ;;  %v1139_v6 = vadd.f32 %v1121_v36, %v1091_v38  ;;  %2376 = vperm.xlu0 %5388, %v7327_v15   ;;  %v5697_v38 = vld [vmem:[%s6005_s13 + $0x78] sm:$0xff] }
 0x307   : > { %v1140_v9 = vadd.f32 %v1123_v32, %v1092_v59  ;;  %v8997_v59 = vld [vmem:[#allocation42_spill] sm:$0xff]  ;;  %v9000_v32 = vsub.f32 %v8999_v55, %v6897_v16  ;;  %v8809_v16 = vmov 3  }
 0x308   : > { %1469 = vst.msk [vmem:[#allocation3 + $0x68] sm:$0xff] %vm1439_vm2, %v1139_v6  ;;  %v8998_v36 = vsub.f32 %v8997_v59, %v6868_v27  ;;  %v9004_v27 = vsub.f32 %v9003_v22, %v6894_v33 }
 0x309   : > { %1470 = vst.msk [vmem:[#allocation3 + $0x70] sm:$0xff] %vm1439_vm2, %v1140_v9  ;;  %2380 = vperm.xlu1 %5387, %v5695_v61   ;;  %v1125_v11 = vpop.xlane.xlu0 %1124  ;;  %v1705_v6 = vmul.f32 1.442695, %v9000_v32  ;;  %v9001_v61 = vld [vmem:[#allocation46_spill] sm:$0xff]  ;;  %v1881_v32 = vld [vmem:[#allocation3 + $0x88] sm:$0xff] }
 0x30a   : > { %v1141_v17 = vadd.f32 %v1125_v11, %v1093_v34  ;;  %2384 = vperm.xlu0 %5388, %v7335_v54   ;;  %v1703_v23 = vmul.f32 1.442695, %v8998_v36  ;;  %v1880_v34 = vld [vmem:[#allocation3 + $0x80] sm:$0xff]  ;;  %v9002_v11 = vsub.f32 %v9001_v61, %v6925_v49  ;;  %v1709_v59 = vmul.f32 1.442695, %v9004_v27  ;;  %v9005_v36 = vld [vmem:[#allocation49_spill] sm:$0xff] }
 0x30b   : > { %v1882_v61 = vld [vmem:[#allocation3 + $0x90] sm:$0xff] }
 0x30c   : > { %1471 = vst.msk [vmem:[#allocation3 + $0x78] sm:$0xff] %vm1439_vm2, %v1141_v17  ;;  %5522 = vpow2.f32 %v1703_v23  ;;  %v1707_v17 = vmul.f32 1.442695, %v9002_v11  ;;  %v9006_v23 = vsub.f32 %v9005_v36, %v6951_v46 }
 0x30d   : > { %2388 = vperm.xlu1 %5387, %v5697_v38   ;;  %5524 = vpow2.f32 %v1705_v6  ;;  %v9007_v6 = vld [vmem:[#allocation45_spill] sm:$0xff] }
 0x30e   : > { %5526 = vpow2.f32 %v1707_v17  ;;  %5390 = vset.pattern.permute.xlu0 %v8809_v16  ;;  %v1711_v49 = vmul.f32 1.442695, %v9006_v23  ;;  %v9009_v17 = vld [vmem:[#allocation52_spill] sm:$0xff]  ;;  %v1883_v23 = vld [vmem:[#allocation3 + $0x98] sm:$0xff]  ;;  %v9013_v16 = vld [vmem:[#allocation51_spill] sm:$0xff] }
 0x30f   : > { %5528 = vpow2.f32 %v1709_v59  ;;  %v9010_v46 = vsub.f32 %v9009_v17, %v6977_v19 }
 0x310   : > { %5530 = vpow2.f32 %v1711_v49  ;;  %v1142_v49 = vld [vmem:[#allocation4] sm:$0xff] }
 0x311   : > { %5389 = vset.pattern.permute.xlu1 %v8996_v56  ;;  %v1238_v17 = vmul.f32 %v7120_v4, %v1142_v49 }
 0x316   : > { %v7347_v9 = vpop.eup %5522 }
 0x317   : > { %v1896_v38 = vmul.f32 %v7347_v9, %v1880_v34  ;;  %v7361_v55 = vpop.eup %5524 }
 0x318   : > { %v1897_v33 = vmul.f32 %v7361_v55, %v1881_v32  ;;  %v7367_v22 = vpop.eup %5526 }
 0x319   : > { %v1898_v27 = vmul.f32 %v7367_v22, %v1882_v61  ;;  %v7374_v59 = vpop.eup %5528 }
 0x31a   : > { %v1899_v61 = vmul.f32 %v7374_v59, %v1883_v23  ;;  %v9017_v23 = vld [vmem:[#allocation60_spill] sm:$0xff] }
 0x326   : > { %v1913_v35 = vpop.xlane.xlu1 %1912 }
 0x327   : > { %v1944_v25 = vadd.f32 %v1913_v35, %v1896_v38  ;;  %v9008_v35 = vsub.f32 %v9007_v6, %v6922_v62  ;;  %v1715_v38 = vmul.f32 1.442695, %v9010_v46  ;;  %v1144_v62 = vld [vmem:[#allocation4 + $0x10] sm:$0xff] }
 0x328   : > { %v9011_v6 = vld [vmem:[#allocation48_spill] sm:$0xff]  ;;  %v1240_v19 = vmul.f32 %v7126_v50, %v1144_v62 }
 0x329   : > { %2290 = vst.msk [vmem:[#allocation3 + $0x80] sm:$0xff] %vm1439_vm2, %v1944_v25  ;;  %v1713_v34 = vmul.f32 1.442695, %v9008_v35  ;;  %v9012_v35 = vsub.f32 %v9011_v6, %v6948_v14  ;;  %v9014_v14 = vld [vmem:[#allocation54_spill] sm:$0xff] }
 0x32a   : > { %v9015_v6 = vsub.f32 %v9013_v16, %v9014_v14 }
 0x32b   : > { %5532 = vpow2.f32 %v1713_v34  ;;  %v1145_v34 = vld [vmem:[#allocation4 + $0x18] sm:$0xff] }
 0x32c   : > { %5534 = vpow2.f32 %v1715_v38  ;;  %v1721_v38 = vmul.f32 1.442695, %v9015_v6  ;;  %v9023_v6 = vld [vmem:[#allocation66_spill] sm:$0xff] }
 0x331   : > { %v1915_v25 = vpop.xlane.xlu0 %1914 }
 0x332   : > { %v1945_v11 = vadd.f32 %v1915_v25, %v1897_v33  ;;  %v1717_v33 = vmul.f32 1.442695, %v9012_v35  ;;  %v1143_v25 = vld [vmem:[#allocation4 + $0x8] sm:$0xff]  ;;  %v1241_v35 = vmul.f32 %v7132_v51, %v1145_v34 }
 0x333   : > { %v1239_v4 = vmul.f32 %v7115_v30, %v1143_v25  ;;  %v1146_v30 = vld [vmem:[#allocation4 + $0x20] sm:$0xff] }
 0x334   : > { %2291 = vst.msk [vmem:[#allocation3 + $0x88] sm:$0xff] %vm1439_vm2, %v1945_v11  ;;  %v7382_v11 = vpop.eup %5530  ;;  %5536 = vpow2.f32 %v1717_v33 }
 0x335   : > { %v1917_v36 = vpop.xlane.xlu0 %1916  ;;  %v7396_v34 = vpop.eup %5532  ;;  %5538 = vpow2.f32 %v1721_v38 }
 0x336   : > { %v1946_v32 = vadd.f32 %v1917_v36, %v1898_v27  ;;  %v1884_v36 = vld [vmem:[#allocation3 + $0xa0] sm:$0xff] }
 0x337   : > { %v1900_v51 = vmul.f32 %v7382_v11, %v1884_v36  ;;  %v9022_v36 = vld [vmem:[#allocation63_spill] sm:$0xff] }
 0x338   : > { %2292 = vst.msk [vmem:[#allocation3 + $0x90] sm:$0xff] %vm1439_vm2, %v1946_v32  ;;  %v9016_v32 = vld [vmem:[#allocation57_spill] sm:$0xff] }
 0x339   : > { %v5203_v46 = vpop.f32.mrb[0].mxu0  ;;  %v1919_v27 = vpop.xlane.xlu1 %1918  ;;  %v9018_v44 = vsub.f32 %v9016_v32, %v9017_v23  ;;  %v1147_v32 = vld [vmem:[#allocation4 + $0x28] sm:$0xff] }
 0x33a   : > { %v1425_v53 = vadd.f32 %v5203_v46, %v1240_v19  ;;  %v1947_v50 = vadd.f32 %v1919_v27, %v1899_v61  ;;  %v1360_v62 = vpop.f32.mrb[1].mxu0  ;;  %v1148_v19 = vld [vmem:[#allocation4 + $0x30] sm:$0xff]  ;;  %v1149_v27 = vld [vmem:[#allocation4 + $0x38] sm:$0xff]  ;;  %v7410_v23 = vpop.eup %5534 }
 0x33b   : > { %v1719_v63 = vmul.f32 1.442695, %v9018_v44  ;;  %v1423_v49 = vadd.f32 %v1360_v62, %v1238_v17  ;;  %v5204_v47 = vpop.f32.mrb[2].mxu0  ;;  %v1885_v44 = vld [vmem:[#allocation3 + $0xa8] sm:$0xff]  ;;  %v1244_v62 = vmul.f32 %v7128_v41, %v1148_v19  ;;  %v9026_v41 = vld [vmem:[#allocation65_spill] sm:$0xff] }
 0x33c   : > { %1475 = vst.msk [vmem:[#allocation4 + $0x10] sm:$0xff] %vm1472_vm3, %v1425_v53  ;;  %v1426_v16 = vadd.f32 %v5204_v47, %v1241_v35  ;;  %v1363_v14 = vpop.f32.mrb[3].mxu0  ;;  %v9019_v53 = vld [vmem:[#allocation56_spill] sm:$0xff]  ;;  %v9020_v17 = vld [vmem:[#allocation59_spill] sm:$0xff]  ;;  %v9024_v35 = vsub.f32 %v9022_v36, %v9023_v6  ;;  %v1901_v38 = vmul.f32 %v7396_v34, %v1885_v44  ;;  %v9029_v6 = vld [vmem:[#allocation69_spill] sm:$0xff] }
 0x33d   : > { %2293 = vst.msk [vmem:[#allocation3 + $0x98] sm:$0xff] %vm1439_vm2, %v1947_v50  ;;  %v1424_v33 = vadd.f32 %v1363_v14, %v1239_v4  ;;  %v1921_v61 = vpop.xlane.xlu0 %1920  ;;  %v9021_v46 = vsub.f32 %v9019_v53, %v9020_v17  ;;  %5540 = vpow2.f32 %v1719_v63  ;;  %v1242_v4 = vmul.f32 %v7122_v2, %v1146_v30  ;;  %v9025_v53 = vld [vmem:[#allocation62_spill] sm:$0xff]  ;;  %v9030_v2 = vld [vmem:[#allocation71_spill] sm:$0xff] }
 0x33e   : > { %1473 = vst.msk [vmem:[#allocation4] sm:$0xff] %vm1472_vm3, %v1423_v49  ;;  %1476 = vst.msk [vmem:[#allocation4 + $0x18] sm:$0xff] %vm1472_vm3, %v1426_v16  ;;  %v1948_v25 = vadd.f32 %v1921_v61, %v1900_v51  ;;  %v1723_v50 = vmul.f32 1.442695, %v9024_v35  ;;  %v1886_v16 = vld [vmem:[#allocation3 + $0xb0] sm:$0xff]  ;;  %v1245_v14 = vmul.f32 %v7143_v13, %v1149_v27  ;;  %v9027_v19 = vsub.f32 %v9025_v53, %v9026_v41  ;;  %v1153_v53 = vld [vmem:[#allocation4 + $0x58] sm:$0xff] }
 0x33f   : > { %v1725_v47 = vmul.f32 1.442695, %v9021_v46  ;;  %1474 = vst.msk [vmem:[#allocation4 + $0x8] sm:$0xff] %vm1472_vm3, %v1424_v33  ;;  %v9031_v30 = vsub.f32 %v9029_v6, %v9030_v2  ;;  %v9037_v41 = vld [vmem:[#allocation72_spill] sm:$0xff]  ;;  %v1151_v6 = vld [vmem:[#allocation4 + $0x48] sm:$0xff] }
 0x340   : > { %2294 = vst.msk [vmem:[#allocation3 + $0xa0] sm:$0xff] %vm1439_vm2, %v1948_v25  ;;  %v1729_v17 = vmul.f32 1.442695, %v9027_v19  ;;  %v9028_v25 = vld [vmem:[#allocation75_spill] sm:$0xff]  ;;  %v9038_v19 = vld [vmem:[#allocation73_spill] sm:$0xff] }
 0x341   : > { %v5207_v49 = vpop.f32.mrb[4].mxu0  ;;  %v1923_v63 = vpop.xlane.xlu1 %1922  ;;  %5542 = vpow2.f32 %v1725_v47  ;;  %v1243_v46 = vmul.f32 %v9028_v25, %v1147_v32  ;;  %v1727_v35 = vmul.f32 1.442695, %v9031_v30  ;;  %v1902_v47 = vmul.f32 %v7410_v23, %v1886_v16  ;;  %v9041_v30 = vld [vmem:[#allocation74_spill] sm:$0xff] }
 0x342   : > { %v1429_v51 = vadd.f32 %v5207_v49, %v1244_v62  ;;  %v1949_v33 = vadd.f32 %v1923_v63, %v1901_v38  ;;  %v1376_v61 = vpop.f32.mrb[5].mxu0  ;;  %5544 = vpow2.f32 %v1723_v50  ;;  %v7424_v62 = vpop.eup %5536  ;;  %v1152_v38 = vld [vmem:[#allocation4 + $0x50] sm:$0xff]  ;;  %v1887_v50 = vld [vmem:[#allocation3 + $0xb8] sm:$0xff]  ;;  %v1150_v49 = vld [vmem:[#allocation4 + $0x40] sm:$0xff]  ;;  %v9039_v25 = vsub.f32 %v9037_v41, %v9038_v19 }
 0x343   : > { %v1427_v44 = vadd.f32 %v1376_v61, %v1242_v4  ;;  %v5208_v36 = vpop.f32.mrb[6].mxu0  ;;  %9032 = vst [vmem:[#allocation38_spill] sm:$0xff] %v7424_v62  ;;  %5546 = vpow2.f32 %v1729_v17  ;;  %v9034_v61 = vld [vmem:[#allocation70_spill] sm:$0xff]  ;;  %v7432_v16 = vpop.eup %5538  ;;  %v1903_v17 = vmul.f32 %v7424_v62, %v1887_v50 }
 0x344   : > { %1479 = vst.msk [vmem:[#allocation4 + $0x30] sm:$0xff] %vm1472_vm3, %v1429_v51  ;;  %v1430_v13 = vadd.f32 %v5208_v36, %v1245_v14  ;;  %v1379_v27 = vpop.f32.mrb[7].mxu0  ;;  %v9033_v51 = vld [vmem:[#allocation68_spill] sm:$0xff]  ;;  %9036 = vst [vmem:[#allocation40_spill] sm:$0xff] %v7432_v16  ;;  %5548 = vpow2.f32 %v1727_v35 }
 0x345   : > { %2295 = vst.msk [vmem:[#allocation3 + $0xa8] sm:$0xff] %vm1439_vm2, %v1949_v33  ;;  %v1428_v32 = vadd.f32 %v1379_v27, %v1243_v46  ;;  %v1925_v4 = vpop.xlane.xlu0 %1924  ;;  %v9035_v33 = vsub.f32 %v9033_v51, %v9034_v61  ;;  %v1731_v46 = vmul.f32 1.442695, %v9039_v25  ;;  %v9042_v35 = vld [vmem:[#allocation80_spill] sm:$0xff] }
 0x346   : > { %1477 = vst.msk [vmem:[#allocation4 + $0x20] sm:$0xff] %vm1472_vm3, %v1427_v44  ;;  %1480 = vst.msk [vmem:[#allocation4 + $0x38] sm:$0xff] %vm1472_vm3, %v1430_v13  ;;  %v1950_v63 = vadd.f32 %v1925_v4, %v1902_v47  ;;  %v9040_v44 = vld [vmem:[#allocation76_spill] sm:$0xff]  ;;  %v1246_v13 = vmul.f32 %v9041_v30, %v1150_v49  ;;  %v1888_v4 = vld [vmem:[#allocation3 + $0xc0] sm:$0xff]  ;;  %v1249_v51 = vmul.f32 %v9042_v35, %v1153_v53 }
 0x347   : > { %v1733_v14 = vmul.f32 1.442695, %v9035_v33  ;;  %1478 = vst.msk [vmem:[#allocation4 + $0x28] sm:$0xff] %vm1472_vm3, %v1428_v32  ;;  %v1248_v36 = vmul.f32 %v9040_v44, %v1152_v38  ;;  %v7440_v2 = vpop.eup %5540  ;;  %v1889_v32 = vld [vmem:[#allocation3 + $0xc8] sm:$0xff]  ;;  %v9043_v38 = vld [vmem:[#allocation78_spill] sm:$0xff] }
 0x348   : > { %2296 = vst.msk [vmem:[#allocation3 + $0xb0] sm:$0xff] %vm1439_vm2, %v1950_v63  ;;  %v1247_v19 = vmul.f32 %v9043_v38, %v1151_v6  ;;  %v1905_v44 = vmul.f32 %v7432_v16, %v1889_v32  ;;  %v1904_v30 = vmul.f32 %v7440_v2, %v1888_v4  ;;  %v1157_v32 = vld [vmem:[#allocation4 + $0x78] sm:$0xff]  ;;  %v9045_v4 = vld [vmem:[#allocation79_spill] sm:$0xff] }
 0x349   : > { %v5211_v27 = vpop.f32.mrb[8].mxu0  ;;  %v1927_v47 = vpop.xlane.xlu1 %1926  ;;  %5550 = vpow2.f32 %v1733_v14 }
 0x34a   : > { %v1433_v61 = vadd.f32 %v5211_v27, %v1248_v36  ;;  %v1951_v33 = vadd.f32 %v1927_v47, %v1903_v17  ;;  %v1392_v41 = vpop.f32.mrb[9].mxu0  ;;  %5552 = vpow2.f32 %v1731_v46  ;;  %v1156_v36 = vld [vmem:[#allocation4 + $0x70] sm:$0xff]  ;;  %v1154_v27 = vld [vmem:[#allocation4 + $0x60] sm:$0xff] }
 0x34b   : > { %v1431_v25 = vadd.f32 %v1392_v41, %v1246_v13  ;;  %v5212_v63 = vpop.f32.mrb[10].mxu0  ;;  %v7449_v53 = vpop.eup %5542  ;;  %v1891_v13 = vld [vmem:[#allocation3 + $0xd8] sm:$0xff] }
 0x34c   : > { %1483 = vst.msk [vmem:[#allocation4 + $0x50] sm:$0xff] %vm1472_vm3, %v1433_v61  ;;  %v1434_v50 = vadd.f32 %v5212_v63, %v1249_v51  ;;  %v1395_v49 = vpop.f32.mrb[11].mxu0  ;;  %9044 = vst [vmem:[#allocation39_spill] sm:$0xff] %v7449_v53  ;;  %v7452_v46 = vpop.eup %5544  ;;  %v1890_v51 = vld [vmem:[#allocation3 + $0xd0] sm:$0xff]  ;;  %v1252_v61 = vmul.f32 %v9045_v4, %v1156_v36  ;;  %v1907_v41 = vmul.f32 %v7449_v53, %v1891_v13 }
 0x34d   : > { %2297 = vst.msk [vmem:[#allocation3 + $0xb8] sm:$0xff] %vm1439_vm2, %v1951_v33  ;;  %v1432_v14 = vadd.f32 %v1395_v49, %v1247_v19  ;;  %v1931_v6 = vpop.xlane.xlu1 %1930  ;;  %v1929_v17 = vpop.xlane.xlu0 %1928  ;;  %v1155_v33 = vld [vmem:[#allocation4 + $0x68] sm:$0xff]  ;;  %v9046_v19 = vld [vmem:[#allocation77_spill] sm:$0xff]  ;;  %v1906_v49 = vmul.f32 %v7452_v46, %v1890_v51 }
 0x34e   : > { %1481 = vst.msk [vmem:[#allocation4 + $0x40] sm:$0xff] %vm1472_vm3, %v1431_v25  ;;  %1484 = vst.msk [vmem:[#allocation4 + $0x58] sm:$0xff] %vm1472_vm3, %v1434_v50  ;;  %v1953_v47 = vadd.f32 %v1931_v6, %v1905_v44  ;;  %v1952_v35 = vadd.f32 %v1929_v17, %v1904_v30  ;;  %v7460_v38 = vpop.eup %5546  ;;  %v1250_v25 = vmul.f32 %v9046_v19, %v1154_v27  ;;  %v1893_v44 = vld [vmem:[#allocation3 + $0xe8] sm:$0xff] }
 0x34f   : > { %1482 = vst.msk [vmem:[#allocation4 + $0x48] sm:$0xff] %vm1472_vm3, %v1432_v14  ;;  %v7464_v30 = vpop.eup %5548  ;;  %v9047_v14 = vld [vmem:[#allocation82_spill] sm:$0xff]  ;;  %v1251_v13 = vmul.f32 %v9048_v48, %v1155_v33  ;;  %v1909_v19 = vmul.f32 %v7460_v38, %v1893_v44  ;;  %v1895_v33 = vld [vmem:[#allocation3 + $0xf8] sm:$0xff] }
 0x350   : > { %2299 = vst.msk [vmem:[#allocation3 + $0xc8] sm:$0xff] %vm1439_vm2, %v1953_v47  ;;  %2298 = vst.msk [vmem:[#allocation3 + $0xc0] sm:$0xff] %vm1439_vm2, %v1952_v35  ;;  %v1253_v36 = vmul.f32 %v9047_v14, %v1157_v32  ;;  %v1892_v35 = vld [vmem:[#allocation3 + $0xe0] sm:$0xff] }
 0x351   : > { %v5215_v63 = vpop.f32.mrb[12].mxu0  ;;  %v1935_v50 = vpop.xlane.xlu1 %1934  ;;  %v1908_v48 = vmul.f32 %v7464_v30, %v1892_v35 }
 0x352   : > { %v1437_v6 = vadd.f32 %v5215_v63, %v1252_v61  ;;  %v1955_v17 = vadd.f32 %v1935_v50, %v1907_v41  ;;  %v1933_v47 = vpop.xlane.xlu0 %1932  ;;  %v1408_v4 = vpop.f32.mrb[13].mxu0  ;;  %v1894_v63 = vld [vmem:[#allocation3 + $0xf0] sm:$0xff] }
 0x353   : > { %v1954_v42 = vadd.f32 %v1933_v47, %v1906_v49  ;;  %v1435_v53 = vadd.f32 %v1408_v4, %v1250_v25  ;;  %v5216_v16 = vpop.f32.mrb[14].mxu0  ;;  %v7471_v62 = vpop.eup %5550 }
 0x354   : > { %1487 = vst.msk [vmem:[#allocation4 + $0x70] sm:$0xff] %vm1472_vm3, %v1437_v6  ;;  %v1438_v27 = vadd.f32 %v5216_v16, %v1253_v36  ;;  %v1411_v51 = vpop.f32.mrb[15].mxu0  ;;  %v7476_v41 = vpop.eup %5552 }
 0x355   : > { %2301 = vst.msk [vmem:[#allocation3 + $0xd8] sm:$0xff] %vm1439_vm2, %v1955_v17  ;;  %2300 = vst.msk [vmem:[#allocation3 + $0xd0] sm:$0xff] %vm1439_vm2, %v1954_v42  ;;  %v1436_v32 = vadd.f32 %v1411_v51, %v1251_v13  ;;  %v1939_v61 = vpop.xlane.xlu1 %1938  ;;  %v1911_v42 = vmul.f32 %v7471_v62, %v1895_v33  ;;  %v1910_v49 = vmul.f32 %v7476_v41, %v1894_v63  ;;  %v7487_v51 = vld [vmem:[%s6000_s9 + $0x2] ss:$0 sm:$0xff] }
 0x356   : > { %1485 = vst.msk [vmem:[#allocation4 + $0x60] sm:$0xff] %vm1472_vm3, %v1435_v53  ;;  %1488 = vst.msk [vmem:[#allocation4 + $0x78] sm:$0xff] %vm1472_vm3, %v1438_v27  ;;  %v1957_v25 = vadd.f32 %v1939_v61, %v1909_v19  ;;  %v1937_v16 = vpop.xlane.xlu0 %1936 }
 0x357   : > { %1486 = vst.msk [vmem:[#allocation4 + $0x68] sm:$0xff] %vm1472_vm3, %v1436_v32  ;;  %v1956_v50 = vadd.f32 %v1937_v16, %v1908_v48 }
 0x358   : > { %2303 = vst.msk [vmem:[#allocation3 + $0xe8] sm:$0xff] %vm1439_vm2, %v1957_v25 }
 0x359   : > { %2302 = vst.msk [vmem:[#allocation3 + $0xe0] sm:$0xff] %vm1439_vm2, %v1956_v50  ;;  %v1943_v53 = vpop.xlane.xlu1 %1942 }
 0x35a   : > { %v1959_v44 = vadd.f32 %v1943_v53, %v1911_v42  ;;  %v1941_v14 = vpop.xlane.xlu0 %1940 }
 0x35b   : > { %v1958_v36 = vadd.f32 %v1941_v14, %v1910_v49  ;;  %v9049_v49 = vld [vmem:[#allocation10_spill] sm:$0xff] }
 0x35c   : > { %2305 = vst.msk [vmem:[#allocation3 + $0xf8] sm:$0xff] %vm1439_vm2, %v1959_v44 }
 0x35d   : > { %2304 = vst.msk [vmem:[#allocation3 + $0xf0] sm:$0xff] %vm1439_vm2, %v1958_v36  ;;  %v2138_v6 = vpop.permute.xlu1 %2137 }
 0x35e   : > { %5217 = vmatprep.subr.bf16.mxu1 %v2138_v6  ;;  %v2140_v17 = vpop.permute.xlu0 %2139 }
 0x35f   : > { %5218 = vmatpush3.bf16.msra.mxu1 %v2138_v6 }
 0x360   : > { %5219 = vmatprep.subr.bf16.mxu1 %v2140_v17 }
 0x361   : > { %v2142_v47 = vpop.permute.xlu1 %2141 }
 0x362   : > { %v2144_v4 = vpop.permute.xlu0 %2143 }
 0x363   : > { %5220 = vmatpush3.bf16.msra.mxu1 %v2140_v17 }
 0x364   : > { %5221 = vmatprep.subr.bf16.mxu1 %v2142_v47 }
 0x365   : > { %v2146_v35 = vpop.permute.xlu1 %2145 }
 0x366   : > { %v2148_v13 = vpop.permute.xlu0 %2147 }
 0x367   : > { %5222 = vmatpush3.bf16.msra.mxu1 %v2142_v47 }
 0x368   : > { %5223 = vmatprep.subr.bf16.mxu1 %v2144_v4 }
 0x369   : > { %v2150_v27 = vpop.permute.xlu1 %2149 }
 0x36a   : > { %v2152_v19 = vpop.permute.xlu0 %2151 }
 0x36b   : > { %5224 = vmatpush3.bf16.msra.mxu1 %v2144_v4 }
 0x36c   : > { %5225 = vmatprep.subr.bf16.mxu1 %v2146_v35 }
 0x36d   : > { %v2329_v32 = vpop.permute.xlu1 %2328 }
 0x36e   : > { %v2391_v61 = vadd.f32 %v7487_v51, %v2329_v32 }
 0x36f   : > { %5226 = vmatpush3.bf16.msra.mxu1 %v2146_v35 }
 0x370   : > { %v2407_v48 = vmul.f32 0.2, %v2391_v61  ;;  %5227 = vmatprep.subr.bf16.mxu1 %v2148_v13 }
 0x371   : > { %v2337_v33 = vpop.permute.xlu1 %2336  ;;  %v2333_v25 = vpop.permute.xlu0 %2332 }
 0x372   : > { %v2423_v16 = vmax.f32 %v2391_v61, %v2407_v48  ;;  %v2393_v63 = vadd.f32 %v7487_v51, %v2337_v33  ;;  %v2392_v50 = vadd.f32 %v7487_v51, %v2333_v25  ;;  %v9053_v48 = vld [vmem:[#allocation14_spill] sm:$0xff] }
 0x373   : > { %5228 = vmatpush3.bf16.msra.mxu1 %v2148_v13  ;;  %v9051_v13 = vld [vmem:[#allocation12_spill] sm:$0xff] }
 0x374   : > { %v2409_v42 = vmul.f32 0.2, %v2393_v63  ;;  %v2408_v53 = vmul.f32 0.2, %v2392_v50  ;;  %5229 = vmatprep.subr.bf16.mxu1 %v2150_v27  ;;  %v7493_v44 = vadd.f32 %v2423_v16, %v9049_v49 }
 0x375   : > { %v2341_v14 = vpop.permute.xlu1 %2340  ;;  %v2345_v36 = vpop.permute.xlu0 %2344 }
 0x376   : > { %9050 = vst [vmem:[#allocation41_spill] sm:$0xff] %v7493_v44  ;;  %v2425_v6 = vmax.f32 %v2393_v63, %v2409_v42  ;;  %v2424_v17 = vmax.f32 %v2392_v50, %v2408_v53  ;;  %v2394_v47 = vadd.f32 %v7487_v51, %v2341_v14  ;;  %v2395_v4 = vadd.f32 %v7487_v51, %v2345_v36  ;;  %v9054_v36 = vld [vmem:[#allocation18_spill] sm:$0xff] }
 0x377   : > { %2472 = vmax.xlane.f32.xlu0 %v7493_v44  ;;  %5230 = vmatpush3.bf16.msra.mxu1 %v2150_v27 }
 0x378   : > { %v2410_v35 = vmul.f32 0.2, %v2394_v47  ;;  %v2411_v32 = vmul.f32 0.2, %v2395_v4  ;;  %v7499_v61 = vadd.f32 %v2425_v6, %v9051_v13  ;;  %5231 = vmatprep.subr.bf16.mxu1 %v2152_v19  ;;  %v7502_v33 = vadd.f32 %v2424_v17, %v9053_v48  ;;  %v9056_v17 = vld [vmem:[#allocation16_spill] sm:$0xff] }
 0x379   : > { %v2349_v25 = vpop.permute.xlu1 %2348  ;;  %v2353_v16 = vpop.permute.xlu0 %2352 }
 0x37a   : > { %9052 = vst [vmem:[#allocation53_spill] sm:$0xff] %v7499_v61  ;;  %v2426_v63 = vmax.f32 %v2394_v47, %v2410_v35  ;;  %v2427_v50 = vmax.f32 %v2395_v4, %v2411_v32  ;;  %v2396_v42 = vadd.f32 %v7487_v51, %v2349_v25  ;;  %v2397_v53 = vadd.f32 %v7487_v51, %v2353_v16 }
 0x37b   : > { %2476 = vmax.xlane.f32.xlu0 %v7499_v61  ;;  %2474 = vmax.xlane.f32.xlu1 %v7502_v33 }
 0x37c   : > { %5232 = vmatpush3.bf16.msra.mxu1 %v2152_v19  ;;  %v2412_v27 = vmul.f32 0.2, %v2396_v42  ;;  %v2413_v14 = vmul.f32 0.2, %v2397_v53  ;;  %v7509_v6 = vadd.f32 %v2426_v63, %v9054_v36  ;;  %v7512_v48 = vadd.f32 %v2427_v50, %v9056_v17 }
 0x37d   : > { %v2357_v44 = vpop.permute.xlu1 %2356  ;;  %v2361_v47 = vpop.permute.xlu0 %2360  ;;  %v9058_v19 = vpack.c.bf16 %v7172_v58, %v7166_v28  ;;  %v9059_v50 = vpack.c.bf16 %v7186_v3, %v7180_v26 }
 0x37e   : > { %9055 = vst [vmem:[#allocation47_spill] sm:$0xff] %v7509_v6  ;;  %9057 = vst [vmem:[#allocation58_spill] sm:$0xff] %v7512_v48  ;;  %v2428_v4 = vmax.f32 %v2396_v42, %v2412_v27  ;;  %v2429_v35 = vmax.f32 %v2397_v53, %v2413_v14  ;;  %v2398_v32 = vadd.f32 %v7487_v51, %v2357_v44  ;;  %v9060_v42 = vld [vmem:[#allocation22_spill] sm:$0xff]  ;;  %v9062_v44 = vld [vmem:[#allocation20_spill] sm:$0xff] }
 0x37f   : > { %v2399_v25 = vadd.f32 %v7487_v51, %v2361_v47  ;;  %2478 = vmax.xlane.f32.xlu0 %v7509_v6  ;;  %5234 = vmatmul.mubr.bf16.vlgmr.msra.gmra.mrb[0].mxu1 %v9058_v19  ;;  %v9064_v19 = vld [vmem:[#allocation27_spill] sm:$0xff] }
 0x380   : > { %2480 = vmax.xlane.f32.xlu1 %v7512_v48  ;;  %v2414_v16 = vmul.f32 0.2, %v2398_v32  ;;  %5237 = vmatprep.mubr.bf16.mxu1 %v9059_v50  ;;  %v7525_v53 = vadd.f32 %v2428_v4, %v9060_v42  ;;  %v7528_v27 = vadd.f32 %v2429_v35, %v9062_v44  ;;  %v9066_v50 = vld [vmem:[#allocation24_spill] sm:$0xff] }
 0x381   : > { %v2415_v63 = vmul.f32 0.2, %v2399_v25  ;;  %v2365_v14 = vpop.permute.xlu1 %2364  ;;  %v2369_v47 = vpop.permute.xlu0 %2368 }
 0x382   : > { %9061 = vst [vmem:[#allocation50_spill] sm:$0xff] %v7525_v53  ;;  %9063 = vst [vmem:[#allocation64_spill] sm:$0xff] %v7528_v27  ;;  %v2430_v6 = vmax.f32 %v2398_v32, %v2414_v16  ;;  %v2400_v28 = vadd.f32 %v7487_v51, %v2365_v14  ;;  %v2401_v58 = vadd.f32 %v7487_v51, %v2369_v47 }
 0x383   : > { %v2431_v61 = vmax.f32 %v2399_v25, %v2415_v63  ;;  %2482 = vmax.xlane.f32.xlu0 %v7525_v53  ;;  %v9068_v14 = vpack.c.bf16 %v7199_v12, %v7194_v40 }
 0x384   : > { %2484 = vmax.xlane.f32.xlu1 %v7528_v27  ;;  %v2416_v26 = vmul.f32 0.2, %v2400_v28  ;;  %v2417_v3 = vmul.f32 0.2, %v2401_v58  ;;  %v7535_v4 = vadd.f32 %v2430_v6, %v9064_v19 }
 0x385   : > { %v7538_v35 = vadd.f32 %v2431_v61, %v9066_v50  ;;  %v2373_v48 = vpop.permute.xlu1 %2372  ;;  %v2377_v44 = vpop.permute.xlu0 %2376  ;;  %v9069_v61 = vpack.c.bf16 %v7209_v60, %v7206_v31 }
 0x386   : > { %9065 = vst [vmem:[#allocation55_spill] sm:$0xff] %v7535_v4  ;;  %v2432_v32 = vmax.f32 %v2400_v28, %v2416_v26  ;;  %v2433_v25 = vmax.f32 %v2401_v58, %v2417_v3  ;;  %v2402_v16 = vadd.f32 %v7487_v51, %v2373_v48  ;;  %v2403_v63 = vadd.f32 %v7487_v51, %v2377_v44  ;;  %v9070_v28 = vld [vmem:[#allocation30_spill] sm:$0xff]  ;;  %v9072_v48 = vld [vmem:[#allocation28_spill] sm:$0xff] }
 0x387   : > { %9067 = vst [vmem:[#allocation61_spill] sm:$0xff] %v7538_v35  ;;  %2486 = vmax.xlane.f32.xlu0 %v7535_v4  ;;  %5238 = vmatmul.mubr.bf16.gmra.mrb[4].mxu1 %v9068_v14  ;;  %v9074_v14 = vld [vmem:[#allocation33_spill] sm:$0xff] }
 0x388   : > { %2488 = vmax.xlane.f32.xlu1 %v7538_v35  ;;  %v2418_v6 = vmul.f32 0.2, %v2402_v16  ;;  %v2419_v47 = vmul.f32 0.2, %v2403_v63  ;;  %5241 = vmatprep.mubr.bf16.mxu1 %v9069_v61  ;;  %v7551_v58 = vadd.f32 %v2432_v32, %v9070_v28  ;;  %v7554_v26 = vadd.f32 %v2433_v25, %v9072_v48  ;;  %v9076_v61 = vld [vmem:[#allocation32_spill] sm:$0xff] }
 0x389   : > { %v2381_v44 = vpop.permute.xlu1 %2380  ;;  %v2385_v3 = vpop.permute.xlu0 %2384 }
 0x38a   : > { %9071 = vst [vmem:[#allocation67_spill] sm:$0xff] %v7551_v58  ;;  %9073 = vst [vmem:[#allocation42_spill] sm:$0xff] %v7554_v26  ;;  %v2434_v4 = vmax.f32 %v2402_v16, %v2418_v6  ;;  %v2435_v27 = vmax.f32 %v2403_v63, %v2419_v47  ;;  %v2404_v40 = vadd.f32 %v7487_v51, %v2381_v44 }
 0x38b   : > { %v2405_v12 = vadd.f32 %v7487_v51, %v2385_v3  ;;  %2490 = vmax.xlane.f32.xlu0 %v7551_v58  ;;  %v9078_v6 = vpack.c.bf16 %v7219_v24, %v7216_v29  ;;  %v9082_v3 = vld [vmem:[#allocation35_spill] sm:$0xff]  ;;  %v9084_v29 = vld [vmem:[#allocation37_spill] sm:$0xff] }
 0x38c   : > { %2492 = vmax.xlane.f32.xlu1 %v7554_v26  ;;  %v2420_v31 = vmul.f32 0.2, %v2404_v40  ;;  %v7561_v32 = vadd.f32 %v2434_v4, %v9074_v14  ;;  %v7564_v25 = vadd.f32 %v2435_v27, %v9076_v61  ;;  %v9079_v4 = vpack.c.bf16 %v7229_v43, %v7226_v52  ;;  %v9080_v27 = vld [vmem:[#allocation36_spill] sm:$0xff]  ;;  %v9089_v43 = vld [vmem:[#allocation39_spill] sm:$0xff] }
 0x38d   : > { %v2421_v60 = vmul.f32 0.2, %v2405_v12  ;;  %v2389_v35 = vpop.permute.xlu1 %2388  ;;  %v9086_v52 = vpack.c.bf16 %v7239_v8, %v7236_v1  ;;  %v7620_v1 = vld [vmem:[#allocation2 + $0x100] sm:$0xff] }
 0x38e   : > { %9075 = vst [vmem:[#allocation44_spill] sm:$0xff] %v7561_v32  ;;  %9077 = vst [vmem:[#allocation46_spill] sm:$0xff] %v7564_v25  ;;  %v2436_v53 = vmax.f32 %v2404_v40, %v2420_v31  ;;  %v2406_v63 = vadd.f32 %v7487_v51, %v2389_v35  ;;  %v9100_v35 = vmov 3  }
 0x38f   : > { %v2437_v16 = vmax.f32 %v2405_v12, %v2421_v60  ;;  %2494 = vmax.xlane.f32.xlu0 %v7561_v32  ;;  %5242 = vmatmul.mubr.bf16.gmra.mrb[8].mxu1 %v9078_v6  ;;  %v7696_v6 = vld [vmem:[#allocation2 + $0x150] sm:$0xff] }
 0x390   : > { %2496 = vmax.xlane.f32.xlu1 %v7564_v25  ;;  %v2422_v47 = vmul.f32 0.2, %v2406_v63  ;;  %5245 = vmatprep.mubr.bf16.mxu1 %v9079_v4  ;;  %v7576_v44 = vadd.f32 %v2436_v53, %v9080_v27  ;;  %v7681_v53 = vld [vmem:[#allocation2 + $0x140] sm:$0xff]  ;;  %9102 = vst [vmem:[#allocation65_spill] sm:$0xff] %v7696_v6  ;;  %v1962_v25 = vld [vmem:[#allocation4 + $0x88] sm:$0xff] }
 0x391   : > { %v7579_v40 = vadd.f32 %v2437_v16, %v9082_v3  ;;  %9099 = vst [vmem:[#allocation66_spill] sm:$0xff] %v7681_v53 }
 0x392   : > { %9081 = vst [vmem:[#allocation43_spill] sm:$0xff] %v7576_v44  ;;  %v2438_v51 = vmax.f32 %v2406_v63, %v2422_v47  ;;  %v7692_v63 = vld [vmem:[#allocation2 + $0x148] sm:$0xff] }
 0x393   : > { %9083 = vst [vmem:[#allocation49_spill] sm:$0xff] %v7579_v40  ;;  %2498 = vmax.xlane.f32.xlu0 %v7576_v44  ;;  %9101 = vst [vmem:[#allocation62_spill] sm:$0xff] %v7692_v63 }
 0x394   : > { %2500 = vmax.xlane.f32.xlu1 %v7579_v40  ;;  %v7584_v24 = vadd.f32 %v2438_v51, %v9084_v29 }
 0x396   : > { %9085 = vst [vmem:[#allocation45_spill] sm:$0xff] %v7584_v24 }
 0x397   : > { %2502 = vmax.xlane.f32.xlu0 %v7584_v24  ;;  %5246 = vmatmul.mubr.bf16.gmra.mrb[12].mxu1 %v9086_v52 }
 0x3a5   : > { %1984 = vperm.xlu1 %5389, %v7361_v55  }
 0x3a9   : > { %1989 = vperm.xlu1 %5389, %v7367_v22  }
 0x3ad   : > { %1999 = vperm.xlu1 %5389, %v7382_v11   ;;  %3161 = vperm.xlu0 %5390, %v7258_v7  }
 0x3b1   : > { %2009 = vperm.xlu1 %5389, %v7410_v23   ;;  %3165 = vperm.xlu0 %5390, %v7270_v18  }
 0x3b5   : > { %2019 = vperm.xlu1 %5389, %v7440_v2   ;;  %3169 = vperm.xlu0 %5390, %v7266_v37   ;;  %v7625_v37 = vld [vmem:[#allocation2 + $0x110] sm:$0xff] }
 0x3b9   : > { %2029 = vperm.xlu1 %5389, %v7452_v46   ;;  %3173 = vperm.xlu0 %5390, %v7278_v10   ;;  %v7632_v10 = vld [vmem:[#allocation2 + $0x108] sm:$0xff] }
 0x3ba   : > { %9090 = vst [vmem:[#allocation52_spill] sm:$0xff] %v7632_v10 }
 0x3bd   : > { %2039 = vperm.xlu1 %5389, %v7464_v30   ;;  %3177 = vperm.xlu0 %5390, %v7282_v5   ;;  %v9088_v5 = vld [vmem:[#allocation40_spill] sm:$0xff] }
 0x3c1   : > { %2049 = vperm.xlu1 %5389, %v7476_v41   ;;  %3181 = vperm.xlu0 %5390, %v7290_v45   ;;  %v7677_v41 = vld [vmem:[#allocation2 + $0x138] sm:$0xff] }
 0x3c2   : > { %9098 = vst [vmem:[#allocation63_spill] sm:$0xff] %v7677_v41 }
 0x3c5   : > { %3185 = vperm.xlu0 %5390, %v7294_v39   ;;  %v9087_v39 = vld [vmem:[#allocation38_spill] sm:$0xff] }
 0x3c9   : > { %3189 = vperm.xlu0 %5390, %v7302_v57  }
 0x3cd   : > { %3197 = vperm.xlu0 %5390, %v7311_v0  }
 0x3d1   : > { %3201 = vperm.xlu0 %5390, %v7315_v21  }
 0x3d5   : > { %3205 = vperm.xlu0 %5390, %v7323_v20   ;;  %v7640_v20 = vld [vmem:[#allocation2 + $0x118] sm:$0xff] }
 0x3d6   : > { %9093 = vst [vmem:[#allocation54_spill] sm:$0xff] %v7640_v20 }
 0x3d9   : > { %3209 = vperm.xlu0 %5390, %v7327_v15  }
 0x3dd   : > { %3217 = vperm.xlu0 %5390, %v7335_v54   ;;  %v7647_v54 = vld [vmem:[#allocation2 + $0x120] sm:$0xff] }
 0x3de   : > { %9094 = vst [vmem:[#allocation57_spill] sm:$0xff] %v7647_v54 }
 0x3e1   : > { %5392 = vset.pattern.permute.xlu0 %v8996_v56 }
 0x3e2   : > { %1979 = vperm.xlu0 %5392, %v7347_v9  }
 0x3e6   : > { %1994 = vperm.xlu0 %5392, %v7374_v59  }
 0x3ea   : > { %2004 = vperm.xlu0 %5392, %v7396_v34   ;;  %v7660_v34 = vld [vmem:[#allocation2 + $0x128] sm:$0xff] }
 0x3eb   : > { %9096 = vst [vmem:[#allocation56_spill] sm:$0xff] %v7660_v34 }
 0x3ee   : > { %2014 = vperm.xlu0 %5392, %v9087_v39   ;;  %v7706_v39 = vld [vmem:[#allocation2 + $0x158] sm:$0xff] }
 0x3ef   : > { %9103 = vst [vmem:[#allocation75_spill] sm:$0xff] %v7706_v39 }
 0x3f2   : > { %2024 = vperm.xlu0 %5392, %v9088_v5   ;;  %v7710_v5 = vld [vmem:[#allocation2 + $0x160] sm:$0xff] }
 0x3f3   : > { %9104 = vst [vmem:[#allocation69_spill] sm:$0xff] %v7710_v5 }
 0x3f6   : > { %2034 = vperm.xlu0 %5392, %v9089_v43  }
 0x3fa   : > { %2044 = vperm.xlu0 %5392, %v7460_v38  }
 0x3fe   : > { %2054 = vperm.xlu0 %5392, %v7471_v62   ;;  %v7667_v62 = vld [vmem:[#allocation2 + $0x130] sm:$0xff] }
 0x3ff   : > { %9097 = vst [vmem:[#allocation59_spill] sm:$0xff] %v7667_v62 }
 0x404   : > { %v2473_v8 = vpop.xlane.xlu0 %2472 }
 0x405   : > { %v7623_v7 = vmax.f32 %v7620_v1, %v2473_v8 }
 0x407   : > { %3107 = vst.msk [vmem:[#allocation2 + $0x100] sm:$0xff] %vm1439_vm2, %v7623_v7  ;;  %2570 = vperm.xlu1 %5389, %v7623_v7  }
 0x408   : > { %v2477_v45 = vpop.xlane.xlu0 %2476  ;;  %v2475_v57 = vpop.xlane.xlu1 %2474 }
 0x409   : > { %v7635_v0 = vmax.f32 %v7625_v37, %v2477_v45  ;;  %v7638_v21 = vmax.f32 %v7632_v10, %v2475_v57 }
 0x40b   : > { %9091 = vst [vmem:[#allocation48_spill] sm:$0xff] %v7635_v0  ;;  %9092 = vst [vmem:[#allocation51_spill] sm:$0xff] %v7638_v21  ;;  %2580 = vperm.xlu1 %5389, %v7635_v0   ;;  %2575 = vperm.xlu0 %5392, %v7638_v21  }
 0x40c   : > { %3109 = vst.msk [vmem:[#allocation2 + $0x110] sm:$0xff] %vm1439_vm2, %v7635_v0  ;;  %3108 = vst.msk [vmem:[#allocation2 + $0x108] sm:$0xff] %vm1439_vm2, %v7638_v21  ;;  %v2479_v55 = vpop.xlane.xlu0 %2478 }
 0x40d   : > { %v2481_v22 = vpop.xlane.xlu1 %2480  ;;  %v7655_v59 = vmax.f32 %v7640_v20, %v2479_v55  ;;  %v7720_v55 = vld [vmem:[#allocation2 + $0x168] sm:$0xff] }
 0x40e   : > { %v7658_v11 = vmax.f32 %v7647_v54, %v2481_v22  ;;  %9106 = vst [vmem:[#allocation68_spill] sm:$0xff] %v7720_v55  ;;  %v7724_v22 = vld [vmem:[#allocation2 + $0x170] sm:$0xff] }
 0x40f   : > { %9095 = vst [vmem:[#allocation60_spill] sm:$0xff] %v7655_v59  ;;  %3110 = vst.msk [vmem:[#allocation2 + $0x118] sm:$0xff] %vm1439_vm2, %v7655_v59  ;;  %2585 = vperm.xlu1 %5389, %v7655_v59  }
 0x410   : > { %3111 = vst.msk [vmem:[#allocation2 + $0x120] sm:$0xff] %vm1439_vm2, %v7658_v11  ;;  %v2483_v2 = vpop.xlane.xlu0 %2482  ;;  %9107 = vst [vmem:[#allocation70_spill] sm:$0xff] %v7724_v22 }
 0x411   : > { %v2485_v46 = vpop.xlane.xlu1 %2484  ;;  %v7672_v38 = vmax.f32 %v7660_v34, %v2483_v2 }
 0x412   : > { %v7675_v30 = vmax.f32 %v7667_v62, %v2485_v46 }
 0x413   : > { %3112 = vst.msk [vmem:[#allocation2 + $0x128] sm:$0xff] %vm1439_vm2, %v7672_v38  ;;  %5391 = vset.pattern.permute.xlu1 %v9100_v35 }
 0x414   : > { %3113 = vst.msk [vmem:[#allocation2 + $0x130] sm:$0xff] %vm1439_vm2, %v7675_v30  ;;  %v2487_v12 = vpop.xlane.xlu0 %2486 }
 0x415   : > { %v2489_v31 = vpop.xlane.xlu1 %2488  ;;  %v7687_v60 = vmax.f32 %v7677_v41, %v2487_v12 }
 0x416   : > { %v7690_v16 = vmax.f32 %v7681_v53, %v2489_v31  ;;  %v7734_v31 = vld [vmem:[#allocation2 + $0x178] sm:$0xff] }
 0x417   : > { %3114 = vst.msk [vmem:[#allocation2 + $0x138] sm:$0xff] %vm1439_vm2, %v7687_v60  ;;  %9109 = vst [vmem:[#allocation73_spill] sm:$0xff] %v7734_v31 }
 0x418   : > { %3115 = vst.msk [vmem:[#allocation2 + $0x140] sm:$0xff] %vm1439_vm2, %v7690_v16  ;;  %v2491_v47 = vpop.xlane.xlu0 %2490 }
 0x419   : > { %v2493_v4 = vpop.xlane.xlu1 %2492  ;;  %v7701_v51 = vmax.f32 %v7692_v63, %v2491_v47 }
 0x41a   : > { %v7704_v52 = vmax.f32 %v7696_v6, %v2493_v4  ;;  %v1963_v6 = vld [vmem:[#allocation4 + $0x90] sm:$0xff] }
 0x41b   : > { %3116 = vst.msk [vmem:[#allocation2 + $0x148] sm:$0xff] %vm1439_vm2, %v7701_v51 }
 0x41c   : > { %3117 = vst.msk [vmem:[#allocation2 + $0x150] sm:$0xff] %vm1439_vm2, %v7704_v52  ;;  %v2495_v43 = vpop.xlane.xlu0 %2494 }
 0x41d   : > { %v2497_v8 = vpop.xlane.xlu1 %2496  ;;  %v7715_v45 = vmax.f32 %v7706_v39, %v2495_v43  ;;  %v7752_v39 = vld [vmem:[%s6000_s9 + $0x3] ss:$0 sm:$0xff]  ;;  %s5895_s9 = smov 32  }
 0x41e   : > { %v7718_v57 = vmax.f32 %v7710_v5, %v2497_v8 }
 0x41f   : > { %9105 = vst [vmem:[#allocation71_spill] sm:$0xff] %v7715_v45  ;;  %3118 = vst.msk [vmem:[#allocation2 + $0x158] sm:$0xff] %vm1439_vm2, %v7715_v45 }
 0x420   : > { %3119 = vst.msk [vmem:[#allocation2 + $0x160] sm:$0xff] %vm1439_vm2, %v7718_v57  ;;  %v2499_v2 = vpop.xlane.xlu0 %2498 }
 0x421   : > { %v2501_v46 = vpop.xlane.xlu1 %2500  ;;  %v7729_v35 = vmax.f32 %v7720_v55, %v2499_v2 }
 0x422   : > { %v7732_v12 = vmax.f32 %v7724_v22, %v2501_v46 }
 0x423   : > { %9108 = vst [vmem:[#allocation72_spill] sm:$0xff] %v7729_v35  ;;  %3120 = vst.msk [vmem:[#allocation2 + $0x168] sm:$0xff] %vm1439_vm2, %v7729_v35 }
 0x424   : > { %3121 = vst.msk [vmem:[#allocation2 + $0x170] sm:$0xff] %vm1439_vm2, %v7732_v12  ;;  %v2503_v47 = vpop.xlane.xlu0 %2502 }
 0x425   : > { %v7741_v4 = vmax.f32 %v7734_v31, %v2503_v47  ;;  %v1985_v9 = vpop.permute.xlu1 %1984 }
 0x426   : > { %v2058_v59 = vmul.f32 %v1985_v9, %v1962_v25 }
 0x427   : > { %9110 = vst [vmem:[#allocation76_spill] sm:$0xff] %v7741_v4  ;;  %3122 = vst.msk [vmem:[#allocation2 + $0x178] sm:$0xff] %vm1439_vm2, %v7741_v4 }
 0x429   : > { %v1990_v18 = vpop.permute.xlu1 %1989 }
 0x42a   : > { %v2059_v24 = vmul.f32 %v1990_v18, %v1963_v6 }
 0x42c   : > { %v3162_v43 = vpop.permute.xlu0 %3161 }
 0x42d   : > { %v2000_v47 = vpop.permute.xlu1 %1999  ;;  %v3224_v31 = vadd.f32 %v7752_v39, %v3162_v43 }
 0x42f   : > { %v3240_v41 = vmul.f32 0.2, %v3224_v31 }
 0x430   : > { %v7745_v8 = vpop.permute.xlu0 %3165 }
 0x431   : > { %v2010_v53 = vpop.permute.xlu1 %2009  ;;  %v3256_v34 = vmax.f32 %v3224_v31, %v3240_v41  ;;  %v1967_v31 = vld [vmem:[#allocation4 + $0xb0] sm:$0xff] }
 0x433   : > { %v7763_v0 = vadd.f32 %v3256_v34, %v9049_v49  ;;  %v2063_v49 = vmul.f32 %v2010_v53, %v1967_v31  ;;  %v1961_v31 = vld [vmem:[#allocation4 + $0x80] sm:$0xff] }
 0x434   : > { %v3170_v2 = vpop.permute.xlu0 %3169 }
 0x435   : > { %v3226_v5 = vadd.f32 %v7752_v39, %v3170_v2  ;;  %v2020_v20 = vpop.permute.xlu1 %2019  ;;  %9111 = vst [vmem:[#allocation74_spill] sm:$0xff] %v7763_v0  ;;  %3305 = vmax.xlane.f32.xlu0 %v7763_v0 }
 0x437   : > { %v3242_v54 = vmul.f32 0.2, %v3226_v5 }
 0x438   : > { %v3174_v46 = vpop.permute.xlu0 %3173 }
 0x439   : > { %v3227_v40 = vadd.f32 %v7752_v39, %v3174_v46  ;;  %v3258_v21 = vmax.f32 %v3226_v5, %v3242_v54 }
 0x43b   : > { %v3243_v2 = vmul.f32 0.2, %v3227_v40  ;;  %v7772_v54 = vadd.f32 %v3258_v21, %v9051_v13 }
 0x43c   : > { %v7747_v23 = vpop.permute.xlu0 %3177 }
 0x43d   : > { %9112 = vst [vmem:[#allocation80_spill] sm:$0xff] %v7772_v54  ;;  %3309 = vmax.xlane.f32.xlu0 %v7772_v54 }
 0x440   : > { %v3182_v15 = vpop.permute.xlu0 %3181 }
 0x441   : > { %v3229_v26 = vadd.f32 %v7752_v39, %v3182_v15 }
 0x443   : > { %v3245_v18 = vmul.f32 0.2, %v3229_v26 }
 0x444   : > { %v7749_v55 = vpop.permute.xlu0 %3185 }
 0x445   : > { %v3261_v34 = vmax.f32 %v3229_v26, %v3245_v18  ;;  %v1971_v26 = vld [vmem:[#allocation4 + $0xd0] sm:$0xff] }
 0x447   : > { %v7788_v18 = vadd.f32 %v3261_v34, %v9060_v42 }
 0x448   : > { %v3190_v63 = vpop.permute.xlu0 %3189 }
 0x449   : > { %v3231_v15 = vadd.f32 %v7752_v39, %v3190_v63 }
 0x44b   : > { %v3247_v5 = vmul.f32 0.2, %v3231_v15 }
 0x44c   : > { %v3198_v22 = vpop.permute.xlu0 %3197 }
 0x44d   : > { %v3233_v46 = vadd.f32 %v7752_v39, %v3198_v22  ;;  %v3263_v53 = vmax.f32 %v3231_v15, %v3247_v5  ;;  %v1964_v5 = vld [vmem:[#allocation4 + $0x98] sm:$0xff] }
 0x450   : > { %v7756_v62 = vpop.permute.xlu0 %3201 }
 0x452   : > { %v5235_v44 = vpop.f32.mrb[0].mxu1 }
 0x453   : > { %v2260_v32 = vadd.f32 %v5235_v44, %v2059_v24  ;;  %v2195_v58 = vpop.f32.mrb[1].mxu1  ;;  %v1965_v44 = vld [vmem:[#allocation4 + $0xa0] sm:$0xff]  ;;  %v3259_v24 = vmax.f32 %v3227_v40, %v3243_v2 }
 0x454   : > { %v3206_v43 = vpop.permute.xlu0 %3205  ;;  %v7760_v10 = vpop.f32.mrb[2].mxu1  ;;  %v2061_v9 = vmul.f32 %v2000_v47, %v1965_v44  ;;  %v3249_v47 = vmul.f32 0.2, %v3233_v46 }
 0x455   : > { %2308 = vst.msk [vmem:[#allocation4 + $0x90] sm:$0xff] %vm1472_vm3, %v2260_v32  ;;  %v2198_v41 = vpop.f32.mrb[3].mxu1  ;;  %v2030_v32 = vpop.permute.xlu1 %2029  ;;  %v7781_v13 = vadd.f32 %v3259_v24, %v9054_v36  ;;  %v3235_v22 = vadd.f32 %v7752_v39, %v3206_v43  ;;  %v7792_v43 = vadd.f32 %v3263_v53, %v9064_v19 }
 0x456   : > { %v2259_v6 = vadd.f32 %v2198_v41, %v2058_v59  ;;  %v2067_v24 = vmul.f32 %v2030_v32, %v1971_v26 }
 0x457   : > { %9113 = vst [vmem:[#allocation78_spill] sm:$0xff] %v7781_v13  ;;  %3311 = vmax.xlane.f32.xlu0 %v7781_v13 }
 0x458   : > { %v7768_v25 = vpop.permute.xlu0 %3209  ;;  %2307 = vst.msk [vmem:[#allocation4 + $0x88] sm:$0xff] %vm1472_vm3, %v2259_v6  ;;  %v1969_v6 = vld [vmem:[#allocation4 + $0xc0] sm:$0xff] }
 0x459   : > { %v2040_v44 = vpop.permute.xlu1 %2039 }
 0x45a   : > { %v5239_v63 = vpop.f32.mrb[4].mxu1 }
 0x45b   : > { %v2264_v59 = vadd.f32 %v5239_v63, %v2063_v49  ;;  %v2211_v41 = vpop.f32.mrb[5].mxu1  ;;  %v3265_v63 = vmax.f32 %v3233_v46, %v3249_v47  ;;  %3315 = vmax.xlane.f32.xlu0 %v7788_v18  ;;  %v1975_v46 = vld [vmem:[#allocation4 + $0xf0] sm:$0xff] }
 0x45c   : > { %v7776_v0 = vpop.permute.xlu0 %3217  ;;  %v2262_v40 = vadd.f32 %v2211_v41, %v2061_v9  ;;  %v7778_v2 = vpop.f32.mrb[6].mxu1  ;;  %v2065_v9 = vmul.f32 %v2020_v20, %v1969_v6 }
 0x45d   : > { %2312 = vst.msk [vmem:[#allocation4 + $0xb0] sm:$0xff] %vm1472_vm3, %v2264_v59  ;;  %v2214_v21 = vpop.f32.mrb[7].mxu1  ;;  %v3251_v59 = vmul.f32 0.2, %v3235_v22  ;;  %v2050_v26 = vpop.permute.xlu1 %2049  ;;  %v7799_v19 = vadd.f32 %v3265_v63, %v9070_v28 }
 0x45e   : > { %2310 = vst.msk [vmem:[#allocation4 + $0xa0] sm:$0xff] %vm1472_vm3, %v2262_v40  ;;  %v2071_v6 = vmul.f32 %v2050_v26, %v1975_v46 }
 0x45f   : > { %v3267_v47 = vmax.f32 %v3235_v22, %v3251_v59  ;;  %3319 = vmax.xlane.f32.xlu0 %v7792_v43 }
 0x461   : > { %v1980_v36 = vpop.permute.xlu0 %1979  ;;  %v7805_v22 = vadd.f32 %v3267_v47, %v9074_v14  ;;  %v1974_v47 = vld [vmem:[#allocation4 + $0xe8] sm:$0xff] }
 0x462   : > { %v2057_v49 = vmul.f32 %v1980_v36, %v1961_v31  ;;  %v5243_v15 = vpop.f32.mrb[8].mxu1  ;;  %v1966_v31 = vld [vmem:[#allocation4 + $0xa8] sm:$0xff] }
 0x463   : > { %v2268_v40 = vadd.f32 %v5243_v15, %v2067_v24  ;;  %v2227_v13 = vpop.f32.mrb[9].mxu1  ;;  %3323 = vmax.xlane.f32.xlu0 %v7799_v19 }
 0x464   : > { %v2258_v41 = vadd.f32 %v2195_v58, %v2057_v49  ;;  %v2266_v42 = vadd.f32 %v2227_v13, %v2065_v9  ;;  %v5244_v34 = vpop.f32.mrb[10].mxu1  ;;  %v1973_v58 = vld [vmem:[#allocation4 + $0xe0] sm:$0xff]  ;;  %v1968_v49 = vld [vmem:[#allocation4 + $0xb8] sm:$0xff] }
 0x465   : > { %v1995_v54 = vpop.permute.xlu0 %1994  ;;  %2316 = vst.msk [vmem:[#allocation4 + $0xd0] sm:$0xff] %vm1472_vm3, %v2268_v40  ;;  %v2230_v20 = vpop.f32.mrb[11].mxu1 }
 0x466   : > { %2306 = vst.msk [vmem:[#allocation4 + $0x80] sm:$0xff] %vm1472_vm3, %v2258_v41  ;;  %v2060_v32 = vmul.f32 %v1995_v54, %v1964_v5  ;;  %2314 = vst.msk [vmem:[#allocation4 + $0xc0] sm:$0xff] %vm1472_vm3, %v2266_v42  ;;  %v2069_v54 = vmul.f32 %v2040_v44, %v1973_v58  ;;  %v1970_v44 = vld [vmem:[#allocation4 + $0xc8] sm:$0xff]  ;;  %v1972_v42 = vld [vmem:[#allocation4 + $0xd8] sm:$0xff] }
 0x467   : > { %3327 = vmax.xlane.f32.xlu0 %v7805_v22 }
 0x468   : > { %v2261_v13 = vadd.f32 %v7760_v10, %v2060_v32 }
 0x469   : > { %v2005_v53 = vpop.permute.xlu0 %2004 }
 0x46a   : > { %2309 = vst.msk [vmem:[#allocation4 + $0x98] sm:$0xff] %vm1472_vm3, %v2261_v13  ;;  %v2062_v36 = vmul.f32 %v2005_v53, %v1966_v31  ;;  %v5247_v24 = vpop.f32.mrb[12].mxu1  ;;  %v1976_v53 = vld [vmem:[#allocation4 + $0xf8] sm:$0xff] }
 0x46b   : > { %v2272_v59 = vadd.f32 %v5247_v24, %v2071_v6  ;;  %v2243_v28 = vpop.f32.mrb[13].mxu1  ;;  %v9114_v24 = vld [vmem:[#allocation41_spill] sm:$0xff] }
 0x46c   : > { %v2263_v9 = vadd.f32 %v2214_v21, %v2062_v36  ;;  %v2270_v63 = vadd.f32 %v2243_v28, %v2069_v54  ;;  %v5248_v15 = vpop.f32.mrb[14].mxu1 }
 0x46d   : > { %v2015_v5 = vpop.permute.xlu0 %2014  ;;  %2320 = vst.msk [vmem:[#allocation4 + $0xf0] sm:$0xff] %vm1472_vm3, %v2272_v59  ;;  %v2246_v10 = vpop.f32.mrb[15].mxu1 }
 0x46e   : > { %2311 = vst.msk [vmem:[#allocation4 + $0xa8] sm:$0xff] %vm1472_vm3, %v2263_v9  ;;  %v2064_v41 = vmul.f32 %v2015_v5, %v1968_v49  ;;  %2318 = vst.msk [vmem:[#allocation4 + $0xe0] sm:$0xff] %vm1472_vm3, %v2270_v63  ;;  %v9115_v5 = vld [vmem:[#allocation6_spill] sm:$0xff] }
 0x470   : > { %v2265_v14 = vadd.f32 %v7778_v2, %v2064_v41  ;;  %v9116_v41 = vld [vmem:[#allocation8_spill] sm:$0xff] }
 0x471   : > { %v2025_v40 = vpop.permute.xlu0 %2024 }
 0x472   : > { %2313 = vst.msk [vmem:[#allocation4 + $0xb8] sm:$0xff] %vm1472_vm3, %v2265_v14  ;;  %v2066_v21 = vmul.f32 %v2025_v40, %v1970_v44  ;;  %v5698_v40 = vld [vmem:[%s6005_s13 + $0x40] sm:$0xff] }
 0x474   : > { %v2267_v32 = vadd.f32 %v2230_v20, %v2066_v21  ;;  %v5699_v21 = vld [vmem:[%s6005_s13 + $0x68] sm:$0xff] }
 0x475   : > { %v2035_v46 = vpop.permute.xlu0 %2034 }
 0x476   : > { %2315 = vst.msk [vmem:[#allocation4 + $0xc8] sm:$0xff] %vm1472_vm3, %v2267_v32  ;;  %v2068_v26 = vmul.f32 %v2035_v46, %v1972_v42  ;;  %v5700_v42 = vld [vmem:[%s6005_s13 + $0x78] sm:$0xff]  ;;  %v3228_v46 = vadd.f32 %v7752_v39, %v7747_v23 }
 0x478   : > { %v2269_v31 = vadd.f32 %v5244_v34, %v2068_v26 }
 0x479   : > { %v2045_v58 = vpop.permute.xlu0 %2044 }
 0x47a   : > { %2317 = vst.msk [vmem:[#allocation4 + $0xd8] sm:$0xff] %vm1472_vm3, %v2269_v31  ;;  %v2070_v13 = vmul.f32 %v2045_v58, %v1974_v47  ;;  %v3244_v47 = vmul.f32 0.2, %v3228_v46  ;;  %v3230_v31 = vadd.f32 %v7752_v39, %v7749_v55 }
 0x47c   : > { %v2271_v6 = vadd.f32 %v2246_v10, %v2070_v13  ;;  %v3260_v58 = vmax.f32 %v3228_v46, %v3244_v47  ;;  %v3246_v13 = vmul.f32 0.2, %v3230_v31 }
 0x47d   : > { %v2055_v36 = vpop.permute.xlu0 %2054 }
 0x47e   : > { %2319 = vst.msk [vmem:[#allocation4 + $0xe8] sm:$0xff] %vm1472_vm3, %v2271_v6  ;;  %v2072_v2 = vmul.f32 %v2055_v36, %v1976_v53  ;;  %v9117_v53 = vld [vmem:[#allocation14_spill] sm:$0xff]  ;;  %v3262_v36 = vmax.f32 %v3230_v31, %v3246_v13 }
 0x480   : > { %v2273_v54 = vadd.f32 %v5248_v15, %v2072_v2  ;;  %v7846_v2 = vld [vmem:[#allocation2 + $0x180] sm:$0xff] }
 0x481   : > { %9119 = vst [vmem:[#allocation79_spill] sm:$0xff] %v7846_v2 }
 0x482   : > { %2321 = vst.msk [vmem:[#allocation4 + $0xf8] sm:$0xff] %vm1472_vm3, %v2273_v54 }
 0x486   : > { %v2571_v20 = vpop.permute.xlu1 %2570 }
 0x487   : > { %v2648_v49 = vsub.f32 %v9114_v24, %v2571_v20  ;;  %v7853_v20 = vld [vmem:[#allocation2 + $0x190] sm:$0xff] }
 0x488   : > { %9121 = vst [vmem:[#allocation82_spill] sm:$0xff] %v7853_v20 }
 0x489   : > { %v2664_v9 = vmul.f32 1.442695, %v2648_v49  ;;  %v7860_v49 = vld [vmem:[#allocation2 + $0x198] sm:$0xff] }
 0x48a   : > { %v2576_v34 = vpop.permute.xlu0 %2575  ;;  %9123 = vst [vmem:[#allocation10_spill] sm:$0xff] %v7860_v49  ;;  %v2581_v31 = vpop.permute.xlu1 %2580 }
 0x48b   : > { %5554 = vpow2.f32 %v2664_v9  ;;  %v2649_v59 = vsub.f32 %v7502_v33, %v2576_v34  ;;  %v3225_v33 = vadd.f32 %v7752_v39, %v7745_v8  ;;  %v9118_v8 = vld [vmem:[#allocation20_spill] sm:$0xff] }
 0x48c   : > { %v7843_v23 = vadd.f32 %v3262_v36, %v9118_v8 }
 0x48d   : > { %v2666_v28 = vmul.f32 1.442695, %v2649_v59  ;;  %v3241_v32 = vmul.f32 0.2, %v3225_v33  ;;  %v7867_v59 = vld [vmem:[#allocation2 + $0x1a8] sm:$0xff] }
 0x48e   : > { %9125 = vst [vmem:[#allocation18_spill] sm:$0xff] %v7867_v59  ;;  %v2586_v13 = vpop.permute.xlu1 %2585 }
 0x48f   : > { %5556 = vpow2.f32 %v2666_v28  ;;  %v3257_v26 = vmax.f32 %v3225_v33, %v3241_v32  ;;  %v7888_v33 = vld [vmem:[#allocation2 + $0x1d8] sm:$0xff] }
 0x490   : > { %9131 = vst [vmem:[#allocation28_spill] sm:$0xff] %v7888_v33 }
 0x491   : > { %v7835_v6 = vadd.f32 %v3257_v26, %v9117_v53  ;;  %v9133_v26 = vsub.f32 %v7620_v1, %v7623_v7  ;;  %v2713_v53 = vld [vmem:[#allocation3 + $0x100] sm:$0xff]  ;;  %v3236_v7 = vadd.f32 %v7752_v39, %v7768_v25 }
 0x493   : > { %v2536_v47 = vmul.f32 1.442695, %v9133_v26 }
 0x495   : > { %v5555_v63 = vpop.eup %5554  ;;  %5558 = vpow2.f32 %v2536_v47 }
 0x496   : > { %v2696_v10 = vmul.f32 %v5555_v63, %v9115_v5 }
 0x498   : > { %2745 = vadd.xlane.f32.xlu1 %v2696_v10 }
 0x499   : > { %v5557_v15 = vpop.eup %5556 }
 0x49a   : > { %v7821_v44 = vmul.f32 %v5557_v15, %v9116_v41 }
 0x49c   : > { %v2906_v14 = vpack.c.bf16 %v7821_v44, %v2696_v10  ;;  %v7874_v10 = vld [vmem:[#allocation2 + $0x1b8] sm:$0xff] }
 0x49d   : > { %9127 = vst [vmem:[#allocation22_spill] sm:$0xff] %v7874_v10 }
 0x49e   : > { %5265 = vmatprep.mubr.bf16.mxu0 %v2906_v14 }
 0x4a9   : > { %3193 = vperm.xlu1 %5391, %v5698_v40   ;;  %v7881_v40 = vld [vmem:[#allocation2 + $0x1c8] sm:$0xff] }
 0x4aa   : > { %9129 = vst [vmem:[#allocation24_spill] sm:$0xff] %v7881_v40 }
 0x4ad   : > { %3213 = vperm.xlu1 %5391, %v5699_v21  }
 0x4b1   : > { %3221 = vperm.xlu1 %5391, %v5700_v42  }
 0x4b5   : > { %5393 = vset.pattern.permute.xlu1 %v8996_v56  ;;  %v7839_v56 = vadd.f32 %v3260_v58, %v9056_v17  ;;  %v7898_v58 = vpop.eup %5558 }
 0x4b6   : > { %9134 = vst [vmem:[#allocation32_spill] sm:$0xff] %v7898_v58  ;;  %v2729_v36 = vmul.f32 %v7898_v58, %v2713_v53 }
 0x4c2   : > { %v3306_v55 = vpop.xlane.xlu0 %3305 }
 0x4c3   : > { %v7849_v54 = vmax.f32 %v7846_v2, %v3306_v55 }
 0x4c5   : > { %9120 = vst [vmem:[#allocation77_spill] sm:$0xff] %v7849_v54  ;;  %3940 = vst.msk [vmem:[#allocation2 + $0x180] sm:$0xff] %vm1439_vm2, %v7849_v54 }
 0x4ca   : > { %v3310_v17 = vpop.xlane.xlu0 %3309 }
 0x4cb   : > { %v7856_v24 = vmax.f32 %v7853_v20, %v3310_v17  ;;  %v9135_v17 = vld [vmem:[#allocation53_spill] sm:$0xff]  ;;  %v9169_v20 = vld [vmem:[#allocation64_spill] sm:$0xff] }
 0x4cd   : > { %9122 = vst [vmem:[#allocation81_spill] sm:$0xff] %v7856_v24  ;;  %3942 = vst.msk [vmem:[#allocation2 + $0x190] sm:$0xff] %vm1439_vm2, %v7856_v24 }
 0x4d5   : > { %3307 = vmax.xlane.f32.xlu1 %v7835_v6 }
 0x4d9   : > { %3313 = vmax.xlane.f32.xlu1 %v7839_v56 }
 0x4dd   : > { %3317 = vmax.xlane.f32.xlu1 %v7843_v23 }
 0x4e4   : > { %v3312_v9 = vpop.xlane.xlu0 %3311 }
 0x4e5   : > { %v7863_v34 = vmax.f32 %v7860_v49, %v3312_v9  ;;  %v2650_v9 = vsub.f32 %v9135_v17, %v2581_v31  ;;  %v9136_v31 = vld [vmem:[#allocation47_spill] sm:$0xff] }
 0x4e6   : > { %v2651_v17 = vsub.f32 %v9136_v31, %v2586_v13  ;;  %v7962_v31 = vld [vmem:[#allocation2 + $0x1a0] sm:$0xff] }
 0x4e7   : > { %9124 = vst [vmem:[#allocation12_spill] sm:$0xff] %v7863_v34  ;;  %3943 = vst.msk [vmem:[#allocation2 + $0x198] sm:$0xff] %vm1439_vm2, %v7863_v34 }
 0x4e8   : > { %v3316_v28 = vpop.xlane.xlu0 %3315  ;;  %9141 = vst [vmem:[#allocation37_spill] sm:$0xff] %v7962_v31 }
 0x4e9   : > { %v7870_v63 = vmax.f32 %v7867_v59, %v3316_v28  ;;  %v3234_v28 = vadd.f32 %v7752_v39, %v7756_v62  ;;  %v2714_v59 = vld [vmem:[#allocation3 + $0x108] sm:$0xff] }
 0x4eb   : > { %9126 = vst [vmem:[#allocation16_spill] sm:$0xff] %v7870_v63  ;;  %3945 = vst.msk [vmem:[#allocation2 + $0x1a8] sm:$0xff] %vm1439_vm2, %v7870_v63 }
 0x4ec   : > { %v3320_v15 = vpop.xlane.xlu0 %3319 }
 0x4ed   : > { %v7877_v14 = vmax.f32 %v7874_v10, %v3320_v15 }
 0x4ef   : > { %9128 = vst [vmem:[#allocation27_spill] sm:$0xff] %v7877_v14  ;;  %3947 = vst.msk [vmem:[#allocation2 + $0x1b8] sm:$0xff] %vm1439_vm2, %v7877_v14 }
 0x4f0   : > { %v3324_v21 = vpop.xlane.xlu0 %3323 }
 0x4f1   : > { %v7884_v42 = vmax.f32 %v7881_v40, %v3324_v21  ;;  %v2668_v21 = vmul.f32 1.442695, %v2650_v9 }
 0x4f3   : > { %9130 = vst [vmem:[#allocation30_spill] sm:$0xff] %v7884_v42  ;;  %3949 = vst.msk [vmem:[#allocation2 + $0x1c8] sm:$0xff] %vm1439_vm2, %v7884_v42  ;;  %5560 = vpow2.f32 %v2668_v21 }
 0x4f4   : > { %v3328_v32 = vpop.xlane.xlu0 %3327 }
 0x4f5   : > { %v7891_v46 = vmax.f32 %v7888_v33, %v3328_v32  ;;  %v3250_v32 = vmul.f32 0.2, %v3234_v28 }
 0x4f7   : > { %9132 = vst [vmem:[#allocation33_spill] sm:$0xff] %v7891_v46  ;;  %3951 = vst.msk [vmem:[#allocation2 + $0x1d8] sm:$0xff] %vm1439_vm2, %v7891_v46  ;;  %v3266_v62 = vmax.f32 %v3234_v28, %v3250_v32 }
 0x4f9   : > { %v7918_v13 = vadd.f32 %v3266_v62, %v9072_v48  ;;  %v9137_v48 = vld [vmem:[#allocation7_spill] sm:$0xff] }
 0x525   : > { %v2746_v8 = vpop.xlane.xlu1 %2745 }
 0x526   : > { %v2777_v55 = vadd.f32 %v2746_v8, %v2729_v36  ;;  %v3252_v8 = vmul.f32 0.2, %v3236_v7 }
 0x528   : > { %3123 = vst.msk [vmem:[#allocation3 + $0x100] sm:$0xff] %vm1439_vm2, %v2777_v55  ;;  %v3238_v55 = vadd.f32 %v7752_v39, %v7776_v0 }
 0x529   : > { %v3194_v15 = vpop.permute.xlu1 %3193 }
 0x52a   : > { %v3232_v1 = vadd.f32 %v7752_v39, %v3194_v15 }
 0x52c   : > { %v3248_v26 = vmul.f32 0.2, %v3232_v1 }
 0x52d   : > { %v3214_v47 = vpop.permute.xlu1 %3213 }
 0x52e   : > { %v3264_v53 = vmax.f32 %v3232_v1, %v3248_v26  ;;  %v3237_v36 = vadd.f32 %v7752_v39, %v3214_v47  ;;  %v3268_v1 = vmax.f32 %v3236_v7, %v3252_v8  ;;  %v2670_v26 = vmul.f32 1.442695, %v2651_v17  ;;  %v5561_v7 = vpop.eup %5560  ;;  %v5411_v8 = vld [vmem:[%s6020_s8 + $0x8] sm:$0xff]   ;;  %v9153_v17 = vld [vmem:[#allocation60_spill] sm:$0xff] }
 0x52f   : > { %v3254_v47 = vmul.f32 0.2, %v3238_v55 }
 0x530   : > { %v3253_v33 = vmul.f32 0.2, %v3237_v36  ;;  %v7913_v15 = vadd.f32 %v3264_v53, %v9066_v50  ;;  %5562 = vpow2.f32 %v2670_v26 }
 0x531   : > { %v3222_v25 = vpop.permute.xlu1 %3221  ;;  %v3270_v50 = vmax.f32 %v3238_v55, %v3254_v47  ;;  %v5412_v47 = vld [vmem:[%s6020_s8 + $0x10] sm:$0xff]  }
 0x532   : > { %v3269_v9 = vmax.f32 %v3237_v36, %v3253_v33  ;;  %v3239_v40 = vadd.f32 %v7752_v39, %v3222_v25  ;;  %3321 = vmax.xlane.f32.xlu1 %v7913_v15  ;;  %v7929_v33 = vadd.f32 %v3268_v1, %v9076_v61  ;;  %v9138_v61 = vld [vmem:[#allocation11_spill] sm:$0xff]  ;;  %v7973_v25 = vld [vmem:[#allocation2 + $0x1b0] sm:$0xff] }
 0x533   : > { %9143 = vst [vmem:[#allocation40_spill] sm:$0xff] %v7973_v25 }
 0x534   : > { %v3255_v21 = vmul.f32 0.2, %v3239_v40  ;;  %v7921_v28 = vadd.f32 %v3269_v9, %v9080_v27  ;;  %v7934_v27 = vmul.f32 %v5561_v7, %v9137_v48  ;;  %v5415_v7 = vld [vmem:[%s6020_s8 + $0x8] sm:$0xff]  }
 0x536   : > { %v3271_v0 = vmax.f32 %v3239_v40, %v3255_v21  ;;  %3325 = vmax.xlane.f32.xlu1 %v7918_v13  ;;  %3331 = vmax.xlane.f32.xlu0 %v7921_v28  ;;  %v7937_v40 = vadd.f32 %v3270_v50, %v9082_v3  ;;  %v5410_v3 = vld [vmem:[%s6020_s8] sm:$0xff]  }
 0x537   : > { %v5414_v50 = vld [vmem:[%s6020_s8] sm:$0xff]  }
 0x538   : > { %v7926_v39 = vadd.f32 %v3271_v0, %v9084_v29  ;;  %v5413_v0 = vld [vmem:[%s6020_s8 + $0x18] sm:$0xff]  }
 0x53a   : > { %3335 = vmax.xlane.f32.xlu0 %v7926_v39  ;;  %3329 = vmax.xlane.f32.xlu1 %v7929_v33  ;;  %v5563_v29 = vpop.eup %5562 }
 0x53b   : > { %v7943_v32 = vmul.f32 %v5563_v29, %v9138_v61  ;;  %v5420_v29 = vld [vmem:[%s6020_s8 + $0x20] sm:$0xff]  }
 0x53e   : > { %2749 = vadd.xlane.f32.xlu0 %v7934_v27  ;;  %3333 = vmax.xlane.f32.xlu1 %v7937_v40 }
 0x542   : > { %2747 = vadd.xlane.f32.xlu1 %v7821_v44  ;;  %v7954_v44 = vld [vmem:[#allocation2 + $0x188] sm:$0xff] }
 0x543   : > { %9139 = vst [vmem:[#allocation36_spill] sm:$0xff] %v7954_v44 }
 0x546   : > { %2751 = vadd.xlane.f32.xlu1 %v7943_v32 }
 0x554   : > { %2615 = vperm.xlu0 %5392, %v7701_v51  }
 0x557   : > { %2590 = vperm.xlu1 %5393, %v7658_v11  }
 0x558   : > { %2625 = vperm.xlu0 %5392, %v7715_v45  }
 0x55b   : > { %2595 = vperm.xlu1 %5393, %v7672_v38  }
 0x55c   : > { %2635 = vperm.xlu0 %5392, %v7729_v35   ;;  %v9189_v35 = vld [vmem:[#allocation74_spill] sm:$0xff] }
 0x55f   : > { %2600 = vperm.xlu1 %5393, %v7675_v30  }
 0x560   : > { %2645 = vperm.xlu0 %5392, %v7741_v4  }
 0x562   : > { %v3308_v53 = vpop.xlane.xlu1 %3307 }
 0x563   : > { %2605 = vperm.xlu1 %5393, %v7687_v60   ;;  %v7958_v36 = vmax.f32 %v7954_v44, %v3308_v53  ;;  %v5416_v53 = vld [vmem:[%s6020_s8 + $0x10] sm:$0xff]   ;;  %v9191_v44 = vld [vmem:[#allocation34_spill] sm:$0xff] }
 0x564   : > { %2970 = vrot.lane.b32.xlu0 %v5410_v3, %s5894_s30  ;;  %v5422_v3 = vld [vmem:[%s6020_s8 + $0x28] sm:$0xff]  }
 0x565   : > { %9140 = vst [vmem:[#allocation35_spill] sm:$0xff] %v7958_v36  ;;  %3941 = vst.msk [vmem:[#allocation2 + $0x188] sm:$0xff] %vm1439_vm2, %v7958_v36 }
 0x566   : > { %v3314_v62 = vpop.xlane.xlu1 %3313 }
 0x567   : > { %2610 = vperm.xlu1 %5393, %v7690_v16   ;;  %v7970_v55 = vmax.f32 %v7962_v31, %v3314_v62  ;;  %v5418_v62 = vld [vmem:[%s6020_s8 + $0x20] sm:$0xff]  }
 0x568   : > { %3805 = vrot.lane.b32.xlu0 %v5411_v8, %s5895_s9  ;;  %v5417_v8 = vld [vmem:[%s6020_s8 + $0x18] sm:$0xff]  }
 0x569   : > { %9142 = vst [vmem:[#allocation38_spill] sm:$0xff] %v7970_v55  ;;  %3944 = vst.msk [vmem:[#allocation2 + $0x1a0] sm:$0xff] %vm1439_vm2, %v7970_v55 }
 0x56a   : > { %v3318_v1 = vpop.xlane.xlu1 %3317 }
 0x56b   : > { %2620 = vperm.xlu1 %5393, %v7704_v52   ;;  %v7981_v26 = vmax.f32 %v7973_v25, %v3318_v1  ;;  %v5419_v1 = vld [vmem:[%s6020_s8 + $0x28] sm:$0xff]  }
 0x56c   : > { %3408 = vperm.xlu0 %5392, %v7958_v36  }
 0x56d   : > { %9144 = vst [vmem:[#allocation39_spill] sm:$0xff] %v7981_v26  ;;  %3946 = vst.msk [vmem:[#allocation2 + $0x1b0] sm:$0xff] %vm1439_vm2, %v7981_v26 }
 0x56f   : > { %2630 = vperm.xlu1 %5393, %v7718_v57  }
 0x570   : > { %2974 = vrot.lane.b32.xlu0 %v5412_v47, %s5894_s30  ;;  %v5421_v47 = vld [vmem:[%s6020_s8 + $0x30] sm:$0xff]  }
 0x573   : > { %2640 = vperm.xlu1 %5393, %v7732_v12  }
 0x574   : > { %2976 = vrot.lane.b32.xlu0 %v5413_v0, %s5894_s30  ;;  %v5423_v0 = vld [vmem:[%s6020_s8 + $0x38] sm:$0xff]  }
 0x577   : > { %3803 = vrot.lane.b32.xlu1 %v5414_v50, %s5895_s9  ;;  %v9145_v50 = vld [vmem:[#allocation48_spill] sm:$0xff] }
 0x578   : > { %3423 = vperm.xlu0 %5392, %v7970_v55  }
 0x57b   : > { %2972 = vrot.lane.b32.xlu1 %v5415_v7, %s5894_s30  ;;  %v9146_v7 = vsub.f32 %v7625_v37, %v9145_v50  ;;  %v8039_v37 = vld [vmem:[#allocation2 + $0x1e8] sm:$0xff] }
 0x57c   : > { %3433 = vperm.xlu0 %5392, %v7981_v26   ;;  %9156 = vst [vmem:[#allocation14_spill] sm:$0xff] %v8039_v37 }
 0x57f   : > { %3403 = vperm.xlu1 %5393, %v7849_v54  }
 0x580   : > { %2978 = vrot.lane.b32.xlu0 %v5420_v29, %s5894_s30  ;;  %v2540_v29 = vmul.f32 1.442695, %v9146_v7 }
 0x582   : > { %5564 = vpow2.f32 %v2540_v29 }
 0x583   : > { %3413 = vperm.xlu1 %5393, %v7856_v24  }
 0x584   : > { %2980 = vrot.lane.b32.xlu0 %v5422_v3, %s5894_s30  ;;  %v9147_v3 = vld [vmem:[#allocation52_spill] sm:$0xff] }
 0x587   : > { %3418 = vperm.xlu1 %5393, %v7863_v34  }
 0x58b   : > { %3807 = vrot.lane.b32.xlu1 %v5416_v53, %s5895_s9  ;;  %v9148_v53 = vld [vmem:[#allocation51_spill] sm:$0xff] }
 0x58f   : > { %3809 = vrot.lane.b32.xlu1 %v5417_v8, %s5895_s9  ;;  %v9149_v8 = vsub.f32 %v9147_v3, %v9148_v53  ;;  %v8054_v3 = vld [vmem:[#allocation2 + $0x1f8] sm:$0xff] }
 0x590   : > { %9160 = vst [vmem:[#allocation7_spill] sm:$0xff] %v8054_v3 }
 0x593   : > { %3428 = vperm.xlu1 %5393, %v7870_v63  }
 0x597   : > { %3438 = vperm.xlu1 %5393, %v7877_v14  }
 0x59b   : > { %3811 = vrot.lane.b32.xlu1 %v5418_v62, %s5895_s9  ;;  %v2538_v62 = vmul.f32 1.442695, %v9149_v8  ;;  %v8075_v8 = vld [vmem:[#allocation2 + $0x1f0] sm:$0xff] }
 0x59c   : > { %9164 = vst [vmem:[#allocation51_spill] sm:$0xff] %v8075_v8 }
 0x59d   : > { %5566 = vpow2.f32 %v2538_v62  ;;  %v5424_v62 = vld [vmem:[%s6020_s8 + $0x30] sm:$0xff]  }
 0x59f   : > { %3813 = vrot.lane.b32.xlu1 %v5419_v1, %s5895_s9  ;;  %v8029_v1 = vld [vmem:[#allocation2 + $0x1c0] sm:$0xff] }
 0x5a0   : > { %9150 = vst [vmem:[#allocation41_spill] sm:$0xff] %v8029_v1 }
 0x5a3   : > { %3448 = vperm.xlu1 %5393, %v7884_v42   ;;  %v8037_v42 = vld [vmem:[#allocation2 + $0x1d0] sm:$0xff] }
 0x5a4   : > { %9155 = vst [vmem:[#allocation8_spill] sm:$0xff] %v8037_v42 }
 0x5a7   : > { %3458 = vperm.xlu1 %5393, %v7891_v46  }
 0x5ab   : > { %3815 = vrot.lane.b32.xlu1 %v5421_v47, %s5895_s9  ;;  %v9152_v47 = vld [vmem:[#allocation54_spill] sm:$0xff] }
 0x5ac   : > { %v9154_v46 = vsub.f32 %v9152_v47, %v9153_v17  ;;  %v8052_v17 = vld [vmem:[#allocation2 + $0x1e0] sm:$0xff]  ;;  %v8067_v47 = vpop.eup %5564 }
 0x5ad   : > { %9159 = vst [vmem:[#allocation47_spill] sm:$0xff] %v8052_v17  ;;  %9161 = vst [vmem:[#allocation11_spill] sm:$0xff] %v8067_v47  ;;  %v8089_v10 = vpop.eup %5566 }
 0x5af   : > { %3817 = vrot.lane.b32.xlu1 %v5423_v0, %s5895_s9  ;;  %v2542_v0 = vmul.f32 1.442695, %v9154_v46 }
 0x5b1   : > { %5568 = vpow2.f32 %v2542_v0 }
 0x5bf   : > { %v3322_v21 = vpop.xlane.xlu1 %3321 }
 0x5c0   : > { %v8032_v9 = vmax.f32 %v8029_v1, %v3322_v21  ;;  %v9171_v1 = vld [vmem:[#allocation55_spill] sm:$0xff] }
 0x5c2   : > { %9151 = vst [vmem:[#allocation6_spill] sm:$0xff] %v8032_v9  ;;  %3948 = vst.msk [vmem:[#allocation2 + $0x1c0] sm:$0xff] %vm1439_vm2, %v8032_v9  ;;  %3443 = vperm.xlu0 %5392, %v8032_v9  }
 0x5c3   : > { %v3326_v21 = vpop.xlane.xlu1 %3325  ;;  %v3332_v7 = vpop.xlane.xlu0 %3331 }
 0x5c4   : > { %v8047_v29 = vmax.f32 %v8037_v42, %v3326_v21  ;;  %v8050_v46 = vmax.f32 %v8039_v37, %v3332_v7  ;;  %v2715_v7 = vld [vmem:[#allocation3 + $0x110] sm:$0xff] }
 0x5c6   : > { %9157 = vst [vmem:[#allocation20_spill] sm:$0xff] %v8047_v29  ;;  %9158 = vst [vmem:[#allocation53_spill] sm:$0xff] %v8050_v46  ;;  %3453 = vperm.xlu0 %5392, %v8047_v29   ;;  %3468 = vperm.xlu1 %5393, %v8050_v46  }
 0x5c7   : > { %3950 = vst.msk [vmem:[#allocation2 + $0x1d0] sm:$0xff] %vm1439_vm2, %v8047_v29  ;;  %3953 = vst.msk [vmem:[#allocation2 + $0x1e8] sm:$0xff] %vm1439_vm2, %v8050_v46  ;;  %v3330_v0 = vpop.xlane.xlu1 %3329  ;;  %v3336_v21 = vpop.xlane.xlu0 %3335 }
 0x5c8   : > { %v8070_v53 = vmax.f32 %v8052_v17, %v3330_v0  ;;  %v8073_v50 = vmax.f32 %v8054_v3, %v3336_v21  ;;  %v2731_v0 = vmul.f32 %v8067_v47, %v2715_v7  ;;  %v5425_v21 = vld [vmem:[%s6020_s8 + $0x38] sm:$0xff]   ;;  %v8101_v7 = vpop.eup %5568 }
 0x5c9   : > { %9166 = vst [vmem:[#allocation60_spill] sm:$0xff] %v8101_v7  ;;  %v2716_v3 = vld [vmem:[#allocation3 + $0x118] sm:$0xff] }
 0x5ca   : > { %9162 = vst [vmem:[#allocation48_spill] sm:$0xff] %v8070_v53  ;;  %9163 = vst [vmem:[#allocation52_spill] sm:$0xff] %v8073_v50  ;;  %2982 = vrot.lane.b32.xlu0 %v5424_v62, %s5894_s30  ;;  %3478 = vperm.xlu1 %5393, %v8073_v50   ;;  %v2730_v62 = vmul.f32 %v8089_v10, %v2714_v59 }
 0x5cb   : > { %3952 = vst.msk [vmem:[#allocation2 + $0x1e0] sm:$0xff] %vm1439_vm2, %v8070_v53  ;;  %3955 = vst.msk [vmem:[#allocation2 + $0x1f8] sm:$0xff] %vm1439_vm2, %v8073_v50  ;;  %v3334_v14 = vpop.xlane.xlu1 %3333  ;;  %v2750_v37 = vpop.xlane.xlu0 %2749 }
 0x5cc   : > { %v8092_v63 = vmax.f32 %v8075_v8, %v3334_v14  ;;  %v2779_v17 = vadd.f32 %v2750_v37, %v2731_v0  ;;  %v2732_v14 = vmul.f32 %v8101_v7, %v2716_v3  ;;  %v9188_v7 = vld [vmem:[#allocation31_spill] sm:$0xff] }
 0x5ce   : > { %9165 = vst [vmem:[#allocation54_spill] sm:$0xff] %v8092_v63  ;;  %3954 = vst.msk [vmem:[#allocation2 + $0x1f0] sm:$0xff] %vm1439_vm2, %v8092_v63  ;;  %2984 = vrot.lane.b32.xlu0 %v5425_v21, %s5894_s30  ;;  %v9167_v21 = vld [vmem:[#allocation58_spill] sm:$0xff] }
 0x5cf   : > { %3125 = vst.msk [vmem:[#allocation3 + $0x110] sm:$0xff] %vm1439_vm2, %v2779_v17  ;;  %v2748_v50 = vpop.xlane.xlu1 %2747 }
 0x5d0   : > { %v2778_v49 = vadd.f32 %v2748_v50, %v2730_v62  ;;  %v9168_v62 = vld [vmem:[#allocation50_spill] sm:$0xff] }
 0x5d2   : > { %3124 = vst.msk [vmem:[#allocation3 + $0x108] sm:$0xff] %vm1439_vm2, %v2778_v49  ;;  %3463 = vperm.xlu0 %5392, %v8070_v53  }
 0x5d3   : > { %v2752_v37 = vpop.xlane.xlu1 %2751  ;;  %v2616_v0 = vpop.permute.xlu0 %2615 }
 0x5d4   : > { %v2780_v46 = vadd.f32 %v2752_v37, %v2732_v14  ;;  %v9170_v37 = vld [vmem:[#allocation67_spill] sm:$0xff] }
 0x5d6   : > { %3126 = vst.msk [vmem:[#allocation3 + $0x118] sm:$0xff] %vm1439_vm2, %v2780_v46  ;;  %3473 = vperm.xlu0 %5392, %v8092_v63   ;;  %v2657_v46 = vsub.f32 %v9170_v37, %v2616_v0 }
 0x5d7   : > { %v2591_v17 = vpop.permute.xlu1 %2590  ;;  %v2626_v59 = vpop.permute.xlu0 %2625 }
 0x5d8   : > { %v2652_v8 = vsub.f32 %v9167_v21, %v2591_v17  ;;  %v9172_v17 = vld [vmem:[#allocation44_spill] sm:$0xff] }
 0x5d9   : > { %v2659_v21 = vsub.f32 %v9172_v17, %v2626_v59  ;;  %v9177_v59 = vld [vmem:[#allocation42_spill] sm:$0xff] }
 0x5da   : > { %v2672_v34 = vmul.f32 1.442695, %v2652_v8  ;;  %v2682_v8 = vmul.f32 1.442695, %v2657_v46  ;;  %v9175_v46 = vld [vmem:[#allocation15_spill] sm:$0xff] }
 0x5db   : > { %v2596_v29 = vpop.permute.xlu1 %2595  ;;  %v2636_v50 = vpop.permute.xlu0 %2635 }
 0x5dc   : > { %v2653_v49 = vsub.f32 %v9168_v62, %v2596_v29  ;;  %5570 = vpow2.f32 %v2672_v34 }
 0x5de   : > { %v2674_v53 = vmul.f32 1.442695, %v2653_v49  ;;  %v2686_v49 = vmul.f32 1.442695, %v2659_v21  ;;  %v9178_v21 = vld [vmem:[#allocation45_spill] sm:$0xff] }
 0x5df   : > { %v2601_v42 = vpop.permute.xlu1 %2600  ;;  %v2646_v3 = vpop.permute.xlu0 %2645 }
 0x5e0   : > { %5572 = vpow2.f32 %v2674_v53  ;;  %v2654_v14 = vsub.f32 %v9169_v20, %v2601_v42  ;;  %v9173_v20 = vld [vmem:[#allocation61_spill] sm:$0xff] }
 0x5e2   : > { %v2676_v24 = vmul.f32 1.442695, %v2654_v14  ;;  %v9174_v14 = vld [vmem:[#allocation43_spill] sm:$0xff] }
 0x5e3   : > { %v2606_v63 = vpop.permute.xlu1 %2605  ;;  %v2971_v9 = vpop.permute.xlu0 %2970  ;;  %v2661_v37 = vsub.f32 %v9174_v14, %v2636_v50 }
 0x5e4   : > { %v2655_v2 = vsub.f32 %v9171_v1, %v2606_v63  ;;  %5249 = vmatprep.subr.bf16.mxu0 %v2971_v9  ;;  %5574 = vpow2.f32 %v2676_v24  ;;  %v9176_v24 = vld [vmem:[#allocation9_spill] sm:$0xff] }
 0x5e5   : > { %5250 = vmatpush3.bf16.msra.mxu0 %v2971_v9 }
 0x5e6   : > { %v2678_v34 = vmul.f32 1.442695, %v2655_v2  ;;  %v5571_v53 = vpop.eup %5570 }
 0x5e7   : > { %v2611_v29 = vpop.permute.xlu1 %2610  ;;  %v8114_v62 = vpop.permute.xlu0 %3805  ;;  %v8122_v2 = vmul.f32 %v5571_v53, %v9176_v24  ;;  %v9179_v53 = vld [vmem:[#allocation46_spill] sm:$0xff] }
 0x5e8   : > { %5576 = vpow2.f32 %v2678_v34  ;;  %v2656_v42 = vsub.f32 %v9173_v20, %v2611_v29  ;;  %v2663_v29 = vsub.f32 %v9178_v21, %v2646_v3  ;;  %v9180_v3 = vld [vmem:[#allocation13_spill] sm:$0xff]  ;;  %v9181_v21 = vld [vmem:[#allocation19_spill] sm:$0xff] }
 0x5e9   : > { %5578 = vpow2.f32 %v2682_v8  ;;  %v2690_v8 = vmul.f32 1.442695, %v2661_v37 }
 0x5ea   : > { %v5573_v0 = vpop.eup %5572  ;;  %v2680_v63 = vmul.f32 1.442695, %v2656_v42 }
 0x5eb   : > { %v2621_v1 = vpop.permute.xlu1 %2620  ;;  %v3409_v9 = vpop.permute.xlu0 %3408  ;;  %v8119_v54 = vmul.f32 %v5573_v0, %v9175_v46 }
 0x5ec   : > { %5580 = vpow2.f32 %v2680_v63  ;;  %v2658_v17 = vsub.f32 %v9177_v59, %v2621_v1  ;;  %v2694_v1 = vmul.f32 1.442695, %v2663_v29  ;;  %v3482_v59 = vsub.f32 %v7835_v6, %v3409_v9 }
 0x5ed   : > { %5582 = vpow2.f32 %v2686_v49 }
 0x5ee   : > { %v2684_v50 = vmul.f32 1.442695, %v2658_v17  ;;  %2755 = vadd.xlane.f32.xlu1 %v8119_v54  ;;  %v5575_v0 = vpop.eup %5574  ;;  %v3499_v9 = vmul.f32 1.442695, %v3482_v59 }
 0x5ef   : > { %v2631_v20 = vpop.permute.xlu1 %2630  ;;  %v8129_v42 = vpop.permute.xlu0 %2974  ;;  %v8136_v17 = vmul.f32 %v5575_v0, %v9180_v3  ;;  %v9183_v0 = vld [vmem:[#allocation17_spill] sm:$0xff] }
 0x5f0   : > { %5584 = vpow2.f32 %v2684_v50  ;;  %v2660_v14 = vsub.f32 %v9179_v53, %v2631_v20  ;;  %v9182_v50 = vld [vmem:[#allocation49_spill] sm:$0xff] }
 0x5f1   : > { %5586 = vpow2.f32 %v2690_v8 }
 0x5f2   : > { %v5577_v63 = vpop.eup %5576  ;;  %v2688_v34 = vmul.f32 1.442695, %v2660_v14 }
 0x5f3   : > { %v2641_v49 = vpop.permute.xlu1 %2640  ;;  %v8133_v37 = vpop.permute.xlu0 %2976  ;;  %v8139_v26 = vmul.f32 %v5577_v63, %v9181_v21  ;;  %v9184_v63 = vld [vmem:[#allocation23_spill] sm:$0xff] }
 0x5f4   : > { %v5579_v25 = vpop.eup %5578  ;;  %5588 = vpow2.f32 %v2688_v34  ;;  %v2662_v4 = vsub.f32 %v9182_v50, %v2641_v49 }
 0x5f5   : > { %2753 = vadd.xlane.f32.xlu0 %v8122_v2  ;;  %5590 = vpow2.f32 %v2694_v1  ;;  %v8149_v55 = vmul.f32 %v5579_v25, %v9184_v63  ;;  %v9185_v25 = vld [vmem:[#allocation21_spill] sm:$0xff] }
 0x5f6   : > { %v5581_v6 = vpop.eup %5580  ;;  %v2692_v29 = vmul.f32 1.442695, %v2662_v4 }
 0x5f7   : > { %v3804_v20 = vpop.permute.xlu1 %3803  ;;  %v3424_v53 = vpop.permute.xlu0 %3423  ;;  %v8146_v14 = vmul.f32 %v5581_v6, %v9183_v0 }
 0x5f8   : > { %v5583_v34 = vpop.eup %5582  ;;  %5592 = vpow2.f32 %v2692_v29  ;;  %v3485_v49 = vsub.f32 %v7839_v56, %v3424_v53  ;;  %5281 = vmatprep.subr.bf16.mxu1 %v3804_v20  ;;  %v9186_v29 = vld [vmem:[#allocation26_spill] sm:$0xff] }
 0x5f9   : > { %2757 = vadd.xlane.f32.xlu0 %v8136_v17  ;;  %2761 = vadd.xlane.f32.xlu1 %v8146_v14  ;;  %5594 = vpow2.f32 %v3499_v9  ;;  %v8160_v31 = vmul.f32 %v5583_v34, %v9186_v29 }
 0x5fa   : > { %v5585_v1 = vpop.eup %5584  ;;  %v3505_v59 = vmul.f32 1.442695, %v3485_v49  ;;  %5282 = vmatpush3.bf16.msra.mxu1 %v3804_v20 }
 0x5fb   : > { %v2973_v50 = vpop.permute.xlu1 %2972  ;;  %v3434_v6 = vpop.permute.xlu0 %3433  ;;  %v8157_v8 = vmul.f32 %v5585_v1, %v9185_v25  ;;  %5283 = vmatprep.subr.bf16.mxu1 %v8114_v62  ;;  %v9187_v1 = vld [vmem:[#allocation25_spill] sm:$0xff] }
 0x5fc   : > { %v5587_v56 = vpop.eup %5586  ;;  %v3487_v53 = vsub.f32 %v7843_v23, %v3434_v6  ;;  %5251 = vmatprep.subr.bf16.mxu0 %v2973_v50  ;;  %5596 = vpow2.f32 %v3505_v59  ;;  %v9193_v59 = vld [vmem:[#allocation78_spill] sm:$0xff] }
 0x5fd   : > { %2759 = vadd.xlane.f32.xlu0 %v8139_v26  ;;  %2765 = vadd.xlane.f32.xlu1 %v8157_v8  ;;  %v8173_v23 = vmul.f32 %v5587_v56, %v9188_v7 }
 0x5fe   : > { %v5589_v20 = vpop.eup %5588  ;;  %v3509_v49 = vmul.f32 1.442695, %v3487_v53  ;;  %5252 = vmatpush3.bf16.msra.mxu0 %v2973_v50  ;;  %5284 = vmatpush3.bf16.msra.mxu1 %v8114_v62 }
 0x5ff   : > { %v3404_v34 = vpop.permute.xlu1 %3403  ;;  %v8170_v4 = vmul.f32 %v5589_v20, %v9187_v1  ;;  %5253 = vmatprep.subr.bf16.mxu0 %v8129_v42  ;;  %v5591_v6 = vpop.eup %5590  ;;  %v9190_v20 = vld [vmem:[#allocation29_spill] sm:$0xff] }
 0x600   : > { %v3481_v36 = vsub.f32 %v9189_v35, %v3404_v34  ;;  %5598 = vpow2.f32 %v3509_v49  ;;  %v2979_v53 = vpop.permute.xlu0 %2978  ;;  %v8186_v47 = vmul.f32 %v5591_v6, %v9191_v44  ;;  %v9192_v34 = vld [vmem:[#allocation80_spill] sm:$0xff] }
 0x601   : > { %2769 = vadd.xlane.f32.xlu1 %v8170_v4  ;;  %2763 = vadd.xlane.f32.xlu0 %v8149_v55 }
 0x602   : > { %v5593_v62 = vpop.eup %5592  ;;  %v3497_v50 = vmul.f32 1.442695, %v3481_v36  ;;  %5254 = vmatpush3.bf16.msra.mxu0 %v8129_v42 }
 0x603   : > { %v3414_v56 = vpop.permute.xlu1 %3413  ;;  %v8183_v9 = vmul.f32 %v5593_v62, %v9190_v20  ;;  %5255 = vmatprep.subr.bf16.mxu0 %v8133_v37  ;;  %v5595_v35 = vpop.eup %5594 }
 0x604   : > { %5600 = vpow2.f32 %v3497_v50  ;;  %v3483_v45 = vsub.f32 %v9192_v34, %v3414_v56  ;;  %v3530_v6 = vmul.f32 %v5595_v35, %v9116_v41  ;;  %v2981_v58 = vpop.permute.xlu0 %2980 }
 0x605   : > { %2773 = vadd.xlane.f32.xlu1 %v8183_v9  ;;  %2767 = vadd.xlane.f32.xlu0 %v8160_v31 }
 0x606   : > { %v3501_v42 = vmul.f32 1.442695, %v3483_v45  ;;  %5256 = vmatpush3.bf16.msra.mxu0 %v8133_v37  ;;  %v5597_v62 = vpop.eup %5596 }
 0x607   : > { %v3419_v49 = vpop.permute.xlu1 %3418  ;;  %5257 = vmatprep.subr.bf16.mxu0 %v2979_v53  ;;  %v8199_v36 = vmul.f32 %v5597_v62, %v9176_v24 }
 0x608   : > { %5602 = vpow2.f32 %v3501_v42  ;;  %v3484_v50 = vsub.f32 %v9193_v59, %v3419_v49 }
 0x609   : > { %2771 = vadd.xlane.f32.xlu0 %v8173_v23  ;;  %3580 = vadd.xlane.f32.xlu1 %v3530_v6 }
 0x60a   : > { %v3503_v56 = vmul.f32 1.442695, %v3484_v50  ;;  %5258 = vmatpush3.bf16.msra.mxu0 %v2979_v53  ;;  %v5599_v45 = vpop.eup %5598 }
 0x60b   : > { %v3808_v34 = vpop.permute.xlu1 %3807  ;;  %5259 = vmatprep.subr.bf16.mxu0 %v2981_v58  ;;  %v3535_v53 = vmul.f32 %v5599_v45, %v9180_v3 }
 0x60c   : > { %5604 = vpow2.f32 %v3503_v56  ;;  %5285 = vmatprep.subr.bf16.mxu1 %v3808_v34 }
 0x60d   : > { %2775 = vadd.xlane.f32.xlu0 %v8186_v47  ;;  %3586 = vadd.xlane.f32.xlu1 %v8199_v36 }
 0x60e   : > { %v5601_v41 = vpop.eup %5600  ;;  %5286 = vmatpush3.bf16.msra.mxu1 %v3808_v34  ;;  %5260 = vmatpush3.bf16.msra.mxu0 %v2981_v58 }
 0x60f   : > { %v3810_v37 = vpop.permute.xlu1 %3809  ;;  %v3529_v59 = vmul.f32 %v5601_v41, %v9115_v5 }
 0x610   : > { %5287 = vmatprep.subr.bf16.mxu1 %v3810_v37 }
 0x611   : > { %3578 = vadd.xlane.f32.xlu0 %v3529_v59  ;;  %3590 = vadd.xlane.f32.xlu1 %v3535_v53  ;;  %v3739_v24 = vpack.c.bf16 %v3530_v6, %v3529_v59 }
 0x612   : > { %v5603_v35 = vpop.eup %5602  ;;  %5288 = vmatpush3.bf16.msra.mxu1 %v3810_v37 }
 0x613   : > { %v3429_v42 = vpop.permute.xlu1 %3428  ;;  %5297 = vmatprep.mubr.bf16.mxu1 %v3739_v24  ;;  %v3531_v49 = vmul.f32 %v5603_v35, %v9137_v48 }
 0x614   : > { %v3486_v62 = vsub.f32 %v7788_v18, %v3429_v42 }
 0x615   : > { %3582 = vadd.xlane.f32.xlu0 %v3531_v49 }
 0x616   : > { %v5605_v50 = vpop.eup %5604  ;;  %v3507_v58 = vmul.f32 1.442695, %v3486_v62 }
 0x617   : > { %v3439_v56 = vpop.permute.xlu1 %3438  ;;  %v3532_v5 = vmul.f32 %v5605_v50, %v9138_v61 }
 0x618   : > { %5606 = vpow2.f32 %v3507_v58  ;;  %v3488_v3 = vsub.f32 %v7792_v43, %v3439_v56 }
 0x619   : > { %3584 = vadd.xlane.f32.xlu0 %v3532_v5 }
 0x61a   : > { %v3511_v34 = vmul.f32 1.442695, %v3488_v3 }
 0x61b   : > { %v3812_v6 = vpop.permute.xlu1 %3811 }
 0x61c   : > { %5608 = vpow2.f32 %v3511_v34  ;;  %5289 = vmatprep.subr.bf16.mxu1 %v3812_v6 }
 0x61d   : > { %5290 = vmatpush3.bf16.msra.mxu1 %v3812_v6 }
 0x61f   : > { %v3814_v45 = vpop.permute.xlu1 %3813 }
 0x620   : > { %5291 = vmatprep.subr.bf16.mxu1 %v3814_v45 }
 0x621   : > { %5292 = vmatpush3.bf16.msra.mxu1 %v3814_v45 }
 0x622   : > { %v5607_v48 = vpop.eup %5606 }
 0x623   : > { %v3449_v18 = vpop.permute.xlu1 %3448  ;;  %v3534_v41 = vmul.f32 %v5607_v48, %v9175_v46 }
 0x624   : > { %v3490_v37 = vsub.f32 %v7799_v19, %v3449_v18  ;;  %v3740_v19 = vpack.c.bf16 %v3532_v5, %v3531_v49 }
 0x625   : > { %3588 = vadd.xlane.f32.xlu0 %v3534_v41  ;;  %v3741_v56 = vpack.c.bf16 %v3534_v41, %v8199_v36 }
 0x626   : > { %v5609_v61 = vpop.eup %5608  ;;  %v3515_v59 = vmul.f32 1.442695, %v3490_v37 }
 0x627   : > { %v3459_v24 = vpop.permute.xlu1 %3458  ;;  %v3536_v43 = vmul.f32 %v5609_v61, %v9181_v21 }
 0x628   : > { %5610 = vpow2.f32 %v3515_v59  ;;  %v3492_v35 = vsub.f32 %v7805_v22, %v3459_v24 }
 0x629   : > { %3592 = vadd.xlane.f32.xlu0 %v3536_v43  ;;  %v3742_v3 = vpack.c.bf16 %v3536_v43, %v3535_v53 }
 0x62a   : > { %v3519_v42 = vmul.f32 1.442695, %v3492_v35 }
 0x62b   : > { %v3816_v62 = vpop.permute.xlu1 %3815 }
 0x62c   : > { %5612 = vpow2.f32 %v3519_v42  ;;  %5293 = vmatprep.subr.bf16.mxu1 %v3816_v62 }
 0x62d   : > { %5294 = vmatpush3.bf16.msra.mxu1 %v3816_v62 }
 0x62f   : > { %v3818_v50 = vpop.permute.xlu1 %3817 }
 0x630   : > { %5295 = vmatprep.subr.bf16.mxu1 %v3818_v50 }
 0x631   : > { %5296 = vmatpush3.bf16.msra.mxu1 %v3818_v50 }
 0x632   : > { %v5611_v46 = vpop.eup %5610 }
 0x633   : > { %v3538_v58 = vmul.f32 %v5611_v46, %v9184_v63 }
 0x634   : > { %5298 = vmatmul.mubr.bf16.vlgmr.msra.gmra.mrb[16].mxu1 %v3740_v19 }
 0x635   : > { %3596 = vadd.xlane.f32.xlu0 %v3538_v58  ;;  %5301 = vmatprep.mubr.bf16.mxu1 %v3741_v56 }
 0x636   : > { %v5613_v21 = vpop.eup %5612 }
 0x637   : > { %v3540_v22 = vmul.f32 %v5613_v21, %v9186_v29  ;;  %v9199_v21 = vpack.c.bf16 %v8173_v23, %v8170_v4  ;;  %v9202_v23 = vld [vmem:[#allocation66_spill] sm:$0xff] }
 0x639   : > { %3600 = vadd.xlane.f32.xlu0 %v3540_v22 }
 0x63c   : > { %5302 = vmatmul.mubr.bf16.gmra.mrb[20].mxu1 %v3742_v3 }
 0x641   : > { %v3444_v34 = vpop.permute.xlu0 %3443 }
 0x642   : > { %v3489_v6 = vsub.f32 %v7913_v15, %v3444_v34  ;;  %v2528_v34 = vsub.f32 %v9202_v23, %v7690_v16  ;;  %v9206_v16 = vld [vmem:[#allocation63_spill] sm:$0xff] }
 0x644   : > { %v3513_v45 = vmul.f32 1.442695, %v3489_v6  ;;  %v9203_v6 = vpack.c.bf16 %v8186_v47, %v8183_v9  ;;  %v9207_v9 = vld [vmem:[#allocation70_spill] sm:$0xff] }
 0x645   : > { %v3469_v48 = vpop.permute.xlu1 %3468  ;;  %v3454_v18 = vpop.permute.xlu0 %3453 }
 0x646   : > { %5614 = vpow2.f32 %v3513_v45  ;;  %v3494_v63 = vsub.f32 %v7921_v28, %v3469_v48  ;;  %v3491_v36 = vsub.f32 %v7918_v13, %v3454_v18  ;;  %v2907_v28 = vpack.c.bf16 %v7943_v32, %v7934_v27  ;;  %v9205_v48 = vld [vmem:[#allocation69_spill] sm:$0xff] }
 0x647   : > { %v2532_v18 = vsub.f32 %v9205_v48, %v7718_v57 }
 0x648   : > { %v3523_v49 = vmul.f32 1.442695, %v3494_v63  ;;  %v3517_v5 = vmul.f32 1.442695, %v3491_v36  ;;  %v2527_v36 = vsub.f32 %v9206_v16, %v7687_v60 }
 0x649   : > { %v3479_v41 = vpop.permute.xlu1 %3478  ;;  %v2983_v37 = vpop.permute.xlu0 %2982  ;;  %v2560_v47 = vmul.f32 1.442695, %v2532_v18  ;;  %v9227_v18 = vld [vmem:[#allocation77_spill] sm:$0xff] }
 0x64a   : > { %5616 = vpow2.f32 %v3523_v49  ;;  %v3496_v29 = vsub.f32 %v7926_v39, %v3479_v41  ;;  %5261 = vmatprep.subr.bf16.mxu0 %v2983_v37  ;;  %v9194_v39 = vpack.c.bf16 %v8119_v54, %v8122_v2  ;;  %v9195_v2 = vpack.c.bf16 %v8139_v26, %v8136_v17  ;;  %v2718_v41 = vld [vmem:[#allocation3 + $0x128] sm:$0xff] }
 0x64b   : > { %5618 = vpow2.f32 %v3517_v5  ;;  %5262 = vmatpush3.bf16.msra.mxu0 %v2983_v37  ;;  %v2534_v49 = vsub.f32 %v9207_v9, %v7732_v12  ;;  %v2550_v37 = vmul.f32 1.442695, %v2527_v36 }
 0x64c   : > { %v3527_v53 = vmul.f32 1.442695, %v3496_v29 }
 0x64d   : > { %v2985_v15 = vpop.permute.xlu0 %2984  ;;  %v2564_v57 = vmul.f32 1.442695, %v2534_v49  ;;  %v9229_v49 = vld [vmem:[#allocation41_spill] sm:$0xff] }
 0x64e   : > { %5620 = vpow2.f32 %v3527_v53  ;;  %5263 = vmatprep.subr.bf16.mxu0 %v2985_v15  ;;  %v9209_v53 = vld [vmem:[#allocation32_spill] sm:$0xff] }
 0x64f   : > { %5264 = vmatpush3.bf16.msra.mxu0 %v2985_v15 }
 0x650   : > { %v5615_v61 = vpop.eup %5614 }
 0x651   : > { %v3464_v13 = vpop.permute.xlu0 %3463  ;;  %v3537_v59 = vmul.f32 %v5615_v61, %v9183_v0 }
 0x652   : > { %v3493_v24 = vsub.f32 %v7929_v33, %v3464_v13  ;;  %5266 = vmatmul.mubr.bf16.vlgmr.msra.gmra.mrb[16].mxu0 %v2907_v28  ;;  %v9210_v13 = vld [vmem:[#allocation71_spill] sm:$0xff] }
 0x653   : > { %3594 = vadd.xlane.f32.xlu1 %v3537_v59  ;;  %5269 = vmatprep.mubr.bf16.mxu0 %v9194_v39  ;;  %v3743_v43 = vpack.c.bf16 %v3538_v58, %v3537_v59  ;;  %v9197_v58 = vld [vmem:[#allocation57_spill] sm:$0xff]  ;;  %v9211_v59 = vld [vmem:[#allocation75_spill] sm:$0xff] }
 0x654   : > { %v5617_v35 = vpop.eup %5616  ;;  %v3521_v42 = vmul.f32 1.442695, %v3493_v24  ;;  %v2524_v56 = vsub.f32 %v9197_v58, %v7658_v11  ;;  %v9201_v11 = vld [vmem:[#allocation59_spill] sm:$0xff]  ;;  %v2531_v12 = vsub.f32 %v9211_v59, %v9210_v13  ;;  %v2721_v58 = vld [vmem:[#allocation3 + $0x140] sm:$0xff] }
 0x655   : > { %v5619_v62 = vpop.eup %5618  ;;  %5305 = vmatprep.mubr.bf16.mxu1 %v3743_v43  ;;  %v3474_v50 = vpop.permute.xlu0 %3473  ;;  %v3542_v46 = vmul.f32 %v5617_v35, %v9188_v7  ;;  %v9196_v7 = vpack.c.bf16 %v8149_v55, %v8146_v14  ;;  %v9200_v55 = vld [vmem:[#allocation56_spill] sm:$0xff]  ;;  %v2526_v3 = vsub.f32 %v9201_v11, %v7675_v30  ;;  %v9212_v39 = vld [vmem:[#allocation11_spill] sm:$0xff]  ;;  %v9233_v13 = vld [vmem:[#allocation82_spill] sm:$0xff] }
 0x656   : > { %5622 = vpow2.f32 %v3521_v42  ;;  %v3495_v27 = vsub.f32 %v7937_v40, %v3474_v50  ;;  %v3539_v32 = vmul.f32 %v5619_v62, %v9185_v25  ;;  %v2525_v14 = vsub.f32 %v9200_v55, %v7672_v38  ;;  %v9213_v43 = vld [vmem:[#allocation36_spill] sm:$0xff]  ;;  %v2717_v62 = vld [vmem:[#allocation3 + $0x120] sm:$0xff]  ;;  %v9223_v55 = vld [vmem:[#allocation73_spill] sm:$0xff] }
 0x657   : > { %3604 = vadd.xlane.f32.xlu0 %v3542_v46  ;;  %v2548_v4 = vmul.f32 1.442695, %v2526_v3  ;;  %v2552_v38 = vmul.f32 1.442695, %v2528_v34  ;;  %v9224_v3 = vld [vmem:[#allocation40_spill] sm:$0xff] }
 0x658   : > { %v5621_v33 = vpop.eup %5620  ;;  %v3525_v0 = vmul.f32 1.442695, %v3495_v27  ;;  %3598 = vadd.xlane.f32.xlu1 %v3539_v32  ;;  %v3744_v19 = vpack.c.bf16 %v3540_v22, %v3539_v32  ;;  %v2544_v22 = vmul.f32 1.442695, %v2524_v56  ;;  %v9216_v27 = vld [vmem:[#allocation72_spill] sm:$0xff] }
 0x659   : > { %v3544_v54 = vmul.f32 %v5621_v33, %v9191_v44  ;;  %v9198_v44 = vpack.c.bf16 %v8160_v31, %v8157_v8  ;;  %v2546_v8 = vmul.f32 1.442695, %v2525_v14  ;;  %v9217_v32 = vld [vmem:[#allocation68_spill] sm:$0xff] }
 0x65a   : > { %5624 = vpow2.f32 %v3525_v0  ;;  %5306 = vmatmul.mubr.bf16.gmra.mrb[24].mxu1 %v3744_v19  ;;  %5270 = vmatmul.mubr.bf16.gmra.mrb[20].mxu0 %v9195_v2  ;;  %v2533_v33 = vsub.f32 %v9217_v32, %v9216_v27  ;;  %v9218_v0 = vld [vmem:[#allocation60_spill] sm:$0xff]  ;;  %v9220_v2 = vld [vmem:[#allocation38_spill] sm:$0xff]  ;;  %v2724_v27 = vld [vmem:[#allocation3 + $0x158] sm:$0xff] }
 0x65b   : > { %3608 = vadd.xlane.f32.xlu0 %v3544_v54  ;;  %5273 = vmatprep.mubr.bf16.mxu0 %v9196_v7  ;;  %5626 = vpow2.f32 %v2544_v22  ;;  %v2719_v56 = vld [vmem:[#allocation3 + $0x130] sm:$0xff] }
 0x65c   : > { %5628 = vpow2.f32 %v2546_v8 }
 0x65d   : > { %5630 = vpow2.f32 %v2548_v4 }
 0x65e   : > { %5632 = vpow2.f32 %v2552_v38  ;;  %v2720_v38 = vld [vmem:[#allocation3 + $0x138] sm:$0xff] }
 0x660   : > { %v5623_v40 = vpop.eup %5622 }
 0x661   : > { %v3541_v25 = vmul.f32 %v5623_v40, %v9187_v1 }
 0x662   : > { %5274 = vmatmul.mubr.bf16.gmra.mrb[24].mxu0 %v9198_v44 }
 0x663   : > { %5277 = vmatprep.mubr.bf16.mxu0 %v9199_v21  ;;  %3602 = vadd.xlane.f32.xlu1 %v3541_v25  ;;  %v3745_v26 = vpack.c.bf16 %v3542_v46, %v3541_v25  ;;  %v2558_v46 = vmul.f32 1.442695, %v2531_v12 }
 0x664   : > { %v5625_v17 = vpop.eup %5624 }
 0x665   : > { %5309 = vmatprep.mubr.bf16.mxu1 %v3745_v26  ;;  %v3543_v1 = vmul.f32 %v5625_v17, %v9190_v20  ;;  %v9204_v20 = vld [vmem:[#allocation65_spill] sm:$0xff]  ;;  %v5627_v63 = vpop.eup %5626  ;;  %v2562_v26 = vmul.f32 1.442695, %v2533_v33  ;;  %v9222_v17 = vld [vmem:[#allocation76_spill] sm:$0xff] }
 0x666   : > { %v2530_v45 = vsub.f32 %v9204_v20, %v7704_v52  ;;  %v5629_v5 = vpop.eup %5628  ;;  %v2733_v19 = vmul.f32 %v5627_v63, %v2717_v62  ;;  %v2535_v14 = vsub.f32 %v9223_v55, %v9222_v17 }
 0x667   : > { %3606 = vadd.xlane.f32.xlu1 %v3543_v1  ;;  %v3746_v31 = vpack.c.bf16 %v3544_v54, %v3543_v1  ;;  %v5631_v52 = vpop.eup %5630  ;;  %v2734_v15 = vmul.f32 %v5629_v5, %v2718_v41  ;;  %v9219_v54 = vld [vmem:[#allocation37_spill] sm:$0xff] }
 0x668   : > { %v2556_v30 = vmul.f32 1.442695, %v2530_v45  ;;  %v5633_v61 = vpop.eup %5632  ;;  %v9221_v7 = vsub.f32 %v9219_v54, %v9220_v2  ;;  %v2735_v22 = vmul.f32 %v5631_v52, %v2719_v56  ;;  %v2566_v48 = vmul.f32 1.442695, %v2535_v14  ;;  %v9237_v54 = vld [vmem:[#allocation12_spill] sm:$0xff]  ;;  %v9238_v2 = vld [vmem:[#allocation10_spill] sm:$0xff] }
 0x669   : > { %5310 = vmatmul.mubr.bf16.gmra.mrb[28].mxu1 %v3746_v31  ;;  %v2737_v1 = vmul.f32 %v5633_v61, %v2721_v58  ;;  %v9225_v31 = vld [vmem:[#allocation39_spill] sm:$0xff] }
 0x66a   : > { %5278 = vmatmul.mubr.bf16.gmra.mrb[28].mxu0 %v9203_v6  ;;  %5634 = vpow2.f32 %v2556_v30  ;;  %v3377_v40 = vmul.f32 1.442695, %v9221_v7  ;;  %v9226_v8 = vsub.f32 %v9224_v3, %v9225_v31  ;;  %v2723_v6 = vld [vmem:[#allocation3 + $0x150] sm:$0xff]  ;;  %v3356_v7 = vsub.f32 %v9238_v2, %v9237_v54  ;;  %v9239_v56 = vld [vmem:[#allocation47_spill] sm:$0xff] }
 0x66b   : > { %5636 = vpow2.f32 %v2560_v47  ;;  %v3547_v14 = vld [vmem:[#allocation3 + $0x188] sm:$0xff]  ;;  %v9252_v54 = vld [vmem:[#allocation28_spill] sm:$0xff] }
 0x66c   : > { %5638 = vpow2.f32 %v2550_v37  ;;  %v3381_v4 = vmul.f32 1.442695, %v9226_v8  ;;  %v3375_v31 = vmul.f32 1.442695, %v3356_v7  ;;  %v9242_v8 = vld [vmem:[#allocation16_spill] sm:$0xff] }
 0x66d   : > { %5640 = vpow2.f32 %v2564_v57 }
 0x671   : > { %2817 = vperm.xlu0 %5392, %v8089_v10   ;;  %v9208_v10 = vld [vmem:[#allocation62_spill] sm:$0xff] }
 0x672   : > { %v2529_v29 = vsub.f32 %v9208_v10, %v7701_v51  ;;  %v9214_v51 = vld [vmem:[#allocation35_spill] sm:$0xff] }
 0x673   : > { %v9215_v35 = vsub.f32 %v9213_v43, %v9214_v51  ;;  %v9234_v43 = vld [vmem:[#allocation8_spill] sm:$0xff] }
 0x674   : > { %v2554_v28 = vmul.f32 1.442695, %v2529_v29  ;;  %v5635_v50 = vpop.eup %5634  ;;  %v2725_v29 = vld [vmem:[#allocation3 + $0x160] sm:$0xff]  ;;  %v9235_v51 = vld [vmem:[#allocation20_spill] sm:$0xff] }
 0x675   : > { %2832 = vperm.xlu0 %5392, %v5627_v63   ;;  %v3371_v42 = vmul.f32 1.442695, %v9215_v35  ;;  %v5637_v21 = vpop.eup %5636  ;;  %v9228_v63 = vld [vmem:[#allocation79_spill] sm:$0xff]  ;;  %v2739_v36 = vmul.f32 %v5635_v50, %v2723_v6  ;;  %v9236_v35 = vsub.f32 %v9234_v43, %v9235_v51 }
 0x676   : > { %5642 = vpow2.f32 %v2554_v28  ;;  %v5639_v11 = vpop.eup %5638  ;;  %v3353_v16 = vsub.f32 %v9228_v63, %v9227_v18  ;;  %v9232_v28 = vld [vmem:[#allocation81_spill] sm:$0xff]  ;;  %v2741_v12 = vmul.f32 %v5637_v21, %v2725_v29 }
 0x677   : > { %5644 = vpow2.f32 %v3371_v42  ;;  %v5641_v30 = vpop.eup %5640  ;;  %v2736_v47 = vmul.f32 %v5639_v11, %v2720_v38  ;;  %v3355_v59 = vsub.f32 %v9233_v13, %v9232_v28  ;;  %v3389_v42 = vmul.f32 1.442695, %v9236_v35 }
 0x678   : > { %2812 = vperm.xlu1 %5393, %v9209_v53   ;;  %5646 = vpow2.f32 %v2558_v46  ;;  %v2722_v53 = vld [vmem:[#allocation3 + $0x148] sm:$0xff]  ;;  %v2727_v46 = vld [vmem:[#allocation3 + $0x170] sm:$0xff] }
 0x679   : > { %2842 = vperm.xlu0 %5392, %v5631_v52   ;;  %5648 = vpow2.f32 %v3377_v40  ;;  %v2743_v40 = vmul.f32 %v5641_v30, %v2727_v46  ;;  %v3548_v46 = vld [vmem:[#allocation3 + $0x190] sm:$0xff] }
 0x67a   : > { %5650 = vpow2.f32 %v2562_v26 }
 0x67b   : > { %v2756_v60 = vpop.xlane.xlu1 %2755  ;;  %5652 = vpow2.f32 %v3381_v4  ;;  %v9243_v4 = vld [vmem:[#allocation18_spill] sm:$0xff] }
 0x67c   : > { %v2782_v24 = vadd.f32 %v2756_v60, %v2734_v15  ;;  %2822 = vperm.xlu1 %5393, %v9212_v39   ;;  %5654 = vpow2.f32 %v2566_v48 }
 0x67d   : > { %2852 = vperm.xlu0 %5392, %v5633_v61   ;;  %v3369_v61 = vmul.f32 1.442695, %v3353_v16  ;;  %v3550_v16 = vld [vmem:[#allocation3 + $0x1a0] sm:$0xff] }
 0x67e   : > { %3128 = vst.msk [vmem:[#allocation3 + $0x128] sm:$0xff] %vm1439_vm2, %v2782_v24 }
 0x680   : > { %2827 = vperm.xlu1 %5393, %v9218_v0   ;;  %v5643_v9 = vpop.eup %5642 }
 0x681   : > { %2862 = vperm.xlu0 %5392, %v5635_v50   ;;  %v5645_v60 = vpop.eup %5644  ;;  %v2738_v24 = vmul.f32 %v5643_v9, %v2722_v53 }
 0x682   : > { %v2754_v25 = vpop.xlane.xlu0 %2753  ;;  %v5647_v39 = vpop.eup %5646 }
 0x683   : > { %v2781_v44 = vadd.f32 %v2754_v25, %v2733_v19  ;;  %v5649_v0 = vpop.eup %5648  ;;  %v3373_v19 = vmul.f32 1.442695, %v3355_v59  ;;  %v2740_v25 = vmul.f32 %v5647_v39, %v2724_v27 }
 0x684   : > { %2837 = vperm.xlu1 %5393, %v5629_v5   ;;  %v9230_v5 = vld [vmem:[#allocation6_spill] sm:$0xff]  ;;  %v5651_v58 = vpop.eup %5650 }
 0x685   : > { %3127 = vst.msk [vmem:[#allocation3 + $0x120] sm:$0xff] %vm1439_vm2, %v2781_v44  ;;  %2872 = vperm.xlu0 %5392, %v5637_v21   ;;  %v9231_v41 = vsub.f32 %v9229_v49, %v9230_v5  ;;  %v9240_v44 = vld [vmem:[#allocation48_spill] sm:$0xff]  ;;  %v5653_v3 = vpop.eup %5652 }
 0x686   : > { %v2762_v23 = vpop.xlane.xlu1 %2761  ;;  %v2758_v34 = vpop.xlane.xlu0 %2757  ;;  %v9241_v21 = vsub.f32 %v9239_v56, %v9240_v44 }
 0x687   : > { %v2785_v20 = vadd.f32 %v2762_v23, %v2737_v1  ;;  %v2783_v45 = vadd.f32 %v2758_v34, %v2735_v22  ;;  %v3385_v52 = vmul.f32 1.442695, %v9231_v41  ;;  %v2726_v1 = vld [vmem:[#allocation3 + $0x168] sm:$0xff]  ;;  %v3358_v23 = vsub.f32 %v9243_v4, %v9242_v8  ;;  %v5655_v38 = vpop.eup %5654  ;;  %v9257_v4 = vld [vmem:[#allocation52_spill] sm:$0xff] }
 0x688   : > { %2847 = vperm.xlu1 %5393, %v5639_v11   ;;  %v3393_v26 = vmul.f32 1.442695, %v9241_v21  ;;  %v3563_v34 = vmul.f32 %v5645_v60, %v3547_v14  ;;  %v2742_v6 = vmul.f32 %v5651_v58, %v2726_v1  ;;  %v9247_v41 = vld [vmem:[#allocation27_spill] sm:$0xff]  ;;  %v9253_v1 = vld [vmem:[#allocation14_spill] sm:$0xff] }
 0x689   : > { %3131 = vst.msk [vmem:[#allocation3 + $0x140] sm:$0xff] %vm1439_vm2, %v2785_v20  ;;  %3129 = vst.msk [vmem:[#allocation3 + $0x130] sm:$0xff] %vm1439_vm2, %v2783_v45  ;;  %2882 = vperm.xlu0 %5392, %v5641_v30   ;;  %5656 = vpow2.f32 %v3385_v52  ;;  %v9244_v20 = vld [vmem:[#allocation51_spill] sm:$0xff]  ;;  %v9245_v45 = vld [vmem:[#allocation54_spill] sm:$0xff]  ;;  %v3379_v5 = vmul.f32 1.442695, %v3358_v23 }
 0x68a   : > { %v2766_v37 = vpop.xlane.xlu1 %2765  ;;  %v2760_v10 = vpop.xlane.xlu0 %2759  ;;  %5658 = vpow2.f32 %v3369_v61  ;;  %v9246_v30 = vsub.f32 %v9244_v20, %v9245_v45  ;;  %v9248_v52 = vld [vmem:[#allocation22_spill] sm:$0xff]  ;;  %v9256_v8 = vld [vmem:[#allocation7_spill] sm:$0xff] }
 0x68b   : > { %v2787_v57 = vadd.f32 %v2766_v37, %v2739_v36  ;;  %v2784_v15 = vadd.f32 %v2760_v10, %v2736_v47  ;;  %5660 = vpow2.f32 %v3389_v42  ;;  %v2728_v36 = vld [vmem:[#allocation3 + $0x178] sm:$0xff]  ;;  %v3360_v37 = vsub.f32 %v9248_v52, %v9247_v41  ;;  %v3546_v61 = vld [vmem:[#allocation3 + $0x180] sm:$0xff] }
 0x68c   : > { %2857 = vperm.xlu1 %5393, %v5643_v9   ;;  %5662 = vpow2.f32 %v3373_v19  ;;  %v3397_v48 = vmul.f32 1.442695, %v9246_v30  ;;  %v3566_v10 = vmul.f32 %v5649_v0, %v3550_v16  ;;  %v2744_v29 = vmul.f32 %v5655_v38, %v2728_v36  ;;  %v9251_v19 = vld [vmem:[#allocation33_spill] sm:$0xff] }
 0x68d   : > { %3133 = vst.msk [vmem:[#allocation3 + $0x150] sm:$0xff] %vm1439_vm2, %v2787_v57  ;;  %3130 = vst.msk [vmem:[#allocation3 + $0x138] sm:$0xff] %vm1439_vm2, %v2784_v15  ;;  %3650 = vperm.xlu0 %5392, %v5645_v60   ;;  %5664 = vpow2.f32 %v3393_v26  ;;  %v3552_v60 = vld [vmem:[#allocation3 + $0x1b0] sm:$0xff]  ;;  %v3364_v2 = vsub.f32 %v9252_v54, %v9251_v19  ;;  %v9258_v23 = vsub.f32 %v9256_v8, %v9257_v4  ;;  %v3553_v30 = vld [vmem:[#allocation3 + $0x1b8] sm:$0xff] }
 0x68e   : > { %v2770_v62 = vpop.xlane.xlu1 %2769  ;;  %v2764_v50 = vpop.xlane.xlu0 %2763  ;;  %5666 = vpow2.f32 %v3375_v31  ;;  %v3568_v51 = vmul.f32 %v5653_v3, %v3552_v60  ;;  %v3628_v8 = vld [vmem:[#allocation4 + $0x188] sm:$0xff] }
 0x68f   : > { %v2789_v32 = vadd.f32 %v2770_v62, %v2741_v12  ;;  %v2786_v33 = vadd.f32 %v2764_v50, %v2738_v24  ;;  %5668 = vpow2.f32 %v3397_v48  ;;  %v3383_v12 = vmul.f32 1.442695, %v3360_v37  ;;  %v9249_v24 = vld [vmem:[#allocation30_spill] sm:$0xff]  ;;  %v3557_v37 = vld [vmem:[#allocation3 + $0x1d8] sm:$0xff] }
 0x690   : > { %2867 = vperm.xlu1 %5393, %v5647_v39   ;;  %5670 = vpow2.f32 %v3379_v5  ;;  %v9250_v39 = vld [vmem:[#allocation24_spill] sm:$0xff]  ;;  %v3391_v21 = vmul.f32 1.442695, %v3364_v2  ;;  %v3555_v5 = vld [vmem:[#allocation3 + $0x1c8] sm:$0xff] }
 0x691   : > { %3135 = vst.msk [vmem:[#allocation3 + $0x160] sm:$0xff] %vm1439_vm2, %v2789_v32  ;;  %3132 = vst.msk [vmem:[#allocation3 + $0x148] sm:$0xff] %vm1439_vm2, %v2786_v33  ;;  %3665 = vperm.xlu0 %5392, %v5649_v0   ;;  %v3362_v43 = vsub.f32 %v9250_v39, %v9249_v24  ;;  %5672 = vpow2.f32 %v3383_v12  ;;  %v3556_v12 = vld [vmem:[#allocation3 + $0x1d0] sm:$0xff] }
 0x692   : > { %v2774_v17 = vpop.xlane.xlu1 %2773  ;;  %v2768_v55 = vpop.xlane.xlu0 %2767 }
 0x693   : > { %v2791_v22 = vadd.f32 %v2774_v17, %v2743_v40  ;;  %v2788_v11 = vadd.f32 %v2768_v55, %v2740_v25  ;;  %v8315_v49 = vpop.eup %5656  ;;  %v3387_v0 = vmul.f32 1.442695, %v3362_v43 }
 0x694   : > { %2877 = vperm.xlu1 %5393, %v5651_v58   ;;  %v5659_v53 = vpop.eup %5658  ;;  %v3549_v58 = vld [vmem:[#allocation3 + $0x198] sm:$0xff] }
 0x695   : > { %3137 = vst.msk [vmem:[#allocation3 + $0x170] sm:$0xff] %vm1439_vm2, %v2791_v22  ;;  %3134 = vst.msk [vmem:[#allocation3 + $0x158] sm:$0xff] %vm1439_vm2, %v2788_v11  ;;  %3675 = vperm.xlu0 %5392, %v5653_v3   ;;  %v8322_v59 = vpop.eup %5660  ;;  %v3562_v35 = vmul.f32 %v5659_v53, %v3546_v61  ;;  %5674 = vpow2.f32 %v3387_v0  ;;  %v9254_v22 = vld [vmem:[#allocation53_spill] sm:$0xff] }
 0x696   : > { %v3581_v18 = vpop.xlane.xlu1 %3580  ;;  %v2772_v63 = vpop.xlane.xlu0 %2771  ;;  %5676 = vpow2.f32 %v3391_v21  ;;  %v9255_v11 = vsub.f32 %v9253_v1, %v9254_v22  ;;  %v3572_v39 = vmul.f32 %v8322_v59, %v3556_v12  ;;  %v3630_v12 = vld [vmem:[#allocation4 + $0x198] sm:$0xff] }
 0x697   : > { %v3611_v47 = vadd.f32 %v3581_v18, %v3563_v34  ;;  %v2790_v9 = vadd.f32 %v2772_v63, %v2742_v6  ;;  %v5663_v42 = vpop.eup %5662  ;;  %v3399_v34 = vmul.f32 1.442695, %v9258_v23  ;;  %v3551_v6 = vld [vmem:[#allocation3 + $0x1a8] sm:$0xff] }
 0x698   : > { %2887 = vperm.xlu1 %5393, %v5655_v38   ;;  %v8329_v33 = vpop.eup %5664  ;;  %v3564_v7 = vmul.f32 %v5663_v42, %v3548_v46  ;;  %v3395_v3 = vmul.f32 1.442695, %v9255_v11 }
 0x699   : > { %3957 = vst.msk [vmem:[#allocation3 + $0x188] sm:$0xff] %vm1439_vm2, %v3611_v47  ;;  %3136 = vst.msk [vmem:[#allocation3 + $0x168] sm:$0xff] %vm1439_vm2, %v2790_v9  ;;  %3685 = vperm.xlu0 %5392, %v8315_v49   ;;  %v5667_v40 = vpop.eup %5666 }
 0x69a   : > { %v3587_v57 = vpop.xlane.xlu1 %3586  ;;  %v2776_v15 = vpop.xlane.xlu0 %2775  ;;  %v3565_v26 = vmul.f32 %v5667_v40, %v3549_v58  ;;  %5678 = vpow2.f32 %v3395_v3 }
 0x69b   : > { %v3614_v28 = vadd.f32 %v3587_v57, %v3566_v10  ;;  %v2792_v13 = vadd.f32 %v2776_v15, %v2744_v29  ;;  %v8336_v44 = vpop.eup %5668  ;;  %5680 = vpow2.f32 %v3399_v34  ;;  %v3554_v15 = vld [vmem:[#allocation3 + $0x1c0] sm:$0xff] }
 0x69c   : > { %3645 = vperm.xlu1 %5393, %v5659_v53   ;;  %v5671_v17 = vpop.eup %5670  ;;  %v3570_v60 = vmul.f32 %v8315_v49, %v3554_v15 }
 0x69d   : > { %3960 = vst.msk [vmem:[#allocation3 + $0x1a0] sm:$0xff] %vm1439_vm2, %v3614_v28  ;;  %3138 = vst.msk [vmem:[#allocation3 + $0x178] sm:$0xff] %vm1439_vm2, %v2792_v13  ;;  %3695 = vperm.xlu0 %5392, %v8322_v59   ;;  %v5673_v31 = vpop.eup %5672  ;;  %v3567_v20 = vmul.f32 %v5671_v17, %v3551_v6  ;;  %v3559_v28 = vld [vmem:[#allocation3 + $0x1e8] sm:$0xff]  ;;  %v3560_v59 = vld [vmem:[#allocation3 + $0x1f0] sm:$0xff] }
 0x69e   : > { %v3591_v62 = vpop.xlane.xlu1 %3590  ;;  %v3579_v50 = vpop.xlane.xlu0 %3578  ;;  %v3569_v63 = vmul.f32 %v5673_v31, %v3553_v30  ;;  %v3576_v2 = vmul.f32 %v8336_v44, %v3560_v59 }
 0x69f   : > { %v3616_v27 = vadd.f32 %v3591_v62, %v3568_v51  ;;  %v3610_v32 = vadd.f32 %v3579_v50, %v3562_v35  ;;  %v5675_v38 = vpop.eup %5674  ;;  %v3561_v51 = vld [vmem:[#allocation3 + $0x1f8] sm:$0xff] }
 0x6a0   : > { %3655 = vperm.xlu1 %5393, %v5663_v42   ;;  %v5677_v48 = vpop.eup %5676  ;;  %v3571_v41 = vmul.f32 %v5675_v38, %v3555_v5 }
 0x6a1   : > { %3962 = vst.msk [vmem:[#allocation3 + $0x1b0] sm:$0xff] %vm1439_vm2, %v3616_v27  ;;  %3956 = vst.msk [vmem:[#allocation3 + $0x180] sm:$0xff] %vm1439_vm2, %v3610_v32  ;;  %3705 = vperm.xlu0 %5392, %v8329_v33   ;;  %v3573_v29 = vmul.f32 %v5677_v48, %v3557_v37  ;;  %v3558_v27 = vld [vmem:[#allocation3 + $0x1e0] sm:$0xff] }
 0x6a2   : > { %v3583_v25 = vpop.xlane.xlu0 %3582  ;;  %v3574_v32 = vmul.f32 %v8329_v33, %v3558_v27 }
 0x6a3   : > { %v3612_v56 = vadd.f32 %v3583_v25, %v3564_v7 }
 0x6a4   : > { %3660 = vperm.xlu1 %5393, %v5667_v40   ;;  %v5679_v36 = vpop.eup %5678 }
 0x6a5   : > { %3958 = vst.msk [vmem:[#allocation3 + $0x190] sm:$0xff] %vm1439_vm2, %v3612_v56  ;;  %3715 = vperm.xlu0 %5392, %v8336_v44   ;;  %v5681_v9 = vpop.eup %5680  ;;  %v3575_v24 = vmul.f32 %v5679_v36, %v3559_v28 }
 0x6a6   : > { %v3585_v55 = vpop.xlane.xlu0 %3584  ;;  %v3577_v50 = vmul.f32 %v5681_v9, %v3561_v51  ;;  %v2795_v51 = vld [vmem:[#allocation4 + $0x108] sm:$0xff] }
 0x6a7   : > { %v3613_v14 = vadd.f32 %v3585_v55, %v3565_v26 }
 0x6a8   : > { %3670 = vperm.xlu1 %5393, %v5671_v17  }
 0x6a9   : > { %3959 = vst.msk [vmem:[#allocation3 + $0x198] sm:$0xff] %vm1439_vm2, %v3613_v14 }
 0x6ac   : > { %3680 = vperm.xlu1 %5393, %v5673_v31  }
 0x6b0   : > { %3690 = vperm.xlu1 %5393, %v5675_v38   ;;  %v3631_v38 = vld [vmem:[#allocation4 + $0x1a0] sm:$0xff] }
 0x6b2   : > { %v3589_v45 = vpop.xlane.xlu0 %3588 }
 0x6b3   : > { %v3615_v18 = vadd.f32 %v3589_v45, %v3567_v20 }
 0x6b4   : > { %3700 = vperm.xlu1 %5393, %v5677_v48  }
 0x6b5   : > { %3961 = vst.msk [vmem:[#allocation3 + $0x1a8] sm:$0xff] %vm1439_vm2, %v3615_v18 }
 0x6b6   : > { %v3593_v16 = vpop.xlane.xlu0 %3592 }
 0x6b7   : > { %v3617_v47 = vadd.f32 %v3593_v16, %v3569_v63 }
 0x6b8   : > { %3710 = vperm.xlu1 %5393, %v5679_v36   ;;  %v3633_v36 = vld [vmem:[#allocation4 + $0x1b0] sm:$0xff] }
 0x6b9   : > { %3963 = vst.msk [vmem:[#allocation3 + $0x1b8] sm:$0xff] %vm1439_vm2, %v3617_v47 }
 0x6bc   : > { %3720 = vperm.xlu1 %5393, %v5681_v9  }
 0x6c2   : > { %v3597_v52 = vpop.xlane.xlu0 %3596 }
 0x6c3   : > { %v3619_v10 = vadd.f32 %v3597_v52, %v3571_v41 }
 0x6c5   : > { %3965 = vst.msk [vmem:[#allocation3 + $0x1c8] sm:$0xff] %vm1439_vm2, %v3619_v10  ;;  %v3627_v10 = vld [vmem:[#allocation4 + $0x180] sm:$0xff] }
 0x6c6   : > { %v3601_v53 = vpop.xlane.xlu0 %3600 }
 0x6c7   : > { %v3621_v57 = vadd.f32 %v3601_v53, %v3573_v29 }
 0x6c9   : > { %3967 = vst.msk [vmem:[#allocation3 + $0x1d8] sm:$0xff] %vm1439_vm2, %v3621_v57  ;;  %v3629_v57 = vld [vmem:[#allocation4 + $0x190] sm:$0xff] }
 0x6e0   : > { %v3595_v61 = vpop.xlane.xlu1 %3594 }
 0x6e1   : > { %v3618_v13 = vadd.f32 %v3595_v61, %v3570_v60  ;;  %v2796_v61 = vld [vmem:[#allocation4 + $0x110] sm:$0xff] }
 0x6e3   : > { %3964 = vst.msk [vmem:[#allocation3 + $0x1c0] sm:$0xff] %vm1439_vm2, %v3618_v13  ;;  %v2794_v13 = vld [vmem:[#allocation4 + $0x100] sm:$0xff] }
 0x6e4   : > { %v3605_v43 = vpop.xlane.xlu0 %3604 }
 0x6e5   : > { %v3599_v35 = vpop.xlane.xlu1 %3598  ;;  %v3623_v42 = vadd.f32 %v3605_v43, %v3575_v24  ;;  %v2797_v24 = vld [vmem:[#allocation4 + $0x118] sm:$0xff] }
 0x6e6   : > { %v3620_v62 = vadd.f32 %v3599_v35, %v3572_v39 }
 0x6e7   : > { %3969 = vst.msk [vmem:[#allocation3 + $0x1e8] sm:$0xff] %vm1439_vm2, %v3623_v42 }
 0x6e8   : > { %3966 = vst.msk [vmem:[#allocation3 + $0x1d0] sm:$0xff] %vm1439_vm2, %v3620_v62  ;;  %v3609_v49 = vpop.xlane.xlu0 %3608 }
 0x6e9   : > { %v3625_v46 = vadd.f32 %v3609_v49, %v3577_v50 }
 0x6eb   : > { %3971 = vst.msk [vmem:[#allocation3 + $0x1f8] sm:$0xff] %vm1439_vm2, %v3625_v46 }
 0x6f0   : > { %v3603_v0 = vpop.xlane.xlu1 %3602  ;;  %v8358_v19 = vpop.permute.xlu0 %2817 }
 0x6f1   : > { %v3622_v54 = vadd.f32 %v3603_v0, %v3574_v32  ;;  %v3632_v0 = vld [vmem:[#allocation4 + $0x1a8] sm:$0xff]  ;;  %v2891_v59 = vmul.f32 %v8358_v19, %v2795_v51  ;;  %v3634_v19 = vld [vmem:[#allocation4 + $0x1b8] sm:$0xff] }
 0x6f3   : > { %3968 = vst.msk [vmem:[#allocation3 + $0x1e0] sm:$0xff] %vm1439_vm2, %v3622_v54 }
 0x6f4   : > { %v3607_v7 = vpop.xlane.xlu1 %3606  ;;  %v8362_v40 = vpop.permute.xlu0 %2832 }
 0x6f5   : > { %v3624_v25 = vadd.f32 %v3607_v7, %v3576_v2 }
 0x6f7   : > { %3970 = vst.msk [vmem:[#allocation3 + $0x1f0] sm:$0xff] %vm1439_vm2, %v3624_v25 }
 0x6f8   : > { %v2813_v58 = vpop.permute.xlu1 %2812  ;;  %v8365_v56 = vpop.permute.xlu0 %2842 }
 0x6f9   : > { %v2890_v62 = vmul.f32 %v2813_v58, %v2794_v13  ;;  %v3637_v58 = vld [vmem:[#allocation4 + $0x1d0] sm:$0xff] }
 0x6fc   : > { %v2823_v21 = vpop.permute.xlu1 %2822  ;;  %v8367_v33 = vpop.permute.xlu0 %2852 }
 0x6fd   : > { %v2892_v35 = vmul.f32 %v2823_v21, %v2796_v61 }
 0x700   : > { %v2828_v26 = vpop.permute.xlu1 %2827  ;;  %v8369_v17 = vpop.permute.xlu0 %2862 }
 0x701   : > { %v2893_v46 = vmul.f32 %v2828_v26, %v2797_v24  ;;  %v2804_v24 = vld [vmem:[#allocation4 + $0x150] sm:$0xff] }
 0x704   : > { %v8371_v55 = vpop.permute.xlu1 %2837  ;;  %v8373_v14 = vpop.permute.xlu0 %2872 }
 0x707   : > { %v5299_v44 = vpop.f32.mrb[16].mxu1 }
 0x708   : > { %v3861_v1 = vpop.f32.mrb[17].mxu1  ;;  %v8375_v22 = vpop.permute.xlu1 %2847 }
 0x709   : > { %v8377_v11 = vpop.permute.xlu0 %2882  ;;  %v5300_v3 = vpop.f32.mrb[18].mxu1 }
 0x70a   : > { %v3864_v31 = vpop.f32.mrb[19].mxu1 }
 0x70c   : > { %v8379_v4 = vpop.permute.xlu1 %2857 }
 0x70d   : > { %v3651_v23 = vpop.permute.xlu0 %3650 }
 0x70e   : > { %v3724_v34 = vmul.f32 %v3651_v23, %v3628_v8  ;;  %v2798_v23 = vld [vmem:[#allocation4 + $0x120] sm:$0xff] }
 0x70f   : > { %v5303_v6 = vpop.f32.mrb[20].mxu1 }
 0x710   : > { %v3925_v20 = vadd.f32 %v3864_v31, %v3724_v34  ;;  %v3877_v45 = vpop.f32.mrb[21].mxu1  ;;  %v8381_v30 = vpop.permute.xlu1 %2867  ;;  %v3635_v34 = vld [vmem:[#allocation4 + $0x1c0] sm:$0xff] }
 0x711   : > { %v3666_v48 = vpop.permute.xlu0 %3665  ;;  %v8383_v18 = vpop.f32.mrb[22].mxu1 }
 0x712   : > { %3973 = vst.msk [vmem:[#allocation4 + $0x188] sm:$0xff] %vm1472_vm3, %v3925_v20  ;;  %v3727_v63 = vmul.f32 %v3666_v48, %v3631_v38  ;;  %v3880_v16 = vpop.f32.mrb[23].mxu1  ;;  %v2799_v20 = vld [vmem:[#allocation4 + $0x128] sm:$0xff] }
 0x714   : > { %v3928_v47 = vadd.f32 %v3877_v45, %v3727_v63  ;;  %v8386_v9 = vpop.permute.xlu1 %2877  ;;  %v2894_v63 = vmul.f32 %v8362_v40, %v2798_v23  ;;  %v3639_v23 = vld [vmem:[#allocation4 + $0x1e0] sm:$0xff] }
 0x715   : > { %v3676_v5 = vpop.permute.xlu0 %3675 }
 0x716   : > { %3976 = vst.msk [vmem:[#allocation4 + $0x1a0] sm:$0xff] %vm1472_vm3, %v3928_v47  ;;  %v3729_v41 = vmul.f32 %v3676_v5, %v3633_v36 }
 0x718   : > { %v3930_v52 = vadd.f32 %v5303_v6, %v3729_v41  ;;  %v8389_v37 = vpop.permute.xlu1 %2887 }
 0x719   : > { %v3686_v39 = vpop.permute.xlu0 %3685 }
 0x71a   : > { %3978 = vst.msk [vmem:[#allocation4 + $0x1b0] sm:$0xff] %vm1472_vm3, %v3930_v52  ;;  %v3731_v36 = vmul.f32 %v3686_v39, %v3635_v34  ;;  %v2802_v39 = vld [vmem:[#allocation4 + $0x140] sm:$0xff] }
 0x71c   : > { %v3646_v29 = vpop.permute.xlu1 %3645 }
 0x71d   : > { %v3723_v53 = vmul.f32 %v3646_v29, %v3627_v10  ;;  %v3696_v31 = vpop.permute.xlu0 %3695 }
 0x71e   : > { %v3733_v45 = vmul.f32 %v3696_v31, %v3637_v58  ;;  %v2808_v31 = vld [vmem:[#allocation4 + $0x170] sm:$0xff] }
 0x71f   : > { %v3924_v15 = vadd.f32 %v3861_v1, %v3723_v53  ;;  %v2800_v1 = vld [vmem:[#allocation4 + $0x130] sm:$0xff] }
 0x720   : > { %v3656_v60 = vpop.permute.xlu1 %3655  ;;  %v2896_v38 = vmul.f32 %v8365_v56, %v2800_v1 }
 0x721   : > { %3972 = vst.msk [vmem:[#allocation4 + $0x180] sm:$0xff] %vm1472_vm3, %v3924_v15  ;;  %v3725_v28 = vmul.f32 %v3656_v60, %v3629_v57 }
 0x723   : > { %v3926_v43 = vadd.f32 %v5299_v44, %v3725_v28  ;;  %v3636_v28 = vld [vmem:[#allocation4 + $0x1c8] sm:$0xff] }
 0x724   : > { %v3661_v42 = vpop.permute.xlu1 %3660 }
 0x725   : > { %3974 = vst.msk [vmem:[#allocation4 + $0x190] sm:$0xff] %vm1472_vm3, %v3926_v43  ;;  %v3726_v50 = vmul.f32 %v3661_v42, %v3630_v12  ;;  %v5267_v49 = vpop.f32.mrb[16].mxu0  ;;  %v3706_v43 = vpop.permute.xlu0 %3705  ;;  %v3638_v42 = vld [vmem:[#allocation4 + $0x1d8] sm:$0xff] }
 0x726   : > { %v3093_v27 = vadd.f32 %v5267_v49, %v2892_v35  ;;  %v3028_v32 = vpop.f32.mrb[17].mxu0  ;;  %v2805_v35 = vld [vmem:[#allocation4 + $0x158] sm:$0xff] }
 0x727   : > { %v3927_v54 = vadd.f32 %v5300_v3, %v3726_v50  ;;  %v3091_v2 = vadd.f32 %v3028_v32, %v2890_v62  ;;  %v5268_v7 = vpop.f32.mrb[18].mxu0  ;;  %v2801_v3 = vld [vmem:[#allocation4 + $0x138] sm:$0xff]  ;;  %v2900_v62 = vmul.f32 %v8369_v17, %v2804_v24  ;;  %v2803_v50 = vld [vmem:[#allocation4 + $0x148] sm:$0xff] }
 0x728   : > { %3141 = vst.msk [vmem:[#allocation4 + $0x110] sm:$0xff] %vm1472_vm3, %v3093_v27  ;;  %v3094_v25 = vadd.f32 %v5268_v7, %v2893_v46  ;;  %v3031_v44 = vpop.f32.mrb[19].mxu0  ;;  %v3671_v21 = vpop.permute.xlu1 %3670  ;;  %v2897_v52 = vmul.f32 %v8375_v22, %v2801_v3  ;;  %v2898_v46 = vmul.f32 %v8367_v33, %v2802_v39  ;;  %v2899_v7 = vmul.f32 %v8379_v4, %v2803_v50  ;;  %v2809_v4 = vld [vmem:[#allocation4 + $0x178] sm:$0xff]  ;;  %v3992_v39 = vld [vmem:[#allocation3 + $0x8] sm:$0xff] (!%p5117_p0) }
 0x729   : > { %3975 = vst.msk [vmem:[#allocation4 + $0x198] sm:$0xff] %vm1472_vm3, %v3927_v54  ;;  %3139 = vst.msk [vmem:[#allocation4 + $0x100] sm:$0xff] %vm1472_vm3, %v3091_v2  ;;  %v3092_v26 = vadd.f32 %v3031_v44, %v2891_v59  ;;  %v3728_v8 = vmul.f32 %v3671_v21, %v3632_v0  ;;  %v2901_v0 = vmul.f32 %v8381_v30, %v2805_v35  ;;  %v3641_v21 = vld [vmem:[#allocation4 + $0x1f0] sm:$0xff]  ;;  %v3716_v1 = vpop.permute.xlu0 %3715  ;;  %v3995_v35 = vld [vmem:[#allocation3 + $0x20] sm:$0xff] (!%p5117_p0) }
 0x72a   : > { %3142 = vst.msk [vmem:[#allocation4 + $0x118] sm:$0xff] %vm1472_vm3, %v3094_v25  ;;  %v3737_v34 = vmul.f32 %v3716_v1, %v3641_v21  ;;  %v2904_v3 = vmul.f32 %v8377_v11, %v2808_v31  ;;  %v3998_v50 = vld [vmem:[#allocation3 + $0x38] sm:$0xff] (!%p5117_p0)  ;;  %v4001_v21 = vld [vmem:[#allocation3 + $0x50] sm:$0xff] (!%p5117_p0) }
 0x72b   : > { %3140 = vst.msk [vmem:[#allocation4 + $0x108] sm:$0xff] %vm1472_vm3, %v3092_v26  ;;  %v3929_v6 = vadd.f32 %v3880_v16, %v3728_v8  ;;  %v2895_v16 = vmul.f32 %v8371_v55, %v2799_v20  ;;  %v2806_v8 = vld [vmem:[#allocation4 + $0x160] sm:$0xff] }
 0x72c   : > { %v3681_v48 = vpop.permute.xlu1 %3680 }
 0x72d   : > { %3977 = vst.msk [vmem:[#allocation4 + $0x1a8] sm:$0xff] %vm1472_vm3, %v3929_v6  ;;  %v5307_v47 = vpop.f32.mrb[24].mxu1  ;;  %v3730_v5 = vmul.f32 %v3681_v48, %v3634_v19  ;;  %v5271_v41 = vpop.f32.mrb[20].mxu0  ;;  %v3642_v19 = vld [vmem:[#allocation4 + $0x1f8] sm:$0xff]  ;;  %v2807_v6 = vld [vmem:[#allocation4 + $0x168] sm:$0xff]  ;;  %v3735_v48 = vmul.f32 %v3706_v43, %v3639_v23 }
 0x72e   : > { %v3934_v10 = vadd.f32 %v5307_v47, %v3733_v45  ;;  %v3097_v29 = vadd.f32 %v5271_v41, %v2896_v38  ;;  %v3893_v53 = vpop.f32.mrb[25].mxu1  ;;  %v3044_v57 = vpop.f32.mrb[21].mxu0  ;;  %v3640_v38 = vld [vmem:[#allocation4 + $0x1e8] sm:$0xff]  ;;  %v2902_v45 = vmul.f32 %v8373_v14, %v2806_v8 }
 0x72f   : > { %v3931_v56 = vadd.f32 %v8383_v18, %v3730_v5  ;;  %v3932_v15 = vadd.f32 %v3893_v53, %v3731_v36  ;;  %v3095_v60 = vadd.f32 %v3044_v57, %v2894_v63  ;;  %v5308_v61 = vpop.f32.mrb[26].mxu1  ;;  %v5272_v40 = vpop.f32.mrb[22].mxu0  ;;  %v2905_v5 = vmul.f32 %v8389_v37, %v2809_v4  ;;  %v3996_v43 = vld [vmem:[#allocation3 + $0x28] sm:$0xff] (!%p5117_p0)  ;;  %v4006_v4 = vld [vmem:[#allocation3 + $0x78] sm:$0xff] (!%p5117_p0) }
 0x730   : > { %3982 = vst.msk [vmem:[#allocation4 + $0x1d0] sm:$0xff] %vm1472_vm3, %v3934_v10  ;;  %3145 = vst.msk [vmem:[#allocation4 + $0x130] sm:$0xff] %vm1472_vm3, %v3097_v29  ;;  %v3098_v13 = vadd.f32 %v5272_v40, %v2897_v52  ;;  %v3896_v12 = vpop.f32.mrb[27].mxu1  ;;  %v3047_v22 = vpop.f32.mrb[23].mxu0  ;;  %v2903_v53 = vmul.f32 %v8386_v9, %v2807_v6  ;;  %v3993_v9 = vld [vmem:[#allocation3 + $0x10] sm:$0xff] (!%p5117_p0) }
 0x731   : > { %3979 = vst.msk [vmem:[#allocation4 + $0x1b8] sm:$0xff] %vm1472_vm3, %v3931_v56  ;;  %3980 = vst.msk [vmem:[#allocation4 + $0x1c0] sm:$0xff] %vm1472_vm3, %v3932_v15  ;;  %v3096_v55 = vadd.f32 %v3047_v22, %v2895_v16  ;;  %v3691_v18 = vpop.permute.xlu1 %3690  ;;  %v5896_v22 = vmov (!%p5117_p0), 0   ;;  %v4009_v24 = vmax.f32 (!%p5117_p0), %v3993_v9, 1e-30 }
 0x732   : > { %3143 = vst.msk [vmem:[#allocation4 + $0x120] sm:$0xff] %vm1472_vm3, %v3095_v60  ;;  %3146 = vst.msk [vmem:[#allocation4 + $0x138] sm:$0xff] %vm1472_vm3, %v3098_v13  ;;  %v3732_v51 = vmul.f32 %v3691_v18, %v3636_v28  ;;  %v3991_v13 = vld [vmem:[#allocation3] sm:$0xff] (!%p5117_p0)  ;;  %5702 = vset.pattern.permute.xlu1 (!%p5117_p0), %v5896_v22  ;;  %5701 = vset.pattern.permute.xlu0 (!%p5117_p0), %v5896_v22  ;;  %v4022_v6 = vmax.f32 (!%p5117_p0), %v4006_v4, 1e-30 }
 0x733   : > { %3144 = vst.msk [vmem:[#allocation4 + $0x128] sm:$0xff] %vm1472_vm3, %v3096_v55  ;;  %v4007_v55 = vmax.f32 (!%p5117_p0), %v3991_v13, 1e-30  ;;  %5703 = vrcp.f32 (!%p5117_p0), %v4009_v24  ;;  %v4160_v13 = vld [vmem:[#allocation3 + $0xc8] sm:$0xff] (!%p5117_p0)  ;;  %v4159_v22 = vld [vmem:[#allocation3 + $0xc0] sm:$0xff] (!%p5117_p0) }
 0x734   : > { %v3933_v49 = vadd.f32 %v3896_v12, %v3732_v51  ;;  %v3994_v12 = vld [vmem:[#allocation3 + $0x18] sm:$0xff] (!%p5117_p0)  ;;  %v4008_v51 = vmax.f32 (!%p5117_p0), %v3992_v39, 1e-30 }
 0x735   : > { %v3701_v27 = vpop.permute.xlu1 %3700  ;;  %v5275_v32 = vpop.f32.mrb[24].mxu0  ;;  %v4010_v18 = vmax.f32 (!%p5117_p0), %v3994_v12, 1e-30  ;;  %5705 = vrcp.f32 (!%p5117_p0), %v4007_v55  ;;  %v4176_v55 = vmax.f32 (!%p5117_p0), %v4160_v13, 1e-30  ;;  %v4162_v39 = vld [vmem:[#allocation3 + $0xd8] sm:$0xff] (!%p5117_p0) }
 0x736   : > { %3981 = vst.msk [vmem:[#allocation4 + $0x1c8] sm:$0xff] %vm1472_vm3, %v3933_v49  ;;  %v3734_v59 = vmul.f32 %v3701_v27, %v3638_v42  ;;  %v3101_v54 = vadd.f32 %v5275_v32, %v2900_v62  ;;  %v3060_v2 = vpop.f32.mrb[25].mxu0  ;;  %v4012_v42 = vmax.f32 (!%p5117_p0), %v3996_v43, 1e-30  ;;  %v4011_v62 = vmax.f32 (!%p5117_p0), %v3995_v35, 1e-30 }
 0x737   : > { %v3099_v25 = vadd.f32 %v3060_v2, %v2898_v46  ;;  %v5276_v44 = vpop.f32.mrb[26].mxu0  ;;  %5707 = vrcp.f32 (!%p5117_p0), %v4010_v18  ;;  %v3997_v49 = vld [vmem:[#allocation3 + $0x30] sm:$0xff] (!%p5117_p0)  ;;  %v4014_v46 = vmax.f32 (!%p5117_p0), %v3998_v50, 1e-30  ;;  %v4000_v32 = vld [vmem:[#allocation3 + $0x48] sm:$0xff] (!%p5117_p0) }
 0x738   : > { %v3935_v17 = vadd.f32 %v5308_v61, %v3734_v59  ;;  %3149 = vst.msk [vmem:[#allocation4 + $0x150] sm:$0xff] %vm1472_vm3, %v3101_v54  ;;  %v3102_v58 = vadd.f32 %v5276_v44, %v2901_v0  ;;  %v3063_v33 = vpop.f32.mrb[27].mxu0  ;;  %5709 = vrcp.f32 (!%p5117_p0), %v4008_v51  ;;  %v4013_v27 = vmax.f32 (!%p5117_p0), %v3997_v49, 1e-30  ;;  %v3999_v0 = vld [vmem:[#allocation3 + $0x40] sm:$0xff] (!%p5117_p0)  ;;  %v4161_v51 = vld [vmem:[#allocation3 + $0xd0] sm:$0xff] (!%p5117_p0) }
 0x739   : > { %3147 = vst.msk [vmem:[#allocation4 + $0x140] sm:$0xff] %vm1472_vm3, %v3099_v25  ;;  %v3100_v30 = vadd.f32 %v3063_v33, %v2899_v7  ;;  %v3711_v26 = vpop.permute.xlu1 %3710  ;;  %5711 = vrcp.f32 (!%p5117_p0), %v4012_v42  ;;  %v4016_v54 = vmax.f32 (!%p5117_p0), %v4000_v32, 1e-30  ;;  %v4015_v7 = vmax.f32 (!%p5117_p0), %v3999_v0, 1e-30  ;;  %v4002_v25 = vld [vmem:[#allocation3 + $0x58] sm:$0xff] (!%p5117_p0) }
 0x73a   : > { %3983 = vst.msk [vmem:[#allocation4 + $0x1d8] sm:$0xff] %vm1472_vm3, %v3935_v17  ;;  %3150 = vst.msk [vmem:[#allocation4 + $0x158] sm:$0xff] %vm1472_vm3, %v3102_v58  ;;  %v3736_v57 = vmul.f32 %v3711_v26, %v3640_v38  ;;  %5713 = vrcp.f32 (!%p5117_p0), %v4011_v62  ;;  %v4018_v17 = vmax.f32 (!%p5117_p0), %v4002_v25, 1e-30  ;;  %v4017_v58 = vmax.f32 (!%p5117_p0), %v4001_v21, 1e-30 }
 0x73b   : > { %3148 = vst.msk [vmem:[#allocation4 + $0x148] sm:$0xff] %vm1472_vm3, %v3100_v30  ;;  %5715 = vrcp.f32 (!%p5117_p0), %v4014_v46  ;;  %v4004_v33 = vld [vmem:[#allocation3 + $0x68] sm:$0xff] (!%p5117_p0)  ;;  %v4003_v30 = vld [vmem:[#allocation3 + $0x60] sm:$0xff] (!%p5117_p0)  ;;  %v4175_v18 = vmax.f32 (!%p5117_p0), %v4159_v22, 1e-30  ;;  %v4326_v22 = vld [vmem:[#allocation3 + $0x178] sm:$0xff] (!%p5117_p0) }
 0x73c   : > { %v5311_v20 = vpop.f32.mrb[28].mxu1  ;;  %5717 = vrcp.f32 (!%p5117_p0), %v4013_v27  ;;  %v4020_v8 = vmax.f32 (!%p5117_p0), %v4004_v33, 1e-30  ;;  %v4019_v23 = vmax.f32 (!%p5117_p0), %v4003_v30, 1e-30  ;;  %v4164_v50 = vld [vmem:[#allocation3 + $0xe8] sm:$0xff] (!%p5117_p0) }
 0x73d   : > { %v3721_v63 = vpop.permute.xlu1 %3720  ;;  %v3938_v36 = vadd.f32 %v5311_v20, %v3737_v34  ;;  %v5279_v47 = vpop.f32.mrb[28].mxu0  ;;  %3990 = sbr.rel (%p5117_p0) target bundleno = 2234 (0x8ba), region = 86  ;;  %5719 = vrcp.f32 (!%p5117_p0), %v4016_v54  ;;  %v4152_v20 = vld [vmem:[#allocation3 + $0x88] sm:$0xff] (!%p5117_p0)  ;;  %v4178_v42 = vmax.f32 (!%p5117_p0), %v4162_v39, 1e-30  ;;  %v4163_v46 = vld [vmem:[#allocation3 + $0xe0] sm:$0xff] (!%p5117_p0) }
 0x73e   : > { %v3738_v41 = vmul.f32 %v3721_v63, %v3642_v19  ;;  %v3105_v52 = vadd.f32 %v5279_v47, %v2904_v3  ;;  %v3909_v10 = vpop.f32.mrb[29].mxu1  ;;  %v3076_v29 = vpop.f32.mrb[29].mxu0  ;;  %5721 = vrcp.f32 (!%p5117_p0), %v4015_v7  ;;  %v4005_v19 = vld [vmem:[#allocation3 + $0x70] sm:$0xff] (!%p5117_p0)  ;;  %v4177_v62 = vmax.f32 (!%p5117_p0), %v4161_v51, 1e-30  ;;  %v4312_v21 = vld [vmem:[#allocation3 + $0x108] sm:$0xff] (!%p5117_p0) }
 0x73f   : > { %3986 = vst.msk [vmem:[#allocation4 + $0x1f0] sm:$0xff] %vm1472_vm3, %v3938_v36  ;;  %v3936_v11 = vadd.f32 %v3909_v10, %v3735_v48  ;;  %v3103_v16 = vadd.f32 %v3076_v29, %v2902_v45  ;;  %v5312_v56 = vpop.f32.mrb[30].mxu1  ;;  %v5280_v15 = vpop.f32.mrb[30].mxu0  ;;  %5723 = vrcp.f32 (!%p5117_p0), %v4018_v17  ;;  %v4021_v38 = vmax.f32 (!%p5117_p0), %v4005_v19, 1e-30  ;;  %v4151_v48 = vld [vmem:[#allocation3 + $0x80] sm:$0xff] (!%p5117_p0) }
 0x740   : > { %3153 = vst.msk [vmem:[#allocation4 + $0x170] sm:$0xff] %vm1472_vm3, %v3105_v52  ;;  %v3939_v14 = vadd.f32 %v5312_v56, %v3738_v41  ;;  %v3106_v60 = vadd.f32 %v5280_v15, %v2905_v5  ;;  %v3912_v61 = vpop.f32.mrb[31].mxu1  ;;  %v3079_v40 = vpop.f32.mrb[31].mxu0  ;;  %5725 = vrcp.f32 (!%p5117_p0), %v4017_v58  ;;  %v4168_v36 = vmax.f32 (!%p5117_p0), %v4152_v20, 1e-30  ;;  %v4154_v5 = vld [vmem:[#allocation3 + $0x98] sm:$0xff] (!%p5117_p0) }
 0x741   : > { %3984 = vst.msk [vmem:[#allocation4 + $0x1e0] sm:$0xff] %vm1472_vm3, %v3936_v11  ;;  %3151 = vst.msk [vmem:[#allocation4 + $0x160] sm:$0xff] %vm1472_vm3, %v3103_v16  ;;  %v3937_v37 = vadd.f32 %v3912_v61, %v3736_v57  ;;  %v3104_v28 = vadd.f32 %v3079_v40, %v2903_v53  ;;  %v5704_v59 = vpop.eup (!%p5117_p0), %5703  ;;  %5727 = vrcp.f32 (!%p5117_p0), %v4020_v8  ;;  %v4167_v47 = vmax.f32 (!%p5117_p0), %v4151_v48, 1e-30  ;;  %v4153_v52 = vld [vmem:[#allocation3 + $0x90] sm:$0xff] (!%p5117_p0)  ;;  %v4156_v57 = vld [vmem:[#allocation3 + $0xa8] sm:$0xff] (!%p5117_p0) }
 0x742   : > { %3987 = vst.msk [vmem:[#allocation4 + $0x1f8] sm:$0xff] %vm1472_vm3, %v3939_v14  ;;  %3154 = vst.msk [vmem:[#allocation4 + $0x178] sm:$0xff] %vm1472_vm3, %v3106_v60  ;;  %v5706_v2 = vpop.eup (!%p5117_p0), %5705  ;;  %4067 = vperm.xlu1 (!%p5117_p0), %5702, %v5704_v59   ;;  %5729 = vrcp.f32 (!%p5117_p0), %v4019_v23  ;;  %v4170_v29 = vmax.f32 (!%p5117_p0), %v4154_v5, 1e-30  ;;  %v4169_v53 = vmax.f32 (!%p5117_p0), %v4153_v52, 1e-30 }
 0x743   : > { %3985 = vst.msk [vmem:[#allocation4 + $0x1e8] sm:$0xff] %vm1472_vm3, %v3937_v37  ;;  %3152 = vst.msk [vmem:[#allocation4 + $0x168] sm:$0xff] %vm1472_vm3, %v3104_v28  ;;  %v5708_v44 = vpop.eup (!%p5117_p0), %5707  ;;  %4057 = vperm.xlu0 (!%p5117_p0), %5701, %v5706_v2   ;;  %5731 = vrcp.f32 (!%p5117_p0), %v4022_v6  ;;  %v4155_v16 = vld [vmem:[#allocation3 + $0xa0] sm:$0xff] (!%p5117_p0)  ;;  %v4172_v15 = vmax.f32 (!%p5117_p0), %v4156_v57, 1e-30  ;;  %v4158_v60 = vld [vmem:[#allocation3 + $0xb8] sm:$0xff] (!%p5117_p0) }
 0x744   : > { %v5710_v1 = vpop.eup %5709  ;;  %5733 = vrcp.f32 %v4021_v38  ;;  %v4171_v14 = vmax.f32 %v4155_v16, 1e-30  ;;  %v4157_v40 = vld [vmem:[#allocation3 + $0xb0] sm:$0xff]  ;;  %v4174_v28 = vmax.f32 %v4158_v60, 1e-30  ;;  %v4166_v59 = vld [vmem:[#allocation3 + $0xf8] sm:$0xff] }
 0x745   : > { %v5712_v31 = vpop.eup %5711  ;;  %5735 = vrcp.f32 %v4168_v36  ;;  %v4173_v9 = vmax.f32 %v4157_v40, 1e-30  ;;  %v4180_v32 = vmax.f32 %v4164_v50, 1e-30  ;;  %v4179_v0 = vmax.f32 %v4163_v46, 1e-30 }
 0x746   : > { %4072 = vperm.xlu1 %5702, %v5708_v44   ;;  %v5714_v26 = vpop.eup %5713  ;;  %5737 = vrcp.f32 %v4167_v47  ;;  %v4165_v2 = vld [vmem:[#allocation3 + $0xf0] sm:$0xff]  ;;  %v4182_v25 = vmax.f32 %v4166_v59, 1e-30  ;;  %v4311_v17 = vld [vmem:[#allocation3 + $0x100] sm:$0xff]  ;;  %v4328_v33 = vmax.f32 %v4312_v21, 1e-30 }
 0x747   : > { %4062 = vperm.xlu0 %5701, %v5710_v1   ;;  %v5716_v34 = vpop.eup %5715  ;;  %5739 = vrcp.f32 %v4170_v29  ;;  %v4181_v44 = vmax.f32 %v4165_v2, 1e-30  ;;  %v4314_v30 = vld [vmem:[#allocation3 + $0x118] sm:$0xff]  ;;  %v4313_v8 = vld [vmem:[#allocation3 + $0x110] sm:$0xff]  ;;  %v4316_v19 = vld [vmem:[#allocation3 + $0x128] sm:$0xff] }
 0x748   : > { %v5718_v3 = vpop.eup %5717  ;;  %5741 = vrcp.f32 %v4169_v53  ;;  %v4330_v4 = vmax.f32 %v4314_v30, 1e-30  ;;  %v4315_v6 = vld [vmem:[#allocation3 + $0x120] sm:$0xff]  ;;  %v4332_v20 = vmax.f32 %v4316_v19, 1e-30  ;;  %v4318_v48 = vld [vmem:[#allocation3 + $0x138] sm:$0xff] }
 0x749   : > { %v5720_v45 = vpop.eup %5719  ;;  %5743 = vrcp.f32 %v4172_v15  ;;  %v4317_v36 = vld [vmem:[#allocation3 + $0x130] sm:$0xff]  ;;  %v4334_v5 = vmax.f32 %v4318_v48, 1e-30  ;;  %v4320_v52 = vld [vmem:[#allocation3 + $0x148] sm:$0xff]  ;;  %v4319_v29 = vld [vmem:[#allocation3 + $0x140] sm:$0xff] }
 0x74a   : > { %4082 = vperm.xlu1 %5702, %v5712_v31   ;;  %v5722_v63 = vpop.eup %5721  ;;  %5745 = vrcp.f32 %v4171_v14  ;;  %v4327_v31 = vmax.f32 %v4311_v17, 1e-30  ;;  %v4336_v57 = vmax.f32 %v4320_v52, 1e-30  ;;  %v4322_v16 = vld [vmem:[#allocation3 + $0x158] sm:$0xff]  ;;  %v4321_v15 = vld [vmem:[#allocation3 + $0x150] sm:$0xff] }
 0x74b   : > { %4077 = vperm.xlu0 %5701, %v5714_v26   ;;  %v5724_v41 = vpop.eup %5723  ;;  %5747 = vrcp.f32 %v4174_v28  ;;  %v4338_v60 = vmax.f32 %v4322_v16, 1e-30  ;;  %v4324_v40 = vld [vmem:[#allocation3 + $0x168] sm:$0xff]  ;;  %v4323_v28 = vld [vmem:[#allocation3 + $0x160] sm:$0xff]  ;;  %v4342_v39 = vmax.f32 %v4326_v22, 1e-30 }
 0x74c   : > { %v5726_v10 = vpop.eup %5725  ;;  %5749 = vrcp.f32 %v4173_v9  ;;  %v4340_v13 = vmax.f32 %v4324_v40, 1e-30  ;;  %v4472_v51 = vld [vmem:[#allocation3 + $0x188] sm:$0xff]  ;;  %v4474_v46 = vld [vmem:[#allocation3 + $0x198] sm:$0xff] }
 0x74d   : > { %v5728_v11 = vpop.eup %5727  ;;  %5751 = vrcp.f32 %v4176_v55  ;;  %v4325_v55 = vld [vmem:[#allocation3 + $0x170] sm:$0xff]  ;;  %v4488_v50 = vmax.f32 %v4472_v51, 1e-30  ;;  %v4490_v59 = vmax.f32 %v4474_v46, 1e-30  ;;  %v4476_v2 = vld [vmem:[#allocation3 + $0x1a8] sm:$0xff] }
 0x74e   : > { %4092 = vperm.xlu1 %5702, %v5716_v34   ;;  %v5730_v56 = vpop.eup %5729  ;;  %5753 = vrcp.f32 %v4175_v18  ;;  %v4329_v34 = vmax.f32 %v4313_v8, 1e-30  ;;  %v4492_v21 = vmax.f32 %v4476_v2, 1e-30  ;;  %v4478_v17 = vld [vmem:[#allocation3 + $0x1b8] sm:$0xff]  ;;  %v4480_v8 = vld [vmem:[#allocation3 + $0x1c8] sm:$0xff] }
 0x74f   : > { %4087 = vperm.xlu0 %5701, %v5718_v3   ;;  %v5732_v61 = vpop.eup %5731  ;;  %5755 = vrcp.f32 %v4178_v42  ;;  %v4471_v42 = vld [vmem:[#allocation3 + $0x180] sm:$0xff]  ;;  %v4494_v30 = vmax.f32 %v4478_v17, 1e-30  ;;  %v4496_v19 = vmax.f32 %v4480_v8, 1e-30 }
 0x750   : > { %v5734_v37 = vpop.eup %5733  ;;  %5757 = vrcp.f32 %v4177_v62 }
 0x751   : > { %v5736_v12 = vpop.eup %5735  ;;  %5759 = vrcp.f32 %v4180_v32  ;;  %v4473_v32 = vld [vmem:[#allocation3 + $0x190] sm:$0xff] }
 0x752   : > { %4102 = vperm.xlu1 %5702, %v5720_v45   ;;  %v5738_v24 = vpop.eup %5737  ;;  %5761 = vrcp.f32 %v4179_v0  ;;  %v4331_v45 = vmax.f32 %v4315_v6, 1e-30  ;;  %v4482_v6 = vld [vmem:[#allocation3 + $0x1d8] sm:$0xff] }
 0x753   : > { %4097 = vperm.xlu0 %5701, %v5722_v63   ;;  %v5740_v43 = vpop.eup %5739  ;;  %5763 = vrcp.f32 %v4182_v25  ;;  %v4475_v25 = vld [vmem:[#allocation3 + $0x1a0] sm:$0xff]  ;;  %v4498_v48 = vmax.f32 %v4482_v6, 1e-30 }
 0x754   : > { %v5742_v35 = vpop.eup %5741  ;;  %5765 = vrcp.f32 %v4181_v44 }
 0x755   : > { %v5744_v49 = vpop.eup %5743  ;;  %5767 = vrcp.f32 %v4328_v33  ;;  %v4477_v33 = vld [vmem:[#allocation3 + $0x1b0] sm:$0xff] }
 0x756   : > { %4112 = vperm.xlu1 %5702, %v5724_v41   ;;  %v5746_v27 = vpop.eup %5745  ;;  %5769 = vrcp.f32 %v4327_v31  ;;  %v4333_v41 = vmax.f32 %v4317_v36, 1e-30  ;;  %v4484_v36 = vld [vmem:[#allocation3 + $0x1e8] sm:$0xff] }
 0x757   : > { %4107 = vperm.xlu0 %5701, %v5726_v10   ;;  %v5748_v54 = vpop.eup %5747  ;;  %5771 = vrcp.f32 %v4330_v4  ;;  %v4479_v4 = vld [vmem:[#allocation3 + $0x1c0] sm:$0xff]  ;;  %v4500_v52 = vmax.f32 %v4484_v36, 1e-30 }
 0x758   : > { %v5750_v7 = vpop.eup %5749  ;;  %5773 = vrcp.f32 %v4329_v34 }
 0x759   : > { %v5752_v1 = vpop.eup %5751  ;;  %5775 = vrcp.f32 %v4332_v20  ;;  %v4481_v20 = vld [vmem:[#allocation3 + $0x1d0] sm:$0xff] }
 0x75a   : > { %4122 = vperm.xlu1 %5702, %v5728_v11   ;;  %v5754_v58 = vpop.eup %5753  ;;  %5777 = vrcp.f32 %v4331_v45  ;;  %v4335_v11 = vmax.f32 %v4319_v29, 1e-30  ;;  %v4486_v29 = vld [vmem:[#allocation3 + $0x1f8] sm:$0xff] }
 0x75b   : > { %4117 = vperm.xlu0 %5701, %v5730_v56   ;;  %v5756_v26 = vpop.eup %5755  ;;  %5779 = vrcp.f32 %v4334_v5  ;;  %v4483_v5 = vld [vmem:[#allocation3 + $0x1e0] sm:$0xff]  ;;  %v4502_v16 = vmax.f32 %v4486_v29, 1e-30 }
 0x75c   : > { %v5758_v23 = vpop.eup %5757  ;;  %5781 = vrcp.f32 %v4333_v41 }
 0x75d   : > { %v5760_v3 = vpop.eup %5759  ;;  %5783 = vrcp.f32 %v4336_v57  ;;  %v4485_v57 = vld [vmem:[#allocation3 + $0x1f0] sm:$0xff] }
 0x75e   : > { %4132 = vperm.xlu1 %5702, %v5732_v61   ;;  %v5762_v38 = vpop.eup %5761  ;;  %5785 = vrcp.f32 %v4335_v11  ;;  %v4337_v61 = vmax.f32 %v4321_v15, 1e-30 }
 0x75f   : > { %4127 = vperm.xlu0 %5701, %v5734_v37   ;;  %v5764_v63 = vpop.eup %5763  ;;  %5787 = vrcp.f32 %v4338_v60 }
 0x760   : > { %v5766_v47 = vpop.eup %5765  ;;  %5789 = vrcp.f32 %v4337_v61 }
 0x761   : > { %v5768_v10 = vpop.eup %5767  ;;  %5791 = vrcp.f32 %v4340_v13 }
 0x762   : > { %4222 = vperm.xlu1 %5702, %v5736_v12   ;;  %v5770_v53 = vpop.eup %5769  ;;  %v4339_v12 = vmax.f32 %v4323_v28, 1e-30 }
 0x763   : > { %4217 = vperm.xlu0 %5701, %v5738_v24   ;;  %v5772_v56 = vpop.eup %5771 }
 0x764   : > { %v5774_v14 = vpop.eup %5773  ;;  %5793 = vrcp.f32 %v4339_v12 }
 0x765   : > { %v5776_v37 = vpop.eup %5775  ;;  %5795 = vrcp.f32 %v4342_v39 }
 0x766   : > { %4232 = vperm.xlu1 %5702, %v5740_v43   ;;  %v5778_v9 = vpop.eup %5777  ;;  %v4341_v43 = vmax.f32 %v4325_v55, 1e-30 }
 0x767   : > { %4227 = vperm.xlu0 %5701, %v5742_v35   ;;  %v5780_v24 = vpop.eup %5779 }
 0x768   : > { %v5782_v18 = vpop.eup %5781  ;;  %5797 = vrcp.f32 %v4341_v43 }
 0x769   : > { %v5784_v35 = vpop.eup %5783  ;;  %5799 = vrcp.f32 %v4488_v50 }
 0x76a   : > { %4242 = vperm.xlu1 %5702, %v5744_v49   ;;  %v5786_v62 = vpop.eup %5785  ;;  %v4487_v49 = vmax.f32 %v4471_v42, 1e-30 }
 0x76b   : > { %4237 = vperm.xlu0 %5701, %v5746_v27   ;;  %v5788_v27 = vpop.eup %5787 }
 0x76c   : > { %v5790_v0 = vpop.eup %5789  ;;  %5801 = vrcp.f32 %v4487_v49 }
 0x76d   : > { %5803 = vrcp.f32 %v4490_v59 }
 0x76e   : > { %4252 = vperm.xlu1 %5702, %v5748_v54   ;;  %v4489_v54 = vmax.f32 %v4473_v32, 1e-30  ;;  %v4200_v32 = vld [vmem:[#allocation4 + $0x88] sm:$0xff] }
 0x76f   : > { %4247 = vperm.xlu0 %5701, %v5750_v7   ;;  %v5792_v7 = vpop.eup %5791 }
 0x770   : > { %v5794_v44 = vpop.eup %5793  ;;  %5805 = vrcp.f32 %v4489_v54 }
 0x771   : > { %5807 = vrcp.f32 %v4492_v21 }
 0x772   : > { %4262 = vperm.xlu1 %5702, %v5752_v1   ;;  %v4491_v1 = vmax.f32 %v4475_v25, 1e-30  ;;  %v4202_v25 = vld [vmem:[#allocation4 + $0x98] sm:$0xff] }
 0x773   : > { %4257 = vperm.xlu0 %5701, %v5754_v58   ;;  %v5796_v58 = vpop.eup %5795 }
 0x774   : > { %v5798_v31 = vpop.eup %5797  ;;  %5809 = vrcp.f32 %v4491_v1 }
 0x775   : > { %5811 = vrcp.f32 %v4494_v30 }
 0x776   : > { %4272 = vperm.xlu1 %5702, %v5756_v26   ;;  %v4493_v26 = vmax.f32 %v4477_v33, 1e-30  ;;  %v4204_v33 = vld [vmem:[#allocation4 + $0xa8] sm:$0xff] }
 0x777   : > { %4267 = vperm.xlu0 %5701, %v5758_v23   ;;  %v5800_v23 = vpop.eup %5799 }
 0x778   : > { %v5802_v34 = vpop.eup %5801  ;;  %5813 = vrcp.f32 %v4493_v26 }
 0x779   : > { %5815 = vrcp.f32 %v4496_v19 }
 0x77a   : > { %4282 = vperm.xlu1 %5702, %v5760_v3   ;;  %v4495_v3 = vmax.f32 %v4479_v4, 1e-30  ;;  %v4206_v4 = vld [vmem:[#allocation4 + $0xb8] sm:$0xff] }
 0x77b   : > { %4277 = vperm.xlu0 %5701, %v5762_v38   ;;  %v5804_v38 = vpop.eup %5803 }
 0x77c   : > { %v5806_v45 = vpop.eup %5805  ;;  %5817 = vrcp.f32 %v4495_v3 }
 0x77d   : > { %5819 = vrcp.f32 %v4498_v48 }
 0x77e   : > { %4292 = vperm.xlu1 %5702, %v5764_v63   ;;  %v4497_v63 = vmax.f32 %v4481_v20, 1e-30  ;;  %v4208_v20 = vld [vmem:[#allocation4 + $0xc8] sm:$0xff] }
 0x77f   : > { %4287 = vperm.xlu0 %5701, %v5766_v47   ;;  %v5808_v47 = vpop.eup %5807 }
 0x780   : > { %v5810_v41 = vpop.eup %5809  ;;  %5821 = vrcp.f32 %v4497_v63 }
 0x781   : > { %5823 = vrcp.f32 %v4500_v52 }
 0x782   : > { %4382 = vperm.xlu1 %5702, %v5768_v10   ;;  %v4499_v10 = vmax.f32 %v4483_v5, 1e-30  ;;  %v4210_v5 = vld [vmem:[#allocation4 + $0xd8] sm:$0xff] }
 0x783   : > { %4377 = vperm.xlu0 %5701, %v5770_v53   ;;  %v5812_v53 = vpop.eup %5811 }
 0x784   : > { %v5814_v11 = vpop.eup %5813  ;;  %5825 = vrcp.f32 %v4499_v10 }
 0x785   : > { %v5816_v15 = vpop.eup %5815  ;;  %5827 = vrcp.f32 %v4502_v16 }
 0x786   : > { %4392 = vperm.xlu1 %5702, %v5772_v56   ;;  %v4501_v56 = vmax.f32 %v4485_v57, 1e-30  ;;  %v4212_v57 = vld [vmem:[#allocation4 + $0xe8] sm:$0xff] }
 0x787   : > { %4387 = vperm.xlu0 %5701, %v5774_v14   ;;  %v5818_v14 = vpop.eup %5817 }
 0x788   : > { %5829 = vrcp.f32 %v4501_v56  ;;  %v5820_v60 = vpop.eup %5819 }
 0x78a   : > { %4402 = vperm.xlu1 %5702, %v5776_v37   ;;  %v5822_v61 = vpop.eup %5821 }
 0x78b   : > { %4397 = vperm.xlu0 %5701, %v5778_v9   ;;  %v5824_v40 = vpop.eup %5823 }
 0x78e   : > { %4412 = vperm.xlu1 %5702, %v5780_v24   ;;  %v5826_v37 = vpop.eup %5825 }
 0x78f   : > { %4407 = vperm.xlu0 %5701, %v5782_v18   ;;  %v5828_v28 = vpop.eup %5827 }
 0x792   : > { %4422 = vperm.xlu1 %5702, %v5784_v35   ;;  %v5830_v9 = vpop.eup %5829 }
 0x793   : > { %4417 = vperm.xlu0 %5701, %v5786_v62  }
 0x796   : > { %4432 = vperm.xlu1 %5702, %v5788_v27  }
 0x797   : > { %4427 = vperm.xlu0 %5701, %v5790_v0   ;;  %v4199_v0 = vld [vmem:[#allocation4 + $0x80] sm:$0xff] }
 0x79a   : > { %4442 = vperm.xlu1 %5702, %v5792_v7  }
 0x79b   : > { %4437 = vperm.xlu0 %5701, %v5794_v44   ;;  %v4201_v44 = vld [vmem:[#allocation4 + $0x90] sm:$0xff] }
 0x79e   : > { %4452 = vperm.xlu1 %5702, %v5796_v58  }
 0x79f   : > { %4447 = vperm.xlu0 %5701, %v5798_v31   ;;  %v4203_v31 = vld [vmem:[#allocation4 + $0xa0] sm:$0xff] }
 0x7a2   : > { %4542 = vperm.xlu1 %5702, %v5800_v23  }
 0x7a3   : > { %4537 = vperm.xlu0 %5701, %v5802_v34   ;;  %v4205_v34 = vld [vmem:[#allocation4 + $0xb0] sm:$0xff] }
 0x7a6   : > { %4552 = vperm.xlu1 %5702, %v5804_v38  }
 0x7a7   : > { %4547 = vperm.xlu0 %5701, %v5806_v45   ;;  %v4207_v45 = vld [vmem:[#allocation4 + $0xc0] sm:$0xff] }
 0x7aa   : > { %4562 = vperm.xlu1 %5702, %v5808_v47  }
 0x7ab   : > { %4557 = vperm.xlu0 %5701, %v5810_v41   ;;  %v4209_v41 = vld [vmem:[#allocation4 + $0xd0] sm:$0xff] }
 0x7ae   : > { %4572 = vperm.xlu1 %5702, %v5812_v53  }
 0x7af   : > { %4567 = vperm.xlu0 %5701, %v5814_v11   ;;  %v4211_v11 = vld [vmem:[#allocation4 + $0xe0] sm:$0xff] }
 0x7b2   : > { %4582 = vperm.xlu1 %5702, %v5816_v15  }
 0x7b3   : > { %4577 = vperm.xlu0 %5701, %v5818_v14  }
 0x7b6   : > { %4592 = vperm.xlu1 %5702, %v5820_v60   ;;  %v4214_v60 = vld [vmem:[#allocation4 + $0xf8] sm:$0xff] }
 0x7b7   : > { %4587 = vperm.xlu0 %5701, %v5822_v61   ;;  %v4213_v61 = vld [vmem:[#allocation4 + $0xf0] sm:$0xff] }
 0x7ba   : > { %4602 = vperm.xlu1 %5702, %v5824_v40  }
 0x7bb   : > { %4597 = vperm.xlu0 %5701, %v5826_v37  }
 0x7be   : > { %4612 = vperm.xlu1 %5702, %v5828_v28  }
 0x7bf   : > { %4607 = vperm.xlu0 %5701, %v5830_v9  }
 0x7c1   : > { %v8436_v13 = vpop.permute.xlu1 %4067 }
 0x7c2   : > { %v8438_v12 = vpop.permute.xlu0 %4057 }
 0x7c5   : > { %v8440_v22 = vpop.permute.xlu1 %4072 }
 0x7c6   : > { %v8442_v24 = vpop.permute.xlu0 %4062 }
 0x7c9   : > { %v8444_v55 = vpop.permute.xlu1 %4082 }
 0x7ca   : > { %v8446_v18 = vpop.permute.xlu0 %4077 }
 0x7cd   : > { %v8448_v39 = vpop.permute.xlu1 %4092 }
 0x7ce   : > { %v8450_v43 = vpop.permute.xlu0 %4087 }
 0x7d1   : > { %v8452_v51 = vpop.permute.xlu1 %4102 }
 0x7d2   : > { %v8454_v35 = vpop.permute.xlu0 %4097 }
 0x7d5   : > { %v8456_v42 = vpop.permute.xlu1 %4112 }
 0x7d6   : > { %v8458_v62 = vpop.permute.xlu0 %4107 }
 0x7d9   : > { %v8460_v50 = vpop.permute.xlu1 %4122 }
 0x7da   : > { %v8462_v49 = vpop.permute.xlu0 %4117 }
 0x7dd   : > { %v8464_v46 = vpop.permute.xlu1 %4132 }
 0x7de   : > { %v8466_v27 = vpop.permute.xlu0 %4127 }
 0x7e1   : > { %v4223_v59 = vpop.permute.xlu1 %4222 }
 0x7e2   : > { %v4296_v54 = vmul.f32 %v4223_v59, %v4200_v32  ;;  %v4218_v2 = vpop.permute.xlu0 %4217  ;;  %v4360_v32 = vld [vmem:[#allocation4 + $0x108] sm:$0xff] }
 0x7e3   : > { %v4295_v7 = vmul.f32 %v4218_v2, %v4199_v0  ;;  %v4359_v0 = vld [vmem:[#allocation4 + $0x100] sm:$0xff] }
 0x7e4   : > { %4649 = vrot.lane.b32.xlu1 %v4296_v54, %s5897_s20 }
 0x7e5   : > { %4647 = vrot.lane.b32.xlu0 %v4295_v7, %s5897_s20  ;;  %v4233_v21 = vpop.permute.xlu1 %4232 }
 0x7e6   : > { %v4298_v1 = vmul.f32 %v4233_v21, %v4202_v25  ;;  %v4228_v17 = vpop.permute.xlu0 %4227  ;;  %v4362_v25 = vld [vmem:[#allocation4 + $0x118] sm:$0xff] }
 0x7e7   : > { %v4297_v58 = vmul.f32 %v4228_v17, %v4201_v44  ;;  %v4361_v44 = vld [vmem:[#allocation4 + $0x110] sm:$0xff] }
 0x7e8   : > { %4653 = vrot.lane.b32.xlu1 %v4298_v1, %s5897_s20 }
 0x7e9   : > { %4651 = vrot.lane.b32.xlu0 %v4297_v58, %s5897_s20  ;;  %v4243_v30 = vpop.permute.xlu1 %4242 }
 0x7ea   : > { %v4300_v26 = vmul.f32 %v4243_v30, %v4204_v33  ;;  %v4238_v8 = vpop.permute.xlu0 %4237  ;;  %v4364_v33 = vld [vmem:[#allocation4 + $0x128] sm:$0xff] }
 0x7eb   : > { %v4299_v23 = vmul.f32 %v4238_v8, %v4203_v31  ;;  %v4363_v31 = vld [vmem:[#allocation4 + $0x120] sm:$0xff] }
 0x7ec   : > { %4657 = vrot.lane.b32.xlu1 %v4300_v26, %s5897_s20 }
 0x7ed   : > { %4655 = vrot.lane.b32.xlu0 %v4299_v23, %s5897_s20  ;;  %v4253_v19 = vpop.permute.xlu1 %4252 }
 0x7ee   : > { %v4302_v3 = vmul.f32 %v4253_v19, %v4206_v4  ;;  %v4248_v6 = vpop.permute.xlu0 %4247  ;;  %v4366_v4 = vld [vmem:[#allocation4 + $0x138] sm:$0xff] }
 0x7ef   : > { %v4301_v38 = vmul.f32 %v4248_v6, %v4205_v34  ;;  %v4365_v34 = vld [vmem:[#allocation4 + $0x130] sm:$0xff] }
 0x7f0   : > { %4661 = vrot.lane.b32.xlu1 %v4302_v3, %s5897_s20 }
 0x7f1   : > { %4659 = vrot.lane.b32.xlu0 %v4301_v38, %s5897_s20  ;;  %v4263_v48 = vpop.permute.xlu1 %4262 }
 0x7f2   : > { %v4304_v63 = vmul.f32 %v4263_v48, %v4208_v20  ;;  %v4258_v36 = vpop.permute.xlu0 %4257  ;;  %v4368_v20 = vld [vmem:[#allocation4 + $0x148] sm:$0xff] }
 0x7f3   : > { %v4303_v47 = vmul.f32 %v4258_v36, %v4207_v45  ;;  %v4367_v45 = vld [vmem:[#allocation4 + $0x140] sm:$0xff] }
 0x7f4   : > { %4665 = vrot.lane.b32.xlu1 %v4304_v63, %s5897_s20 }
 0x7f5   : > { %4663 = vrot.lane.b32.xlu0 %v4303_v47, %s5897_s20  ;;  %v4273_v52 = vpop.permute.xlu1 %4272 }
 0x7f6   : > { %v4306_v10 = vmul.f32 %v4273_v52, %v4210_v5  ;;  %v4268_v29 = vpop.permute.xlu0 %4267  ;;  %v4370_v5 = vld [vmem:[#allocation4 + $0x158] sm:$0xff] }
 0x7f7   : > { %v4305_v53 = vmul.f32 %v4268_v29, %v4209_v41  ;;  %v4369_v41 = vld [vmem:[#allocation4 + $0x150] sm:$0xff] }
 0x7f8   : > { %4669 = vrot.lane.b32.xlu1 %v4306_v10, %s5897_s20 }
 0x7f9   : > { %4667 = vrot.lane.b32.xlu0 %v4305_v53, %s5897_s20  ;;  %v4283_v16 = vpop.permute.xlu1 %4282 }
 0x7fa   : > { %v4308_v56 = vmul.f32 %v4283_v16, %v4212_v57  ;;  %v4278_v15 = vpop.permute.xlu0 %4277  ;;  %v4372_v57 = vld [vmem:[#allocation4 + $0x168] sm:$0xff] }
 0x7fb   : > { %v4307_v14 = vmul.f32 %v4278_v15, %v4211_v11  ;;  %v4371_v11 = vld [vmem:[#allocation4 + $0x160] sm:$0xff] }
 0x7fc   : > { %4673 = vrot.lane.b32.xlu1 %v4308_v56, %s5897_s20 }
 0x7fd   : > { %4671 = vrot.lane.b32.xlu0 %v4307_v14, %s5897_s20  ;;  %v4293_v40 = vpop.permute.xlu1 %4292 }
 0x7fe   : > { %v4310_v37 = vmul.f32 %v4293_v40, %v4214_v60  ;;  %v4288_v28 = vpop.permute.xlu0 %4287  ;;  %v4374_v60 = vld [vmem:[#allocation4 + $0x178] sm:$0xff] }
 0x7ff   : > { %v4309_v9 = vmul.f32 %v4288_v28, %v4213_v61  ;;  %v4373_v61 = vld [vmem:[#allocation4 + $0x170] sm:$0xff] }
 0x800   : > { %4677 = vrot.lane.b32.xlu1 %v4310_v37, %s5897_s20 }
 0x801   : > { %4675 = vrot.lane.b32.xlu0 %v4309_v9, %s5897_s20  ;;  %v4383_v59 = vpop.permute.xlu1 %4382 }
 0x802   : > { %v4456_v54 = vmul.f32 %v4383_v59, %v4360_v32  ;;  %v4378_v2 = vpop.permute.xlu0 %4377  ;;  %v4520_v32 = vld [vmem:[#allocation4 + $0x188] sm:$0xff] }
 0x803   : > { %v4455_v7 = vmul.f32 %v4378_v2, %v4359_v0  ;;  %v4519_v0 = vld [vmem:[#allocation4 + $0x180] sm:$0xff] }
 0x804   : > { %4713 = vrot.lane.b32.xlu1 %v4456_v54, %s5898_s10 }
 0x805   : > { %4711 = vrot.lane.b32.xlu0 %v4455_v7, %s5898_s10  ;;  %v4393_v21 = vpop.permute.xlu1 %4392 }
 0x806   : > { %v4458_v1 = vmul.f32 %v4393_v21, %v4362_v25  ;;  %v4388_v17 = vpop.permute.xlu0 %4387  ;;  %v4522_v25 = vld [vmem:[#allocation4 + $0x198] sm:$0xff] }
 0x807   : > { %v4457_v58 = vmul.f32 %v4388_v17, %v4361_v44  ;;  %v4521_v44 = vld [vmem:[#allocation4 + $0x190] sm:$0xff] }
 0x808   : > { %4717 = vrot.lane.b32.xlu1 %v4458_v1, %s5898_s10 }
 0x809   : > { %4715 = vrot.lane.b32.xlu0 %v4457_v58, %s5898_s10  ;;  %v4403_v30 = vpop.permute.xlu1 %4402 }
 0x80a   : > { %v4460_v26 = vmul.f32 %v4403_v30, %v4364_v33  ;;  %v4398_v8 = vpop.permute.xlu0 %4397  ;;  %v4524_v33 = vld [vmem:[#allocation4 + $0x1a8] sm:$0xff] }
 0x80b   : > { %v4459_v23 = vmul.f32 %v4398_v8, %v4363_v31  ;;  %v4523_v31 = vld [vmem:[#allocation4 + $0x1a0] sm:$0xff] }
 0x80c   : > { %4721 = vrot.lane.b32.xlu1 %v4460_v26, %s5898_s10 }
 0x80d   : > { %4719 = vrot.lane.b32.xlu0 %v4459_v23, %s5898_s10  ;;  %v4413_v19 = vpop.permute.xlu1 %4412 }
 0x80e   : > { %v4462_v3 = vmul.f32 %v4413_v19, %v4366_v4  ;;  %v4408_v6 = vpop.permute.xlu0 %4407  ;;  %v4526_v4 = vld [vmem:[#allocation4 + $0x1b8] sm:$0xff] }
 0x80f   : > { %v4461_v38 = vmul.f32 %v4408_v6, %v4365_v34  ;;  %v4525_v34 = vld [vmem:[#allocation4 + $0x1b0] sm:$0xff] }
 0x810   : > { %4725 = vrot.lane.b32.xlu1 %v4462_v3, %s5898_s10 }
 0x811   : > { %4723 = vrot.lane.b32.xlu0 %v4461_v38, %s5898_s10  ;;  %v4423_v48 = vpop.permute.xlu1 %4422 }
 0x812   : > { %v4464_v63 = vmul.f32 %v4423_v48, %v4368_v20  ;;  %v4418_v36 = vpop.permute.xlu0 %4417  ;;  %v4528_v20 = vld [vmem:[#allocation4 + $0x1c8] sm:$0xff] }
 0x813   : > { %v4463_v47 = vmul.f32 %v4418_v36, %v4367_v45  ;;  %v4527_v45 = vld [vmem:[#allocation4 + $0x1c0] sm:$0xff] }
 0x814   : > { %4729 = vrot.lane.b32.xlu1 %v4464_v63, %s5898_s10 }
 0x815   : > { %4727 = vrot.lane.b32.xlu0 %v4463_v47, %s5898_s10  ;;  %v4433_v52 = vpop.permute.xlu1 %4432 }
 0x816   : > { %v4466_v10 = vmul.f32 %v4433_v52, %v4370_v5  ;;  %v4428_v29 = vpop.permute.xlu0 %4427  ;;  %v4530_v5 = vld [vmem:[#allocation4 + $0x1d8] sm:$0xff] }
 0x817   : > { %v4465_v53 = vmul.f32 %v4428_v29, %v4369_v41  ;;  %v4529_v41 = vld [vmem:[#allocation4 + $0x1d0] sm:$0xff] }
 0x818   : > { %4733 = vrot.lane.b32.xlu1 %v4466_v10, %s5898_s10 }
 0x819   : > { %4731 = vrot.lane.b32.xlu0 %v4465_v53, %s5898_s10  ;;  %v4443_v16 = vpop.permute.xlu1 %4442 }
 0x81a   : > { %v4468_v56 = vmul.f32 %v4443_v16, %v4372_v57  ;;  %v4438_v15 = vpop.permute.xlu0 %4437  ;;  %v4532_v57 = vld [vmem:[#allocation4 + $0x1e8] sm:$0xff] }
 0x81b   : > { %v4467_v14 = vmul.f32 %v4438_v15, %v4371_v11  ;;  %v4531_v11 = vld [vmem:[#allocation4 + $0x1e0] sm:$0xff] }
 0x81c   : > { %4737 = vrot.lane.b32.xlu1 %v4468_v56, %s5898_s10 }
 0x81d   : > { %4735 = vrot.lane.b32.xlu0 %v4467_v14, %s5898_s10  ;;  %v4453_v40 = vpop.permute.xlu1 %4452 }
 0x81e   : > { %v4470_v37 = vmul.f32 %v4453_v40, %v4374_v60  ;;  %v4448_v28 = vpop.permute.xlu0 %4447  ;;  %v4534_v60 = vld [vmem:[#allocation4 + $0x1f8] sm:$0xff] }
 0x81f   : > { %v4469_v9 = vmul.f32 %v4448_v28, %v4373_v61  ;;  %v4533_v61 = vld [vmem:[#allocation4 + $0x1f0] sm:$0xff] }
 0x820   : > { %4741 = vrot.lane.b32.xlu1 %v4470_v37, %s5898_s10 }
 0x821   : > { %4739 = vrot.lane.b32.xlu0 %v4469_v9, %s5898_s10  ;;  %v4543_v59 = vpop.permute.xlu1 %4542 }
 0x822   : > { %v4616_v54 = vmul.f32 %v4543_v59, %v4520_v32  ;;  %v4538_v2 = vpop.permute.xlu0 %4537 }
 0x823   : > { %v4615_v7 = vmul.f32 %v4538_v2, %v4519_v0 }
 0x824   : > { %4777 = vrot.lane.b32.xlu1 %v4616_v54, %s5899_s12 }
 0x825   : > { %4775 = vrot.lane.b32.xlu0 %v4615_v7, %s5899_s12  ;;  %v4553_v21 = vpop.permute.xlu1 %4552 }
 0x826   : > { %v4618_v1 = vmul.f32 %v4553_v21, %v4522_v25  ;;  %v4548_v17 = vpop.permute.xlu0 %4547 }
 0x827   : > { %v4617_v58 = vmul.f32 %v4548_v17, %v4521_v44 }
 0x828   : > { %4781 = vrot.lane.b32.xlu1 %v4618_v1, %s5899_s12 }
 0x829   : > { %4779 = vrot.lane.b32.xlu0 %v4617_v58, %s5899_s12  ;;  %v4563_v30 = vpop.permute.xlu1 %4562 }
 0x82a   : > { %v4620_v26 = vmul.f32 %v4563_v30, %v4524_v33  ;;  %v4558_v8 = vpop.permute.xlu0 %4557 }
 0x82b   : > { %v4619_v23 = vmul.f32 %v4558_v8, %v4523_v31 }
 0x82c   : > { %4785 = vrot.lane.b32.xlu1 %v4620_v26, %s5899_s12 }
 0x82d   : > { %4783 = vrot.lane.b32.xlu0 %v4619_v23, %s5899_s12  ;;  %v4573_v19 = vpop.permute.xlu1 %4572 }
 0x82e   : > { %v4622_v3 = vmul.f32 %v4573_v19, %v4526_v4  ;;  %v4568_v6 = vpop.permute.xlu0 %4567 }
 0x82f   : > { %v4621_v38 = vmul.f32 %v4568_v6, %v4525_v34 }
 0x830   : > { %4789 = vrot.lane.b32.xlu1 %v4622_v3, %s5899_s12 }
 0x831   : > { %4787 = vrot.lane.b32.xlu0 %v4621_v38, %s5899_s12  ;;  %v4583_v48 = vpop.permute.xlu1 %4582 }
 0x832   : > { %v4624_v63 = vmul.f32 %v4583_v48, %v4528_v20  ;;  %v4578_v36 = vpop.permute.xlu0 %4577 }
 0x833   : > { %v4623_v47 = vmul.f32 %v4578_v36, %v4527_v45 }
 0x834   : > { %4793 = vrot.lane.b32.xlu1 %v4624_v63, %s5899_s12 }
 0x835   : > { %4791 = vrot.lane.b32.xlu0 %v4623_v47, %s5899_s12  ;;  %v4593_v52 = vpop.permute.xlu1 %4592 }
 0x836   : > { %v4626_v10 = vmul.f32 %v4593_v52, %v4530_v5  ;;  %v4588_v29 = vpop.permute.xlu0 %4587  ;;  %v4040_v5 = vld [vmem:[#allocation4 + $0x8] sm:$0xff] }
 0x837   : > { %v4625_v53 = vmul.f32 %v4588_v29, %v4529_v41  ;;  %v4039_v41 = vld [vmem:[#allocation4] sm:$0xff] }
 0x838   : > { %4797 = vrot.lane.b32.xlu1 %v4626_v10, %s5899_s12  ;;  %v4136_v10 = vmul.f32 %v8442_v24, %v4040_v5 }
 0x839   : > { %4795 = vrot.lane.b32.xlu0 %v4625_v53, %s5899_s12  ;;  %v4603_v16 = vpop.permute.xlu1 %4602  ;;  %v4135_v53 = vmul.f32 %v8438_v12, %v4039_v41  ;;  %v4043_v41 = vld [vmem:[#allocation4 + $0x20] sm:$0xff] }
 0x83a   : > { %v4628_v56 = vmul.f32 %v4603_v16, %v4532_v57  ;;  %v4598_v15 = vpop.permute.xlu0 %4597  ;;  %v4042_v57 = vld [vmem:[#allocation4 + $0x18] sm:$0xff] }
 0x83b   : > { %v4627_v14 = vmul.f32 %v4598_v15, %v4531_v11  ;;  %v4041_v11 = vld [vmem:[#allocation4 + $0x10] sm:$0xff]  ;;  %v4138_v24 = vmul.f32 %v8440_v22, %v4042_v57 }
 0x83c   : > { %4801 = vrot.lane.b32.xlu1 %v4628_v56, %s5899_s12  ;;  %v4874_v56 = vld [vmem:[%s6010_s21 + $0x8] sm:$0xff] }
 0x83d   : > { %4799 = vrot.lane.b32.xlu0 %v4627_v14, %s5899_s12  ;;  %v4613_v40 = vpop.permute.xlu1 %4612 }
 0x83e   : > { %v4630_v37 = vmul.f32 %v4613_v40, %v4534_v60  ;;  %v4608_v28 = vpop.permute.xlu0 %4607 }
 0x83f   : > { %v4629_v9 = vmul.f32 %v4608_v28, %v4533_v61  ;;  %v4873_v61 = vld [vmem:[%s6010_s21] sm:$0xff]  ;;  %v4137_v28 = vmul.f32 %v8436_v13, %v4041_v11 }
 0x840   : > { %4805 = vrot.lane.b32.xlu1 %v4630_v37, %s5899_s12 }
 0x841   : > { %4803 = vrot.lane.b32.xlu0 %v4629_v9, %s5899_s12  ;;  %v4044_v9 = vld [vmem:[#allocation4 + $0x28] sm:$0xff] }
 0x842   : > { %v4140_v13 = vmul.f32 %v8444_v55, %v4044_v9 }
 0x856   : > { %v4650_v32 = vpop.permute.xlu1 %4649 }
 0x857   : > { %v4648_v0 = vpop.permute.xlu0 %4647  ;;  %v4824_v16 = vsel %vm1472_vm3, %v4136_v10, %v4650_v32  ;;  %v4876_v10 = vld [vmem:[%s6010_s21 + $0x18] sm:$0xff] }
 0x858   : > { %v4823_v15 = vsel %vm1472_vm3, %v4135_v53, %v4648_v0 }
 0x85a   : > { %v4654_v59 = vpop.permute.xlu1 %4653 }
 0x85b   : > { %v4652_v54 = vpop.permute.xlu0 %4651  ;;  %v4826_v0 = vsel %vm1472_vm3, %v4138_v24, %v4654_v59 }
 0x85c   : > { %v4825_v22 = vsel %vm1472_vm3, %v4137_v28, %v4652_v54  ;;  %v4877_v28 = vld [vmem:[%s6010_s21 + $0x20] sm:$0xff] }
 0x85e   : > { %v8516_v2 = vpop.permute.xlu1 %4657 }
 0x85f   : > { %v8518_v7 = vpop.permute.xlu0 %4655  ;;  %v4828_v24 = vsel %vm1472_vm3, %v4140_v13, %v8516_v2 }
 0x862   : > { %v8520_v25 = vpop.permute.xlu1 %4661 }
 0x863   : > { %v8522_v44 = vpop.permute.xlu0 %4659 }
 0x866   : > { %v8524_v21 = vpop.permute.xlu1 %4665 }
 0x867   : > { %v8526_v1 = vpop.permute.xlu0 %4663 }
 0x86a   : > { %v8528_v17 = vpop.permute.xlu1 %4669 }
 0x86b   : > { %v8530_v58 = vpop.permute.xlu0 %4667 }
 0x86e   : > { %v8532_v33 = vpop.permute.xlu1 %4673 }
 0x86f   : > { %v8534_v31 = vpop.permute.xlu0 %4671 }
 0x872   : > { %v8536_v30 = vpop.permute.xlu1 %4677 }
 0x873   : > { %v8538_v26 = vpop.permute.xlu0 %4675 }
 0x876   : > { %v4714_v8 = vpop.permute.xlu1 %4713 }
 0x877   : > { %v4712_v23 = vpop.permute.xlu0 %4711  ;;  %v4841_v14 = vsel %vm4839_vm4, %v4824_v16, %v4714_v8  ;;  %v4875_v16 = vld [vmem:[%s6010_s21 + $0x10] sm:$0xff] }
 0x878   : > { %v4840_v40 = vsel %vm4839_vm4, %v4823_v15, %v4712_v23 }
 0x87a   : > { %v4718_v4 = vpop.permute.xlu1 %4717 }
 0x87b   : > { %v4716_v34 = vpop.permute.xlu0 %4715  ;;  %v4843_v53 = vsel %vm4839_vm4, %v4826_v0, %v4718_v4 }
 0x87c   : > { %v4842_v11 = vsel %vm4839_vm4, %v4825_v22, %v4716_v34  ;;  %v4878_v34 = vld [vmem:[%s6010_s21 + $0x28] sm:$0xff] }
 0x87e   : > { %v4722_v19 = vpop.permute.xlu1 %4721 }
 0x87f   : > { %v8540_v3 = vpop.permute.xlu0 %4719 }
 0x882   : > { %v8542_v6 = vpop.permute.xlu1 %4725 }
 0x883   : > { %v8544_v38 = vpop.permute.xlu0 %4723 }
 0x886   : > { %v8546_v20 = vpop.permute.xlu1 %4729 }
 0x887   : > { %v8548_v45 = vpop.permute.xlu0 %4727 }
 0x88a   : > { %v8550_v48 = vpop.permute.xlu1 %4733 }
 0x88b   : > { %v8552_v63 = vpop.permute.xlu0 %4731 }
 0x88e   : > { %v8554_v36 = vpop.permute.xlu1 %4737 }
 0x88f   : > { %v8556_v47 = vpop.permute.xlu0 %4735 }
 0x892   : > { %v8558_v52 = vpop.permute.xlu1 %4741 }
 0x893   : > { %v8561_v29 = vpop.permute.xlu0 %4739 }
 0x896   : > { %v4778_v60 = vpop.permute.xlu1 %4777 }
 0x897   : > { %v4858_v12 = vsel %vm4856_vm5, %v4841_v14, %v4778_v60  ;;  %v4776_v37 = vpop.permute.xlu0 %4775  ;;  %v4139_v14 = vmul.f32 %v8446_v18, %v4043_v41  ;;  %v4046_v60 = vld [vmem:[#allocation4 + $0x38] sm:$0xff] }
 0x898   : > { %v4890_v32 = vadd.f32 %v4874_v56, %v4858_v12  ;;  %v4857_v5 = vsel %vm4856_vm5, %v4840_v40, %v4776_v37  ;;  %v4845_v12 = vsel %vm4839_vm4, %v4828_v24, %v4722_v19  ;;  %v4142_v9 = vmul.f32 %v8448_v39, %v4046_v60  ;;  %v4049_v60 = vld [vmem:[#allocation4 + $0x50] sm:$0xff] }
 0x899   : > { %v4889_v8 = vadd.f32 %v4873_v61, %v4857_v5  ;;  %v4045_v61 = vld [vmem:[#allocation4 + $0x30] sm:$0xff]  ;;  %v4827_v40 = vsel %vm1472_vm3, %v4139_v14, %v8518_v7  ;;  %v4048_v7 = vld [vmem:[#allocation4 + $0x48] sm:$0xff] }
 0x89a   : > { %v4906_v23 = vmax.f32 %v4890_v32, 0.0  ;;  %v4782_v57 = vpop.permute.xlu1 %4781  ;;  %v4844_v32 = vsel %vm4839_vm4, %v4827_v40, %v8540_v3  ;;  %v4141_v0 = vmul.f32 %v8450_v43, %v4045_v61  ;;  %v4830_v22 = vsel %vm1472_vm3, %v4142_v9, %v8520_v25  ;;  %v4880_v3 = vld [vmem:[%s6010_s21 + $0x38] sm:$0xff]  ;;  %v4051_v9 = vld [vmem:[#allocation4 + $0x60] sm:$0xff] }
 0x89b   : > { %v4905_v56 = vmax.f32 %v4889_v8, 0.0  ;;  %v4860_v15 = vsel %vm4856_vm5, %v4843_v53, %v4782_v57  ;;  %v4780_v59 = vpop.permute.xlu0 %4779  ;;  %v4144_v13 = vmul.f32 %v8452_v51, %v4048_v7 }
 0x89c   : > { %4922 = vst [vmem:[%s6015_s28 + $0x8] sm:$0xff] %v4906_v23  ;;  %v4892_v54 = vadd.f32 %v4876_v10, %v4860_v15  ;;  %v4859_v4 = vsel %vm4856_vm5, %v4842_v11, %v4780_v59  ;;  %v4047_v10 = vld [vmem:[#allocation4 + $0x40] sm:$0xff]  ;;  %v4829_v53 = vsel %vm1472_vm3, %v4141_v0, %v8522_v44  ;;  %v4847_v23 = vsel %vm4839_vm4, %v4830_v22, %v8542_v6  ;;  %v4050_v59 = vld [vmem:[#allocation4 + $0x58] sm:$0xff]  ;;  %v4883_v0 = vld [vmem:[%s6010_s21 + $0x50] sm:$0xff] }
 0x89d   : > { %4921 = vst [vmem:[%s6015_s28] sm:$0xff] %v4905_v56  ;;  %v4891_v55 = vadd.f32 %v4875_v16, %v4859_v4  ;;  %v4879_v16 = vld [vmem:[%s6010_s21 + $0x30] sm:$0xff]  ;;  %v4846_v25 = vsel %vm4839_vm4, %v4829_v53, %v8544_v38  ;;  %v4143_v44 = vmul.f32 %v8454_v35, %v4047_v10  ;;  %v4882_v38 = vld [vmem:[%s6010_s21 + $0x48] sm:$0xff]  ;;  %v4054_v22 = vld [vmem:[#allocation4 + $0x78] sm:$0xff] }
 0x89e   : > { %v4908_v18 = vmax.f32 %v4892_v54, 0.0  ;;  %v4786_v37 = vpop.permute.xlu1 %4785  ;;  %v4832_v54 = vsel %vm1472_vm3, %v4144_v13, %v8524_v21  ;;  %v4150_v13 = vmul.f32 %v8464_v46, %v4054_v22 }
 0x89f   : > { %v4907_v2 = vmax.f32 %v4891_v55, 0.0  ;;  %v4862_v5 = vsel %vm4856_vm5, %v4845_v12, %v4786_v37  ;;  %v4784_v41 = vpop.permute.xlu0 %4783  ;;  %v4831_v4 = vsel %vm1472_vm3, %v4143_v44, %v8526_v1  ;;  %v4849_v61 = vsel %vm4839_vm4, %v4832_v54, %v8546_v20  ;;  %v4881_v55 = vld [vmem:[%s6010_s21 + $0x40] sm:$0xff]  ;;  %v4052_v37 = vld [vmem:[#allocation4 + $0x68] sm:$0xff] }
 0x8a0   : > { %4924 = vst [vmem:[%s6015_s28 + $0x18] sm:$0xff] %v4908_v18  ;;  %v4894_v19 = vadd.f32 %v4878_v34, %v4862_v5  ;;  %v4861_v8 = vsel %vm4856_vm5, %v4844_v32, %v4784_v41  ;;  %v4146_v34 = vmul.f32 %v8456_v42, %v4050_v59  ;;  %v4848_v21 = vsel %vm4839_vm4, %v4831_v4, %v8548_v45  ;;  %v4884_v45 = vld [vmem:[%s6010_s21 + $0x58] sm:$0xff] }
 0x8a1   : > { %4923 = vst [vmem:[%s6015_s28 + $0x10] sm:$0xff] %v4907_v2  ;;  %v4893_v39 = vadd.f32 %v4877_v28, %v4861_v8  ;;  %v4145_v1 = vmul.f32 %v8458_v62, %v4049_v60  ;;  %v4148_v7 = vmul.f32 %v8460_v50, %v4052_v37  ;;  %v4838_v44 = vsel %vm1472_vm3, %v4150_v13, %v8536_v30  ;;  %v4888_v59 = vld [vmem:[%s6010_s21 + $0x78] sm:$0xff]  ;;  %v4887_v60 = vld [vmem:[%s6010_s21 + $0x70] sm:$0xff] }
 0x8a2   : > { %v4910_v43 = vmax.f32 %v4894_v19, 0.0  ;;  %v4790_v57 = vpop.permute.xlu1 %4789  ;;  %v4834_v32 = vsel %vm1472_vm3, %v4146_v34, %v8528_v17 }
 0x8a3   : > { %v4909_v11 = vmax.f32 %v4893_v39, 0.0  ;;  %v4864_v56 = vsel %vm4856_vm5, %v4847_v23, %v4790_v57  ;;  %v4788_v15 = vpop.permute.xlu0 %4787  ;;  %v4833_v2 = vsel %vm1472_vm3, %v4145_v1, %v8530_v58  ;;  %v4851_v5 = vsel %vm4839_vm4, %v4834_v32, %v8550_v48 }
 0x8a4   : > { %4926 = vst [vmem:[%s6015_s28 + $0x28] sm:$0xff] %v4910_v43  ;;  %v4896_v6 = vadd.f32 %v4880_v3, %v4864_v56  ;;  %v4863_v14 = vsel %vm4856_vm5, %v4846_v25, %v4788_v15  ;;  %v4850_v17 = vsel %vm4839_vm4, %v4833_v2, %v8552_v63  ;;  %v4147_v58 = vmul.f32 %v8462_v49, %v4051_v9  ;;  %v4053_v3 = vld [vmem:[#allocation4 + $0x70] sm:$0xff]  ;;  %v4886_v63 = vld [vmem:[%s6010_s21 + $0x68] sm:$0xff] }
 0x8a5   : > { %4925 = vst [vmem:[%s6015_s28 + $0x20] sm:$0xff] %v4909_v11  ;;  %v4895_v51 = vadd.f32 %v4879_v16, %v4863_v14  ;;  %v4836_v50 = vsel %vm1472_vm3, %v4148_v7, %v8532_v33  ;;  %v4885_v16 = vld [vmem:[%s6010_s21 + $0x60] sm:$0xff]  ;;  %v4149_v15 = vmul.f32 %v8466_v27, %v4053_v3 }
 0x8a6   : > { %v4912_v35 = vmax.f32 %v4896_v6, 0.0  ;;  %v4794_v24 = vpop.permute.xlu1 %4793  ;;  %v4835_v23 = vsel %vm1472_vm3, %v4147_v58, %v8534_v31  ;;  %v4853_v49 = vsel %vm4839_vm4, %v4836_v50, %v8554_v36  ;;  %v4855_v6 = vsel %vm4839_vm4, %v4838_v44, %v8558_v52 }
 0x8a7   : > { %v4911_v40 = vmax.f32 %v4895_v51, 0.0  ;;  %v4866_v12 = vsel %vm4856_vm5, %v4849_v61, %v4794_v24  ;;  %v4792_v18 = vpop.permute.xlu0 %4791  ;;  %v4852_v25 = vsel %vm4839_vm4, %v4835_v23, %v8556_v47  ;;  %v4837_v47 = vsel %vm1472_vm3, %v4149_v15, %v8538_v26 }
 0x8a8   : > { %4928 = vst [vmem:[%s6015_s28 + $0x38] sm:$0xff] %v4912_v35  ;;  %v4898_v20 = vadd.f32 %v4882_v38, %v4866_v12  ;;  %v4865_v28 = vsel %vm4856_vm5, %v4848_v21, %v4792_v18  ;;  %v4854_v54 = vsel %vm4839_vm4, %v4837_v47, %v8561_v29 }
 0x8a9   : > { %4927 = vst [vmem:[%s6015_s28 + $0x30] sm:$0xff] %v4911_v40  ;;  %v4897_v42 = vadd.f32 %v4881_v55, %v4865_v28 }
 0x8aa   : > { %v4914_v62 = vmax.f32 %v4898_v20, 0.0  ;;  %v4798_v41 = vpop.permute.xlu1 %4797 }
 0x8ab   : > { %v4913_v19 = vmax.f32 %v4897_v42, 0.0  ;;  %v4868_v8 = vsel %vm4856_vm5, %v4851_v5, %v4798_v41  ;;  %v4796_v10 = vpop.permute.xlu0 %4795 }
 0x8ac   : > { %4930 = vst [vmem:[%s6015_s28 + $0x48] sm:$0xff] %v4914_v62  ;;  %v4900_v48 = vadd.f32 %v4884_v45, %v4868_v8  ;;  %v4867_v39 = vsel %vm4856_vm5, %v4850_v17, %v4796_v10 }
 0x8ad   : > { %4929 = vst [vmem:[%s6015_s28 + $0x40] sm:$0xff] %v4913_v19  ;;  %v4899_v53 = vadd.f32 %v4883_v0, %v4867_v39 }
 0x8ae   : > { %v4916_v43 = vmax.f32 %v4900_v48, 0.0  ;;  %v4802_v57 = vpop.permute.xlu1 %4801 }
 0x8af   : > { %v4915_v33 = vmax.f32 %v4899_v53, 0.0  ;;  %v4870_v11 = vsel %vm4856_vm5, %v4853_v49, %v4802_v57  ;;  %v4800_v56 = vpop.permute.xlu0 %4799 }
 0x8b0   : > { %4932 = vst [vmem:[%s6015_s28 + $0x58] sm:$0xff] %v4916_v43  ;;  %v4902_v31 = vadd.f32 %v4886_v63, %v4870_v11  ;;  %v4869_v36 = vsel %vm4856_vm5, %v4852_v25, %v4800_v56 }
 0x8b1   : > { %4931 = vst [vmem:[%s6015_s28 + $0x50] sm:$0xff] %v4915_v33  ;;  %v4901_v46 = vadd.f32 %v4885_v16, %v4869_v36 }
 0x8b2   : > { %v4918_v27 = vmax.f32 %v4902_v31, 0.0  ;;  %v4806_v14 = vpop.permute.xlu1 %4805 }
 0x8b3   : > { %v4917_v51 = vmax.f32 %v4901_v46, 0.0  ;;  %v4872_v30 = vsel %vm4856_vm5, %v4855_v6, %v4806_v14  ;;  %v4804_v38 = vpop.permute.xlu0 %4803 }
 0x8b4   : > { %4934 = vst [vmem:[%s6015_s28 + $0x68] sm:$0xff] %v4918_v27  ;;  %v4904_v4 = vadd.f32 %v4888_v59, %v4872_v30  ;;  %v4871_v61 = vsel %vm4856_vm5, %v4854_v54, %v4804_v38 }
 0x8b5   : > { %4933 = vst [vmem:[%s6015_s28 + $0x60] sm:$0xff] %v4917_v51  ;;  %v4903_v26 = vadd.f32 %v4887_v60, %v4871_v61 }
 0x8b6   : > { %v4920_v35 = vmax.f32 %v4904_v4, 0.0 }
 0x8b7   : > { %v4919_v24 = vmax.f32 %v4903_v26, 0.0 }
 0x8b8   : > { %4936 = vst [vmem:[%s6015_s28 + $0x78] sm:$0xff] %v4920_v35 }
 0x8b9   : > { %4935 = vst [vmem:[%s6015_s28 + $0x70] sm:$0xff] %v4919_v24 }
 0x8ba PF: > { %s15_s24 = sadd.s32 1, %s5885_s24   ;;  %s9259_s18 = smov %s5865_s19 }
 0x8bb   : > { %p12_p1 = scmp.ge.s32.totalorder %s15_s24, 6   ;;  %s9260_s19 = smov %s5981_s6 }
 0x8bc   : > { %s9261_s20 = smov %s5877_s22  ;;  %s9262_s21 = smov %s5881_s23 }
 0x8bd   : > { %s9263_s22 = smov %s9266_s25  ;;  %s9264_s23 = smov %s9270_s26 }
 0x8be   :  { %14 = sbr.rel (!%p12_p1) target bundleno = 4 (0x4), region = 142 }

// kernel: run.15
= control target key start
LH: loop header
LB: loop body
LE: loop exit
PB: predicated region body
PF: predicated region fallthrough
CT: control target
= control target key end

     0   :  { %s2709_s24 = smov 0   ;;  %s2711_s25 = smov 0   ;;  %s3887_s0 = inlined_call_operand.vmem [shape: f32[1,256], index: 0, kind: input, shape index: {}]   ;;  %s3888_s1 = inlined_call_operand.vmem [shape: f32[256,1], index: 1, kind: input, shape index: {}]   ;;  %s3889_s2 = inlined_call_operand.vmem [shape: bf16[256,32], index: 2, kind: input, shape index: {}]   ;;  %s3890_s3 = inlined_call_operand.vmem [shape: s8[256,256], index: 3, kind: input, shape index: {}]   ;;  %s3891_s4 = inlined_call_operand.vmem [shape: f32[256,32], index: 4, kind: input, shape index: {}]   ;;  %s3892_s5 = inlined_call_operand.vmem [shape: f32[256,32], index: 5, kind: output, shape index: {0}]   ;;  %s3893_s6 = inlined_call_operand.vmem [shape: f32[256,32], index: 6, kind: output, shape index: {1}]   ;;  %s3894_s7 = inlined_call_operand.vmem [shape: f32[1,256,256], index: 7, kind: output, shape index: {2}]  }
   0x1   :  { %s2713_s26 = smov 0  }
   0x2 LB: > { %s30_s27 = sadd.s32 1, %s2660_s25  ;;  %p2322_p0 = scmp.ge.s32.totalorder %s2664_s26, 1  ;;  %s2664_s26 = sphi %s2713_s26, %s18_s26   ;;  %s2660_s25 = sphi %s2711_s25, %s4032_s25   ;;  %s2656_s24 = sphi %s2709_s24, %s4031_s24  }
   0x3   : > { %p32_p1 = scmp.ge.s32.totalorder %s30_s27, 2  ;;  %p306_p2 = scmp.lt.s32.totalorder %s2664_s26, 3 }
   0x5   : > { %s4034_s27 = smov (%p32_p1, %s30_s27), 0  ;;  %p307_p3 = pnand %p2322_p0, %p306_p2 }
   0x7   : > { %310 = sbr.rel (%p307_p3) target bundleno = 821 (0x335), region = 40 }
   0xe   : > { %s2323_s28 = sshll.u32 %s2656_s24, 4  ;;  %v2666_v0 = vmov 0   ;;  %vm432_vm0 = vcmask 7168   ;;  %v2667_v17 = vmov -1e+30   ;;  %s2325_s10 = sshll.u32 %s2656_s24, 2  ;;  %v636_v19 = vlaneseq }
   0xf   : > { %2465 = vset.pattern.permute.xlu1 %v2666_v0  ;;  %2464 = vset.pattern.permute.xlu0 %v2666_v0  ;;  %p379_p4 = scmp.lt.s32.totalorder %s2323_s28, 31  ;;  %433 = vst.msk [vmem:[#allocation2] sm:$0xff] %vm432_vm0, %v2667_v17  ;;  %434 = vst.msk [vmem:[#allocation2 + $0x8] sm:$0xff] %vm432_vm0, %v2667_v17  ;;  %p392_p5 = scmp.lt.s32.totalorder %s2325_s10, 7  ;;  %vm465_vm1 = vcmask 261120  }
  0x10   : > { %435 = vst.msk [vmem:[#allocation2 + $0x10] sm:$0xff] %vm432_vm0, %v2667_v17  ;;  %436 = vst.msk [vmem:[#allocation2 + $0x18] sm:$0xff] %vm432_vm0, %v2667_v17  ;;  %v2765_v26 = vshrl.u32 %v636_v19, 7 }
  0x11   : > { %s4036_s28 = smov (!%p379_p4, %s2323_s28), 31  ;;  %437 = vst.msk [vmem:[#allocation2 + $0x20] sm:$0xff] %vm432_vm0, %v2667_v17  ;;  %438 = vst.msk [vmem:[#allocation2 + $0x28] sm:$0xff] %vm432_vm0, %v2667_v17  ;;  %s4038_s10 = smov (!%p392_p5, %s2325_s10), 7 }
  0x12   : > { %s2733_s29 = sshll.u32 %s4036_s28, 3  ;;  %439 = vst.msk [vmem:[#allocation2 + $0x30] sm:$0xff] %vm432_vm0, %v2667_v17  ;;  %440 = vst.msk [vmem:[#allocation2 + $0x38] sm:$0xff] %vm432_vm0, %v2667_v17  ;;  %s2355_s11 = sshll.u32 %s4038_s10, 4  ;;  %v638_v36 = vsub.s32 0, %v2765_v26 }
  0x13   : > { %s382_s9 = scalar_lea.vmem %s3888_s1, %s2733_s29  ;;  %441 = vst.msk [vmem:[#allocation2 + $0x40] sm:$0xff] %vm432_vm0, %v2667_v17  ;;  %442 = vst.msk [vmem:[#allocation2 + $0x48] sm:$0xff] %vm432_vm0, %v2667_v17  ;;  %s2759_s14 = scalar_lea.vmem %s3890_s3, %s2355_s11 }
  0x14   : > { %v626_v1 = vld [vmem:[%s382_s9 + $0x40] sm:$0xff]  ;;  %v627_v3 = vld [vmem:[%s382_s9 + $0x48] sm:$0xff]  ;;  %v621_v5 = vld [vmem:[%s382_s9 + $0x18] sm:$0xff]  ;;  %443 = vst.msk [vmem:[#allocation2 + $0x50] sm:$0xff] %vm432_vm0, %v2667_v17  ;;  %s2356_s13 = sshll.u32 %s4036_s28, 4  ;;  %s3774_s18 = scalar_lea.vmem %s3891_s4, %s2733_s29 }
  0x15   : > { %v618_v2 = vld [vmem:[%s382_s9] sm:$0xff]  ;;  %688 = vperm.xlu1 %2465, %v626_v1   ;;  %v619_v4 = vld [vmem:[%s382_s9 + $0x8] sm:$0xff]  ;;  %v620_v6 = vld [vmem:[%s382_s9 + $0x10] sm:$0xff]  ;;  %444 = vst.msk [vmem:[#allocation2 + $0x58] sm:$0xff] %vm432_vm0, %v2667_v17  ;;  %s3714_s16 = scalar_lea.vmem %s3894_s7, %s2356_s13  ;;  %s3784_s21 = scalar_lea.vmem %s3893_s6, %s2733_s29 }
  0x16   : > { %648 = vperm.xlu0 %2464, %v618_v2   ;;  %v629_v7 = vld [vmem:[%s382_s9 + $0x58] sm:$0xff]  ;;  %v628_v8 = vld [vmem:[%s382_s9 + $0x50] sm:$0xff]  ;;  %v623_v9 = vld [vmem:[%s382_s9 + $0x28] sm:$0xff]  ;;  %445 = vst.msk [vmem:[#allocation2 + $0x60] sm:$0xff] %vm432_vm0, %v2667_v17  ;;  %s3796_s24 = scalar_lea.vmem %s3892_s5, %s2733_s29 }
  0x17   : > { %v622_v10 = vld [vmem:[%s382_s9 + $0x20] sm:$0xff]  ;;  %v631_v11 = vld [vmem:[%s382_s9 + $0x68] sm:$0xff]  ;;  %v625_v13 = vld [vmem:[%s382_s9 + $0x38] sm:$0xff]  ;;  %446 = vst.msk [vmem:[#allocation2 + $0x68] sm:$0xff] %vm432_vm0, %v2667_v17 }
  0x18   : > { %v630_v12 = vld [vmem:[%s382_s9 + $0x60] sm:$0xff]  ;;  %v624_v14 = vld [vmem:[%s382_s9 + $0x30] sm:$0xff]  ;;  %v633_v15 = vld [vmem:[%s382_s9 + $0x78] sm:$0xff]  ;;  %447 = vst.msk [vmem:[#allocation2 + $0x70] sm:$0xff] %vm432_vm0, %v2667_v17 }
  0x19   : > { %693 = vperm.xlu1 %2465, %v627_v3   ;;  %v632_v16 = vld [vmem:[%s382_s9 + $0x70] sm:$0xff]  ;;  %448 = vst.msk [vmem:[#allocation2 + $0x78] sm:$0xff] %vm432_vm0, %v2667_v17  ;;  %v482_v18 = vld [vmem:[%s2759_s14] sm:$0xff]  ;;  %v483_v20 = vld [vmem:[%s2759_s14 + $0x8] sm:$0xff] }
  0x1a   : > { %653 = vperm.xlu0 %2464, %v619_v4   ;;  %v490_v21 = vunpack.c.0.s8 %v482_v18  ;;  %v486_v22 = vld [vmem:[%s2759_s14 + $0x20] sm:$0xff]  ;;  %v487_v23 = vld [vmem:[%s2759_s14 + $0x28] sm:$0xff]  ;;  %v491_v24 = vunpack.c.0.s8 %v483_v20  ;;  %v492_v25 = vunpack.c.1.s8 %v482_v18  ;;  %v493_v29 = vunpack.c.1.s8 %v483_v20  ;;  %v484_v63 = vld [vmem:[%s2759_s14 + $0x10] sm:$0xff] }
  0x1b   : > { %v506_v27 = vunpack.c.0.s8 %v486_v22  ;;  %v507_v28 = vunpack.c.0.s8 %v487_v23  ;;  %v508_v30 = vunpack.c.1.s8 %v486_v22  ;;  %v509_v34 = vunpack.c.1.s8 %v487_v23  ;;  %v2814_v4 = vld [vmem:[%s3887_s0] sm:$0x3] }
  0x1c   : > { %v2767_v31 = vcvt.s32.f32 %v490_v21  ;;  %v2769_v32 = vcvt.s32.f32 %v491_v24  ;;  %v2771_v33 = vcvt.s32.f32 %v492_v25  ;;  %v494_v35 = vunpack.c.2.s8 %v482_v18 }
  0x1d   : > { %663 = vperm.xlu1 %2465, %v621_v5   ;;  %v495_v37 = vunpack.c.2.s8 %v483_v20  ;;  %v496_v38 = vunpack.c.3.s8 %v482_v18  ;;  %v2774_v39 = vcvt.s32.f32 %v506_v27  ;;  %v2776_v40 = vcvt.s32.f32 %v507_v28  ;;  %v488_v18 = vld [vmem:[%s2759_s14 + $0x30] sm:$0xff] }
  0x1e   : > { %658 = vperm.xlu0 %2464, %v620_v6   ;;  %3939 = vst [vmem:[#allocation5_spill] sm:$0xff] %v2767_v31  ;;  %3940 = vst [vmem:[#allocation6_spill] sm:$0xff] %v2769_v32  ;;  %v2778_v41 = vcvt.s32.f32 %v493_v29  ;;  %v2780_v42 = vcvt.s32.f32 %v508_v30  ;;  %v554_v44 = vsub.f32 1.0, %v2767_v31  ;;  %v497_v45 = vunpack.c.3.s8 %v483_v20 }
  0x1f   : > { %3941 = vst [vmem:[#allocation7_spill] sm:$0xff] %v2771_v33  ;;  %3942 = vst [vmem:[#allocation8_spill] sm:$0xff] %v2774_v39  ;;  %v510_v46 = vunpack.c.2.s8 %v486_v22  ;;  %v555_v47 = vsub.f32 1.0, %v2769_v32  ;;  %v556_v48 = vsub.f32 1.0, %v2771_v33  ;;  %v2786_v49 = vcvt.s32.f32 %v509_v34 }
  0x20   : > { %3943 = vst [vmem:[#allocation9_spill] sm:$0xff] %v2776_v40  ;;  %3944 = vst [vmem:[#allocation10_spill] sm:$0xff] %v2778_v41  ;;  %v2788_v50 = vcvt.s32.f32 %v494_v35  ;;  %v2790_v51 = vcvt.s32.f32 %v495_v37  ;;  %v2792_v52 = vcvt.s32.f32 %v496_v38  ;;  %v511_v53 = vunpack.c.2.s8 %v487_v23 }
  0x21   : > { %703 = vperm.xlu1 %2465, %v629_v7   ;;  %3945 = vst [vmem:[#allocation11_spill] sm:$0xff] %v2780_v42  ;;  %3946 = vst [vmem:[#allocation12_spill] sm:$0xff] %v2786_v49  ;;  %v512_v54 = vunpack.c.3.s8 %v486_v22  ;;  %v570_v55 = vsub.f32 1.0, %v2774_v39  ;;  %v571_v56 = vsub.f32 1.0, %v2776_v40  ;;  %v557_v57 = vsub.f32 1.0, %v2778_v41 }
  0x22   : > { %698 = vperm.xlu0 %2464, %v628_v8   ;;  %3947 = vst [vmem:[#allocation13_spill] sm:$0xff] %v2788_v50  ;;  %3948 = vst [vmem:[#allocation14_spill] sm:$0xff] %v2790_v51  ;;  %v572_v58 = vsub.f32 1.0, %v2780_v42  ;;  %v2798_v59 = vmul.f32 -1e+30, %v554_v44  ;;  %v2800_v60 = vcvt.s32.f32 %v497_v45  ;;  %v2802_v61 = vcvt.s32.f32 %v510_v46 }
  0x23   : > { %3949 = vst [vmem:[#allocation15_spill] sm:$0xff] %v2792_v52  ;;  %v513_v62 = vunpack.c.3.s8 %v487_v23  ;;  %v2805_v0 = vmul.f32 -1e+30, %v555_v47  ;;  %v2807_v1 = vmul.f32 -1e+30, %v556_v48  ;;  %v573_v2 = vsub.f32 1.0, %v2786_v49 }
  0x24   : > { %3950 = vst [vmem:[#allocation16_spill] sm:$0xff] %v2800_v60  ;;  %3951 = vst [vmem:[#allocation17_spill] sm:$0xff] %v2802_v61  ;;  %v558_v3 = vsub.f32 1.0, %v2788_v50  ;;  %v559_v5 = vsub.f32 1.0, %v2790_v51  ;;  %v560_v6 = vsub.f32 1.0, %v2792_v52  ;;  %v2818_v7 = vcvt.s32.f32 %v511_v53  ;;  %v489_v23 = vld [vmem:[%s2759_s14 + $0x38] sm:$0xff] }
  0x25   : > { %673 = vperm.xlu1 %2465, %v623_v9   ;;  %v2820_v8 = vcvt.s32.f32 %v512_v54  ;;  %v485_v9 = vld [vmem:[%s2759_s14 + $0x18] sm:$0xff]  ;;  %v2833_v17 = vcvt.s32.f32 %v513_v62  ;;  %v2837_v19 = vrot.slane %v2814_v4, %v638_v36  ;;  %v2839_v20 = vmul.f32 -1e+30, %v573_v2 }
  0x26   : > { %668 = vperm.xlu0 %2464, %v622_v10   ;;  %3952 = vst [vmem:[#allocation18_spill] sm:$0xff] %v2818_v7  ;;  %v2823_v10 = vmul.f32 -1e+30, %v570_v55  ;;  %v2841_v21 = vmul.f32 -1e+30, %v558_v3  ;;  %v499_v22 = vunpack.c.0.s8 %v485_v9  ;;  %v575_v27 = vsub.f32 1.0, %v2818_v7 }
  0x27   : > { %3953 = vst [vmem:[#allocation19_spill] sm:$0xff] %v2820_v8  ;;  %3954 = vst [vmem:[#allocation20_spill] sm:$0xff] %v2833_v17  ;;  %v2844_v24 = vmul.f32 -1e+30, %v559_v5  ;;  %v2846_v25 = vmul.f32 -1e+30, %v560_v6  ;;  %v500_v30 = vunpack.c.1.s8 %v484_v63  ;;  %v501_v34 = vunpack.c.1.s8 %v485_v9 }
  0x28   : > { %v576_v28 = vsub.f32 1.0, %v2820_v8  ;;  %v514_v35 = vunpack.c.0.s8 %v488_v18  ;;  %v577_v38 = vsub.f32 1.0, %v2833_v17  ;;  %v515_v44 = vunpack.c.0.s8 %v489_v23 }
  0x29   : > { %713 = vperm.xlu1 %2465, %v631_v11   ;;  %v2825_v11 = vmul.f32 -1e+30, %v571_v56  ;;  %v2857_v45 = vcvt.s32.f32 %v499_v22  ;;  %v516_v46 = vunpack.c.1.s8 %v488_v18  ;;  %v517_v47 = vunpack.c.1.s8 %v489_v23 }
  0x2a   : > { %708 = vperm.xlu0 %2464, %v630_v12   ;;  %v2827_v12 = vmul.f32 -1e+30, %v557_v57  ;;  %v502_v48 = vunpack.c.2.s8 %v484_v63  ;;  %v2859_v53 = vmul.f32 -1e+30, %v575_v27  ;;  %v2861_v54 = vmul.f32 -1e+30, %v576_v28 }
  0x2b   : > { %3956 = vst [vmem:[#allocation22_spill] sm:$0xff] %v2857_v45  ;;  %v503_v55 = vunpack.c.2.s8 %v485_v9  ;;  %v504_v56 = vunpack.c.3.s8 %v484_v63  ;;  %v2866_v62 = vcvt.s32.f32 %v501_v34  ;;  %v2868_v2 = vcvt.s32.f32 %v514_v35 }
  0x2c   : > { %v2870_v3 = vmul.f32 -1e+30, %v577_v38  ;;  %v2872_v5 = vcvt.s32.f32 %v515_v44  ;;  %v505_v6 = vunpack.c.3.s8 %v485_v9  ;;  %v2877_v22 = vcvt.s32.f32 %v517_v47 }
  0x2d   : > { %683 = vperm.xlu1 %2465, %v625_v13   ;;  %v498_v13 = vunpack.c.0.s8 %v484_v63  ;;  %3958 = vst [vmem:[#allocation24_spill] sm:$0xff] %v2866_v62  ;;  %3959 = vst [vmem:[#allocation25_spill] sm:$0xff] %v2868_v2  ;;  %v2879_v63 = vcvt.s32.f32 %v502_v48  ;;  %v2881_v27 = vcvt.s32.f32 %v503_v55  ;;  %v2883_v28 = vcvt.s32.f32 %v504_v56 }
  0x2e   : > { %678 = vperm.xlu0 %2464, %v624_v14   ;;  %v2829_v14 = vmul.f32 -1e+30, %v572_v58  ;;  %v2864_v58 = vcvt.s32.f32 %v500_v30  ;;  %3960 = vst [vmem:[#allocation26_spill] sm:$0xff] %v2872_v5  ;;  %3962 = vst [vmem:[#allocation28_spill] sm:$0xff] %v2877_v22  ;;  %v519_v30 = vunpack.c.2.s8 %v489_v23  ;;  %v520_v34 = vunpack.c.3.s8 %v488_v18 }
  0x2f   : > { %v2850_v29 = vcvt.s32.f32 %v498_v13  ;;  %v518_v13 = vunpack.c.2.s8 %v488_v18  ;;  %3963 = vst [vmem:[#allocation29_spill] sm:$0xff] %v2879_v63  ;;  %3964 = vst [vmem:[#allocation30_spill] sm:$0xff] %v2881_v27  ;;  %v565_v9 = vsub.f32 1.0, %v2866_v62  ;;  %v578_v44 = vsub.f32 1.0, %v2868_v2 }
  0x30   : > { %3957 = vst [vmem:[#allocation23_spill] sm:$0xff] %v2864_v58  ;;  %3965 = vst [vmem:[#allocation31_spill] sm:$0xff] %v2883_v28  ;;  %v564_v38 = vsub.f32 1.0, %v2864_v58  ;;  %v2891_v47 = vcvt.s32.f32 %v505_v6  ;;  %v521_v55 = vunpack.c.3.s8 %v489_v23  ;;  %v581_v18 = vsub.f32 1.0, %v2877_v22 }
  0x31   : > { %723 = vperm.xlu1 %2465, %v633_v15   ;;  %v561_v15 = vsub.f32 1.0, %v2800_v60  ;;  %3955 = vst [vmem:[#allocation21_spill] sm:$0xff] %v2850_v29  ;;  %v562_v57 = vsub.f32 1.0, %v2850_v29  ;;  %v2893_v48 = vcvt.s32.f32 %v518_v13  ;;  %v567_v58 = vsub.f32 1.0, %v2881_v27 }
  0x32   : > { %718 = vperm.xlu0 %2464, %v632_v16   ;;  %v574_v16 = vsub.f32 1.0, %v2802_v61  ;;  %3966 = vst [vmem:[#allocation32_spill] sm:$0xff] %v2891_v47  ;;  %v568_v62 = vsub.f32 1.0, %v2883_v28  ;;  %v2902_v2 = vcvt.s32.f32 %v519_v30  ;;  %v3970_v6 = vsub.s32 1, %v2765_v26 }
  0x33   : > { %v2852_v36 = vmul.f32 -1e+30, %v561_v15  ;;  %v563_v15 = vsub.f32 1.0, %v2857_v45  ;;  %v2885_v35 = vmul.f32 -1e+30, %v562_v57  ;;  %3967 = vst [vmem:[#allocation33_spill] sm:$0xff] %v2893_v48  ;;  %v2921_v28 = vcvt.s32.f32 %v521_v55 }
  0x34   : > { %v2854_v37 = vmul.f32 -1e+30, %v574_v16  ;;  %v2875_v16 = vcvt.s32.f32 %v516_v46  ;;  %v579_v46 = vsub.f32 1.0, %v2872_v5  ;;  %v566_v57 = vsub.f32 1.0, %v2879_v63  ;;  %3968 = vst [vmem:[#allocation34_spill] sm:$0xff] %v2902_v2 }
  0x35   : > { %v2895_v43 = vmul.f32 -1e+30, %v563_v15  ;;  %v2904_v5 = vcvt.s32.f32 %v520_v34  ;;  %v2909_v23 = vrot.slane %v2814_v4, %v3970_v6  ;;  %v2911_v13 = vmul.f32 -1e+30, %v564_v38 }
  0x36   : > { %3961 = vst [vmem:[#allocation27_spill] sm:$0xff] %v2875_v16  ;;  %v580_v56 = vsub.f32 1.0, %v2875_v16  ;;  %v2913_v15 = vmul.f32 -1e+30, %v565_v9  ;;  %v2915_v16 = vmul.f32 -1e+30, %v578_v44 }
  0x37   : > { %3969 = vst [vmem:[#allocation35_spill] sm:$0xff] %v2904_v5  ;;  %v2917_v63 = vmul.f32 -1e+30, %v579_v46  ;;  %v569_v27 = vsub.f32 1.0, %v2891_v47  ;;  %v582_v30 = vsub.f32 1.0, %v2893_v48  ;;  %v583_v46 = vsub.f32 1.0, %v2902_v2 }
  0x38   : > { %v2923_v34 = vmul.f32 -1e+30, %v580_v56  ;;  %v2925_v26 = vmul.f32 -1e+30, %v581_v18  ;;  %v2927_v4 = vmul.f32 -1e+30, %v566_v57 }
  0x39   : > { %v2929_v9 = vmul.f32 -1e+30, %v567_v58  ;;  %v2931_v44 = vmul.f32 -1e+30, %v568_v62  ;;  %v584_v47 = vsub.f32 1.0, %v2904_v5 }
  0x3a   : > { %v2939_v57 = vmul.f32 -1e+30, %v569_v27  ;;  %v2941_v22 = vmul.f32 -1e+30, %v582_v30  ;;  %v2944_v29 = vmul.f32 -1e+30, %v583_v46 }
  0x3b   : > { %v2946_v17 = vmul.f32 -1e+30, %v584_v47 }
  0x94   : > { %v689_v38 = vpop.permute.xlu1 %688 }
  0x95   : > { %v649_v6 = vpop.permute.xlu0 %648  ;;  %v742_v48 = vadd.f32 %v689_v38, %v2837_v19  ;;  %v743_v55 = vadd.f32 %v689_v38, %v2909_v23 }
  0x96   : > { %v726_v56 = vadd.f32 %v649_v6, %v2837_v19  ;;  %v727_v18 = vadd.f32 %v649_v6, %v2909_v23 }
  0x97   : > { %v774_v62 = vmul.f32 0.2, %v742_v48  ;;  %v775_v8 = vmul.f32 0.2, %v743_v55 }
  0x98   : > { %v758_v61 = vmul.f32 0.2, %v726_v56  ;;  %v759_v2 = vmul.f32 0.2, %v727_v18  ;;  %v694_v45 = vpop.permute.xlu1 %693 }
  0x99   : > { %v654_v5 = vpop.permute.xlu0 %653  ;;  %v744_v38 = vadd.f32 %v694_v45, %v2837_v19  ;;  %v745_v6 = vadd.f32 %v694_v45, %v2909_v23  ;;  %v806_v52 = vmax.f32 %v742_v48, %v774_v62  ;;  %v807_v60 = vmax.f32 %v743_v55, %v775_v8 }
  0x9a   : > { %v728_v27 = vadd.f32 %v654_v5, %v2837_v19  ;;  %v729_v30 = vadd.f32 %v654_v5, %v2909_v23  ;;  %v790_v7 = vmax.f32 %v726_v56, %v758_v61  ;;  %v791_v58 = vmax.f32 %v727_v18, %v759_v2 }
  0x9b   : > { %v776_v42 = vmul.f32 0.2, %v744_v38  ;;  %v777_v51 = vmul.f32 0.2, %v745_v6  ;;  %v2959_v45 = vadd.f32 %v806_v52, %v2823_v10 }
  0x9c   : > { %v760_v50 = vmul.f32 0.2, %v728_v27  ;;  %v761_v49 = vmul.f32 0.2, %v729_v30  ;;  %v664_v46 = vpop.permute.xlu1 %663  ;;  %v2953_v47 = vadd.f32 %v790_v7, %v2798_v59  ;;  %v2956_v39 = vadd.f32 %v791_v58, %v2805_v0 }
  0x9d   : > { %v659_v41 = vpop.permute.xlu0 %658  ;;  %v732_v61 = vadd.f32 %v664_v46, %v2837_v19  ;;  %v733_v2 = vadd.f32 %v664_v46, %v2909_v23  ;;  %v2968_v59 = vadd.f32 %v807_v60, %v2825_v11  ;;  %v808_v10 = vmax.f32 %v744_v38, %v776_v42 }
  0x9e   : > { %v730_v8 = vadd.f32 %v659_v41, %v2837_v19  ;;  %v731_v5 = vadd.f32 %v659_v41, %v2909_v23  ;;  %v870_v48 = vmax.f32 %v2953_v47, %v2956_v39  ;;  %v792_v7 = vmax.f32 %v728_v27, %v760_v50 }
  0x9f   : > { %v793_v0 = vmax.f32 %v729_v30, %v761_v49  ;;  %v764_v55 = vmul.f32 0.2, %v732_v61  ;;  %v765_v56 = vmul.f32 0.2, %v733_v2  ;;  %v894_v46 = vmax.f32 %v2959_v45, %v2968_v59 }
  0xa0   : > { %v762_v52 = vmul.f32 0.2, %v730_v8  ;;  %v763_v18 = vmul.f32 0.2, %v731_v5  ;;  %871 = vmax.xlane.f32.xlu0 %v870_v48  ;;  %v704_v58 = vpop.permute.xlu1 %703  ;;  %v2973_v41 = vadd.f32 %v792_v7, %v2807_v1  ;;  %v809_v38 = vmax.f32 %v745_v6, %v777_v51 }
  0xa1   : > { %v699_v62 = vpop.permute.xlu0 %698  ;;  %v2976_v40 = vadd.f32 %v793_v0, %v2827_v12  ;;  %v748_v50 = vadd.f32 %v704_v58, %v2837_v19  ;;  %v2980_v49 = vadd.f32 %v704_v58, %v2909_v23  ;;  %v2987_v27 = vadd.f32 %v808_v10, %v2829_v14 }
  0xa2   : > { %v746_v42 = vadd.f32 %v699_v62, %v2837_v19  ;;  %v747_v60 = vadd.f32 %v699_v62, %v2909_v23  ;;  %v794_v1 = vmax.f32 %v730_v8, %v762_v52  ;;  %v795_v7 = vmax.f32 %v731_v5, %v763_v18 }
  0xa3   : > { %v873_v11 = vmax.f32 %v2973_v41, %v2976_v40  ;;  %v780_v30 = vmul.f32 0.2, %v748_v50  ;;  %v781_v12 = vmul.f32 0.2, %v2980_v49  ;;  %v2991_v62 = vadd.f32 %v809_v38, %v2839_v20 }
  0xa4   : > { %v778_v48 = vmul.f32 0.2, %v746_v42  ;;  %v779_v0 = vmul.f32 0.2, %v747_v60  ;;  %895 = vmax.xlane.f32.xlu0 %v894_v46  ;;  %v674_v58 = vpop.permute.xlu1 %673  ;;  %v2994_v32 = vadd.f32 %v794_v1, %v2841_v21  ;;  %v796_v51 = vmax.f32 %v732_v61, %v764_v55 }
  0xa5   : > { %874 = vmax.xlane.f32.xlu1 %v873_v11  ;;  %v669_v33 = vpop.permute.xlu0 %668  ;;  %v736_v14 = vadd.f32 %v674_v58, %v2837_v19  ;;  %v2998_v6 = vadd.f32 %v674_v58, %v2909_v23  ;;  %v897_v52 = vmax.f32 %v2987_v27, %v2991_v62  ;;  %v3005_v10 = vadd.f32 %v795_v7, %v2844_v24 }
  0xa6   : > { %v734_v8 = vadd.f32 %v669_v33, %v2837_v19  ;;  %v735_v5 = vadd.f32 %v669_v33, %v2909_v23  ;;  %v797_v20 = vmax.f32 %v733_v2, %v765_v56  ;;  %v3008_v21 = vadd.f32 %v796_v51, %v2846_v25 }
  0xa7   : > { %v768_v61 = vmul.f32 0.2, %v736_v14  ;;  %v769_v55 = vmul.f32 0.2, %v2998_v6  ;;  %v810_v46 = vmax.f32 %v746_v42, %v778_v48  ;;  %v876_v33 = vmax.f32 %v2994_v32, %v3005_v10 }
  0xa8   : > { %v766_v18 = vmul.f32 0.2, %v734_v8  ;;  %v767_v11 = vmul.f32 0.2, %v735_v5  ;;  %898 = vmax.xlane.f32.xlu0 %v897_v52  ;;  %v714_v38 = vpop.permute.xlu1 %713  ;;  %v3014_v58 = vadd.f32 %v797_v20, %v2852_v36  ;;  %v811_v24 = vmax.f32 %v747_v60, %v779_v0 }
  0xa9   : > { %v709_v1 = vpop.permute.xlu0 %708  ;;  %v3017_v2 = vadd.f32 %v714_v38, %v2837_v19  ;;  %v3020_v25 = vadd.f32 %v714_v38, %v2909_v23  ;;  %877 = vmax.xlane.f32.xlu1 %v876_v33  ;;  %v3027_v7 = vadd.f32 %v810_v46, %v2854_v37  ;;  %v812_v60 = vmax.f32 %v748_v50, %v780_v30 }
  0xaa   : > { %v750_v56 = vadd.f32 %v709_v1, %v2837_v19  ;;  %v751_v42 = vadd.f32 %v709_v1, %v2909_v23  ;;  %v879_v48 = vmax.f32 %v3008_v21, %v3014_v58  ;;  %v3030_v36 = vadd.f32 %v811_v24, %v2859_v53 }
  0xab   : > { %3971 = vst [vmem:[#allocation36_spill] sm:$0xff] %v3027_v7  ;;  %v784_v0 = vmul.f32 0.2, %v3017_v2  ;;  %v785_v51 = vmul.f32 0.2, %v3020_v25  ;;  %v813_v20 = vmax.f32 %v2980_v49, %v781_v12  ;;  %v3038_v37 = vadd.f32 %v812_v60, %v2861_v54 }
  0xac   : > { %3972 = vst [vmem:[#allocation37_spill] sm:$0xff] %v3030_v36  ;;  %v782_v52 = vmul.f32 0.2, %v750_v56  ;;  %v783_v38 = vmul.f32 0.2, %v751_v42  ;;  %880 = vmax.xlane.f32.xlu0 %v879_v48  ;;  %v900_v33 = vmax.f32 %v3027_v7, %v3030_v36  ;;  %v684_v1 = vpop.permute.xlu1 %683  ;;  %v798_v53 = vmax.f32 %v734_v8, %v766_v18 }
  0xad   : > { %v679_v31 = vpop.permute.xlu0 %678  ;;  %v740_v50 = vadd.f32 %v684_v1, %v2837_v19  ;;  %v741_v30 = vadd.f32 %v684_v1, %v2909_v23  ;;  %v3045_v49 = vadd.f32 %v813_v20, %v2870_v3  ;;  %v799_v12 = vmax.f32 %v735_v5, %v767_v11 }
  0xae   : > { %v738_v46 = vadd.f32 %v679_v31, %v2837_v19  ;;  %v739_v24 = vadd.f32 %v679_v31, %v2909_v23  ;;  %901 = vmax.xlane.f32.xlu1 %v900_v33  ;;  %v3048_v48 = vadd.f32 %v798_v53, %v2885_v35  ;;  %v800_v36 = vmax.f32 %v736_v14, %v768_v61 }
  0xaf   : > { %v772_v54 = vmul.f32 0.2, %v740_v50  ;;  %v773_v60 = vmul.f32 0.2, %v741_v30  ;;  %v801_v18 = vmax.f32 %v2998_v6, %v769_v55  ;;  %v903_v1 = vmax.f32 %v3038_v37, %v3045_v49 }
  0xb0   : > { %v770_v8 = vmul.f32 0.2, %v738_v46  ;;  %v771_v7 = vmul.f32 0.2, %v739_v24  ;;  %v3054_v31 = vadd.f32 %v799_v12, %v2895_v43  ;;  %v724_v33 = vpop.permute.xlu1 %723  ;;  %v3057_v5 = vadd.f32 %v800_v36, %v2911_v13 }
  0xb1   : > { %v719_v3 = vpop.permute.xlu0 %718  ;;  %v756_v35 = vadd.f32 %v724_v33, %v2837_v19  ;;  %v757_v14 = vadd.f32 %v724_v33, %v2909_v23  ;;  %904 = vmax.xlane.f32.xlu0 %v903_v1  ;;  %v3066_v43 = vadd.f32 %v801_v18, %v2913_v15  ;;  %v814_v11 = vmax.f32 %v750_v56, %v782_v52 }
  0xb2   : > { %v754_v61 = vadd.f32 %v719_v3, %v2837_v19  ;;  %v755_v6 = vadd.f32 %v719_v3, %v2909_v23  ;;  %v882_v55 = vmax.f32 %v3048_v48, %v3054_v31  ;;  %v815_v20 = vmax.f32 %v751_v42, %v783_v38 }
  0xb3   : > { %v788_v53 = vmul.f32 0.2, %v756_v35  ;;  %v789_v13 = vmul.f32 0.2, %v757_v14  ;;  %v816_v12 = vmax.f32 %v3017_v2, %v784_v0  ;;  %v885_v19 = vmax.f32 %v3057_v5, %v3066_v43 }
  0xb4   : > { %v786_v36 = vmul.f32 0.2, %v754_v61  ;;  %883 = vmax.xlane.f32.xlu1 %v882_v55  ;;  %v787_v33 = vmul.f32 0.2, %v755_v6  ;;  %v3072_v23 = vadd.f32 %v814_v11, %v2915_v16  ;;  %v3075_v1 = vadd.f32 %v815_v20, %v2917_v63  ;;  %v3170_v11 = vld [vmem:[#allocation2 + $0x8] sm:$0xff]  ;;  %v3172_v20 = vld [vmem:[#allocation2 + $0x40] sm:$0xff] }
  0xb5   : > { %v820_v15 = vmax.f32 %v756_v35, %v788_v53  ;;  %v817_v56 = vmax.f32 %v3020_v25, %v785_v51  ;;  %v3973_v42 = vsub.f32 1.0, %v2921_v28  ;;  %886 = vmax.xlane.f32.xlu0 %v885_v19  ;;  %v3083_v0 = vadd.f32 %v816_v12, %v2923_v34  ;;  %v3191_v19 = vld [vmem:[#allocation2 + $0x10] sm:$0xff] }
  0xb6   : > { %v818_v18 = vmax.f32 %v754_v61, %v786_v36  ;;  %v819_v38 = vmax.f32 %v755_v6, %v787_v33  ;;  %v906_v2 = vmax.f32 %v3072_v23, %v3075_v1  ;;  %v802_v16 = vmax.f32 %v738_v46, %v770_v8  ;;  %v2467_v46 = vld [vmem:[%s3889_s2] sm:$0xff]   ;;  %v3183_v33 = vld [vmem:[#allocation2 + $0x48] sm:$0xff] }
  0xb7   : > { %v617_v52 = vmul.f32 -1e+30, %v3973_v42  ;;  %v3086_v3 = vadd.f32 %v817_v56, %v2925_v26  ;;  %v803_v63 = vmax.f32 %v739_v24, %v771_v7  ;;  %v804_v35 = vmax.f32 %v740_v50, %v772_v54  ;;  %v2468_v24 = vld [vmem:[%s3889_s2 + $0x48] sm:$0xff]   ;;  %v2471_v56 = vld [vmem:[%s3889_s2 + $0x10] sm:$0xff]  }
  0xb8   : > { %v805_v61 = vmax.f32 %v741_v30, %v773_v60  ;;  %v821_v55 = vmax.f32 %v757_v14, %v789_v13  ;;  %907 = vmax.xlane.f32.xlu1 %v906_v2  ;;  %v3089_v25 = vadd.f32 %v802_v16, %v2927_v4  ;;  %v3092_v51 = vadd.f32 %v818_v18, %v2941_v22  ;;  %v2469_v54 = vld [vmem:[%s3889_s2 + $0x8] sm:$0xff]   ;;  %v3165_v60 = vld [vmem:[#allocation2] sm:$0xff]  ;;  %v2470_v18 = vld [vmem:[%s3889_s2 + $0x50] sm:$0xff]  }
  0xb9   : > { %v3095_v6 = vadd.f32 %v819_v38, %v2944_v29  ;;  %v909_v34 = vmax.f32 %v3083_v0, %v3086_v3  ;;  %v3100_v26 = vadd.f32 %v803_v63, %v2929_v9  ;;  %v3103_v7 = vadd.f32 %v804_v35, %v2931_v44  ;;  %v3202_v38 = vld [vmem:[#allocation2 + $0x18] sm:$0xff]  ;;  %v3210_v16 = vld [vmem:[#allocation2 + $0x50] sm:$0xff] }
  0xba   : > { %v3106_v50 = vadd.f32 %v805_v61, %v2939_v57  ;;  %v3111_v4 = vadd.f32 %v820_v15, %v2946_v17  ;;  %v3117_v30 = vadd.f32 %v821_v55, %v617_v52  ;;  %v2668_v44 = vmov 0.0   ;;  %v2466_v57 = vld [vmem:[%s3889_s2 + $0x40] sm:$0xff]   ;;  %v2472_v35 = vld [vmem:[%s3889_s2 + $0x58] sm:$0xff]  }
  0xbb   : > { %910 = vmax.xlane.f32.xlu0 %v909_v34  ;;  %v888_v22 = vmax.f32 %v3089_v25, %v3100_v26  ;;  %v912_v9 = vmax.f32 %v3092_v51, %v3095_v6  ;;  %449 = vst.msk [vmem:[#allocation3] sm:$0xff] %vm432_vm0, %v2668_v44  ;;  %450 = vst.msk [vmem:[#allocation3 + $0x8] sm:$0xff] %vm432_vm0, %v2668_v44  ;;  %2357 = vmatprep.subr.bf16.mxu0 %v2466_v57  ;;  %v2473_v55 = vld [vmem:[%s3889_s2 + $0x18] sm:$0xff]  }
  0xbc   : > { %v891_v29 = vmax.f32 %v3103_v7, %v3106_v50  ;;  %451 = vst.msk [vmem:[#allocation3 + $0x10] sm:$0xff] %vm432_vm0, %v2668_v44  ;;  %452 = vst.msk [vmem:[#allocation3 + $0x18] sm:$0xff] %vm432_vm0, %v2668_v44  ;;  %v915_v17 = vmax.f32 %v3111_v4, %v3117_v30  ;;  %2421 = vmatprep.subr.bf16.mxu1 %v2466_v57  ;;  %2358 = vmatpush3.bf16.msra.mxu0 %v2467_v46  ;;  %v858_v57 = vld [vmem:[#allocation2 + $0x20] sm:$0xff] }
  0xbd   : > { %889 = vmax.xlane.f32.xlu1 %v888_v22  ;;  %453 = vst.msk [vmem:[#allocation3 + $0x20] sm:$0xff] %vm432_vm0, %v2668_v44  ;;  %454 = vst.msk [vmem:[#allocation3 + $0x28] sm:$0xff] %vm432_vm0, %v2668_v44  ;;  %2429 = vmatpush3.bf16.msra.mxu1 %v2467_v46 }
  0xbe   : > { %455 = vst.msk [vmem:[#allocation3 + $0x30] sm:$0xff] %vm432_vm0, %v2668_v44  ;;  %456 = vst.msk [vmem:[#allocation3 + $0x38] sm:$0xff] %vm432_vm0, %v2668_v44  ;;  %2359 = vmatprep.subr.bf16.mxu0 %v2468_v24  ;;  %2422 = vmatprep.subr.bf16.mxu1 %v2468_v24 }
  0xbf   : > { %457 = vst.msk [vmem:[#allocation3 + $0x40] sm:$0xff] %vm432_vm0, %v2668_v44  ;;  %458 = vst.msk [vmem:[#allocation3 + $0x48] sm:$0xff] %vm432_vm0, %v2668_v44  ;;  %892 = vmax.xlane.f32.xlu0 %v891_v29  ;;  %v3230_v29 = vld [vmem:[#allocation2 + $0x58] sm:$0xff] }
  0xc0   : > { %459 = vst.msk [vmem:[#allocation3 + $0x50] sm:$0xff] %vm432_vm0, %v2668_v44  ;;  %460 = vst.msk [vmem:[#allocation3 + $0x58] sm:$0xff] %vm432_vm0, %v2668_v44  ;;  %2360 = vmatpush3.bf16.msra.mxu0 %v2469_v54 }
  0xc1   : > { %461 = vst.msk [vmem:[#allocation3 + $0x60] sm:$0xff] %vm432_vm0, %v2668_v44  ;;  %462 = vst.msk [vmem:[#allocation3 + $0x68] sm:$0xff] %vm432_vm0, %v2668_v44  ;;  %913 = vmax.xlane.f32.xlu1 %v912_v9  ;;  %2430 = vmatpush3.bf16.msra.mxu1 %v2469_v54  ;;  %v2474_v9 = vld [vmem:[%s3889_s2 + $0x60] sm:$0xff]  }
  0xc2   : > { %463 = vst.msk [vmem:[#allocation3 + $0x70] sm:$0xff] %vm432_vm0, %v2668_v44  ;;  %464 = vst.msk [vmem:[#allocation3 + $0x78] sm:$0xff] %vm432_vm0, %v2668_v44  ;;  %2361 = vmatprep.subr.bf16.mxu0 %v2470_v18  ;;  %2423 = vmatprep.subr.bf16.mxu1 %v2470_v18  ;;  %v2477_v18 = vld [vmem:[%s3889_s2 + $0x28] sm:$0xff]  }
  0xc3   : > { %916 = vmax.xlane.f32.xlu0 %v915_v17  ;;  %v2475_v17 = vld [vmem:[%s3889_s2 + $0x20] sm:$0xff]   ;;  %467 = vst.msk [vmem:[#allocation4 + $0x8] sm:$0xff] %vm465_vm1, %v2668_v44  ;;  %466 = vst.msk [vmem:[#allocation4] sm:$0xff] %vm465_vm1, %v2668_v44 }
  0xc4   : > { %2362 = vmatpush3.bf16.msra.mxu0 %v2471_v56  ;;  %468 = vst.msk [vmem:[#allocation4 + $0x10] sm:$0xff] %vm465_vm1, %v2668_v44  ;;  %469 = vst.msk [vmem:[#allocation4 + $0x18] sm:$0xff] %vm465_vm1, %v2668_v44 }
  0xc5   : > { %2431 = vmatpush3.bf16.msra.mxu1 %v2471_v56  ;;  %2363 = vmatprep.subr.bf16.mxu0 %v2472_v35  ;;  %v3257_v56 = vld [vmem:[#allocation2 + $0x60] sm:$0xff]  ;;  %470 = vst.msk [vmem:[#allocation4 + $0x20] sm:$0xff] %vm465_vm1, %v2668_v44  ;;  %471 = vst.msk [vmem:[#allocation4 + $0x28] sm:$0xff] %vm465_vm1, %v2668_v44 }
  0xc6   : > { %2424 = vmatprep.subr.bf16.mxu1 %v2472_v35  ;;  %v2478_v35 = vld [vmem:[%s3889_s2 + $0x70] sm:$0xff]   ;;  %472 = vst.msk [vmem:[#allocation4 + $0x30] sm:$0xff] %vm465_vm1, %v2668_v44  ;;  %473 = vst.msk [vmem:[#allocation4 + $0x38] sm:$0xff] %vm465_vm1, %v2668_v44 }
  0xc7   : > { %474 = vst.msk [vmem:[#allocation4 + $0x40] sm:$0xff] %vm465_vm1, %v2668_v44  ;;  %475 = vst.msk [vmem:[#allocation4 + $0x48] sm:$0xff] %vm465_vm1, %v2668_v44 }
  0xc8   : > { %2364 = vmatpush3.bf16.msra.mxu0 %v2473_v55  ;;  %476 = vst.msk [vmem:[#allocation4 + $0x50] sm:$0xff] %vm465_vm1, %v2668_v44  ;;  %477 = vst.msk [vmem:[#allocation4 + $0x58] sm:$0xff] %vm465_vm1, %v2668_v44 }
  0xc9   : > { %2432 = vmatpush3.bf16.msra.mxu1 %v2473_v55  ;;  %2365 = vmatprep.subr.bf16.mxu0 %v2474_v9  ;;  %478 = vst.msk [vmem:[#allocation4 + $0x60] sm:$0xff] %vm465_vm1, %v2668_v44  ;;  %479 = vst.msk [vmem:[#allocation4 + $0x68] sm:$0xff] %vm465_vm1, %v2668_v44 }
  0xca   : > { %2425 = vmatprep.subr.bf16.mxu1 %v2474_v9  ;;  %480 = vst.msk [vmem:[#allocation4 + $0x70] sm:$0xff] %vm465_vm1, %v2668_v44  ;;  %481 = vst.msk [vmem:[#allocation4 + $0x78] sm:$0xff] %vm465_vm1, %v2668_v44 }
  0xcc   : > { %2366 = vmatpush3.bf16.msra.mxu0 %v2475_v17 }
  0xcd   : > { %2433 = vmatpush3.bf16.msra.mxu1 %v2475_v17 }
 0x12d   : > { %v872_v8 = vpop.xlane.xlu0 %871 }
 0x12e   : > { %v3168_v14 = vmax.f32 %v3165_v60, %v872_v8  ;;  %v3244_v8 = vld [vmem:[#allocation2 + $0x28] sm:$0xff] }
 0x130   : > { %1656 = vst.msk [vmem:[#allocation2] sm:$0xff] %vm432_vm0, %v3168_v14  ;;  %984 = vperm.xlu1 %2465, %v3168_v14  }
 0x131   : > { %v896_v13 = vpop.xlane.xlu0 %895 }
 0x132   : > { %v875_v53 = vpop.xlane.xlu1 %874  ;;  %v3181_v12 = vmax.f32 %v3172_v20, %v896_v13 }
 0x133   : > { %v3178_v36 = vmax.f32 %v3170_v11, %v875_v53  ;;  %v2476_v53 = vld [vmem:[%s3889_s2 + $0x68] sm:$0xff]  }
 0x134   : > { %1664 = vst.msk [vmem:[#allocation2 + $0x40] sm:$0xff] %vm432_vm0, %v3181_v12  ;;  %1024 = vperm.xlu1 %2465, %v3181_v12   ;;  %2367 = vmatprep.subr.bf16.mxu0 %v2476_v53 }
 0x135   : > { %1657 = vst.msk [vmem:[#allocation2 + $0x8] sm:$0xff] %vm432_vm0, %v3178_v36  ;;  %989 = vperm.xlu0 %2464, %v3178_v36   ;;  %v899_v15 = vpop.xlane.xlu0 %898  ;;  %v935_v13 = vsub.f32 %v3170_v11, %v3178_v36  ;;  %2426 = vmatprep.subr.bf16.mxu1 %v2476_v53 }
 0x136   : > { %v3200_v42 = vmax.f32 %v3183_v33, %v899_v15  ;;  %v878_v52 = vpop.xlane.xlu1 %877  ;;  %2368 = vmatpush3.bf16.msra.mxu0 %v2477_v18  ;;  %2434 = vmatpush3.bf16.msra.mxu1 %v2477_v18 }
 0x137   : > { %v3205_v2 = vmax.f32 %v3191_v19, %v878_v52  ;;  %v952_v55 = vmul.f32 1.442695, %v935_v13  ;;  %2369 = vmatprep.subr.bf16.mxu0 %v2478_v35  ;;  %2427 = vmatprep.subr.bf16.mxu1 %v2478_v35  ;;  %v2480_v13 = vld [vmem:[%s3889_s2 + $0x78] sm:$0xff]   ;;  %v3300_v35 = vld [vmem:[#allocation2 + $0x70] sm:$0xff] }
 0x138   : > { %1665 = vst.msk [vmem:[#allocation2 + $0x48] sm:$0xff] %vm432_vm0, %v3200_v42  ;;  %1029 = vperm.xlu1 %2465, %v3200_v42  }
 0x139   : > { %v881_v63 = vpop.xlane.xlu0 %880  ;;  %1658 = vst.msk [vmem:[#allocation2 + $0x10] sm:$0xff] %vm432_vm0, %v3205_v2  ;;  %994 = vperm.xlu0 %2464, %v3205_v2   ;;  %2482 = vpow2.f32 %v952_v55 }
 0x13a   : > { %v3219_v61 = vmax.f32 %v3202_v38, %v881_v63  ;;  %v934_v63 = vsub.f32 %v3165_v60, %v3168_v14  ;;  %v3274_v60 = vld [vmem:[#allocation2 + $0x68] sm:$0xff]  ;;  %v2479_v14 = vld [vmem:[%s3889_s2 + $0x30] sm:$0xff]  }
 0x13b   : > { %v902_v34 = vpop.xlane.xlu1 %901  ;;  %2370 = vmatpush3.bf16.msra.mxu0 %v2479_v14  ;;  %2435 = vmatpush3.bf16.msra.mxu1 %v2479_v14 }
 0x13c   : > { %v3225_v22 = vmax.f32 %v3210_v16, %v902_v34  ;;  %1659 = vst.msk [vmem:[#allocation2 + $0x18] sm:$0xff] %vm432_vm0, %v3219_v61  ;;  %999 = vperm.xlu1 %2465, %v3219_v61   ;;  %v950_v17 = vmul.f32 1.442695, %v934_v63  ;;  %2371 = vmatprep.subr.bf16.mxu0 %v2480_v13 }
 0x13d   : > { %2428 = vmatprep.subr.bf16.mxu1 %v2480_v13 }
 0x13e   : > { %1666 = vst.msk [vmem:[#allocation2 + $0x50] sm:$0xff] %vm432_vm0, %v3225_v22  ;;  %1034 = vperm.xlu0 %2464, %v3225_v22   ;;  %v905_v46 = vpop.xlane.xlu0 %904  ;;  %2484 = vpow2.f32 %v950_v17  ;;  %v944_v44 = vsub.f32 %v3210_v16, %v3225_v22 }
 0x13f   : > { %v3242_v24 = vmax.f32 %v3230_v29, %v905_v46  ;;  %v860_v46 = vld [vmem:[#allocation2 + $0x30] sm:$0xff] }
 0x140   : > { %v970_v16 = vmul.f32 1.442695, %v944_v44 }
 0x141   : > { %v884_v54 = vpop.xlane.xlu1 %883  ;;  %1667 = vst.msk [vmem:[#allocation2 + $0x58] sm:$0xff] %vm432_vm0, %v3242_v24  ;;  %1039 = vperm.xlu1 %2465, %v3242_v24  }
 0x142   : > { %v922_v15 = vmax.f32 %v858_v57, %v884_v54  ;;  %v887_v52 = vpop.xlane.xlu0 %886 }
 0x143   : > { %v3263_v11 = vmax.f32 %v3244_v8, %v887_v52 }
 0x144   : > { %1660 = vst.msk [vmem:[#allocation2 + $0x20] sm:$0xff] %vm432_vm0, %v922_v15  ;;  %1004 = vperm.xlu0 %2464, %v922_v15   ;;  %v938_v34 = vsub.f32 %v858_v57, %v922_v15  ;;  %v936_v57 = vsub.f32 %v3191_v19, %v3205_v2  ;;  %v3290_v19 = vld [vmem:[#allocation2 + $0x38] sm:$0xff] }
 0x145   : > { %v908_v36 = vpop.xlane.xlu1 %907  ;;  %1661 = vst.msk [vmem:[#allocation2 + $0x28] sm:$0xff] %vm432_vm0, %v3263_v11  ;;  %1009 = vperm.xlu1 %2465, %v3263_v11   ;;  %v2481_v2 = vld [vmem:[%s3889_s2 + $0x38] sm:$0xff]  }
 0x146   : > { %v3269_v9 = vmax.f32 %v3257_v56, %v908_v36  ;;  %v958_v15 = vmul.f32 1.442695, %v938_v34  ;;  %v954_v63 = vmul.f32 1.442695, %v936_v57  ;;  %v937_v36 = vsub.f32 %v3202_v38, %v3219_v61  ;;  %2372 = vmatpush3.bf16.msra.mxu0 %v2481_v2  ;;  %2436 = vmatpush3.bf16.msra.mxu1 %v2481_v2  ;;  %v3306_v57 = vld [vmem:[#allocation2 + $0x78] sm:$0xff] }
 0x148   : > { %1668 = vst.msk [vmem:[#allocation2 + $0x60] sm:$0xff] %vm432_vm0, %v3269_v9  ;;  %1044 = vperm.xlu0 %2464, %v3269_v9   ;;  %v911_v54 = vpop.xlane.xlu0 %910  ;;  %2486 = vpow2.f32 %v958_v15  ;;  %v946_v22 = vsub.f32 %v3257_v56, %v3269_v9  ;;  %v945_v9 = vsub.f32 %v3230_v29, %v3242_v24 }
 0x149   : > { %v3285_v53 = vmax.f32 %v3274_v60, %v911_v54  ;;  %v942_v54 = vsub.f32 %v3172_v20, %v3181_v12  ;;  %2488 = vpow2.f32 %v954_v63  ;;  %v956_v20 = vmul.f32 1.442695, %v937_v36 }
 0x14a   : > { %v890_v18 = vpop.xlane.xlu1 %889  ;;  %v939_v12 = vsub.f32 %v3244_v8, %v3263_v11  ;;  %v3361_v11 = vpop.eup %2482 }
 0x14b   : > { %v924_v52 = vmax.f32 %v860_v46, %v890_v18  ;;  %1669 = vst.msk [vmem:[#allocation2 + $0x68] sm:$0xff] %vm432_vm0, %v3285_v53  ;;  %1049 = vperm.xlu1 %2465, %v3285_v53   ;;  %v966_v18 = vmul.f32 1.442695, %v942_v54  ;;  %v3365_v63 = vpop.eup %2484 }
 0x14c   : > { %v893_v55 = vpop.xlane.xlu0 %892  ;;  %v960_v2 = vmul.f32 1.442695, %v939_v12 }
 0x14d   : > { %v940_v34 = vsub.f32 %v860_v46, %v924_v52  ;;  %1662 = vst.msk [vmem:[#allocation2 + $0x30] sm:$0xff] %vm432_vm0, %v924_v52  ;;  %1014 = vperm.xlu0 %2464, %v924_v52   ;;  %v925_v14 = vmax.f32 %v3290_v19, %v893_v55  ;;  %v943_v55 = vsub.f32 %v3183_v33, %v3200_v42 }
 0x14e   : > { %v914_v17 = vpop.xlane.xlu1 %913 }
 0x14f   : > { %v962_v38 = vmul.f32 1.442695, %v940_v34  ;;  %v3309_v61 = vmax.f32 %v3300_v35, %v914_v17  ;;  %1663 = vst.msk [vmem:[#allocation2 + $0x38] sm:$0xff] %vm432_vm0, %v925_v14  ;;  %1019 = vperm.xlu1 %2465, %v925_v14   ;;  %v941_v52 = vsub.f32 %v3290_v19, %v925_v14  ;;  %v974_v14 = vmul.f32 1.442695, %v946_v22 }
 0x150   : > { %v917_v46 = vpop.xlane.xlu0 %916  ;;  %v968_v56 = vmul.f32 1.442695, %v943_v55  ;;  %v972_v17 = vmul.f32 1.442695, %v945_v9 }
 0x151   : > { %2490 = vpow2.f32 %v962_v38  ;;  %1670 = vst.msk [vmem:[#allocation2 + $0x70] sm:$0xff] %vm432_vm0, %v3309_v61  ;;  %1054 = vperm.xlu0 %2464, %v3309_v61   ;;  %v3352_v15 = vmax.f32 %v3306_v57, %v917_v46  ;;  %v964_v34 = vmul.f32 1.442695, %v941_v52  ;;  %v947_v38 = vsub.f32 %v3274_v60, %v3285_v53 }
 0x152   : > { %2492 = vpow2.f32 %v956_v20  ;;  %v3370_v36 = vpop.eup %2486 }
 0x153   : > { %1671 = vst.msk [vmem:[#allocation2 + $0x78] sm:$0xff] %vm432_vm0, %v3352_v15  ;;  %1059 = vperm.xlu1 %2465, %v3352_v15   ;;  %2494 = vpow2.f32 %v966_v18  ;;  %v3375_v19 = vpop.eup %2488  ;;  %v976_v24 = vmul.f32 1.442695, %v947_v38 }
 0x154   : > { %2496 = vpow2.f32 %v960_v2 }
 0x155   : > { %1309 = vperm.xlu0 %2464, %v3361_v11   ;;  %2498 = vpow2.f32 %v970_v16 }
 0x156   : > { %2500 = vpow2.f32 %v964_v34 }
 0x157   : > { %1304 = vperm.xlu1 %2465, %v3365_v63   ;;  %2502 = vpow2.f32 %v974_v14 }
 0x158   : > { %2504 = vpow2.f32 %v968_v56 }
 0x159   : > { %1324 = vperm.xlu0 %2464, %v3370_v36   ;;  %2506 = vpow2.f32 %v972_v17 }
 0x15a   : > { %2508 = vpow2.f32 %v976_v24 }
 0x15b   : > { %v3377_v54 = vpop.eup %2490  ;;  %1314 = vperm.xlu1 %2465, %v3375_v19  }
 0x15c   : > { %v3383_v33 = vpop.eup %2492 }
 0x15d   : > { %1334 = vperm.xlu0 %2464, %v3377_v54   ;;  %v3386_v42 = vpop.eup %2494 }
 0x15e   : > { %v3391_v20 = vpop.eup %2496 }
 0x15f   : > { %1319 = vperm.xlu1 %2465, %v3383_v33   ;;  %v3394_v29 = vpop.eup %2498 }
 0x160   : > { %v3397_v12 = vpop.eup %2500 }
 0x161   : > { %1344 = vperm.xlu0 %2464, %v3386_v42   ;;  %v3400_v46 = vpop.eup %2502 }
 0x162   : > { %v3403_v60 = vpop.eup %2504 }
 0x163   : > { %1329 = vperm.xlu1 %2465, %v3391_v20   ;;  %v3406_v53 = vpop.eup %2506 }
 0x164   : > { %v3409_v18 = vpop.eup %2508 }
 0x165   : > { %1354 = vperm.xlu0 %2464, %v3394_v29  }
 0x167   : > { %1339 = vperm.xlu1 %2465, %v3397_v12  }
 0x169   : > { %1364 = vperm.xlu0 %2464, %v3400_v46  }
 0x16b   : > { %1349 = vperm.xlu1 %2465, %v3403_v60  }
 0x16f   : > { %1359 = vperm.xlu1 %2465, %v3406_v53  }
 0x173   : > { %1369 = vperm.xlu1 %2465, %v3409_v18  }
 0x1af   : > { %v985_v44 = vpop.permute.xlu1 %984 }
 0x1b0   : > { %v1062_v2 = vsub.f32 %v2953_v47, %v985_v44  ;;  %v1063_v52 = vsub.f32 %v2956_v39, %v985_v44 }
 0x1b2   : > { %v1094_v16 = vmul.f32 1.442695, %v1062_v2  ;;  %v1096_v22 = vmul.f32 1.442695, %v1063_v52 }
 0x1b3   : > { %v1025_v55 = vpop.permute.xlu1 %1024 }
 0x1b4   : > { %v990_v34 = vpop.permute.xlu0 %989  ;;  %2510 = vpow2.f32 %v1094_v16  ;;  %v1078_v14 = vsub.f32 %v2959_v45, %v1025_v55  ;;  %v1079_v56 = vsub.f32 %v2968_v59, %v1025_v55 }
 0x1b5   : > { %v1064_v9 = vsub.f32 %v2973_v41, %v990_v34  ;;  %2512 = vpow2.f32 %v1096_v22  ;;  %v1065_v17 = vsub.f32 %v2976_v40, %v990_v34 }
 0x1b6   : > { %v1126_v38 = vmul.f32 1.442695, %v1078_v14  ;;  %v1128_v24 = vmul.f32 1.442695, %v1079_v56  ;;  %v3974_v14 = vld [vmem:[#allocation36_spill] sm:$0xff] }
 0x1b7   : > { %v1098_v13 = vmul.f32 1.442695, %v1064_v9  ;;  %v1100_v47 = vmul.f32 1.442695, %v1065_v17  ;;  %v1030_v8 = vpop.permute.xlu1 %1029  ;;  %v3975_v9 = vld [vmem:[#allocation37_spill] sm:$0xff] }
 0x1b8   : > { %2514 = vpow2.f32 %v1126_v38  ;;  %v1080_v39 = vsub.f32 %v2987_v27, %v1030_v8  ;;  %v1081_v44 = vsub.f32 %v2991_v62, %v1030_v8  ;;  %v995_v2 = vpop.permute.xlu0 %994  ;;  %v3976_v17 = vld [vmem:[#allocation5_spill] sm:$0xff] }
 0x1b9   : > { %2516 = vpow2.f32 %v1128_v24  ;;  %v1066_v41 = vsub.f32 %v2994_v32, %v995_v2  ;;  %v1067_v40 = vsub.f32 %v3005_v10, %v995_v2 }
 0x1ba   : > { %2518 = vpow2.f32 %v1098_v13  ;;  %v1130_v45 = vmul.f32 1.442695, %v1080_v39  ;;  %v1132_v59 = vmul.f32 1.442695, %v1081_v44 }
 0x1bb   : > { %2520 = vpow2.f32 %v1100_v47  ;;  %v1000_v52 = vpop.permute.xlu1 %999  ;;  %v1102_v16 = vmul.f32 1.442695, %v1066_v41  ;;  %v1104_v27 = vmul.f32 1.442695, %v1067_v40 }
 0x1bc   : > { %2522 = vpow2.f32 %v1130_v45  ;;  %v1068_v22 = vsub.f32 %v3008_v21, %v1000_v52  ;;  %v1069_v55 = vsub.f32 %v3014_v58, %v1000_v52  ;;  %v3977_v21 = vld [vmem:[#allocation6_spill] sm:$0xff] }
 0x1bd   : > { %2524 = vpow2.f32 %v1132_v59  ;;  %v1035_v62 = vpop.permute.xlu0 %1034 }
 0x1be   : > { %v2511_v8 = vpop.eup %2510  ;;  %2526 = vpow2.f32 %v1102_v16  ;;  %v1106_v13 = vmul.f32 1.442695, %v1068_v22  ;;  %v1108_v34 = vmul.f32 1.442695, %v1069_v55  ;;  %v1082_v56 = vsub.f32 %v3974_v14, %v1035_v62  ;;  %v3980_v14 = vld [vmem:[#allocation8_spill] sm:$0xff] }
 0x1bf   : > { %v2513_v32 = vpop.eup %2512  ;;  %2528 = vpow2.f32 %v1104_v27  ;;  %v1083_v10 = vsub.f32 %v3975_v9, %v1035_v62  ;;  %v3427_v38 = vmul.f32 %v2511_v8, %v3976_v17 }
 0x1c0   : > { %v1134_v24 = vmul.f32 1.442695, %v1082_v56  ;;  %v3430_v47 = vmul.f32 %v2513_v32, %v3977_v21  ;;  %2530 = vpow2.f32 %v1108_v34  ;;  %v1040_v39 = vpop.permute.xlu1 %1039  ;;  %v3981_v21 = vld [vmem:[#allocation10_spill] sm:$0xff] }
 0x1c1   : > { %v1136_v58 = vmul.f32 1.442695, %v1083_v10  ;;  %2532 = vpow2.f32 %v1106_v13  ;;  %v1084_v2 = vsub.f32 %v3038_v37, %v1040_v39  ;;  %v1085_v45 = vsub.f32 %v3045_v49, %v1040_v39  ;;  %v3978_v37 = vld [vmem:[#allocation7_spill] sm:$0xff]  ;;  %v3979_v49 = vld [vmem:[#allocation9_spill] sm:$0xff] }
 0x1c2   : > { %v2515_v44 = vpop.eup %2514  ;;  %v1222_v59 = vadd.f32 %v3430_v47, %v3427_v38  ;;  %2534 = vpow2.f32 %v1134_v24 }
 0x1c3   : > { %v2517_v41 = vpop.eup %2516  ;;  %v1005_v40 = vpop.permute.xlu0 %1004  ;;  %v1138_v16 = vmul.f32 1.442695, %v1084_v2  ;;  %v1140_v22 = vmul.f32 1.442695, %v1085_v45  ;;  %2536 = vpow2.f32 %v1136_v58  ;;  %v3445_v56 = vmul.f32 %v2515_v44, %v3980_v14 }
 0x1c4   : > { %v2519_v52 = vpop.eup %2518  ;;  %v1070_v55 = vsub.f32 %v3048_v48, %v1005_v40  ;;  %v1071_v27 = vsub.f32 %v3054_v31, %v1005_v40  ;;  %1223 = vadd.xlane.f32.xlu0 %v1222_v59  ;;  %v1010_v8 = vpop.permute.xlu1 %1009  ;;  %v3442_v34 = vmul.f32 %v2517_v41, %v3979_v49 }
 0x1c5   : > { %v2521_v62 = vpop.eup %2520  ;;  %v3439_v13 = vmul.f32 %v2519_v52, %v3978_v37  ;;  %2538 = vpow2.f32 %v1138_v16  ;;  %v1072_v48 = vsub.f32 %v3057_v5, %v1010_v8  ;;  %v1073_v17 = vsub.f32 %v3066_v43, %v1010_v8  ;;  %v3983_v8 = vld [vmem:[#allocation13_spill] sm:$0xff] }
 0x1c6   : > { %v2523_v32 = vpop.eup %2522  ;;  %v1110_v9 = vmul.f32 1.442695, %v1070_v55  ;;  %v1112_v10 = vmul.f32 1.442695, %v1071_v27  ;;  %2540 = vpow2.f32 %v1140_v22  ;;  %v3450_v58 = vmul.f32 %v2521_v62, %v3981_v21  ;;  %v3982_v55 = vld [vmem:[#allocation12_spill] sm:$0xff] }
 0x1c7   : > { %v2525_v31 = vpop.eup %2524  ;;  %v1045_v24 = vpop.permute.xlu0 %1044  ;;  %v1398_v39 = vpack.c.bf16 %v3439_v13, %v3427_v38  ;;  %v1114_v44 = vmul.f32 1.442695, %v1072_v48  ;;  %v1116_v5 = vmul.f32 1.442695, %v1073_v17 }
 0x1c8   : > { %v2527_v2 = vpop.eup %2526  ;;  %2542 = vpow2.f32 %v1110_v9  ;;  %v1086_v45 = vsub.f32 %v3072_v23, %v1045_v24  ;;  %v1087_v59 = vsub.f32 %v3075_v1, %v1045_v24  ;;  %v1399_v43 = vpack.c.bf16 %v3450_v58, %v3430_v47 }
 0x1c9   : > { %v2529_v41 = vpop.eup %2528  ;;  %2544 = vpow2.f32 %v1112_v10  ;;  %v1225_v40 = vadd.f32 %v3450_v58, %v3439_v13  ;;  %v3461_v27 = vmul.f32 %v2525_v31, %v3982_v55  ;;  %v3466_v37 = vmul.f32 %v2527_v2, %v3983_v8  ;;  %v3984_v10 = vld [vmem:[#allocation14_spill] sm:$0xff]  ;;  %v3985_v31 = vld [vmem:[#allocation11_spill] sm:$0xff] }
 0x1ca   : > { %2546 = vpow2.f32 %v1114_v44  ;;  %v1142_v52 = vmul.f32 1.442695, %v1086_v45  ;;  %v1144_v16 = vmul.f32 1.442695, %v1087_v59  ;;  %v1050_v22 = vpop.permute.xlu1 %1049  ;;  %v2531_v62 = vpop.eup %2530  ;;  %1574 = vmatprep.mubr.bf16.mxu0 %v1399_v43  ;;  %v3471_v48 = vmul.f32 %v2529_v41, %v3984_v10  ;;  %v3986_v59 = vld [vmem:[#allocation16_spill] sm:$0xff] }
 0x1cb   : > { %2548 = vpow2.f32 %v1116_v5  ;;  %v1088_v23 = vsub.f32 %v3083_v0, %v1050_v22  ;;  %v1089_v1 = vsub.f32 %v3086_v3, %v1050_v22  ;;  %1226 = vadd.xlane.f32.xlu1 %v1225_v40  ;;  %v2533_v49 = vpop.eup %2532  ;;  %1575 = vmatmul.mubr.bf16.vlgmr.msra.gmra.mrb[0].mxu0 %v1398_v39  ;;  %v1407_v9 = vpack.c.bf16 %v3461_v27, %v3442_v34  ;;  %v3987_v22 = vld [vmem:[#allocation15_spill] sm:$0xff] }
 0x1cc   : > { %2550 = vpow2.f32 %v1142_v52  ;;  %v1015_v14 = vpop.permute.xlu0 %1014  ;;  %v3474_v17 = vmul.f32 %v2523_v32, %v3985_v31  ;;  %v2535_v0 = vpop.eup %2534  ;;  %v1228_v39 = vadd.f32 %v3471_v48, %v3466_v37  ;;  %v3483_v41 = vmul.f32 %v2531_v62, %v3986_v59 }
 0x1cd   : > { %2552 = vpow2.f32 %v1144_v16  ;;  %v1146_v3 = vmul.f32 1.442695, %v1088_v23  ;;  %v1148_v24 = vmul.f32 1.442695, %v1089_v1  ;;  %v1074_v21 = vsub.f32 %v3089_v25, %v1015_v14  ;;  %1606 = vmatprep.mubr.bf16.mxu1 %v1407_v9  ;;  %v2537_v32 = vpop.eup %2536 }
 0x1ce   : > { %v1075_v2 = vsub.f32 %v3100_v26, %v1015_v14  ;;  %v1020_v44 = vpop.permute.xlu1 %1019  ;;  %v1406_v45 = vpack.c.bf16 %v3474_v17, %v3445_v56  ;;  %1229 = vadd.xlane.f32.xlu0 %v1228_v39  ;;  %v1401_v16 = vpack.c.bf16 %v3483_v41, %v3471_v48  ;;  %v3490_v55 = vmul.f32 %v2533_v49, %v3987_v22 }
 0x1cf   : > { %2554 = vpow2.f32 %v1146_v3  ;;  %v1118_v5 = vmul.f32 1.442695, %v1074_v21  ;;  %v1076_v43 = vsub.f32 %v3103_v7, %v1020_v44  ;;  %v1077_v25 = vsub.f32 %v3106_v50, %v1020_v44  ;;  %v2539_v40 = vpop.eup %2538  ;;  %v3990_v44 = vld [vmem:[#allocation20_spill] sm:$0xff] }
 0x1d0   : > { %2556 = vpow2.f32 %v1148_v24  ;;  %v1120_v26 = vmul.f32 1.442695, %v1075_v2  ;;  %v1055_v52 = vpop.permute.xlu0 %1054  ;;  %1607 = vmatmul.mubr.bf16.vlgmr.msra.gmra.mrb[0].mxu1 %v1406_v45  ;;  %v2541_v62 = vpop.eup %2540  ;;  %1582 = vmatprep.mubr.bf16.mxu0 %v1401_v16  ;;  %v1231_v9 = vadd.f32 %v3483_v41, %v3490_v55  ;;  %v1400_v10 = vpack.c.bf16 %v3490_v55, %v3466_v37  ;;  %v3994_v16 = vld [vmem:[#allocation17_spill] sm:$0xff] }
 0x1d1   : > { %2558 = vpow2.f32 %v1118_v5  ;;  %v1122_v23 = vmul.f32 1.442695, %v1076_v43  ;;  %v1124_v1 = vmul.f32 1.442695, %v1077_v25  ;;  %v1090_v7 = vsub.f32 %v3092_v51, %v1055_v52 }
 0x1d2   : > { %v2543_v8 = vpop.eup %2542  ;;  %2560 = vpow2.f32 %v1120_v26  ;;  %v1091_v50 = vsub.f32 %v3095_v6, %v1055_v52  ;;  %v1060_v14 = vpop.permute.xlu1 %1059  ;;  %1232 = vadd.xlane.f32.xlu0 %v1231_v9  ;;  %v3988_v6 = vld [vmem:[#allocation18_spill] sm:$0xff]  ;;  %v3504_v39 = vmul.f32 %v2541_v62, %v3990_v44  ;;  %v3515_v22 = vmul.f32 %v2535_v0, %v3994_v16  ;;  %v3995_v62 = vld [vmem:[#allocation19_spill] sm:$0xff] }
 0x1d3   : > { %v2545_v49 = vpop.eup %2544  ;;  %2562 = vpow2.f32 %v1122_v23  ;;  %v1150_v31 = vmul.f32 1.442695, %v1090_v7  ;;  %v1092_v3 = vsub.f32 %v3111_v4, %v1060_v14  ;;  %v1093_v24 = vsub.f32 %v3117_v30, %v1060_v14  ;;  %1583 = vmatmul.mubr.bf16.gmra.mrb[4].mxu0 %v1400_v10  ;;  %v3992_v30 = vld [vmem:[#allocation21_spill] sm:$0xff]  ;;  %v3993_v26 = vld [vmem:[#allocation22_spill] sm:$0xff]  ;;  %v3997_v7 = vld [vmem:[#allocation23_spill] sm:$0xff] }
 0x1d4   : > { %v2547_v51 = vpop.eup %2546  ;;  %2564 = vpow2.f32 %v1124_v1  ;;  %v1152_v21 = vmul.f32 1.442695, %v1091_v50  ;;  %v3501_v2 = vmul.f32 %v2537_v32, %v3988_v6  ;;  %3991 = vst [vmem:[#allocation37_spill] sm:$0xff] %v3504_v39  ;;  %v3509_v25 = vmul.f32 %v2543_v8, %v3992_v30  ;;  %v3998_v8 = vld [vmem:[#allocation24_spill] sm:$0xff]  ;;  %v4003_v44 = vld [vmem:[#allocation27_spill] sm:$0xff]  ;;  %v4006_v16 = vld [vmem:[#allocation30_spill] sm:$0xff] }
 0x1d5   : > { %v2549_v45 = vpop.eup %2548  ;;  %2566 = vpow2.f32 %v1150_v31  ;;  %v1154_v59 = vmul.f32 1.442695, %v1092_v3  ;;  %v1156_v5 = vmul.f32 1.442695, %v1093_v24  ;;  %v3512_v52 = vmul.f32 %v2545_v49, %v3993_v26  ;;  %v3999_v24 = vld [vmem:[#allocation26_spill] sm:$0xff] }
 0x1d6   : > { %3989 = vst [vmem:[#allocation36_spill] sm:$0xff] %v3501_v2  ;;  %v2551_v43 = vpop.eup %2550  ;;  %2568 = vpow2.f32 %v1152_v21  ;;  %v1409_v4 = vpack.c.bf16 %v3504_v39, %v3501_v2  ;;  %v3518_v23 = vmul.f32 %v2539_v40, %v3995_v62  ;;  %v3523_v50 = vmul.f32 %v2547_v51, %v3997_v7  ;;  %v4001_v21 = vld [vmem:[#allocation28_spill] sm:$0xff]  ;;  %v4007_v62 = vld [vmem:[#allocation25_spill] sm:$0xff] }
 0x1d7   : > { %v2553_v32 = vpop.eup %2552  ;;  %2570 = vpow2.f32 %v1154_v59  ;;  %v1234_v1 = vadd.f32 %v3512_v52, %v3509_v25  ;;  %v3526_v14 = vmul.f32 %v2549_v45, %v3998_v8  ;;  %v4009_v8 = vld [vmem:[#allocation31_spill] sm:$0xff] }
 0x1d8   : > { %3996 = vst [vmem:[#allocation5_spill] sm:$0xff] %v3518_v23  ;;  %2572 = vpow2.f32 %v1156_v5  ;;  %1614 = vmatprep.mubr.bf16.mxu1 %v1409_v4  ;;  %v1408_v10 = vpack.c.bf16 %v3518_v23, %v3515_v22  ;;  %v1402_v31 = vpack.c.bf16 %v3523_v50, %v3509_v25  ;;  %v3537_v51 = vmul.f32 %v2553_v32, %v3999_v24  ;;  %v4005_v5 = vld [vmem:[#allocation29_spill] sm:$0xff] }
 0x1d9   : > { %v2555_v9 = vpop.eup %2554  ;;  %1235 = vadd.xlane.f32.xlu1 %v1234_v1  ;;  %v1237_v40 = vadd.f32 %v3526_v14, %v3523_v50  ;;  %v1403_v49 = vpack.c.bf16 %v3526_v14, %v3512_v52  ;;  %v3554_v1 = vmul.f32 %v2551_v43, %v4007_v62  ;;  %v4014_v62 = vld [vmem:[#allocation35_spill] sm:$0xff] }
 0x1da   : > { %v2557_v0 = vpop.eup %2556  ;;  %1615 = vmatmul.mubr.bf16.gmra.mrb[4].mxu1 %v1408_v10  ;;  %4000 = vst [vmem:[#allocation6_spill] sm:$0xff] %v3537_v51  ;;  %v3543_v45 = vmul.f32 %v2555_v9, %v4003_v44 }
 0x1db   : > { %v2559_v3 = vpop.eup %2558  ;;  %v3540_v6 = vmul.f32 %v2557_v0, %v4001_v21  ;;  %1238 = vadd.xlane.f32.xlu0 %v1237_v40  ;;  %1590 = vmatprep.mubr.bf16.mxu0 %v1403_v49  ;;  %4008 = vst [vmem:[#allocation8_spill] sm:$0xff] %v3554_v1  ;;  %v4010_v49 = vld [vmem:[#allocation32_spill] sm:$0xff] }
 0x1dc   : > { %4004 = vst [vmem:[#allocation9_spill] sm:$0xff] %v3543_v45  ;;  %v2561_v59 = vpop.eup %2560  ;;  %v3546_v4 = vmul.f32 %v2559_v3, %v4005_v5  ;;  %1591 = vmatmul.mubr.bf16.gmra.mrb[8].mxu0 %v1402_v31  ;;  %v1410_v40 = vpack.c.bf16 %v3543_v45, %v3554_v1  ;;  %v1246_v5 = vadd.f32 %v3442_v34, %v3445_v56 }
 0x1dd   : > { %4002 = vst [vmem:[#allocation7_spill] sm:$0xff] %v3540_v6  ;;  %v2563_v30 = vpop.eup %2562  ;;  %v1411_v26 = vpack.c.bf16 %v3540_v6, %v3537_v51  ;;  %v3551_v32 = vmul.f32 %v2561_v59, %v4006_v16 }
 0x1de   : > { %v2565_v7 = vpop.eup %2564  ;;  %v3557_v9 = vmul.f32 %v2563_v30, %v4009_v8  ;;  %v4011_v30 = vld [vmem:[#allocation34_spill] sm:$0xff]  ;;  %v1249_v8 = vadd.f32 %v3461_v27, %v3474_v17 }
 0x1df   : > { %v2567_v10 = vpop.eup %2566  ;;  %1622 = vmatprep.mubr.bf16.mxu1 %v1411_v26  ;;  %v1240_v0 = vadd.f32 %v3551_v32, %v3546_v4  ;;  %v3564_v31 = vmul.f32 %v2565_v7, %v4010_v49 }
 0x1e0   : > { %v2569_v3 = vpop.eup %2568  ;;  %v1404_v44 = vpack.c.bf16 %v3557_v9, %v3546_v4 }
 0x1e1   : > { %v2571_v24 = vpop.eup %2570  ;;  %1241 = vadd.xlane.f32.xlu1 %v1240_v0  ;;  %v1243_v43 = vadd.f32 %v3564_v31, %v3557_v9  ;;  %v1405_v21 = vpack.c.bf16 %v3564_v31, %v3551_v32  ;;  %v3575_v26 = vmul.f32 %v2569_v3, %v4011_v30  ;;  %v4019_v30 = vsub.f32 %v3300_v35, %v3309_v61 }
 0x1e2   : > { %v2573_v59 = vpop.eup %2572  ;;  %1623 = vmatmul.mubr.bf16.gmra.mrb[8].mxu1 %v1410_v40  ;;  %v3581_v7 = vmul.f32 %v2571_v24, %v4014_v62  ;;  %v4016_v40 = vld [vmem:[#allocation33_spill] sm:$0xff]  ;;  %v1255_v24 = vadd.f32 %v3504_v39, %v3518_v23 }
 0x1e3   : > { %1244 = vadd.xlane.f32.xlu0 %v1243_v43  ;;  %4012 = vst [vmem:[#allocation10_spill] sm:$0xff] %v3575_v26  ;;  %v3578_v16 = vmul.f32 %v2573_v59, %v2921_v28  ;;  %1598 = vmatprep.mubr.bf16.mxu0 %v1405_v21  ;;  %v3588_v49 = vmul.f32 %v2567_v10, %v4016_v40  ;;  %v978_v62 = vmul.f32 1.442695, %v4019_v30  ;;  %v3616_v40 = vpop.permute.xlu1 %1304 }
 0x1e4   : > { %4015 = vst [vmem:[#allocation13_spill] sm:$0xff] %v3581_v7  ;;  %1599 = vmatmul.mubr.bf16.gmra.mrb[12].mxu0 %v1404_v44  ;;  %v1252_v28 = vadd.f32 %v3501_v2, %v3515_v22  ;;  %v1258_v43 = vadd.f32 %v3537_v51, %v3554_v1  ;;  %v1261_v10 = vadd.f32 %v3540_v6, %v3543_v45  ;;  %v1192_v1 = vld [vmem:[#allocation3 + $0x10] sm:$0xff] }
 0x1e5   : > { %4013 = vst [vmem:[#allocation12_spill] sm:$0xff] %v3578_v16  ;;  %1247 = vadd.xlane.f32.xlu1 %v1246_v5  ;;  %v1413_v0 = vpack.c.bf16 %v3578_v16, %v3575_v26  ;;  %4017 = vst [vmem:[#allocation14_spill] sm:$0xff] %v3588_v49  ;;  %v1412_v3 = vpack.c.bf16 %v3581_v7, %v3588_v49  ;;  %v1264_v21 = vadd.f32 %v3575_v26, %v3588_v49  ;;  %v1191_v49 = vld [vmem:[#allocation3 + $0x8] sm:$0xff] }
 0x1e6   : > { %v1267_v44 = vadd.f32 %v3578_v16, %v3581_v7  ;;  %v4018_v59 = vsub.f32 %v3306_v57, %v3352_v15  ;;  %v1207_v6 = vmul.f32 %v3361_v11, %v1191_v49  ;;  %v1208_v23 = vmul.f32 %v3375_v19, %v1192_v1 }
 0x1e7   : > { %1250 = vadd.xlane.f32.xlu0 %v1249_v8  ;;  %1630 = vmatprep.mubr.bf16.mxu1 %v1413_v0  ;;  %v3620_v57 = vpop.permute.xlu1 %1314 }
 0x1e8   : > { %v980_v5 = vmul.f32 1.442695, %v4018_v59  ;;  %v1190_v59 = vld [vmem:[#allocation3] sm:$0xff] }
 0x1e9   : > { %1253 = vadd.xlane.f32.xlu1 %v1252_v28  ;;  %v3618_v28 = vpop.permute.xlu0 %1309  ;;  %v1206_v30 = vmul.f32 %v3365_v63, %v1190_v59  ;;  %v1193_v59 = vld [vmem:[#allocation3 + $0x18] sm:$0xff] }
 0x1ea   : > { %1631 = vmatmul.mubr.bf16.gmra.mrb[12].mxu1 %v1412_v3  ;;  %2574 = vpow2.f32 %v980_v5 }
 0x1eb   : > { %1256 = vadd.xlane.f32.xlu0 %v1255_v24  ;;  %2576 = vpow2.f32 %v978_v62  ;;  %v3624_v3 = vpop.permute.xlu1 %1319 }
 0x1ed   : > { %1259 = vadd.xlane.f32.xlu1 %v1258_v43  ;;  %v3622_v15 = vpop.permute.xlu0 %1324 }
 0x1ef   : > { %1262 = vadd.xlane.f32.xlu0 %v1261_v10  ;;  %v3628_v61 = vpop.permute.xlu1 %1329 }
 0x1f1   : > { %1265 = vadd.xlane.f32.xlu1 %v1264_v21  ;;  %v3626_v35 = vpop.permute.xlu0 %1334 }
 0x1f3   : > { %1268 = vadd.xlane.f32.xlu0 %v1267_v44  ;;  %v3632_v43 = vpop.permute.xlu1 %1339 }
 0x1f4   : > { %v3610_v8 = vpop.eup %2574 }
 0x1f5   : > { %v3613_v0 = vpop.eup %2576  ;;  %v3630_v24 = vpop.permute.xlu0 %1344 }
 0x1f7   : > { %v3636_v21 = vpop.permute.xlu1 %1349 }
 0x1f9   : > { %v3634_v10 = vpop.permute.xlu0 %1354 }
 0x1fb   : > { %v3640_v5 = vpop.permute.xlu1 %1359 }
 0x1fd   : > { %v3638_v44 = vpop.permute.xlu0 %1364 }
 0x1ff   : > { %v3643_v7 = vpop.permute.xlu1 %1369 }
 0x202   : > { %1379 = vperm.xlu1 %2465, %v3610_v8  }
 0x209   : > { %1374 = vperm.xlu0 %2464, %v3613_v0  }
 0x251   : > { %v1224_v62 = vpop.xlane.xlu0 %1223 }
 0x252   : > { %v1270_v16 = vadd.f32 %v1224_v62, %v1206_v30 }
 0x254   : > { %1672 = vst.msk [vmem:[#allocation3] sm:$0xff] %vm432_vm0, %v1270_v16  ;;  %v1708_v26 = vmax.f32 %v1270_v16, 1e-30 }
 0x256   : > { %2578 = vrcp.f32 %v1708_v26  ;;  %v1209_v26 = vmul.f32 %v3383_v33, %v1193_v59 }
 0x258   : > { %v1227_v45 = vpop.xlane.xlu1 %1226 }
 0x259   : > { %v1271_v51 = vadd.f32 %v1227_v45, %v1207_v6  ;;  %v1194_v6 = vld [vmem:[#allocation3 + $0x20] sm:$0xff]  ;;  %v1195_v45 = vld [vmem:[#allocation3 + $0x28] sm:$0xff] }
 0x25a   : > { %v1210_v19 = vmul.f32 %v3370_v36, %v1194_v6  ;;  %v1211_v49 = vmul.f32 %v3391_v20, %v1195_v45 }
 0x25b   : > { %1673 = vst.msk [vmem:[#allocation3 + $0x8] sm:$0xff] %vm432_vm0, %v1271_v51  ;;  %v1709_v39 = vmax.f32 %v1271_v51, 1e-30  ;;  %v1230_v63 = vpop.xlane.xlu0 %1229 }
 0x25c   : > { %v1272_v30 = vadd.f32 %v1230_v63, %v1208_v23 }
 0x25d   : > { %2580 = vrcp.f32 %v1709_v39 }
 0x25e   : > { %1674 = vst.msk [vmem:[#allocation3 + $0x10] sm:$0xff] %vm432_vm0, %v1272_v30  ;;  %v1710_v16 = vmax.f32 %v1272_v30, 1e-30 }
 0x25f   : > { %v1233_v2 = vpop.xlane.xlu0 %1232 }
 0x260   : > { %v2579_v62 = vpop.eup %2578  ;;  %2582 = vrcp.f32 %v1710_v16  ;;  %v1273_v11 = vadd.f32 %v1233_v2, %v1209_v26  ;;  %v1196_v2 = vld [vmem:[#allocation3 + $0x30] sm:$0xff]  ;;  %v1197_v16 = vld [vmem:[#allocation3 + $0x38] sm:$0xff] }
 0x261   : > { %1742 = vperm.xlu0 %2464, %v2579_v62   ;;  %v1212_v36 = vmul.f32 %v3377_v54, %v1196_v2  ;;  %v1213_v20 = vmul.f32 %v3397_v12, %v1197_v16  ;;  %v1201_v2 = vld [vmem:[#allocation3 + $0x58] sm:$0xff] }
 0x262   : > { %1675 = vst.msk [vmem:[#allocation3 + $0x18] sm:$0xff] %vm432_vm0, %v1273_v11  ;;  %v1711_v51 = vmax.f32 %v1273_v11, 1e-30  ;;  %v1198_v11 = vld [vmem:[#allocation3 + $0x40] sm:$0xff] }
 0x264   : > { %2584 = vrcp.f32 %v1711_v51 }
 0x266   : > { %v1236_v23 = vpop.xlane.xlu1 %1235 }
 0x267   : > { %v2581_v39 = vpop.eup %2580  ;;  %v1274_v1 = vadd.f32 %v1236_v23, %v1210_v19  ;;  %v1199_v19 = vld [vmem:[#allocation3 + $0x48] sm:$0xff]  ;;  %v1214_v23 = vmul.f32 %v3386_v42, %v1198_v11 }
 0x268   : > { %1747 = vperm.xlu1 %2465, %v2581_v39   ;;  %v1239_v63 = vpop.xlane.xlu0 %1238 }
 0x269   : > { %1676 = vst.msk [vmem:[#allocation3 + $0x20] sm:$0xff] %vm432_vm0, %v1274_v1  ;;  %v1712_v33 = vmax.f32 %v1274_v1, 1e-30  ;;  %v1275_v59 = vadd.f32 %v1239_v63, %v1211_v49  ;;  %v1200_v63 = vld [vmem:[#allocation3 + $0x50] sm:$0xff] }
 0x26a   : > { %v2583_v30 = vpop.eup %2582 }
 0x26b   : > { %2586 = vrcp.f32 %v1712_v33  ;;  %1677 = vst.msk [vmem:[#allocation3 + $0x28] sm:$0xff] %vm432_vm0, %v1275_v59  ;;  %v1713_v62 = vmax.f32 %v1275_v59, 1e-30  ;;  %1752 = vperm.xlu0 %2464, %v2583_v30   ;;  %v1215_v59 = vmul.f32 %v3403_v60, %v1199_v19  ;;  %v1217_v60 = vmul.f32 %v3406_v53, %v1201_v2 }
 0x26d   : > { %2588 = vrcp.f32 %v1713_v62  ;;  %v1216_v62 = vmul.f32 %v3394_v29, %v1200_v63 }
 0x26e   : > { %v1242_v26 = vpop.xlane.xlu1 %1241  ;;  %v2585_v51 = vpop.eup %2584 }
 0x26f   : > { %v1276_v6 = vadd.f32 %v1242_v26, %v1212_v36  ;;  %1757 = vperm.xlu1 %2465, %v2585_v51   ;;  %v1202_v26 = vld [vmem:[#allocation3 + $0x60] sm:$0xff]  ;;  %v1203_v51 = vld [vmem:[#allocation3 + $0x68] sm:$0xff] }
 0x270   : > { %v1245_v45 = vpop.xlane.xlu0 %1244  ;;  %v1218_v29 = vmul.f32 %v3400_v46, %v1202_v26 }
 0x271   : > { %1678 = vst.msk [vmem:[#allocation3 + $0x30] sm:$0xff] %vm432_vm0, %v1276_v6  ;;  %v1714_v39 = vmax.f32 %v1276_v6, 1e-30  ;;  %v1277_v1 = vadd.f32 %v1245_v45, %v1213_v20 }
 0x272   : > { %v1248_v49 = vpop.xlane.xlu1 %1247 }
 0x273   : > { %2590 = vrcp.f32 %v1714_v39  ;;  %v1278_v54 = vadd.f32 %v1248_v49, %v1214_v23  ;;  %1679 = vst.msk [vmem:[#allocation3 + $0x38] sm:$0xff] %vm432_vm0, %v1277_v1  ;;  %v1715_v33 = vmax.f32 %v1277_v1, 1e-30  ;;  %v1204_v1 = vld [vmem:[#allocation3 + $0x70] sm:$0xff] }
 0x274   : > { %v1251_v12 = vpop.xlane.xlu0 %1250  ;;  %v1220_v2 = vmul.f32 %v3613_v0, %v1204_v1 }
 0x275   : > { %1680 = vst.msk [vmem:[#allocation3 + $0x40] sm:$0xff] %vm432_vm0, %v1278_v54  ;;  %v1716_v30 = vmax.f32 %v1278_v54, 1e-30  ;;  %2592 = vrcp.f32 %v1715_v33  ;;  %v1279_v42 = vadd.f32 %v1251_v12, %v1215_v59  ;;  %v2587_v16 = vpop.eup %2586  ;;  %v1219_v54 = vmul.f32 %v3409_v18, %v1203_v51  ;;  %v1205_v33 = vld [vmem:[#allocation3 + $0x78] sm:$0xff] }
 0x276   : > { %v1254_v36 = vpop.xlane.xlu1 %1253  ;;  %1762 = vperm.xlu0 %2464, %v2587_v16   ;;  %v1221_v18 = vmul.f32 %v3610_v8, %v1205_v33 }
 0x277   : > { %2594 = vrcp.f32 %v1716_v30  ;;  %v1280_v11 = vadd.f32 %v1254_v36, %v1216_v62  ;;  %1681 = vst.msk [vmem:[#allocation3 + $0x48] sm:$0xff] %vm432_vm0, %v1279_v42  ;;  %v1717_v6 = vmax.f32 %v1279_v42, 1e-30  ;;  %v2589_v45 = vpop.eup %2588  ;;  %v1884_v36 = vld [vmem:[#allocation3] sm:$0xff] }
 0x278   : > { %v1257_v20 = vpop.xlane.xlu0 %1256  ;;  %1767 = vperm.xlu1 %2465, %v2589_v45   ;;  %v1886_v45 = vld [vmem:[#allocation3 + $0x10] sm:$0xff] }
 0x279   : > { %1682 = vst.msk [vmem:[#allocation3 + $0x50] sm:$0xff] %vm432_vm0, %v1280_v11  ;;  %v1718_v19 = vmax.f32 %v1280_v11, 1e-30  ;;  %2596 = vrcp.f32 %v1717_v6  ;;  %v1281_v39 = vadd.f32 %v1257_v20, %v1217_v60  ;;  %v1885_v60 = vld [vmem:[#allocation3 + $0x8] sm:$0xff]  ;;  %v1900_v20 = vmax.f32 %v1884_v36, 1e-30 }
 0x27a   : > { %v1260_v23 = vpop.xlane.xlu1 %1259  ;;  %v1901_v8 = vmax.f32 %v1885_v60, 1e-30  ;;  %v1890_v33 = vld [vmem:[#allocation3 + $0x30] sm:$0xff] }
 0x27b   : > { %v1282_v49 = vadd.f32 %v1260_v23, %v1218_v29  ;;  %1683 = vst.msk [vmem:[#allocation3 + $0x58] sm:$0xff] %vm432_vm0, %v1281_v39  ;;  %v1719_v63 = vmax.f32 %v1281_v39, 1e-30  ;;  %2598 = vrcp.f32 %v1718_v19  ;;  %v1887_v19 = vld [vmem:[#allocation3 + $0x18] sm:$0xff]  ;;  %v1902_v39 = vmax.f32 %v1886_v45, 1e-30 }
 0x27c   : > { %v1263_v53 = vpop.xlane.xlu0 %1262  ;;  %v1888_v23 = vld [vmem:[#allocation3 + $0x20] sm:$0xff] }
 0x27d   : > { %v2591_v59 = vpop.eup %2590  ;;  %1684 = vst.msk [vmem:[#allocation3 + $0x60] sm:$0xff] %vm432_vm0, %v1282_v49  ;;  %v1720_v12 = vmax.f32 %v1282_v49, 1e-30  ;;  %v1283_v46 = vadd.f32 %v1263_v53, %v1219_v54  ;;  %2600 = vrcp.f32 %v1719_v63  ;;  %v1903_v49 = vmax.f32 %v1887_v19, 1e-30  ;;  %v1889_v63 = vld [vmem:[#allocation3 + $0x28] sm:$0xff] }
 0x27e   : > { %v1266_v30 = vpop.xlane.xlu1 %1265  ;;  %1772 = vperm.xlu0 %2464, %v2591_v59   ;;  %v1904_v53 = vmax.f32 %v1888_v23, 1e-30 }
 0x27f   : > { %v2593_v62 = vpop.eup %2592  ;;  %v1284_v42 = vadd.f32 %v1266_v30, %v1220_v2  ;;  %1685 = vst.msk [vmem:[#allocation3 + $0x68] sm:$0xff] %vm432_vm0, %v1283_v46  ;;  %v1721_v16 = vmax.f32 %v1283_v46, 1e-30  ;;  %2602 = vrcp.f32 %v1720_v12  ;;  %v1905_v12 = vmax.f32 %v1889_v63, 1e-30  ;;  %v1891_v2 = vld [vmem:[#allocation3 + $0x38] sm:$0xff] }
 0x280   : > { %1777 = vperm.xlu1 %2465, %v2593_v62   ;;  %v1269_v26 = vpop.xlane.xlu0 %1268  ;;  %v1906_v30 = vmax.f32 %v1890_v33, 1e-30  ;;  %v1892_v62 = vld [vmem:[#allocation3 + $0x40] sm:$0xff] }
 0x281   : > { %v2595_v11 = vpop.eup %2594  ;;  %1686 = vst.msk [vmem:[#allocation3 + $0x70] sm:$0xff] %vm432_vm0, %v1284_v42  ;;  %v1722_v6 = vmax.f32 %v1284_v42, 1e-30  ;;  %v3675_v0 = vadd.f32 %v1269_v26, %v1221_v18  ;;  %2604 = vrcp.f32 %v1721_v16  ;;  %v1907_v16 = vmax.f32 %v1891_v2, 1e-30  ;;  %v1893_v18 = vld [vmem:[#allocation3 + $0x48] sm:$0xff] }
 0x282   : > { %1782 = vperm.xlu0 %2464, %v2595_v11   ;;  %v1908_v26 = vmax.f32 %v1892_v62, 1e-30  ;;  %v1894_v11 = vld [vmem:[#allocation3 + $0x50] sm:$0xff]  ;;  %v1909_v60 = vmax.f32 %v1893_v18, 1e-30 }
 0x283   : > { %v2597_v51 = vpop.eup %2596  ;;  %1687 = vst.msk [vmem:[#allocation3 + $0x78] sm:$0xff] %vm432_vm0, %v3675_v0  ;;  %2606 = vrcp.f32 %v1722_v6  ;;  %v1910_v45 = vmax.f32 %v1894_v11, 1e-30  ;;  %v1294_v11 = vld [vmem:[#allocation4 + $0x40] sm:$0xff] }
 0x284   : > { %1787 = vperm.xlu1 %2465, %v2597_v51   ;;  %2608 = vrcp.f32 %v1900_v20  ;;  %v1895_v20 = vld [vmem:[#allocation3 + $0x58] sm:$0xff] }
 0x285   : > { %v2599_v29 = vpop.eup %2598  ;;  %2610 = vrcp.f32 %v1901_v8  ;;  %v1896_v8 = vld [vmem:[#allocation3 + $0x60] sm:$0xff] }
 0x286   : > { %1792 = vperm.xlu0 %2464, %v2599_v29   ;;  %2612 = vrcp.f32 %v1902_v39  ;;  %v1911_v29 = vmax.f32 %v1895_v20, 1e-30  ;;  %v1897_v39 = vld [vmem:[#allocation3 + $0x68] sm:$0xff] }
 0x287   : > { %v2601_v1 = vpop.eup %2600  ;;  %2614 = vrcp.f32 %v1903_v49 }
 0x288   : > { %1797 = vperm.xlu1 %2465, %v2601_v1   ;;  %2616 = vrcp.f32 %v1904_v53  ;;  %v1912_v1 = vmax.f32 %v1896_v8, 1e-30  ;;  %v1898_v49 = vld [vmem:[#allocation3 + $0x70] sm:$0xff] }
 0x289   : > { %v2603_v54 = vpop.eup %2602  ;;  %2618 = vrcp.f32 %v1905_v12  ;;  %v1914_v12 = vmax.f32 %v1898_v49, 1e-30 }
 0x28a   : > { %1802 = vperm.xlu0 %2464, %v2603_v54   ;;  %2620 = vrcp.f32 %v1906_v30  ;;  %v1913_v54 = vmax.f32 %v1897_v39, 1e-30  ;;  %v1899_v53 = vld [vmem:[#allocation3 + $0x78] sm:$0xff]  ;;  %v1287_v30 = vld [vmem:[#allocation4 + $0x8] sm:$0xff] }
 0x28b   : > { %v2605_v59 = vpop.eup %2604  ;;  %2622 = vrcp.f32 %v1907_v16  ;;  %v1915_v62 = vmax.f32 %v1899_v53, 1e-30  ;;  %v1383_v20 = vmul.f32 %v3618_v28, %v1287_v30 }
 0x28c   : > { %1807 = vperm.xlu1 %2465, %v2605_v59   ;;  %2624 = vrcp.f32 %v1908_v26  ;;  %v1286_v59 = vld [vmem:[#allocation4] sm:$0xff] }
 0x28d   : > { %v2607_v46 = vpop.eup %2606  ;;  %2626 = vrcp.f32 %v1909_v60  ;;  %v1382_v16 = vmul.f32 %v3616_v40, %v1286_v59  ;;  %v1390_v40 = vmul.f32 %v3630_v24, %v1294_v11  ;;  %v1289_v24 = vld [vmem:[#allocation4 + $0x18] sm:$0xff] }
 0x28e   : > { %1812 = vperm.xlu0 %2464, %v2607_v46   ;;  %v2609_v42 = vpop.eup %2608  ;;  %2628 = vrcp.f32 %v1910_v45 }
 0x28f   : > { %v2611_v36 = vpop.eup %2610  ;;  %2630 = vrcp.f32 %v1911_v29  ;;  %v1295_v29 = vld [vmem:[#allocation4 + $0x48] sm:$0xff] }
 0x290   : > { %1950 = vperm.xlu1 %2465, %v2609_v42   ;;  %v2613_v6 = vpop.eup %2612  ;;  %2632 = vrcp.f32 %v1912_v1 }
 0x291   : > { %v2615_v51 = vpop.eup %2614  ;;  %2634 = vrcp.f32 %v1913_v54  ;;  %v1391_v54 = vmul.f32 %v3636_v21, %v1295_v29  ;;  %v1385_v21 = vmul.f32 %v3624_v3, %v1289_v24 }
 0x292   : > { %1955 = vperm.xlu0 %2464, %v2611_v36   ;;  %v2617_v19 = vpop.eup %2616  ;;  %2636 = vrcp.f32 %v1914_v12 }
 0x293   : > { %v2619_v23 = vpop.eup %2618  ;;  %2638 = vrcp.f32 %v1915_v62 }
 0x294   : > { %1960 = vperm.xlu1 %2465, %v2613_v6   ;;  %v2621_v63 = vpop.eup %2620  ;;  %v1723_v6 = vmax.f32 %v3675_v0, 1e-30 }
 0x295   : > { %v2623_v33 = vpop.eup %2622 }
 0x296   : > { %1965 = vperm.xlu0 %2464, %v2615_v51   ;;  %v2625_v46 = vpop.eup %2624  ;;  %2640 = vrcp.f32 %v1723_v6  ;;  %v1296_v6 = vld [vmem:[#allocation4 + $0x50] sm:$0xff] }
 0x297   : > { %v2627_v26 = vpop.eup %2626 }
 0x298   : > { %1970 = vperm.xlu1 %2465, %v2617_v19   ;;  %v2629_v19 = vpop.eup %2628 }
 0x299   : > { %v2631_v0 = vpop.eup %2630 }
 0x29a   : > { %1975 = vperm.xlu0 %2464, %v2619_v23   ;;  %v2633_v12 = vpop.eup %2632 }
 0x29c   : > { %1980 = vperm.xlu1 %2465, %v2621_v63   ;;  %v1288_v63 = vld [vmem:[#allocation4 + $0x10] sm:$0xff] }
 0x29e   : > { %1985 = vperm.xlu0 %2464, %v2623_v33   ;;  %v2373_v2 = vpop.f32.mrb[0].mxu0 }
 0x29f   : > { %v2374_v42 = vpop.f32.mrb[1].mxu0 }
 0x2a0   : > { %v2375_v18 = vadd.f32 %v2374_v42, %v2373_v2  ;;  %1990 = vperm.xlu1 %2465, %v2625_v46   ;;  %v2376_v36 = vpop.f32.mrb[2].mxu0  ;;  %v1384_v46 = vmul.f32 %v3620_v57, %v1288_v63 }
 0x2a1   : > { %v2377_v60 = vpop.f32.mrb[3].mxu0 }
 0x2a2   : > { %v1639_v51 = vadd.f32 %v2375_v18, %v1382_v16  ;;  %1995 = vperm.xlu0 %2464, %v2627_v26   ;;  %v2378_v45 = vadd.f32 %v2377_v60, %v2376_v36  ;;  %v2635_v16 = vpop.eup %2634 }
 0x2a3   : > { %v2397_v8 = vpop.f32.mrb[0].mxu1  ;;  %v2637_v11 = vpop.eup %2636 }
 0x2a4   : > { %v2398_v39 = vpop.f32.mrb[1].mxu1  ;;  %1689 = vst.msk [vmem:[#allocation4] sm:$0xff] %vm465_vm1, %v1639_v51  ;;  %v1640_v23 = vadd.f32 %v2378_v45, %v1383_v20  ;;  %2000 = vperm.xlu1 %2465, %v2629_v19   ;;  %v2639_v60 = vpop.eup %2638  ;;  %v1290_v20 = vld [vmem:[#allocation4 + $0x20] sm:$0xff]  ;;  %v1297_v45 = vld [vmem:[#allocation4 + $0x58] sm:$0xff]  ;;  %v1392_v19 = vmul.f32 %v3634_v10, %v1296_v6 }
 0x2a5   : > { %v2399_v1 = vadd.f32 %v2398_v39, %v2397_v8  ;;  %v2400_v49 = vpop.f32.mrb[2].mxu1  ;;  %v2641_v3 = vpop.eup %2640  ;;  %v1393_v63 = vmul.f32 %v3640_v5, %v1297_v45 }
 0x2a6   : > { %v2401_v28 = vpop.f32.mrb[3].mxu1  ;;  %1690 = vst.msk [vmem:[#allocation4 + $0x8] sm:$0xff] %vm465_vm1, %v1640_v23  ;;  %2005 = vperm.xlu0 %2464, %v2631_v0   ;;  %v2379_v59 = vpop.f32.mrb[4].mxu0  ;;  %v1386_v23 = vmul.f32 %v3622_v15, %v1290_v20  ;;  %v1292_v15 = vld [vmem:[#allocation4 + $0x30] sm:$0xff] }
 0x2a7   : > { %v1647_v53 = vadd.f32 %v2399_v1, %v1390_v40  ;;  %v2402_v33 = vadd.f32 %v2401_v28, %v2400_v49  ;;  %v2380_v2 = vpop.f32.mrb[5].mxu0  ;;  %v1291_v1 = vld [vmem:[#allocation4 + $0x28] sm:$0xff] }
 0x2a8   : > { %v2381_v62 = vadd.f32 %v2380_v2, %v2379_v59  ;;  %2010 = vperm.xlu1 %2465, %v2633_v12   ;;  %v2382_v42 = vpop.f32.mrb[6].mxu0  ;;  %v1387_v12 = vmul.f32 %v3628_v61, %v1291_v1  ;;  %v1380_v1 = vpop.permute.xlu1 %1379 }
 0x2a9   : > { %1697 = vst.msk [vmem:[#allocation4 + $0x40] sm:$0xff] %vm465_vm1, %v1647_v53  ;;  %v1648_v30 = vadd.f32 %v2402_v33, %v1391_v54  ;;  %v2383_v18 = vpop.f32.mrb[7].mxu0 }
 0x2aa   : > { %v1641_v36 = vadd.f32 %v2381_v62, %v1384_v46  ;;  %2015 = vperm.xlu0 %2464, %v2635_v16   ;;  %v2384_v26 = vadd.f32 %v2383_v18, %v2382_v42  ;;  %v1298_v46 = vld [vmem:[#allocation4 + $0x60] sm:$0xff]  ;;  %v1299_v62 = vld [vmem:[#allocation4 + $0x68] sm:$0xff] }
 0x2ab   : > { %1698 = vst.msk [vmem:[#allocation4 + $0x48] sm:$0xff] %vm465_vm1, %v1648_v30  ;;  %v1394_v16 = vmul.f32 %v3638_v44, %v1298_v46 }
 0x2ac   : > { %1691 = vst.msk [vmem:[#allocation4 + $0x10] sm:$0xff] %vm465_vm1, %v1641_v36  ;;  %v1642_v57 = vadd.f32 %v2384_v26, %v1385_v21  ;;  %2020 = vperm.xlu1 %2465, %v2637_v11   ;;  %v1388_v36 = vmul.f32 %v3626_v35, %v1292_v15  ;;  %v1293_v26 = vld [vmem:[#allocation4 + $0x38] sm:$0xff] }
 0x2ad   : > { %v2403_v51 = vpop.f32.mrb[4].mxu1 }
 0x2ae   : > { %1692 = vst.msk [vmem:[#allocation4 + $0x18] sm:$0xff] %vm465_vm1, %v1642_v57  ;;  %v2404_v8 = vpop.f32.mrb[5].mxu1  ;;  %2025 = vperm.xlu0 %2464, %v2639_v60   ;;  %v1395_v57 = vmul.f32 %v3643_v7, %v1299_v62 }
 0x2af   : > { %v2405_v29 = vadd.f32 %v2404_v8, %v2403_v51  ;;  %v2406_v39 = vpop.f32.mrb[6].mxu1  ;;  %v2385_v40 = vpop.f32.mrb[8].mxu0 }
 0x2b0   : > { %v2407_v49 = vpop.f32.mrb[7].mxu1  ;;  %v2386_v0 = vpop.f32.mrb[9].mxu0  ;;  %1817 = vperm.xlu1 %2465, %v2641_v3   ;;  %v1389_v3 = vmul.f32 %v3632_v43, %v1293_v26 }
 0x2b1   : > { %v1649_v28 = vadd.f32 %v2405_v29, %v1392_v19  ;;  %v2408_v54 = vadd.f32 %v2407_v49, %v2406_v39  ;;  %v2387_v53 = vadd.f32 %v2386_v0, %v2385_v40  ;;  %v2388_v33 = vpop.f32.mrb[10].mxu0  ;;  %v1300_v39 = vld [vmem:[#allocation4 + $0x70] sm:$0xff]  ;;  %v1375_v40 = vpop.permute.xlu0 %1374 }
 0x2b2   : > { %v2389_v59 = vpop.f32.mrb[11].mxu0  ;;  %v1396_v0 = vmul.f32 %v1375_v40, %v1300_v39  ;;  %v4027_v40 = vld [vmem:[#allocation14_spill] sm:$0xff] }
 0x2b3   : > { %1699 = vst.msk [vmem:[#allocation4 + $0x50] sm:$0xff] %vm465_vm1, %v1649_v28  ;;  %v1650_v10 = vadd.f32 %v2408_v54, %v1393_v63  ;;  %v1643_v24 = vadd.f32 %v2387_v53, %v1386_v23  ;;  %v2390_v2 = vadd.f32 %v2389_v59, %v2388_v33  ;;  %v1301_v23 = vld [vmem:[#allocation4 + $0x78] sm:$0xff] }
 0x2b4   : > { %v1397_v54 = vmul.f32 %v1380_v1, %v1301_v23  ;;  %v1932_v1 = vld [vmem:[#allocation4] sm:$0xff] }
 0x2b5   : > { %1700 = vst.msk [vmem:[#allocation4 + $0x58] sm:$0xff] %vm465_vm1, %v1650_v10  ;;  %1693 = vst.msk [vmem:[#allocation4 + $0x20] sm:$0xff] %vm465_vm1, %v1643_v24  ;;  %v1644_v30 = vadd.f32 %v2390_v2, %v1387_v12  ;;  %v2409_v5 = vpop.f32.mrb[8].mxu1 }
 0x2b6   : > { %v2410_v42 = vpop.f32.mrb[9].mxu1 }
 0x2b7   : > { %1694 = vst.msk [vmem:[#allocation4 + $0x28] sm:$0xff] %vm465_vm1, %v1644_v30  ;;  %v2411_v61 = vadd.f32 %v2410_v42, %v2409_v5  ;;  %v2412_v18 = vpop.f32.mrb[10].mxu1  ;;  %v2391_v21 = vpop.f32.mrb[12].mxu0 }
 0x2b8   : > { %v2413_v11 = vpop.f32.mrb[11].mxu1  ;;  %v2392_v6 = vpop.f32.mrb[13].mxu0 }
 0x2b9   : > { %v1651_v60 = vadd.f32 %v2411_v61, %v1394_v16  ;;  %v2414_v20 = vadd.f32 %v2413_v11, %v2412_v18  ;;  %v2393_v51 = vadd.f32 %v2392_v6, %v2391_v21  ;;  %v2394_v45 = vpop.f32.mrb[14].mxu0  ;;  %v4020_v11 = vld [vmem:[#allocation36_spill] sm:$0xff]  ;;  %v4021_v6 = vld [vmem:[#allocation5_spill] sm:$0xff] }
 0x2ba   : > { %v2395_v8 = vpop.f32.mrb[15].mxu0 }
 0x2bb   : > { %1701 = vst.msk [vmem:[#allocation4 + $0x60] sm:$0xff] %vm465_vm1, %v1651_v60  ;;  %v1652_v44 = vadd.f32 %v2414_v20, %v1395_v57  ;;  %v1645_v19 = vadd.f32 %v2393_v51, %v1388_v36  ;;  %v2396_v29 = vadd.f32 %v2395_v8, %v2394_v45  ;;  %v4023_v20 = vld [vmem:[#allocation8_spill] sm:$0xff]  ;;  %v4024_v45 = vld [vmem:[#allocation6_spill] sm:$0xff] }
 0x2bd   : > { %1702 = vst.msk [vmem:[#allocation4 + $0x68] sm:$0xff] %vm465_vm1, %v1652_v44  ;;  %1695 = vst.msk [vmem:[#allocation4 + $0x30] sm:$0xff] %vm465_vm1, %v1645_v19  ;;  %v1646_v35 = vadd.f32 %v2396_v29, %v1389_v3  ;;  %v2415_v7 = vpop.f32.mrb[12].mxu1  ;;  %v4025_v3 = vld [vmem:[#allocation9_spill] sm:$0xff]  ;;  %v4026_v19 = vld [vmem:[#allocation7_spill] sm:$0xff] }
 0x2be   : > { %v2416_v49 = vpop.f32.mrb[13].mxu1 }
 0x2bf   : > { %1696 = vst.msk [vmem:[#allocation4 + $0x38] sm:$0xff] %vm465_vm1, %v1646_v35  ;;  %v2417_v43 = vadd.f32 %v2416_v49, %v2415_v7  ;;  %v2418_v63 = vpop.f32.mrb[14].mxu1  ;;  %v4028_v7 = vld [vmem:[#allocation10_spill] sm:$0xff]  ;;  %v2044_v49 = vld [vmem:[%s3774_s18] sm:$0xff] }
 0x2c0   : > { %v2419_v28 = vpop.f32.mrb[15].mxu1 }
 0x2c1   : > { %v1653_v53 = vadd.f32 %v2417_v43, %v1396_v0  ;;  %v2420_v33 = vadd.f32 %v2419_v28, %v2418_v63  ;;  %v1933_v63 = vld [vmem:[#allocation4 + $0x8] sm:$0xff] }
 0x2c2   : > { %v2045_v28 = vld [vmem:[%s3774_s18 + $0x8] sm:$0xff] }
 0x2c3   : > { %1703 = vst.msk [vmem:[#allocation4 + $0x70] sm:$0xff] %vm465_vm1, %v1653_v53  ;;  %v1654_v59 = vadd.f32 %v2420_v33, %v1397_v54 }
 0x2c5   : > { %1704 = vst.msk [vmem:[#allocation4 + $0x78] sm:$0xff] %vm465_vm1, %v1654_v59  ;;  %v1934_v59 = vld [vmem:[#allocation4 + $0x10] sm:$0xff] }
 0x2e0   : > { %v1743_v12 = vpop.permute.xlu0 %1742 }
 0x2e1   : > { %v1820_v10 = vmul.f32 %v1743_v12, %v3427_v38  ;;  %v1821_v24 = vmul.f32 %v1743_v12, %v3430_v47  ;;  %v2046_v12 = vld [vmem:[%s3774_s18 + $0x10] sm:$0xff] }
 0x2e3   : > { %1852 = vst [vmem:[%s3714_s16] sm:$0xff] %v1820_v10  ;;  %1853 = vst [vmem:[%s3714_s16 + $0x8] sm:$0xff] %v1821_v24 }
 0x2e7   : > { %v1748_v2 = vpop.permute.xlu1 %1747 }
 0x2e8   : > { %v1822_v46 = vmul.f32 %v1748_v2, %v3439_v13  ;;  %v1823_v15 = vmul.f32 %v1748_v2, %v3450_v58 }
 0x2ea   : > { %1854 = vst [vmem:[%s3714_s16 + $0x10] sm:$0xff] %v1822_v46  ;;  %1855 = vst [vmem:[%s3714_s16 + $0x18] sm:$0xff] %v1823_v15  ;;  %v1753_v30 = vpop.permute.xlu0 %1752  ;;  %v1935_v15 = vld [vmem:[#allocation4 + $0x18] sm:$0xff] }
 0x2eb   : > { %v1824_v5 = vmul.f32 %v1753_v30, %v3466_v37  ;;  %v1825_v38 = vmul.f32 %v1753_v30, %v3471_v48  ;;  %v2047_v30 = vld [vmem:[%s3774_s18 + $0x18] sm:$0xff] }
 0x2ed   : > { %1856 = vst [vmem:[%s3714_s16 + $0x20] sm:$0xff] %v1824_v5  ;;  %1857 = vst [vmem:[%s3714_s16 + $0x28] sm:$0xff] %v1825_v38 }
 0x2ee   : > { %v1758_v47 = vpop.permute.xlu1 %1757 }
 0x2ef   : > { %v1826_v62 = vmul.f32 %v1758_v47, %v3490_v55  ;;  %v1827_v13 = vmul.f32 %v1758_v47, %v3483_v41 }
 0x2f1   : > { %1858 = vst [vmem:[%s3714_s16 + $0x30] sm:$0xff] %v1826_v62  ;;  %1859 = vst [vmem:[%s3714_s16 + $0x38] sm:$0xff] %v1827_v13  ;;  %v1936_v13 = vld [vmem:[#allocation4 + $0x20] sm:$0xff] }
 0x2f5   : > { %v1763_v58 = vpop.permute.xlu0 %1762 }
 0x2f6   : > { %v1828_v42 = vmul.f32 %v1763_v58, %v3509_v25  ;;  %v1829_v37 = vmul.f32 %v1763_v58, %v3512_v52  ;;  %v2048_v58 = vld [vmem:[%s3774_s18 + $0x20] sm:$0xff] }
 0x2f7   : > { %v1768_v48 = vpop.permute.xlu1 %1767 }
 0x2f8   : > { %1860 = vst [vmem:[%s3714_s16 + $0x40] sm:$0xff] %v1828_v42  ;;  %1861 = vst [vmem:[%s3714_s16 + $0x48] sm:$0xff] %v1829_v37  ;;  %v1830_v16 = vmul.f32 %v1768_v48, %v3523_v50  ;;  %v1831_v55 = vmul.f32 %v1768_v48, %v3526_v14 }
 0x2fa   : > { %1862 = vst [vmem:[%s3714_s16 + $0x50] sm:$0xff] %v1830_v16  ;;  %1863 = vst [vmem:[%s3714_s16 + $0x58] sm:$0xff] %v1831_v55  ;;  %v1937_v55 = vld [vmem:[#allocation4 + $0x28] sm:$0xff] }
 0x2fd   : > { %v1773_v41 = vpop.permute.xlu0 %1772 }
 0x2fe   : > { %v1832_v61 = vmul.f32 %v1773_v41, %v3546_v4  ;;  %v1833_v25 = vmul.f32 %v1773_v41, %v3551_v32  ;;  %v2049_v41 = vld [vmem:[%s3774_s18 + $0x28] sm:$0xff] }
 0x2ff   : > { %v1778_v52 = vpop.permute.xlu1 %1777 }
 0x300   : > { %1864 = vst [vmem:[%s3714_s16 + $0x60] sm:$0xff] %v1832_v61  ;;  %1865 = vst [vmem:[%s3714_s16 + $0x68] sm:$0xff] %v1833_v25  ;;  %v1834_v18 = vmul.f32 %v1778_v52, %v3557_v9  ;;  %v1835_v50 = vmul.f32 %v1778_v52, %v3564_v31 }
 0x301   : > { %v1783_v21 = vpop.permute.xlu0 %1782 }
 0x302   : > { %1866 = vst [vmem:[%s3714_s16 + $0x70] sm:$0xff] %v1834_v18  ;;  %1867 = vst [vmem:[%s3714_s16 + $0x78] sm:$0xff] %v1835_v50  ;;  %v1836_v14 = vmul.f32 %v1783_v21, %v3445_v56  ;;  %v1837_v4 = vmul.f32 %v1783_v21, %v3442_v34  ;;  %v1938_v50 = vld [vmem:[#allocation4 + $0x30] sm:$0xff] }
 0x303   : > { %v1788_v36 = vpop.permute.xlu1 %1787  ;;  %v2050_v21 = vld [vmem:[%s3774_s18 + $0x30] sm:$0xff] }
 0x304   : > { %1868 = vst [vmem:[%s3714_s16 + $0x80] sm:$0xff] %v1836_v14  ;;  %1869 = vst [vmem:[%s3714_s16 + $0x88] sm:$0xff] %v1837_v4  ;;  %v1838_v32 = vmul.f32 %v1788_v36, %v3474_v17  ;;  %v1839_v9 = vmul.f32 %v1788_v36, %v3461_v27  ;;  %v4022_v17 = vld [vmem:[#allocation37_spill] sm:$0xff] }
 0x305   : > { %v1793_v31 = vpop.permute.xlu0 %1792 }
 0x306   : > { %1870 = vst [vmem:[%s3714_s16 + $0x90] sm:$0xff] %v1838_v32  ;;  %1871 = vst [vmem:[%s3714_s16 + $0x98] sm:$0xff] %v1839_v9  ;;  %v1840_v26 = vmul.f32 %v1793_v31, %v3515_v22  ;;  %v1841_v56 = vmul.f32 %v1793_v31, %v4020_v11  ;;  %v1939_v9 = vld [vmem:[#allocation4 + $0x38] sm:$0xff] }
 0x307   : > { %v1798_v34 = vpop.permute.xlu1 %1797  ;;  %v2051_v31 = vld [vmem:[%s3774_s18 + $0x38] sm:$0xff] }
 0x308   : > { %1872 = vst [vmem:[%s3714_s16 + $0xa0] sm:$0xff] %v1840_v26  ;;  %1873 = vst [vmem:[%s3714_s16 + $0xa8] sm:$0xff] %v1841_v56  ;;  %v1842_v57 = vmul.f32 %v1798_v34, %v4021_v6  ;;  %v1843_v60 = vmul.f32 %v1798_v34, %v4022_v17  ;;  %v1940_v6 = vld [vmem:[#allocation4 + $0x40] sm:$0xff] }
 0x309   : > { %v1803_v27 = vpop.permute.xlu0 %1802 }
 0x30a   : > { %1874 = vst [vmem:[%s3714_s16 + $0xb0] sm:$0xff] %v1842_v57  ;;  %1875 = vst [vmem:[%s3714_s16 + $0xb8] sm:$0xff] %v1843_v60  ;;  %v1844_v51 = vmul.f32 %v1803_v27, %v4023_v20  ;;  %v1845_v22 = vmul.f32 %v1803_v27, %v4024_v45  ;;  %v2052_v57 = vld [vmem:[%s3774_s18 + $0x40] sm:$0xff]  ;;  %v2053_v45 = vld [vmem:[%s3774_s18 + $0x48] sm:$0xff] }
 0x30b   : > { %v1808_v8 = vpop.permute.xlu1 %1807 }
 0x30c   : > { %1876 = vst [vmem:[%s3714_s16 + $0xc0] sm:$0xff] %v1844_v51  ;;  %1877 = vst [vmem:[%s3714_s16 + $0xc8] sm:$0xff] %v1845_v22  ;;  %v1846_v44 = vmul.f32 %v1808_v8, %v4025_v3  ;;  %v1847_v29 = vmul.f32 %v1808_v8, %v4026_v19  ;;  %v1941_v51 = vld [vmem:[#allocation4 + $0x48] sm:$0xff]  ;;  %v1942_v19 = vld [vmem:[#allocation4 + $0x50] sm:$0xff] }
 0x30d   : > { %v1813_v39 = vpop.permute.xlu0 %1812 }
 0x30e   : > { %1878 = vst [vmem:[%s3714_s16 + $0xd0] sm:$0xff] %v1846_v44  ;;  %1879 = vst [vmem:[%s3714_s16 + $0xd8] sm:$0xff] %v1847_v29  ;;  %v1848_v35 = vmul.f32 %v1813_v39, %v4027_v40  ;;  %v1849_v23 = vmul.f32 %v1813_v39, %v4028_v7  ;;  %v2054_v29 = vld [vmem:[%s3774_s18 + $0x50] sm:$0xff] }
 0x30f   : > { %v1951_v0 = vpop.permute.xlu1 %1950 }
 0x310   : > { %1880 = vst [vmem:[%s3714_s16 + $0xe0] sm:$0xff] %v1848_v35  ;;  %1881 = vst [vmem:[%s3714_s16 + $0xe8] sm:$0xff] %v1849_v23  ;;  %v2028_v43 = vmul.f32 %v1951_v0, %v1932_v1  ;;  %v1943_v23 = vld [vmem:[#allocation4 + $0x58] sm:$0xff] }
 0x311   : > { %v1956_v54 = vpop.permute.xlu0 %1955  ;;  %v2055_v1 = vld [vmem:[%s3774_s18 + $0x58] sm:$0xff] }
 0x312   : > { %v2060_v53 = vadd.f32 %v2044_v49, %v2028_v43  ;;  %2108 = vst.msk [vmem:[%s3784_s21] sm:$0xff] %vm465_vm1, %v2028_v43  ;;  %v2029_v33 = vmul.f32 %v1956_v54, %v1933_v63  ;;  %v2056_v54 = vld [vmem:[%s3774_s18 + $0x60] sm:$0xff] }
 0x313   : > { %v1961_v10 = vpop.permute.xlu1 %1960 }
 0x314   : > { %v2076_v24 = vmax.f32 %v2060_v53, 0.0  ;;  %v2061_v2 = vadd.f32 %v2045_v28, %v2029_v33  ;;  %2109 = vst.msk [vmem:[%s3784_s21 + $0x8] sm:$0xff] %vm465_vm1, %v2029_v33  ;;  %v2030_v46 = vmul.f32 %v1961_v10, %v1934_v59  ;;  %v1944_v28 = vld [vmem:[#allocation4 + $0x60] sm:$0xff]  ;;  %v1945_v10 = vld [vmem:[#allocation4 + $0x68] sm:$0xff] }
 0x315   : > { %v1966_v5 = vpop.permute.xlu0 %1965 }
 0x316   : > { %2092 = vst.msk [vmem:[%s3796_s24] sm:$0xff] %vm465_vm1, %v2076_v24  ;;  %v2077_v38 = vmax.f32 %v2061_v2, 0.0  ;;  %v2062_v47 = vadd.f32 %v2046_v12, %v2030_v46  ;;  %2110 = vst.msk [vmem:[%s3784_s21 + $0x10] sm:$0xff] %vm465_vm1, %v2030_v46  ;;  %v2031_v62 = vmul.f32 %v1966_v5, %v1935_v15  ;;  %v2057_v24 = vld [vmem:[%s3774_s18 + $0x68] sm:$0xff]  ;;  %v2058_v5 = vld [vmem:[%s3774_s18 + $0x70] sm:$0xff] }
 0x317   : > { %v1971_v42 = vpop.permute.xlu1 %1970 }
 0x318   : > { %2093 = vst.msk [vmem:[%s3796_s24 + $0x8] sm:$0xff] %vm465_vm1, %v2077_v38  ;;  %v2078_v37 = vmax.f32 %v2062_v47, 0.0  ;;  %v2063_v48 = vadd.f32 %v2047_v30, %v2031_v62  ;;  %2111 = vst.msk [vmem:[%s3784_s21 + $0x18] sm:$0xff] %vm465_vm1, %v2031_v62  ;;  %v2032_v16 = vmul.f32 %v1971_v42, %v1936_v13  ;;  %v1946_v47 = vld [vmem:[#allocation4 + $0x70] sm:$0xff]  ;;  %v1947_v42 = vld [vmem:[#allocation4 + $0x78] sm:$0xff] }
 0x319   : > { %v1976_v61 = vpop.permute.xlu0 %1975 }
 0x31a   : > { %2094 = vst.msk [vmem:[%s3796_s24 + $0x10] sm:$0xff] %vm465_vm1, %v2078_v37  ;;  %v2079_v25 = vmax.f32 %v2063_v48, 0.0  ;;  %v2064_v52 = vadd.f32 %v2048_v58, %v2032_v16  ;;  %2112 = vst.msk [vmem:[%s3784_s21 + $0x20] sm:$0xff] %vm465_vm1, %v2032_v16  ;;  %v2033_v18 = vmul.f32 %v1976_v61, %v1937_v55  ;;  %v2059_v37 = vld [vmem:[%s3774_s18 + $0x78] sm:$0xff] }
 0x31b   : > { %v1981_v14 = vpop.permute.xlu1 %1980 }
 0x31c   : > { %2095 = vst.msk [vmem:[%s3796_s24 + $0x18] sm:$0xff] %vm465_vm1, %v2079_v25  ;;  %v2080_v4 = vmax.f32 %v2064_v52, 0.0  ;;  %v2065_v36 = vadd.f32 %v2049_v41, %v2033_v18  ;;  %2113 = vst.msk [vmem:[%s3784_s21 + $0x28] sm:$0xff] %vm465_vm1, %v2033_v18  ;;  %v2034_v32 = vmul.f32 %v1981_v14, %v1938_v50  ;;  %v4029_v18 = vld [vmem:[#allocation13_spill] sm:$0xff] }
 0x31d   : > { %v1986_v26 = vpop.permute.xlu0 %1985 }
 0x31e   : > { %2096 = vst.msk [vmem:[%s3796_s24 + $0x20] sm:$0xff] %vm465_vm1, %v2080_v4  ;;  %v2081_v11 = vmax.f32 %v2065_v36, 0.0  ;;  %v2066_v56 = vadd.f32 %v2050_v21, %v2034_v32  ;;  %2114 = vst.msk [vmem:[%s3784_s21 + $0x30] sm:$0xff] %vm465_vm1, %v2034_v32  ;;  %v2035_v34 = vmul.f32 %v1986_v26, %v1939_v9  ;;  %v4030_v21 = vld [vmem:[#allocation12_spill] sm:$0xff] }
 0x31f   : > { %v1991_v17 = vpop.permute.xlu1 %1990 }
 0x320   : > { %2097 = vst.msk [vmem:[%s3796_s24 + $0x28] sm:$0xff] %vm465_vm1, %v2081_v11  ;;  %v2082_v60 = vmax.f32 %v2066_v56, 0.0  ;;  %v2067_v27 = vadd.f32 %v2051_v31, %v2035_v34  ;;  %2115 = vst.msk [vmem:[%s3784_s21 + $0x38] sm:$0xff] %vm465_vm1, %v2035_v34  ;;  %v2036_v20 = vmul.f32 %v1991_v17, %v1940_v6 }
 0x321   : > { %v1996_v22 = vpop.permute.xlu0 %1995 }
 0x322   : > { %2098 = vst.msk [vmem:[%s3796_s24 + $0x30] sm:$0xff] %vm465_vm1, %v2082_v60  ;;  %v2083_v8 = vmax.f32 %v2067_v27, 0.0  ;;  %v2068_v3 = vadd.f32 %v2052_v57, %v2036_v20  ;;  %2116 = vst.msk [vmem:[%s3784_s21 + $0x40] sm:$0xff] %vm465_vm1, %v2036_v20  ;;  %v2037_v44 = vmul.f32 %v1996_v22, %v1941_v51 }
 0x323   : > { %v2001_v39 = vpop.permute.xlu1 %2000 }
 0x324   : > { %2099 = vst.msk [vmem:[%s3796_s24 + $0x38] sm:$0xff] %vm465_vm1, %v2083_v8  ;;  %v2084_v40 = vmax.f32 %v2068_v3, 0.0  ;;  %v2069_v35 = vadd.f32 %v2053_v45, %v2037_v44  ;;  %2117 = vst.msk [vmem:[%s3784_s21 + $0x48] sm:$0xff] %vm465_vm1, %v2037_v44  ;;  %v2038_v7 = vmul.f32 %v2001_v39, %v1942_v19 }
 0x325   : > { %v2006_v49 = vpop.permute.xlu0 %2005 }
 0x326   : > { %2100 = vst.msk [vmem:[%s3796_s24 + $0x40] sm:$0xff] %vm465_vm1, %v2084_v40  ;;  %v2085_v0 = vmax.f32 %v2069_v35, 0.0  ;;  %v2070_v43 = vadd.f32 %v2054_v29, %v2038_v7  ;;  %2118 = vst.msk [vmem:[%s3784_s21 + $0x50] sm:$0xff] %vm465_vm1, %v2038_v7  ;;  %v2039_v63 = vmul.f32 %v2006_v49, %v1943_v23 }
 0x327   : > { %v2011_v53 = vpop.permute.xlu1 %2010 }
 0x328   : > { %2101 = vst.msk [vmem:[%s3796_s24 + $0x48] sm:$0xff] %vm465_vm1, %v2085_v0  ;;  %v2086_v33 = vmax.f32 %v2070_v43, 0.0  ;;  %v2071_v59 = vadd.f32 %v2055_v1, %v2039_v63  ;;  %2119 = vst.msk [vmem:[%s3784_s21 + $0x58] sm:$0xff] %vm465_vm1, %v2039_v63  ;;  %v2040_v12 = vmul.f32 %v2011_v53, %v1944_v28 }
 0x329   : > { %v2016_v2 = vpop.permute.xlu0 %2015 }
 0x32a   : > { %2102 = vst.msk [vmem:[%s3796_s24 + $0x50] sm:$0xff] %vm465_vm1, %v2086_v33  ;;  %v2087_v46 = vmax.f32 %v2071_v59, 0.0  ;;  %v2072_v15 = vadd.f32 %v2056_v54, %v2040_v12  ;;  %2120 = vst.msk [vmem:[%s3784_s21 + $0x60] sm:$0xff] %vm465_vm1, %v2040_v12  ;;  %v2041_v30 = vmul.f32 %v2016_v2, %v1945_v10 }
 0x32b   : > { %v2021_v38 = vpop.permute.xlu1 %2020 }
 0x32c   : > { %2103 = vst.msk [vmem:[%s3796_s24 + $0x58] sm:$0xff] %vm465_vm1, %v2087_v46  ;;  %v2088_v62 = vmax.f32 %v2072_v15, 0.0  ;;  %v2073_v13 = vadd.f32 %v2057_v24, %v2041_v30  ;;  %2121 = vst.msk [vmem:[%s3784_s21 + $0x68] sm:$0xff] %vm465_vm1, %v2041_v30  ;;  %v2042_v58 = vmul.f32 %v2021_v38, %v1946_v47 }
 0x32d   : > { %v2026_v48 = vpop.permute.xlu0 %2025 }
 0x32e   : > { %2104 = vst.msk [vmem:[%s3796_s24 + $0x60] sm:$0xff] %vm465_vm1, %v2088_v62  ;;  %v2089_v16 = vmax.f32 %v2073_v13, 0.0  ;;  %v2074_v55 = vadd.f32 %v2058_v5, %v2042_v58  ;;  %2122 = vst.msk [vmem:[%s3784_s21 + $0x70] sm:$0xff] %vm465_vm1, %v2042_v58  ;;  %v2043_v41 = vmul.f32 %v2026_v48, %v1947_v42 }
 0x32f   : > { %v1818_v61 = vpop.permute.xlu1 %1817 }
 0x330   : > { %2105 = vst.msk [vmem:[%s3796_s24 + $0x68] sm:$0xff] %vm465_vm1, %v2089_v16  ;;  %v2090_v25 = vmax.f32 %v2074_v55, 0.0  ;;  %v2075_v52 = vadd.f32 %v2059_v37, %v2043_v41  ;;  %2123 = vst.msk [vmem:[%s3784_s21 + $0x78] sm:$0xff] %vm465_vm1, %v2043_v41  ;;  %v1850_v50 = vmul.f32 %v1818_v61, %v4029_v18  ;;  %v1851_v14 = vmul.f32 %v1818_v61, %v4030_v21 }
 0x332   : > { %2106 = vst.msk [vmem:[%s3796_s24 + $0x70] sm:$0xff] %vm465_vm1, %v2090_v25  ;;  %v2091_v4 = vmax.f32 %v2075_v52, 0.0  ;;  %1882 = vst [vmem:[%s3714_s16 + $0xf0] sm:$0xff] %v1850_v50 }
 0x333   : > { %1883 = vst [vmem:[%s3714_s16 + $0xf8] sm:$0xff] %v1851_v14 }
 0x334   : > { %2107 = vst.msk [vmem:[%s3796_s24 + $0x78] sm:$0xff] %vm465_vm1, %v2091_v4 }
 0x335 PF: > { %s18_s26 = sadd.s32 1, %s2664_s26   ;;  %s4031_s24 = smov %s2660_s25 }
 0x336   : > { %p15_p6 = scmp.ge.s32.totalorder %s18_s26, 4   ;;  %s4032_s25 = smov %s4034_s27 }
 0x338   :  { %17 = sbr.rel (!%p15_p6) target bundleno = 2 (0x2), region = 114 }

</bundles_post_ra>
